<compile_context>
chip_gen: v7x
topology: tpu7x:2x2x1
jax: 0.10.0
libtpu: 0.0.40
codegen_flags: <defaults>
</compile_context>

<pallas_src>
import functools

import jax
import jax.numpy as jnp
from jax.experimental import pallas as pl
from jax.experimental.pallas import tpu as pltpu

BN_EPS = 1e-5
BN_SCALE = 1.0 / (1.0 + BN_EPS) ** 0.5


# ------------------------------ configuration ------------------------------ #

def make_config(*, batch=2, num_nodes=8, in_dim=4, blocks=2, layers=1,
                kernel_size=2, dilation=2, dilation_channels=16,
                residual_channels=16, skip_channels=32, end_channels=64,
                out_dim=7, iternum=0):
    n_layers = blocks * layers
    rf = 1 + n_layers * kernel_size * dilation          # = 9 for the demo config
    # support-index lists per branch into the flat 23-entry support stack:
    #   branch 0 (dgcn): dynamic supports [d0, d1, adp]
    #   branches 1..4 (sgcn): 5 supports each
    sup_ids = [list(range(3))]
    for b in range(4):
        sup_ids.append(list(range(3 + 5 * b, 3 + 5 * (b + 1))))
    return dict(
        B=batch, N=num_nodes, Cin=in_dim, Cdil=dilation_channels,
        Cres=residual_channels, Cskip=skip_channels, Cend=end_channels,
        Cout=out_dim, n_layers=n_layers, dil=dilation, rf=rf, iter=iternum,
        branch_sup_ids=sup_ids,
    )


# --------------------------- plain-XLA graph prep --------------------------- #

def sym_adj(A):
    """Graph-WaveNet utils.sym_adj: D^-1/2 A^T D^-1/2 (zero-degree safe)."""
    rowsum = A.sum(axis=1)
    d = jnp.where(rowsum > 0, rowsum, 1.0) ** -0.5
    d = jnp.where(rowsum > 0, d, 0.0)
    return (d[:, None] * A.T) * d[None, :]


def adaptive_adj(v1, v2):
    return jax.nn.softmax(jax.nn.relu(v1 @ v2), axis=1)


# ------------------------------ fused kernel ------------------------------- #

def make_kernel(cfg, L0):
    BNn = cfg['B'] * cfg['N']
    Cdil = cfg['Cdil']
    n_layers, dil = cfg['n_layers'], cfg['dil']
    sup_ids = cfg['branch_sup_ids']
    n_dg = len(sup_ids[0])               # 3 supports for the dgcn branch
    n_sg = len(sup_ids[1])               # 5 supports for each sgcn branch
    shift = dil * BNn                    # one dilation step on the lane axis
    # per-branch column slab inside cat_s, 128-aligned -> lane-dense stores
    slab = -(-((L0 - dil) * BNn) // 128) * 128
    n_in = 15 + 2 * n_layers

    def kernel(*refs):
        (x_ref, wbeg_ref, bbeg_ref, wtcn_ref, btcn_ref, wdg_ref, bdg_ref,
         wsg_ref, bsg_ref, wskip_ref, bskip_ref,
         wend1_ref, bend1_ref, wend2_ref, bend2_ref) = refs[:15]
        kdg_refs = refs[15:15 + n_layers]            # bf16, auto-pipelined
        ksg_hbm = refs[15 + n_layers:n_in]           # bf16, HBM (pl.ANY)
        o_ref = refs[n_in]
        cat_d_ref = refs[n_in + 1]
        cat_s_ref = refs[n_in + 2]
        ksg_vmem = refs[n_in + 3:n_in + 3 + n_layers]
        sem = refs[n_in + 3 + n_layers]

        def mm(a, b):
            return jnp.dot(a, b, preferred_element_type=jnp.float32)

        # Kick off the big sgcn K-stack DMAs right away so they overlap the
        # begin conv / gated TCN / dgcn work (most exposed on v5e's HBM).
        ksg_cp = []
        for li in range(n_layers):
            cp = pltpu.make_async_copy(ksg_hbm[li], ksg_vmem[li], sem.at[li])
            cp.start()
            ksg_cp.append(cp)

        # deterministic scratch contents (padding columns are never read back)
        cat_d_ref[...] = jnp.zeros_like(cat_d_ref)
        cat_s_ref[...] = jnp.zeros_like(cat_s_ref)

        # begin 1x1 conv; startbatchnorm (eval) scale already folded into wbeg
        x = mm(wbeg_ref[...], x_ref[...]) + bbeg_ref[...]        # (Cres, L0*BN)

        xs = [x] * 5
        skip = None
        L = L0
        for i in range(n_layers):
            M = L * BNn
            Lo = L - 2 * dil
            Mg = (L - dil) * BNn
            Mo = Lo * BNn

            # ---- gated TCN: all 5 branches stacked along lanes, 2 matmuls ----
            res_cat = jnp.concatenate(xs, axis=1)                # (Cres, 5*M)
            z0 = mm(wtcn_ref[2 * i], res_cat)                    # tap 0
            z1 = mm(wtcn_ref[2 * i + 1], res_cat)                # tap +dil
            b_t = btcn_ref[i]
            gs = []
            for b in range(5):
                zb = (z0[:, b * M:b * M + Mg]
                      + z1[:, b * M + shift:b * M + shift + Mg] + b_t)
                gs.append(jnp.tanh(zb[:Cdil]) * jax.nn.sigmoid(zb[Cdil:]))

            # ---- graph propagation: one wide 2-hop matmul per branch ----
            # dgcn branch 0 (small K stack, auto-pipelined input)
            p0 = mm(gs[0].astype(jnp.bfloat16), kdg_refs[i][...])
            cat_d_ref[0:Cdil, :Mg] = gs[0]
            for k in range(2 * n_dg):
                cat_d_ref[(k + 1) * Cdil:(k + 2) * Cdil, :Mg] = (
                    p0[:, k * Mg:(k + 1) * Mg])

            # sgcn branches 1..4: wait (once) for this layer's K-stack DMA
            ksg_cp[i].wait()
            for b in range(1, 5):
                pb = mm(gs[b].astype(jnp.bfloat16), ksg_vmem[i][b - 1])
                c0 = (b - 1) * slab
                cat_s_ref[0:Cdil, c0:c0 + Mg] = gs[b]
                for k in range(2 * n_sg):
                    cat_s_ref[(k + 1) * Cdil:(k + 2) * Cdil, c0:c0 + Mg] = (
                        pb[:, k * Mg:(k + 1) * Mg])

            # ---- GCN mlp: both dilation taps via lane-offset output slices ----
            yd0 = mm(wdg_ref[2 * i], cat_d_ref[...])
            yd1 = mm(wdg_ref[2 * i + 1], cat_d_ref[...])
            ys0 = mm(wsg_ref[2 * i], cat_s_ref[...])      # all 4 sgcn branches
            ys1 = mm(wsg_ref[2 * i + 1], cat_s_ref[...])

            new_xs, xsum = [], None
            for b in range(5):
                if b == 0:
                    f0, f1, bias, c0 = yd0, yd1, bdg_ref[i], 0
                else:
                    f0, f1, bias, c0 = ys0, ys1, bsg_ref[i], (b - 1) * slab
                y = (f0[:, c0:c0 + Mo] + f1[:, c0 + shift:c0 + shift + Mo]
                     + bias + xs[b][:, 2 * shift:])       # + residual time-crop
                new_xs.append(y)
                xsum = y if xsum is None else xsum + y
            xs = new_xs

            # skip connection; (mean over 5 branches)*BN scale folded into wskip
            s = mm(wskip_ref[i], xsum) + bskip_ref[i]             # (Cskip, Mo)
            skip = s if skip is None else s + skip[:, 2 * shift:]
            L = Lo

        # output head
        h = jax.nn.leaky_relu(skip, 0.01)
        h = jax.nn.leaky_relu(mm(wend1_ref[...], h) + bend1_ref[...], 0.01)
        o_ref[...] = mm(wend2_ref[...], h) + bend2_ref[...]

    return kernel, slab


# ------------------------- input / weight preparation ----------------------- #

def prepare_inputs(cfg, p, x_nchw, L0):
    B, N = cfg['B'], cfg['N']
    BNn = B * N
    Cin, dil, rf, it = cfg['Cin'], cfg['dil'], cfg['rf'], cfg['iter']
    n_layers = cfg['n_layers']
    sup_ids = cfg['branch_sup_ids']
    f32, bf16 = jnp.float32, jnp.bfloat16

    # input: left-pad time to receptive field, then (B,C,N,L) -> (C, (l, b, n))
    Lin = x_nchw.shape[-1]
    if Lin < rf:
        x_nchw = jnp.pad(x_nchw, ((0, 0), (0, 0), (0, 0), (rf - Lin, 0)))
    x0 = jnp.transpose(x_nchw, (1, 3, 0, 2)).reshape(Cin, L0 * BNn).astype(f32)

    # adjacency preparation (tiny; plain XLA — no Pallas dispatches)
    adp = adaptive_adj(p['nodevec1'], p['nodevec2'])
    sadp = [adaptive_adj(p[f'snv{k}1'], p[f'snv{k}2']) for k in range(1, 5)]
    dyn = [p['dynamic_supports'][it][0], p['dynamic_supports'][it][1], adp]
    statics = [p['static1'], p['static2'], p['static3'], p['static4']]
    flat_sups = list(dyn)
    for b in range(4):
        A = p['dgcn_adj'][it, b]
        imf = [sym_adj(A), sym_adj(A.T)]
        sb = statics[b]
        if b == 0:
            head = [sb[0] * imf[0], sb[1] * imf[1]]
        else:
            head = [sb[0] * imf[0] * dyn[0], sb[1] * imf[1] * dyn[1]]
        flat_sups += head + [sb[0] * dyn[0], sb[1] * dyn[1], sadp[b]]
    # 23 support matrices total, indexed by cfg['branch_sup_ids'].

    # Per-layer, per-branch 2-hop RHS stacks on the (l, b, n) lane axis:
    #   nconv 'ncvl,wv->ncwl' == X @ kron(I_{L*B}, A^T) in this layout, and the
    #   second GCN hop uses kron(I, (A^2)^T) so the in-kernel serial chain goes
    #   away.  Stored in bf16 (native MXU path, half the DMA / VMEM).
    kdg_list, ksg_list = [], []
    L = L0
    for _ in range(n_layers):
        LB = (L - dil) * B
        eye_lb = jnp.eye(LB, dtype=f32)

        def hops(a, eye_lb=eye_lb):
            a = a.astype(f32)
            return [jnp.kron(eye_lb, a.T), jnp.kron(eye_lb, (a @ a).T)]

        kdg = jnp.concatenate(
            [m for s in sup_ids[0] for m in hops(flat_sups[s])], axis=1)
        kdg_list.append(kdg.astype(bf16))
        ksg = jnp.stack([
            jnp.concatenate(
                [m for s in sup_ids[br] for m in hops(flat_sups[s])], axis=1)
            for br in range(1, 5)])
        ksg_list.append(ksg.astype(bf16))
        L -= 2 * dil

    # weights (BatchNorm scale and /5 branch-average folded in here)
    wbeg = (p['begin_w'] * BN_SCALE).astype(f32)
    bbeg = p['begin_b'].reshape(-1, 1).astype(f32)

    wtcn, btcn, wdg, bdg, wsg, bsg, wskip, bskip = ([] for _ in range(8))
    for lp in p['layer_params']:
        for tap in range(2):
            wtcn.append(jnp.concatenate([lp['tcn1_w'][:, :, 0, tap],
                                         lp['tcn2_w'][:, :, 0, tap]], axis=0))
            wdg.append(lp['dgcn_w'][:, :, 0, tap] * BN_SCALE)
            wsg.append(lp['sgcn_w'][:, :, 0, tap] * BN_SCALE)
        btcn.append(jnp.concatenate([lp['tcn1_b'], lp['tcn2_b']]).reshape(-1, 1))
        bdg.append((lp['dgcn_b'] * BN_SCALE).reshape(-1, 1))
        bsg.append((lp['sgcn_b'] * BN_SCALE).reshape(-1, 1))
        wskip.append(lp['skip_w'] * (BN_SCALE / 5.0))
        bskip.append(lp['skip_b'].reshape(-1, 1))

    stack = lambda arrs: jnp.stack(arrs).astype(f32)
    dense = [x0, wbeg, bbeg,
             stack(wtcn), stack(btcn), stack(wdg), stack(bdg),
             stack(wsg), stack(bsg), stack(wskip), stack(bskip),
             p['end1_w'].astype(f32), p['end1_b'].reshape(-1, 1).astype(f32),
             p['end2_w'].astype(f32), p['end2_b'].reshape(-1, 1).astype(f32)]
    return dense + kdg_list, ksg_list


# --------------------------------- forward ---------------------------------- #

def mynet_forward(cfg, p, x_nchw):
    B, N = cfg['B'], cfg['N']
    BNn = B * N
    Cout, Cdil = cfg['Cout'], cfg['Cdil']
    rf, dil, n_layers = cfg['rf'], cfg['dil'], cfg['n_layers']
    sup_ids = cfg['branch_sup_ids']
    n_dg, n_sg = len(sup_ids[0]), len(sup_ids[1])

    Lin = x_nchw.shape[-1]
    L0 = max(Lin, rf)
    Lf = L0 - n_layers * 2 * dil                     # final time length (=1 here)

    dense_args, ksg_args = prepare_inputs(cfg, p, x_nchw, L0)
    kernel, slab = make_kernel(cfg, L0)

    def full_spec(a):
        nd = a.ndim
        return pl.BlockSpec(a.shape, lambda *_: (0,) * nd)

    in_specs = ([full_spec(a) for a in dense_args]
                + [pl.BlockSpec(memory_space=pl.ANY) for _ in ksg_args])

    scratch_shapes = (
        [pltpu.VMEM(((2 * n_dg + 1) * Cdil, slab), jnp.float32),        # cat_d
         pltpu.VMEM(((2 * n_sg + 1) * Cdil, 4 * slab), jnp.float32)]    # cat_s
        + [pltpu.VMEM(k.shape, k.dtype) for k in ksg_args]              # ksg bufs
        + [pltpu.SemaphoreType.DMA((n_layers,))])

    out = pl.pallas_call(
        kernel,
        out_shape=jax.ShapeDtypeStruct((Cout, Lf * BNn), jnp.float32),
        grid=(1,),
        in_specs=in_specs,
        out_specs=pl.BlockSpec((Cout, Lf * BNn), lambda i: (0, 0)),
        scratch_shapes=scratch_shapes,
    )(*dense_args, *ksg_args)

    # (Cout, (l, b, n)) -> (B, Cout, N, Lf)   (PyTorch NCHW output layout)
    return jnp.transpose(out.reshape(Cout, Lf, B, N), (2, 0, 3, 1))


# ------------------------------- parameters --------------------------------- #

def init_params(key, cfg):
    N, Cin = cfg['N'], cfg['Cin']
    Cres, Cdil, Cskip, Cend, Cout = (cfg['Cres'], cfg['Cdil'], cfg['Cskip'],
                                     cfg['Cend'], cfg['Cout'])
    keys = iter(jax.random.split(key, 128))

    def nrm(shape, scale=0.1):
        return scale * jax.random.normal(next(keys), shape, dtype=jnp.float32)

    def rand_adj():
        return jax.random.uniform(next(keys), (N, N), dtype=jnp.float32,
                                  minval=0.1, maxval=1.0)

    p = {}
    p['nodevec1'] = nrm((N, 10), 1.0)
    p['nodevec2'] = nrm((10, N), 1.0)
    for k in range(1, 5):
        p[f'snv{k}1'] = nrm((N, 10), 1.0)
        p[f'snv{k}2'] = nrm((10, N), 1.0)

    p['begin_w'] = nrm((Cres, Cin))
    p['begin_b'] = nrm((Cres,))

    p['layer_params'] = []
    for _ in range(cfg['n_layers']):
        p['layer_params'].append(dict(
            tcn1_w=nrm((Cdil, Cres, 1, 2)), tcn1_b=nrm((Cdil,)),
            tcn2_w=nrm((Cdil, Cres, 1, 2)), tcn2_b=nrm((Cdil,)),
            skip_w=nrm((Cskip, Cres)), skip_b=nrm((Cskip,)),
            dgcn_w=nrm((Cres, 7 * Cdil, 1, 2)), dgcn_b=nrm((Cres,)),
            sgcn_w=nrm((Cres, 11 * Cdil, 1, 2)), sgcn_b=nrm((Cres,)),
        ))

    p['end1_w'] = nrm((Cend, Cskip))
    p['end1_b'] = nrm((Cend,))
    p['end2_w'] = nrm((Cout, Cend))
    p['end2_b'] = nrm((Cout,))

    # graph structures (constructor args of the PyTorch module)
    p['dynamic_supports'] = [[sym_adj(rand_adj()), sym_adj(rand_adj())]]
    for k in range(1, 5):
        A = rand_adj()
        p[f'static{k}'] = [sym_adj(A), sym_adj(A.T)]
    p['dgcn_adj'] = jax.random.uniform(next(keys), (1, 4, N, N),
                                       dtype=jnp.float32, minval=0.1, maxval=1.0)
    return p


# ----------------------------------- main ------------------------------------ #

if __name__ == "__main__":
    key = jax.random.PRNGKey(0)
    k_param, k_input = jax.random.split(key)

    cfg = make_config(batch=2, num_nodes=8, in_dim=4, blocks=2, layers=1,
                      dilation_channels=16, residual_channels=16,
                      skip_channels=32, end_channels=64, out_dim=7)
    params = init_params(k_param, cfg)

    x = jax.random.normal(k_input, (cfg['B'], cfg['Cin'], cfg['N'], 8),
                          dtype=jnp.float32)

    fwd = jax.jit(functools.partial(mynet_forward, cfg))
    out = jax.block_until_ready(fwd(params, x))

    assert out.shape == (cfg['B'], cfg['Cout'], cfg['N'], 1), out.shape
    assert bool(jnp.all(jnp.isfinite(out)))
    print("KERNEL_OK")
</pallas_src>

<mosaic_0001>
module attributes {stable_mosaic.version = 11 : i64} {
  func.func @kernel(%arg0: i32, %arg1: memref<4x144xf32, #tpu.memory_space<vmem>>, %arg2: memref<16x4xf32, #tpu.memory_space<vmem>>, %arg3: memref<16x1xf32, #tpu.memory_space<vmem>>, %arg4: memref<4x32x16xf32, #tpu.memory_space<vmem>>, %arg5: memref<2x32x1xf32, #tpu.memory_space<vmem>>, %arg6: memref<4x16x112xf32, #tpu.memory_space<vmem>>, %arg7: memref<2x16x1xf32, #tpu.memory_space<vmem>>, %arg8: memref<4x16x176xf32, #tpu.memory_space<vmem>>, %arg9: memref<2x16x1xf32, #tpu.memory_space<vmem>>, %arg10: memref<2x32x16xf32, #tpu.memory_space<vmem>>, %arg11: memref<2x32x1xf32, #tpu.memory_space<vmem>>, %arg12: memref<64x32xf32, #tpu.memory_space<vmem>>, %arg13: memref<64x1xf32, #tpu.memory_space<vmem>>, %arg14: memref<7x64xf32, #tpu.memory_space<vmem>>, %arg15: memref<7x1xf32, #tpu.memory_space<vmem>>, %arg16: memref<112x672xbf16, #tpu.memory_space<vmem>>, %arg17: memref<48x288xbf16, #tpu.memory_space<vmem>>, %arg18: memref<4x112x1120xbf16, #tpu.memory_space<any>>, %arg19: memref<4x48x480xbf16, #tpu.memory_space<any>>, %arg20: memref<7x16xf32, #tpu.memory_space<vmem>>, %arg21: memref<112x128xf32, #tpu.memory_space<vmem>>, %arg22: memref<176x512xf32, #tpu.memory_space<vmem>>, %arg23: memref<4x112x1120xbf16, #tpu.memory_space<vmem>>, %arg24: memref<4x48x480xbf16, #tpu.memory_space<vmem>>, %arg25: memref<2x!tpu.dma_semaphore, #tpu.memory_space<semaphore_mem>>) attributes {dimension_semantics = [#tpu.dimension_semantics<arbitrary>], iteration_bounds = array<i64: 1>, scalar_prefetch = 0 : i64, scratch_operands = 5 : i64, tpu.core_type = #tpu.core_type<tc>, window_params = [{pipeline_mode = #tpu.pipeline_mode<synchronous>, transform_indices = @transform_0, window_bounds = array<i64: 4, 144>}, {pipeline_mode = #tpu.pipeline_mode<synchronous>, transform_indices = @transform_1, window_bounds = array<i64: 16, 4>}, {pipeline_mode = #tpu.pipeline_mode<synchronous>, transform_indices = @transform_2, window_bounds = array<i64: 16, 1>}, {pipeline_mode = #tpu.pipeline_mode<synchronous>, transform_indices = @transform_3, window_bounds = array<i64: 4, 32, 16>}, {pipeline_mode = #tpu.pipeline_mode<synchronous>, transform_indices = @transform_4, window_bounds = array<i64: 2, 32, 1>}, {pipeline_mode = #tpu.pipeline_mode<synchronous>, transform_indices = @transform_5, window_bounds = array<i64: 4, 16, 112>}, {pipeline_mode = #tpu.pipeline_mode<synchronous>, transform_indices = @transform_6, window_bounds = array<i64: 2, 16, 1>}, {pipeline_mode = #tpu.pipeline_mode<synchronous>, transform_indices = @transform_7, window_bounds = array<i64: 4, 16, 176>}, {pipeline_mode = #tpu.pipeline_mode<synchronous>, transform_indices = @transform_8, window_bounds = array<i64: 2, 16, 1>}, {pipeline_mode = #tpu.pipeline_mode<synchronous>, transform_indices = @transform_9, window_bounds = array<i64: 2, 32, 16>}, {pipeline_mode = #tpu.pipeline_mode<synchronous>, transform_indices = @transform_10, window_bounds = array<i64: 2, 32, 1>}, {pipeline_mode = #tpu.pipeline_mode<synchronous>, transform_indices = @transform_11, window_bounds = array<i64: 64, 32>}, {pipeline_mode = #tpu.pipeline_mode<synchronous>, transform_indices = @transform_12, window_bounds = array<i64: 64, 1>}, {pipeline_mode = #tpu.pipeline_mode<synchronous>, transform_indices = @transform_13, window_bounds = array<i64: 7, 64>}, {pipeline_mode = #tpu.pipeline_mode<synchronous>, transform_indices = @transform_14, window_bounds = array<i64: 7, 1>}, {pipeline_mode = #tpu.pipeline_mode<synchronous>, transform_indices = @transform_15, window_bounds = array<i64: 112, 672>}, {pipeline_mode = #tpu.pipeline_mode<synchronous>, transform_indices = @transform_16, window_bounds = array<i64: 48, 288>}, {}, {}, {pipeline_mode = #tpu.pipeline_mode<synchronous>, transform_indices = @transform_19, window_bounds = array<i64: 7, 16>}]} {
    %c0_i32 = arith.constant 0 : i32
    %0 = tpu.memref_slice %arg25[%c0_i32] : memref<2x!tpu.dma_semaphore, #tpu.memory_space<semaphore_mem>> -> memref<1x!tpu.dma_semaphore, #tpu.memory_space<semaphore_mem>>
    %1 = tpu.memref_squeeze %0 : memref<1x!tpu.dma_semaphore, #tpu.memory_space<semaphore_mem>> -> memref<!tpu.dma_semaphore, #tpu.memory_space<semaphore_mem>>
    tpu.enqueue_dma source(%arg18 : memref<4x112x1120xbf16, #tpu.memory_space<any>>) target(%arg23 : memref<4x112x1120xbf16, #tpu.memory_space<vmem>>) target_semaphore(%1 : memref<!tpu.dma_semaphore, #tpu.memory_space<semaphore_mem>>)
    %c1_i32 = arith.constant 1 : i32
    %2 = tpu.memref_slice %arg25[%c1_i32] : memref<2x!tpu.dma_semaphore, #tpu.memory_space<semaphore_mem>> -> memref<1x!tpu.dma_semaphore, #tpu.memory_space<semaphore_mem>>
    %3 = tpu.memref_squeeze %2 : memref<1x!tpu.dma_semaphore, #tpu.memory_space<semaphore_mem>> -> memref<!tpu.dma_semaphore, #tpu.memory_space<semaphore_mem>>
    tpu.enqueue_dma source(%arg19 : memref<4x48x480xbf16, #tpu.memory_space<any>>) target(%arg24 : memref<4x48x480xbf16, #tpu.memory_space<vmem>>) target_semaphore(%3 : memref<!tpu.dma_semaphore, #tpu.memory_space<semaphore_mem>>)
    %cst = arith.constant 0.000000e+00 : f32
    %4 = vector.broadcast %cst : f32 to vector<112x128xf32>
    %c0 = arith.constant 0 : index
    %c0_0 = arith.constant 0 : index
    %5 = vector.load %arg21[%c0, %c0_0] : memref<112x128xf32, #tpu.memory_space<vmem>>, vector<112x128xf32>
    tpu.vector_store %arg21[%c0, %c0_0], %4 {strides = array<i32>} : memref<112x128xf32, #tpu.memory_space<vmem>>, vector<112x128xf32>,
    %cst_1 = arith.constant 0.000000e+00 : f32
    %6 = vector.broadcast %cst_1 : f32 to vector<176x512xf32>
    %c0_2 = arith.constant 0 : index
    %c0_3 = arith.constant 0 : index
    %7 = vector.load %arg22[%c0_2, %c0_3] : memref<176x512xf32, #tpu.memory_space<vmem>>, vector<176x512xf32>
    tpu.vector_store %arg22[%c0_2, %c0_3], %6 {strides = array<i32>} : memref<176x512xf32, #tpu.memory_space<vmem>>, vector<176x512xf32>,
    %c0_4 = arith.constant 0 : index
    %c0_5 = arith.constant 0 : index
    %8 = vector.load %arg2[%c0_4, %c0_5] : memref<16x4xf32, #tpu.memory_space<vmem>>, vector<16x4xf32>
    %c0_6 = arith.constant 0 : index
    %c0_7 = arith.constant 0 : index
    %9 = vector.load %arg1[%c0_6, %c0_7] : memref<4x144xf32, #tpu.memory_space<vmem>>, vector<4x144xf32>
    %cst_8 = arith.constant dense<0.000000e+00> : vector<16x144xf32>
    %10 = tpu.matmul %8, %9, %cst_8 {dimension_numbers = #tpu.dot_dimension_numbers<[1], [0], [0], [1], [0, 0, 1, 1], [], []>} : vector<16x4xf32>, vector<4x144xf32>, vector<16x144xf32> -> vector<16x144xf32>
    %c0_9 = arith.constant 0 : index
    %c0_10 = arith.constant 0 : index
    %11 = vector.load %arg3[%c0_9, %c0_10] : memref<16x1xf32, #tpu.memory_space<vmem>>, vector<16x1xf32>
    %12 = vector.broadcast %11 : vector<16x1xf32> to vector<16x144xf32>
    %13 = arith.addf %10, %12 : vector<16x144xf32>
    %14 = tpu.concatenate %13, %13, %13, %13, %13 in 1 : vector<16x144xf32>, vector<16x144xf32>, vector<16x144xf32>, vector<16x144xf32>, vector<16x144xf32> -> vector<16x720xf32>
    %c0_11 = arith.constant 0 : index
    %c0_12 = arith.constant 0 : index
    %c0_13 = arith.constant 0 : index
    %15 = vector.load %arg4[%c0_11, %c0_12, %c0_13] : memref<4x32x16xf32, #tpu.memory_space<vmem>>, vector<1x32x16xf32>
    %16 = vector.shape_cast %15 : vector<1x32x16xf32> to vector<32x16xf32>
    %cst_14 = arith.constant dense<0.000000e+00> : vector<32x720xf32>
    %17 = tpu.matmul %16, %14, %cst_14 {dimension_numbers = #tpu.dot_dimension_numbers<[1], [0], [0], [1], [0, 0, 1, 1], [], []>} : vector<32x16xf32>, vector<16x720xf32>, vector<32x720xf32> -> vector<32x720xf32>
    %c1 = arith.constant 1 : index
    %c0_15 = arith.constant 0 : index
    %c0_16 = arith.constant 0 : index
    %18 = vector.load %arg4[%c1, %c0_15, %c0_16] : memref<4x32x16xf32, #tpu.memory_space<vmem>>, vector<1x32x16xf32>
    %19 = vector.shape_cast %18 : vector<1x32x16xf32> to vector<32x16xf32>
    %cst_17 = arith.constant dense<0.000000e+00> : vector<32x720xf32>
    %20 = tpu.matmul %19, %14, %cst_17 {dimension_numbers = #tpu.dot_dimension_numbers<[1], [0], [0], [1], [0, 0, 1, 1], [], []>} : vector<32x16xf32>, vector<16x720xf32>, vector<32x720xf32> -> vector<32x720xf32>
    %c0_18 = arith.constant 0 : index
    %c0_19 = arith.constant 0 : index
    %c0_20 = arith.constant 0 : index
    %21 = vector.load %arg5[%c0_18, %c0_19, %c0_20] : memref<2x32x1xf32, #tpu.memory_space<vmem>>, vector<1x32x1xf32>
    %22 = vector.shape_cast %21 : vector<1x32x1xf32> to vector<32x1xf32>
    %23 = vector.extract_strided_slice %17 {offsets = [0, 0], sizes = [32, 112], strides = [1, 1]} : vector<32x720xf32> to vector<32x112xf32>
    %24 = vector.extract_strided_slice %20 {offsets = [0, 32], sizes = [32, 112], strides = [1, 1]} : vector<32x720xf32> to vector<32x112xf32>
    %25 = arith.addf %23, %24 : vector<32x112xf32>
    %26 = vector.broadcast %22 : vector<32x1xf32> to vector<32x112xf32>
    %27 = arith.addf %25, %26 : vector<32x112xf32>
    %28 = vector.extract_strided_slice %27 {offsets = [0, 0], sizes = [16, 112], strides = [1, 1]} : vector<32x112xf32> to vector<16x112xf32>
    %29 = math.tanh %28 : vector<16x112xf32>
    %30 = vector.extract_strided_slice %27 {offsets = [16, 0], sizes = [16, 112], strides = [1, 1]} : vector<32x112xf32> to vector<16x112xf32>
    %31 = arith.negf %30 : vector<16x112xf32>
    %32 = math.exp %31 : vector<16x112xf32>
    %cst_21 = arith.constant 1.000000e+00 : f32
    %33 = vector.broadcast %cst_21 : f32 to vector<16x112xf32>
    %34 = arith.addf %33, %32 : vector<16x112xf32>
    %35 = arith.divf %33, %34 : vector<16x112xf32>
    %36 = arith.mulf %29, %35 : vector<16x112xf32>
    %37 = vector.extract_strided_slice %17 {offsets = [0, 144], sizes = [32, 112], strides = [1, 1]} : vector<32x720xf32> to vector<32x112xf32>
    %38 = vector.extract_strided_slice %20 {offsets = [0, 176], sizes = [32, 112], strides = [1, 1]} : vector<32x720xf32> to vector<32x112xf32>
    %39 = arith.addf %37, %38 : vector<32x112xf32>
    %40 = vector.broadcast %22 : vector<32x1xf32> to vector<32x112xf32>
    %41 = arith.addf %39, %40 : vector<32x112xf32>
    %42 = vector.extract_strided_slice %41 {offsets = [0, 0], sizes = [16, 112], strides = [1, 1]} : vector<32x112xf32> to vector<16x112xf32>
    %43 = math.tanh %42 : vector<16x112xf32>
    %44 = vector.extract_strided_slice %41 {offsets = [16, 0], sizes = [16, 112], strides = [1, 1]} : vector<32x112xf32> to vector<16x112xf32>
    %45 = arith.negf %44 : vector<16x112xf32>
    %46 = math.exp %45 : vector<16x112xf32>
    %cst_22 = arith.constant 1.000000e+00 : f32
    %47 = vector.broadcast %cst_22 : f32 to vector<16x112xf32>
    %48 = arith.addf %47, %46 : vector<16x112xf32>
    %49 = arith.divf %47, %48 : vector<16x112xf32>
    %50 = arith.mulf %43, %49 : vector<16x112xf32>
    %51 = vector.extract_strided_slice %17 {offsets = [0, 288], sizes = [32, 112], strides = [1, 1]} : vector<32x720xf32> to vector<32x112xf32>
    %52 = vector.extract_strided_slice %20 {offsets = [0, 320], sizes = [32, 112], strides = [1, 1]} : vector<32x720xf32> to vector<32x112xf32>
    %53 = arith.addf %51, %52 : vector<32x112xf32>
    %54 = vector.broadcast %22 : vector<32x1xf32> to vector<32x112xf32>
    %55 = arith.addf %53, %54 : vector<32x112xf32>
    %56 = vector.extract_strided_slice %55 {offsets = [0, 0], sizes = [16, 112], strides = [1, 1]} : vector<32x112xf32> to vector<16x112xf32>
    %57 = math.tanh %56 : vector<16x112xf32>
    %58 = vector.extract_strided_slice %55 {offsets = [16, 0], sizes = [16, 112], strides = [1, 1]} : vector<32x112xf32> to vector<16x112xf32>
    %59 = arith.negf %58 : vector<16x112xf32>
    %60 = math.exp %59 : vector<16x112xf32>
    %cst_23 = arith.constant 1.000000e+00 : f32
    %61 = vector.broadcast %cst_23 : f32 to vector<16x112xf32>
    %62 = arith.addf %61, %60 : vector<16x112xf32>
    %63 = arith.divf %61, %62 : vector<16x112xf32>
    %64 = arith.mulf %57, %63 : vector<16x112xf32>
    %65 = vector.extract_strided_slice %17 {offsets = [0, 432], sizes = [32, 112], strides = [1, 1]} : vector<32x720xf32> to vector<32x112xf32>
    %66 = vector.extract_strided_slice %20 {offsets = [0, 464], sizes = [32, 112], strides = [1, 1]} : vector<32x720xf32> to vector<32x112xf32>
    %67 = arith.addf %65, %66 : vector<32x112xf32>
    %68 = vector.broadcast %22 : vector<32x1xf32> to vector<32x112xf32>
    %69 = arith.addf %67, %68 : vector<32x112xf32>
    %70 = vector.extract_strided_slice %69 {offsets = [0, 0], sizes = [16, 112], strides = [1, 1]} : vector<32x112xf32> to vector<16x112xf32>
    %71 = math.tanh %70 : vector<16x112xf32>
    %72 = vector.extract_strided_slice %69 {offsets = [16, 0], sizes = [16, 112], strides = [1, 1]} : vector<32x112xf32> to vector<16x112xf32>
    %73 = arith.negf %72 : vector<16x112xf32>
    %74 = math.exp %73 : vector<16x112xf32>
    %cst_24 = arith.constant 1.000000e+00 : f32
    %75 = vector.broadcast %cst_24 : f32 to vector<16x112xf32>
    %76 = arith.addf %75, %74 : vector<16x112xf32>
    %77 = arith.divf %75, %76 : vector<16x112xf32>
    %78 = arith.mulf %71, %77 : vector<16x112xf32>
    %79 = vector.extract_strided_slice %17 {offsets = [0, 576], sizes = [32, 112], strides = [1, 1]} : vector<32x720xf32> to vector<32x112xf32>
    %80 = vector.extract_strided_slice %20 {offsets = [0, 608], sizes = [32, 112], strides = [1, 1]} : vector<32x720xf32> to vector<32x112xf32>
    %81 = arith.addf %79, %80 : vector<32x112xf32>
    %82 = vector.broadcast %22 : vector<32x1xf32> to vector<32x112xf32>
    %83 = arith.addf %81, %82 : vector<32x112xf32>
    %84 = vector.extract_strided_slice %83 {offsets = [0, 0], sizes = [16, 112], strides = [1, 1]} : vector<32x112xf32> to vector<16x112xf32>
    %85 = math.tanh %84 : vector<16x112xf32>
    %86 = vector.extract_strided_slice %83 {offsets = [16, 0], sizes = [16, 112], strides = [1, 1]} : vector<32x112xf32> to vector<16x112xf32>
    %87 = arith.negf %86 : vector<16x112xf32>
    %88 = math.exp %87 : vector<16x112xf32>
    %cst_25 = arith.constant 1.000000e+00 : f32
    %89 = vector.broadcast %cst_25 : f32 to vector<16x112xf32>
    %90 = arith.addf %89, %88 : vector<16x112xf32>
    %91 = arith.divf %89, %90 : vector<16x112xf32>
    %92 = arith.mulf %85, %91 : vector<16x112xf32>
    %93 = arith.truncf %36 : vector<16x112xf32> to vector<16x112xbf16>
    %c0_26 = arith.constant 0 : index
    %c0_27 = arith.constant 0 : index
    %94 = vector.load %arg16[%c0_26, %c0_27] : memref<112x672xbf16, #tpu.memory_space<vmem>>, vector<112x672xbf16>
    %cst_28 = arith.constant dense<0.000000e+00> : vector<16x672xf32>
    %95 = tpu.matmul %93, %94, %cst_28 {dimension_numbers = #tpu.dot_dimension_numbers<[1], [0], [0], [1], [0, 0, 1, 1], [], []>} : vector<16x112xbf16>, vector<112x672xbf16>, vector<16x672xf32> -> vector<16x672xf32>
    %c0_29 = arith.constant 0 : index
    %c0_30 = arith.constant 0 : index
    %96 = vector.load %arg21[%c0_29, %c0_30] : memref<112x128xf32, #tpu.memory_space<vmem>>, vector<16x112xf32>
    tpu.vector_store %arg21[%c0_29, %c0_30], %36 {strides = array<i32>} : memref<112x128xf32, #tpu.memory_space<vmem>>, vector<16x112xf32>,
    %97 = vector.extract_strided_slice %95 {offsets = [0, 0], sizes = [16, 112], strides = [1, 1]} : vector<16x672xf32> to vector<16x112xf32>
    %c16 = arith.constant 16 : index
    %c0_31 = arith.constant 0 : index
    %98 = vector.load %arg21[%c16, %c0_31] : memref<112x128xf32, #tpu.memory_space<vmem>>, vector<16x112xf32>
    tpu.vector_store %arg21[%c16, %c0_31], %97 {strides = array<i32>} : memref<112x128xf32, #tpu.memory_space<vmem>>, vector<16x112xf32>,
    %99 = vector.extract_strided_slice %95 {offsets = [0, 112], sizes = [16, 112], strides = [1, 1]} : vector<16x672xf32> to vector<16x112xf32>
    %c32 = arith.constant 32 : index
    %c0_32 = arith.constant 0 : index
    %100 = vector.load %arg21[%c32, %c0_32] : memref<112x128xf32, #tpu.memory_space<vmem>>, vector<16x112xf32>
    tpu.vector_store %arg21[%c32, %c0_32], %99 {strides = array<i32>} : memref<112x128xf32, #tpu.memory_space<vmem>>, vector<16x112xf32>,
    %101 = vector.extract_strided_slice %95 {offsets = [0, 224], sizes = [16, 112], strides = [1, 1]} : vector<16x672xf32> to vector<16x112xf32>
    %c48 = arith.constant 48 : index
    %c0_33 = arith.constant 0 : index
    %102 = vector.load %arg21[%c48, %c0_33] : memref<112x128xf32, #tpu.memory_space<vmem>>, vector<16x112xf32>
    tpu.vector_store %arg21[%c48, %c0_33], %101 {strides = array<i32>} : memref<112x128xf32, #tpu.memory_space<vmem>>, vector<16x112xf32>,
    %103 = vector.extract_strided_slice %95 {offsets = [0, 336], sizes = [16, 112], strides = [1, 1]} : vector<16x672xf32> to vector<16x112xf32>
    %c64 = arith.constant 64 : index
    %c0_34 = arith.constant 0 : index
    %104 = vector.load %arg21[%c64, %c0_34] : memref<112x128xf32, #tpu.memory_space<vmem>>, vector<16x112xf32>
    tpu.vector_store %arg21[%c64, %c0_34], %103 {strides = array<i32>} : memref<112x128xf32, #tpu.memory_space<vmem>>, vector<16x112xf32>,
    %105 = vector.extract_strided_slice %95 {offsets = [0, 448], sizes = [16, 112], strides = [1, 1]} : vector<16x672xf32> to vector<16x112xf32>
    %c80 = arith.constant 80 : index
    %c0_35 = arith.constant 0 : index
    %106 = vector.load %arg21[%c80, %c0_35] : memref<112x128xf32, #tpu.memory_space<vmem>>, vector<16x112xf32>
    tpu.vector_store %arg21[%c80, %c0_35], %105 {strides = array<i32>} : memref<112x128xf32, #tpu.memory_space<vmem>>, vector<16x112xf32>,
    %107 = vector.extract_strided_slice %95 {offsets = [0, 560], sizes = [16, 112], strides = [1, 1]} : vector<16x672xf32> to vector<16x112xf32>
    %c96 = arith.constant 96 : index
    %c0_36 = arith.constant 0 : index
    %108 = vector.load %arg21[%c96, %c0_36] : memref<112x128xf32, #tpu.memory_space<vmem>>, vector<16x112xf32>
    tpu.vector_store %arg21[%c96, %c0_36], %107 {strides = array<i32>} : memref<112x128xf32, #tpu.memory_space<vmem>>, vector<16x112xf32>,
    %c0_i32_37 = arith.constant 0 : i32
    %109 = tpu.memref_slice %arg25[%c0_i32_37] : memref<2x!tpu.dma_semaphore, #tpu.memory_space<semaphore_mem>> -> memref<1x!tpu.dma_semaphore, #tpu.memory_space<semaphore_mem>>
    %110 = tpu.memref_squeeze %109 : memref<1x!tpu.dma_semaphore, #tpu.memory_space<semaphore_mem>> -> memref<!tpu.dma_semaphore, #tpu.memory_space<semaphore_mem>>
    tpu.wait_dma2 semaphore(%110 : memref<!tpu.dma_semaphore, #tpu.memory_space<semaphore_mem>>) src(%arg18 : memref<4x112x1120xbf16, #tpu.memory_space<any>>) dst(%arg23 : memref<4x112x1120xbf16, #tpu.memory_space<vmem>>)
    %111 = arith.truncf %50 : vector<16x112xf32> to vector<16x112xbf16>
    %c0_38 = arith.constant 0 : index
    %c0_39 = arith.constant 0 : index
    %c0_40 = arith.constant 0 : index
    %112 = vector.load %arg23[%c0_38, %c0_39, %c0_40] : memref<4x112x1120xbf16, #tpu.memory_space<vmem>>, vector<1x112x1120xbf16>
    %113 = vector.shape_cast %112 : vector<1x112x1120xbf16> to vector<112x1120xbf16>
    %cst_41 = arith.constant dense<0.000000e+00> : vector<16x1120xf32>
    %114 = tpu.matmul %111, %113, %cst_41 {dimension_numbers = #tpu.dot_dimension_numbers<[1], [0], [0], [1], [0, 0, 1, 1], [], []>} : vector<16x112xbf16>, vector<112x1120xbf16>, vector<16x1120xf32> -> vector<16x1120xf32>
    %c0_42 = arith.constant 0 : index
    %c0_43 = arith.constant 0 : index
    %115 = vector.load %arg22[%c0_42, %c0_43] : memref<176x512xf32, #tpu.memory_space<vmem>>, vector<16x112xf32>
    tpu.vector_store %arg22[%c0_42, %c0_43], %50 {strides = array<i32>} : memref<176x512xf32, #tpu.memory_space<vmem>>, vector<16x112xf32>,
    %116 = vector.extract_strided_slice %114 {offsets = [0, 0], sizes = [16, 112], strides = [1, 1]} : vector<16x1120xf32> to vector<16x112xf32>
    %c16_44 = arith.constant 16 : index
    %c0_45 = arith.constant 0 : index
    %117 = vector.load %arg22[%c16_44, %c0_45] : memref<176x512xf32, #tpu.memory_space<vmem>>, vector<16x112xf32>
    tpu.vector_store %arg22[%c16_44, %c0_45], %116 {strides = array<i32>} : memref<176x512xf32, #tpu.memory_space<vmem>>, vector<16x112xf32>,
    %118 = vector.extract_strided_slice %114 {offsets = [0, 112], sizes = [16, 112], strides = [1, 1]} : vector<16x1120xf32> to vector<16x112xf32>
    %c32_46 = arith.constant 32 : index
    %c0_47 = arith.constant 0 : index
    %119 = vector.load %arg22[%c32_46, %c0_47] : memref<176x512xf32, #tpu.memory_space<vmem>>, vector<16x112xf32>
    tpu.vector_store %arg22[%c32_46, %c0_47], %118 {strides = array<i32>} : memref<176x512xf32, #tpu.memory_space<vmem>>, vector<16x112xf32>,
    %120 = vector.extract_strided_slice %114 {offsets = [0, 224], sizes = [16, 112], strides = [1, 1]} : vector<16x1120xf32> to vector<16x112xf32>
    %c48_48 = arith.constant 48 : index
    %c0_49 = arith.constant 0 : index
    %121 = vector.load %arg22[%c48_48, %c0_49] : memref<176x512xf32, #tpu.memory_space<vmem>>, vector<16x112xf32>
    tpu.vector_store %arg22[%c48_48, %c0_49], %120 {strides = array<i32>} : memref<176x512xf32, #tpu.memory_space<vmem>>, vector<16x112xf32>,
    %122 = vector.extract_strided_slice %114 {offsets = [0, 336], sizes = [16, 112], strides = [1, 1]} : vector<16x1120xf32> to vector<16x112xf32>
    %c64_50 = arith.constant 64 : index
    %c0_51 = arith.constant 0 : index
    %123 = vector.load %arg22[%c64_50, %c0_51] : memref<176x512xf32, #tpu.memory_space<vmem>>, vector<16x112xf32>
    tpu.vector_store %arg22[%c64_50, %c0_51], %122 {strides = array<i32>} : memref<176x512xf32, #tpu.memory_space<vmem>>, vector<16x112xf32>,
    %124 = vector.extract_strided_slice %114 {offsets = [0, 448], sizes = [16, 112], strides = [1, 1]} : vector<16x1120xf32> to vector<16x112xf32>
    %c80_52 = arith.constant 80 : index
    %c0_53 = arith.constant 0 : index
    %125 = vector.load %arg22[%c80_52, %c0_53] : memref<176x512xf32, #tpu.memory_space<vmem>>, vector<16x112xf32>
    tpu.vector_store %arg22[%c80_52, %c0_53], %124 {strides = array<i32>} : memref<176x512xf32, #tpu.memory_space<vmem>>, vector<16x112xf32>,
    %126 = vector.extract_strided_slice %114 {offsets = [0, 560], sizes = [16, 112], strides = [1, 1]} : vector<16x1120xf32> to vector<16x112xf32>
    %c96_54 = arith.constant 96 : index
    %c0_55 = arith.constant 0 : index
    %127 = vector.load %arg22[%c96_54, %c0_55] : memref<176x512xf32, #tpu.memory_space<vmem>>, vector<16x112xf32>
    tpu.vector_store %arg22[%c96_54, %c0_55], %126 {strides = array<i32>} : memref<176x512xf32, #tpu.memory_space<vmem>>, vector<16x112xf32>,
    %128 = vector.extract_strided_slice %114 {offsets = [0, 672], sizes = [16, 112], strides = [1, 1]} : vector<16x1120xf32> to vector<16x112xf32>
    %c112 = arith.constant 112 : index
    %c0_56 = arith.constant 0 : index
    %129 = vector.load %arg22[%c112, %c0_56] : memref<176x512xf32, #tpu.memory_space<vmem>>, vector<16x112xf32>
    tpu.vector_store %arg22[%c112, %c0_56], %128 {strides = array<i32>} : memref<176x512xf32, #tpu.memory_space<vmem>>, vector<16x112xf32>,
    %130 = vector.extract_strided_slice %114 {offsets = [0, 784], sizes = [16, 112], strides = [1, 1]} : vector<16x1120xf32> to vector<16x112xf32>
    %c128 = arith.constant 128 : index
    %c0_57 = arith.constant 0 : index
    %131 = vector.load %arg22[%c128, %c0_57] : memref<176x512xf32, #tpu.memory_space<vmem>>, vector<16x112xf32>
    tpu.vector_store %arg22[%c128, %c0_57], %130 {strides = array<i32>} : memref<176x512xf32, #tpu.memory_space<vmem>>, vector<16x112xf32>,
    %132 = vector.extract_strided_slice %114 {offsets = [0, 896], sizes = [16, 112], strides = [1, 1]} : vector<16x1120xf32> to vector<16x112xf32>
    %c144 = arith.constant 144 : index
    %c0_58 = arith.constant 0 : index
    %133 = vector.load %arg22[%c144, %c0_58] : memref<176x512xf32, #tpu.memory_space<vmem>>, vector<16x112xf32>
    tpu.vector_store %arg22[%c144, %c0_58], %132 {strides = array<i32>} : memref<176x512xf32, #tpu.memory_space<vmem>>, vector<16x112xf32>,
    %134 = vector.extract_strided_slice %114 {offsets = [0, 1008], sizes = [16, 112], strides = [1, 1]} : vector<16x1120xf32> to vector<16x112xf32>
    %c160 = arith.constant 160 : index
    %c0_59 = arith.constant 0 : index
    %135 = vector.load %arg22[%c160, %c0_59] : memref<176x512xf32, #tpu.memory_space<vmem>>, vector<16x112xf32>
    tpu.vector_store %arg22[%c160, %c0_59], %134 {strides = array<i32>} : memref<176x512xf32, #tpu.memory_space<vmem>>, vector<16x112xf32>,
    %136 = arith.truncf %64 : vector<16x112xf32> to vector<16x112xbf16>
    %c1_60 = arith.constant 1 : index
    %c0_61 = arith.constant 0 : index
    %c0_62 = arith.constant 0 : index
    %137 = vector.load %arg23[%c1_60, %c0_61, %c0_62] : memref<4x112x1120xbf16, #tpu.memory_space<vmem>>, vector<1x112x1120xbf16>
    %138 = vector.shape_cast %137 : vector<1x112x1120xbf16> to vector<112x1120xbf16>
    %cst_63 = arith.constant dense<0.000000e+00> : vector<16x1120xf32>
    %139 = tpu.matmul %136, %138, %cst_63 {dimension_numbers = #tpu.dot_dimension_numbers<[1], [0], [0], [1], [0, 0, 1, 1], [], []>} : vector<16x112xbf16>, vector<112x1120xbf16>, vector<16x1120xf32> -> vector<16x1120xf32>
    %c0_64 = arith.constant 0 : index
    %c128_65 = arith.constant 128 : index
    %140 = vector.load %arg22[%c0_64, %c128_65] : memref<176x512xf32, #tpu.memory_space<vmem>>, vector<16x112xf32>
    tpu.vector_store %arg22[%c0_64, %c128_65], %64 {strides = array<i32>} : memref<176x512xf32, #tpu.memory_space<vmem>>, vector<16x112xf32>,
    %141 = vector.extract_strided_slice %139 {offsets = [0, 0], sizes = [16, 112], strides = [1, 1]} : vector<16x1120xf32> to vector<16x112xf32>
    %c16_66 = arith.constant 16 : index
    %c128_67 = arith.constant 128 : index
    %142 = vector.load %arg22[%c16_66, %c128_67] : memref<176x512xf32, #tpu.memory_space<vmem>>, vector<16x112xf32>
    tpu.vector_store %arg22[%c16_66, %c128_67], %141 {strides = array<i32>} : memref<176x512xf32, #tpu.memory_space<vmem>>, vector<16x112xf32>,
    %143 = vector.extract_strided_slice %139 {offsets = [0, 112], sizes = [16, 112], strides = [1, 1]} : vector<16x1120xf32> to vector<16x112xf32>
    %c32_68 = arith.constant 32 : index
    %c128_69 = arith.constant 128 : index
    %144 = vector.load %arg22[%c32_68, %c128_69] : memref<176x512xf32, #tpu.memory_space<vmem>>, vector<16x112xf32>
    tpu.vector_store %arg22[%c32_68, %c128_69], %143 {strides = array<i32>} : memref<176x512xf32, #tpu.memory_space<vmem>>, vector<16x112xf32>,
    %145 = vector.extract_strided_slice %139 {offsets = [0, 224], sizes = [16, 112], strides = [1, 1]} : vector<16x1120xf32> to vector<16x112xf32>
    %c48_70 = arith.constant 48 : index
    %c128_71 = arith.constant 128 : index
    %146 = vector.load %arg22[%c48_70, %c128_71] : memref<176x512xf32, #tpu.memory_space<vmem>>, vector<16x112xf32>
    tpu.vector_store %arg22[%c48_70, %c128_71], %145 {strides = array<i32>} : memref<176x512xf32, #tpu.memory_space<vmem>>, vector<16x112xf32>,
    %147 = vector.extract_strided_slice %139 {offsets = [0, 336], sizes = [16, 112], strides = [1, 1]} : vector<16x1120xf32> to vector<16x112xf32>
    %c64_72 = arith.constant 64 : index
    %c128_73 = arith.constant 128 : index
    %148 = vector.load %arg22[%c64_72, %c128_73] : memref<176x512xf32, #tpu.memory_space<vmem>>, vector<16x112xf32>
    tpu.vector_store %arg22[%c64_72, %c128_73], %147 {strides = array<i32>} : memref<176x512xf32, #tpu.memory_space<vmem>>, vector<16x112xf32>,
    %149 = vector.extract_strided_slice %139 {offsets = [0, 448], sizes = [16, 112], strides = [1, 1]} : vector<16x1120xf32> to vector<16x112xf32>
    %c80_74 = arith.constant 80 : index
    %c128_75 = arith.constant 128 : index
    %150 = vector.load %arg22[%c80_74, %c128_75] : memref<176x512xf32, #tpu.memory_space<vmem>>, vector<16x112xf32>
    tpu.vector_store %arg22[%c80_74, %c128_75], %149 {strides = array<i32>} : memref<176x512xf32, #tpu.memory_space<vmem>>, vector<16x112xf32>,
    %151 = vector.extract_strided_slice %139 {offsets = [0, 560], sizes = [16, 112], strides = [1, 1]} : vector<16x1120xf32> to vector<16x112xf32>
    %c96_76 = arith.constant 96 : index
    %c128_77 = arith.constant 128 : index
    %152 = vector.load %arg22[%c96_76, %c128_77] : memref<176x512xf32, #tpu.memory_space<vmem>>, vector<16x112xf32>
    tpu.vector_store %arg22[%c96_76, %c128_77], %151 {strides = array<i32>} : memref<176x512xf32, #tpu.memory_space<vmem>>, vector<16x112xf32>,
    %153 = vector.extract_strided_slice %139 {offsets = [0, 672], sizes = [16, 112], strides = [1, 1]} : vector<16x1120xf32> to vector<16x112xf32>
    %c112_78 = arith.constant 112 : index
    %c128_79 = arith.constant 128 : index
    %154 = vector.load %arg22[%c112_78, %c128_79] : memref<176x512xf32, #tpu.memory_space<vmem>>, vector<16x112xf32>
    tpu.vector_store %arg22[%c112_78, %c128_79], %153 {strides = array<i32>} : memref<176x512xf32, #tpu.memory_space<vmem>>, vector<16x112xf32>,
    %155 = vector.extract_strided_slice %139 {offsets = [0, 784], sizes = [16, 112], strides = [1, 1]} : vector<16x1120xf32> to vector<16x112xf32>
    %c128_80 = arith.constant 128 : index
    %c128_81 = arith.constant 128 : index
    %156 = vector.load %arg22[%c128_80, %c128_81] : memref<176x512xf32, #tpu.memory_space<vmem>>, vector<16x112xf32>
    tpu.vector_store %arg22[%c128_80, %c128_81], %155 {strides = array<i32>} : memref<176x512xf32, #tpu.memory_space<vmem>>, vector<16x112xf32>,
    %157 = vector.extract_strided_slice %139 {offsets = [0, 896], sizes = [16, 112], strides = [1, 1]} : vector<16x1120xf32> to vector<16x112xf32>
    %c144_82 = arith.constant 144 : index
    %c128_83 = arith.constant 128 : index
    %158 = vector.load %arg22[%c144_82, %c128_83] : memref<176x512xf32, #tpu.memory_space<vmem>>, vector<16x112xf32>
    tpu.vector_store %arg22[%c144_82, %c128_83], %157 {strides = array<i32>} : memref<176x512xf32, #tpu.memory_space<vmem>>, vector<16x112xf32>,
    %159 = vector.extract_strided_slice %139 {offsets = [0, 1008], sizes = [16, 112], strides = [1, 1]} : vector<16x1120xf32> to vector<16x112xf32>
    %c160_84 = arith.constant 160 : index
    %c128_85 = arith.constant 128 : index
    %160 = vector.load %arg22[%c160_84, %c128_85] : memref<176x512xf32, #tpu.memory_space<vmem>>, vector<16x112xf32>
    tpu.vector_store %arg22[%c160_84, %c128_85], %159 {strides = array<i32>} : memref<176x512xf32, #tpu.memory_space<vmem>>, vector<16x112xf32>,
    %161 = arith.truncf %78 : vector<16x112xf32> to vector<16x112xbf16>
    %c2 = arith.constant 2 : index
    %c0_86 = arith.constant 0 : index
    %c0_87 = arith.constant 0 : index
    %162 = vector.load %arg23[%c2, %c0_86, %c0_87] : memref<4x112x1120xbf16, #tpu.memory_space<vmem>>, vector<1x112x1120xbf16>
    %163 = vector.shape_cast %162 : vector<1x112x1120xbf16> to vector<112x1120xbf16>
    %cst_88 = arith.constant dense<0.000000e+00> : vector<16x1120xf32>
    %164 = tpu.matmul %161, %163, %cst_88 {dimension_numbers = #tpu.dot_dimension_numbers<[1], [0], [0], [1], [0, 0, 1, 1], [], []>} : vector<16x112xbf16>, vector<112x1120xbf16>, vector<16x1120xf32> -> vector<16x1120xf32>
    %c0_89 = arith.constant 0 : index
    %c256 = arith.constant 256 : index
    %165 = vector.load %arg22[%c0_89, %c256] : memref<176x512xf32, #tpu.memory_space<vmem>>, vector<16x112xf32>
    tpu.vector_store %arg22[%c0_89, %c256], %78 {strides = array<i32>} : memref<176x512xf32, #tpu.memory_space<vmem>>, vector<16x112xf32>,
    %166 = vector.extract_strided_slice %164 {offsets = [0, 0], sizes = [16, 112], strides = [1, 1]} : vector<16x1120xf32> to vector<16x112xf32>
    %c16_90 = arith.constant 16 : index
    %c256_91 = arith.constant 256 : index
    %167 = vector.load %arg22[%c16_90, %c256_91] : memref<176x512xf32, #tpu.memory_space<vmem>>, vector<16x112xf32>
    tpu.vector_store %arg22[%c16_90, %c256_91], %166 {strides = array<i32>} : memref<176x512xf32, #tpu.memory_space<vmem>>, vector<16x112xf32>,
    %168 = vector.extract_strided_slice %164 {offsets = [0, 112], sizes = [16, 112], strides = [1, 1]} : vector<16x1120xf32> to vector<16x112xf32>
    %c32_92 = arith.constant 32 : index
    %c256_93 = arith.constant 256 : index
    %169 = vector.load %arg22[%c32_92, %c256_93] : memref<176x512xf32, #tpu.memory_space<vmem>>, vector<16x112xf32>
    tpu.vector_store %arg22[%c32_92, %c256_93], %168 {strides = array<i32>} : memref<176x512xf32, #tpu.memory_space<vmem>>, vector<16x112xf32>,
    %170 = vector.extract_strided_slice %164 {offsets = [0, 224], sizes = [16, 112], strides = [1, 1]} : vector<16x1120xf32> to vector<16x112xf32>
    %c48_94 = arith.constant 48 : index
    %c256_95 = arith.constant 256 : index
    %171 = vector.load %arg22[%c48_94, %c256_95] : memref<176x512xf32, #tpu.memory_space<vmem>>, vector<16x112xf32>
    tpu.vector_store %arg22[%c48_94, %c256_95], %170 {strides = array<i32>} : memref<176x512xf32, #tpu.memory_space<vmem>>, vector<16x112xf32>,
    %172 = vector.extract_strided_slice %164 {offsets = [0, 336], sizes = [16, 112], strides = [1, 1]} : vector<16x1120xf32> to vector<16x112xf32>
    %c64_96 = arith.constant 64 : index
    %c256_97 = arith.constant 256 : index
    %173 = vector.load %arg22[%c64_96, %c256_97] : memref<176x512xf32, #tpu.memory_space<vmem>>, vector<16x112xf32>
    tpu.vector_store %arg22[%c64_96, %c256_97], %172 {strides = array<i32>} : memref<176x512xf32, #tpu.memory_space<vmem>>, vector<16x112xf32>,
    %174 = vector.extract_strided_slice %164 {offsets = [0, 448], sizes = [16, 112], strides = [1, 1]} : vector<16x1120xf32> to vector<16x112xf32>
    %c80_98 = arith.constant 80 : index
    %c256_99 = arith.constant 256 : index
    %175 = vector.load %arg22[%c80_98, %c256_99] : memref<176x512xf32, #tpu.memory_space<vmem>>, vector<16x112xf32>
    tpu.vector_store %arg22[%c80_98, %c256_99], %174 {strides = array<i32>} : memref<176x512xf32, #tpu.memory_space<vmem>>, vector<16x112xf32>,
    %176 = vector.extract_strided_slice %164 {offsets = [0, 560], sizes = [16, 112], strides = [1, 1]} : vector<16x1120xf32> to vector<16x112xf32>
    %c96_100 = arith.constant 96 : index
    %c256_101 = arith.constant 256 : index
    %177 = vector.load %arg22[%c96_100, %c256_101] : memref<176x512xf32, #tpu.memory_space<vmem>>, vector<16x112xf32>
    tpu.vector_store %arg22[%c96_100, %c256_101], %176 {strides = array<i32>} : memref<176x512xf32, #tpu.memory_space<vmem>>, vector<16x112xf32>,
    %178 = vector.extract_strided_slice %164 {offsets = [0, 672], sizes = [16, 112], strides = [1, 1]} : vector<16x1120xf32> to vector<16x112xf32>
    %c112_102 = arith.constant 112 : index
    %c256_103 = arith.constant 256 : index
    %179 = vector.load %arg22[%c112_102, %c256_103] : memref<176x512xf32, #tpu.memory_space<vmem>>, vector<16x112xf32>
    tpu.vector_store %arg22[%c112_102, %c256_103], %178 {strides = array<i32>} : memref<176x512xf32, #tpu.memory_space<vmem>>, vector<16x112xf32>,
    %180 = vector.extract_strided_slice %164 {offsets = [0, 784], sizes = [16, 112], strides = [1, 1]} : vector<16x1120xf32> to vector<16x112xf32>
    %c128_104 = arith.constant 128 : index
    %c256_105 = arith.constant 256 : index
    %181 = vector.load %arg22[%c128_104, %c256_105] : memref<176x512xf32, #tpu.memory_space<vmem>>, vector<16x112xf32>
    tpu.vector_store %arg22[%c128_104, %c256_105], %180 {strides = array<i32>} : memref<176x512xf32, #tpu.memory_space<vmem>>, vector<16x112xf32>,
    %182 = vector.extract_strided_slice %164 {offsets = [0, 896], sizes = [16, 112], strides = [1, 1]} : vector<16x1120xf32> to vector<16x112xf32>
    %c144_106 = arith.constant 144 : index
    %c256_107 = arith.constant 256 : index
    %183 = vector.load %arg22[%c144_106, %c256_107] : memref<176x512xf32, #tpu.memory_space<vmem>>, vector<16x112xf32>
    tpu.vector_store %arg22[%c144_106, %c256_107], %182 {strides = array<i32>} : memref<176x512xf32, #tpu.memory_space<vmem>>, vector<16x112xf32>,
    %184 = vector.extract_strided_slice %164 {offsets = [0, 1008], sizes = [16, 112], strides = [1, 1]} : vector<16x1120xf32> to vector<16x112xf32>
    %c160_108 = arith.constant 160 : index
    %c256_109 = arith.constant 256 : index
    %185 = vector.load %arg22[%c160_108, %c256_109] : memref<176x512xf32, #tpu.memory_space<vmem>>, vector<16x112xf32>
    tpu.vector_store %arg22[%c160_108, %c256_109], %184 {strides = array<i32>} : memref<176x512xf32, #tpu.memory_space<vmem>>, vector<16x112xf32>,
    %186 = arith.truncf %92 : vector<16x112xf32> to vector<16x112xbf16>
    %c3 = arith.constant 3 : index
    %c0_110 = arith.constant 0 : index
    %c0_111 = arith.constant 0 : index
    %187 = vector.load %arg23[%c3, %c0_110, %c0_111] : memref<4x112x1120xbf16, #tpu.memory_space<vmem>>, vector<1x112x1120xbf16>
    %188 = vector.shape_cast %187 : vector<1x112x1120xbf16> to vector<112x1120xbf16>
    %cst_112 = arith.constant dense<0.000000e+00> : vector<16x1120xf32>
    %189 = tpu.matmul %186, %188, %cst_112 {dimension_numbers = #tpu.dot_dimension_numbers<[1], [0], [0], [1], [0, 0, 1, 1], [], []>} : vector<16x112xbf16>, vector<112x1120xbf16>, vector<16x1120xf32> -> vector<16x1120xf32>
    %c0_113 = arith.constant 0 : index
    %c384 = arith.constant 384 : index
    %190 = vector.load %arg22[%c0_113, %c384] : memref<176x512xf32, #tpu.memory_space<vmem>>, vector<16x112xf32>
    tpu.vector_store %arg22[%c0_113, %c384], %92 {strides = array<i32>} : memref<176x512xf32, #tpu.memory_space<vmem>>, vector<16x112xf32>,
    %191 = vector.extract_strided_slice %189 {offsets = [0, 0], sizes = [16, 112], strides = [1, 1]} : vector<16x1120xf32> to vector<16x112xf32>
    %c16_114 = arith.constant 16 : index
    %c384_115 = arith.constant 384 : index
    %192 = vector.load %arg22[%c16_114, %c384_115] : memref<176x512xf32, #tpu.memory_space<vmem>>, vector<16x112xf32>
    tpu.vector_store %arg22[%c16_114, %c384_115], %191 {strides = array<i32>} : memref<176x512xf32, #tpu.memory_space<vmem>>, vector<16x112xf32>,
    %193 = vector.extract_strided_slice %189 {offsets = [0, 112], sizes = [16, 112], strides = [1, 1]} : vector<16x1120xf32> to vector<16x112xf32>
    %c32_116 = arith.constant 32 : index
    %c384_117 = arith.constant 384 : index
    %194 = vector.load %arg22[%c32_116, %c384_117] : memref<176x512xf32, #tpu.memory_space<vmem>>, vector<16x112xf32>
    tpu.vector_store %arg22[%c32_116, %c384_117], %193 {strides = array<i32>} : memref<176x512xf32, #tpu.memory_space<vmem>>, vector<16x112xf32>,
    %195 = vector.extract_strided_slice %189 {offsets = [0, 224], sizes = [16, 112], strides = [1, 1]} : vector<16x1120xf32> to vector<16x112xf32>
    %c48_118 = arith.constant 48 : index
    %c384_119 = arith.constant 384 : index
    %196 = vector.load %arg22[%c48_118, %c384_119] : memref<176x512xf32, #tpu.memory_space<vmem>>, vector<16x112xf32>
    tpu.vector_store %arg22[%c48_118, %c384_119], %195 {strides = array<i32>} : memref<176x512xf32, #tpu.memory_space<vmem>>, vector<16x112xf32>,
    %197 = vector.extract_strided_slice %189 {offsets = [0, 336], sizes = [16, 112], strides = [1, 1]} : vector<16x1120xf32> to vector<16x112xf32>
    %c64_120 = arith.constant 64 : index
    %c384_121 = arith.constant 384 : index
    %198 = vector.load %arg22[%c64_120, %c384_121] : memref<176x512xf32, #tpu.memory_space<vmem>>, vector<16x112xf32>
    tpu.vector_store %arg22[%c64_120, %c384_121], %197 {strides = array<i32>} : memref<176x512xf32, #tpu.memory_space<vmem>>, vector<16x112xf32>,
    %199 = vector.extract_strided_slice %189 {offsets = [0, 448], sizes = [16, 112], strides = [1, 1]} : vector<16x1120xf32> to vector<16x112xf32>
    %c80_122 = arith.constant 80 : index
    %c384_123 = arith.constant 384 : index
    %200 = vector.load %arg22[%c80_122, %c384_123] : memref<176x512xf32, #tpu.memory_space<vmem>>, vector<16x112xf32>
    tpu.vector_store %arg22[%c80_122, %c384_123], %199 {strides = array<i32>} : memref<176x512xf32, #tpu.memory_space<vmem>>, vector<16x112xf32>,
    %201 = vector.extract_strided_slice %189 {offsets = [0, 560], sizes = [16, 112], strides = [1, 1]} : vector<16x1120xf32> to vector<16x112xf32>
    %c96_124 = arith.constant 96 : index
    %c384_125 = arith.constant 384 : index
    %202 = vector.load %arg22[%c96_124, %c384_125] : memref<176x512xf32, #tpu.memory_space<vmem>>, vector<16x112xf32>
    tpu.vector_store %arg22[%c96_124, %c384_125], %201 {strides = array<i32>} : memref<176x512xf32, #tpu.memory_space<vmem>>, vector<16x112xf32>,
    %203 = vector.extract_strided_slice %189 {offsets = [0, 672], sizes = [16, 112], strides = [1, 1]} : vector<16x1120xf32> to vector<16x112xf32>
    %c112_126 = arith.constant 112 : index
    %c384_127 = arith.constant 384 : index
    %204 = vector.load %arg22[%c112_126, %c384_127] : memref<176x512xf32, #tpu.memory_space<vmem>>, vector<16x112xf32>
    tpu.vector_store %arg22[%c112_126, %c384_127], %203 {strides = array<i32>} : memref<176x512xf32, #tpu.memory_space<vmem>>, vector<16x112xf32>,
    %205 = vector.extract_strided_slice %189 {offsets = [0, 784], sizes = [16, 112], strides = [1, 1]} : vector<16x1120xf32> to vector<16x112xf32>
    %c128_128 = arith.constant 128 : index
    %c384_129 = arith.constant 384 : index
    %206 = vector.load %arg22[%c128_128, %c384_129] : memref<176x512xf32, #tpu.memory_space<vmem>>, vector<16x112xf32>
    tpu.vector_store %arg22[%c128_128, %c384_129], %205 {strides = array<i32>} : memref<176x512xf32, #tpu.memory_space<vmem>>, vector<16x112xf32>,
    %207 = vector.extract_strided_slice %189 {offsets = [0, 896], sizes = [16, 112], strides = [1, 1]} : vector<16x1120xf32> to vector<16x112xf32>
    %c144_130 = arith.constant 144 : index
    %c384_131 = arith.constant 384 : index
    %208 = vector.load %arg22[%c144_130, %c384_131] : memref<176x512xf32, #tpu.memory_space<vmem>>, vector<16x112xf32>
    tpu.vector_store %arg22[%c144_130, %c384_131], %207 {strides = array<i32>} : memref<176x512xf32, #tpu.memory_space<vmem>>, vector<16x112xf32>,
    %209 = vector.extract_strided_slice %189 {offsets = [0, 1008], sizes = [16, 112], strides = [1, 1]} : vector<16x1120xf32> to vector<16x112xf32>
    %c160_132 = arith.constant 160 : index
    %c384_133 = arith.constant 384 : index
    %210 = vector.load %arg22[%c160_132, %c384_133] : memref<176x512xf32, #tpu.memory_space<vmem>>, vector<16x112xf32>
    tpu.vector_store %arg22[%c160_132, %c384_133], %209 {strides = array<i32>} : memref<176x512xf32, #tpu.memory_space<vmem>>, vector<16x112xf32>,
    %c0_134 = arith.constant 0 : index
    %c0_135 = arith.constant 0 : index
    %c0_136 = arith.constant 0 : index
    %211 = vector.load %arg6[%c0_134, %c0_135, %c0_136] : memref<4x16x112xf32, #tpu.memory_space<vmem>>, vector<1x16x112xf32>
    %212 = vector.shape_cast %211 : vector<1x16x112xf32> to vector<16x112xf32>
    %c0_137 = arith.constant 0 : index
    %c0_138 = arith.constant 0 : index
    %213 = vector.load %arg21[%c0_137, %c0_138] : memref<112x128xf32, #tpu.memory_space<vmem>>, vector<112x128xf32>
    %cst_139 = arith.constant dense<0.000000e+00> : vector<16x128xf32>
    %214 = tpu.matmul %212, %213, %cst_139 {dimension_numbers = #tpu.dot_dimension_numbers<[1], [0], [0], [1], [0, 0, 1, 1], [], []>} : vector<16x112xf32>, vector<112x128xf32>, vector<16x128xf32> -> vector<16x128xf32>
    %c1_140 = arith.constant 1 : index
    %c0_141 = arith.constant 0 : index
    %c0_142 = arith.constant 0 : index
    %215 = vector.load %arg6[%c1_140, %c0_141, %c0_142] : memref<4x16x112xf32, #tpu.memory_space<vmem>>, vector<1x16x112xf32>
    %216 = vector.shape_cast %215 : vector<1x16x112xf32> to vector<16x112xf32>
    %c0_143 = arith.constant 0 : index
    %c0_144 = arith.constant 0 : index
    %217 = vector.load %arg21[%c0_143, %c0_144] : memref<112x128xf32, #tpu.memory_space<vmem>>, vector<112x128xf32>
    %cst_145 = arith.constant dense<0.000000e+00> : vector<16x128xf32>
    %218 = tpu.matmul %216, %217, %cst_145 {dimension_numbers = #tpu.dot_dimension_numbers<[1], [0], [0], [1], [0, 0, 1, 1], [], []>} : vector<16x112xf32>, vector<112x128xf32>, vector<16x128xf32> -> vector<16x128xf32>
    %c0_146 = arith.constant 0 : index
    %c0_147 = arith.constant 0 : index
    %c0_148 = arith.constant 0 : index
    %219 = vector.load %arg8[%c0_146, %c0_147, %c0_148] : memref<4x16x176xf32, #tpu.memory_space<vmem>>, vector<1x16x176xf32>
    %220 = vector.shape_cast %219 : vector<1x16x176xf32> to vector<16x176xf32>
    %c0_149 = arith.constant 0 : index
    %c0_150 = arith.constant 0 : index
    %221 = vector.load %arg22[%c0_149, %c0_150] : memref<176x512xf32, #tpu.memory_space<vmem>>, vector<176x512xf32>
    %cst_151 = arith.constant dense<0.000000e+00> : vector<16x512xf32>
    %222 = tpu.matmul %220, %221, %cst_151 {dimension_numbers = #tpu.dot_dimension_numbers<[1], [0], [0], [1], [0, 0, 1, 1], [], []>} : vector<16x176xf32>, vector<176x512xf32>, vector<16x512xf32> -> vector<16x512xf32>
    %c1_152 = arith.constant 1 : index
    %c0_153 = arith.constant 0 : index
    %c0_154 = arith.constant 0 : index
    %223 = vector.load %arg8[%c1_152, %c0_153, %c0_154] : memref<4x16x176xf32, #tpu.memory_space<vmem>>, vector<1x16x176xf32>
    %224 = vector.shape_cast %223 : vector<1x16x176xf32> to vector<16x176xf32>
    %c0_155 = arith.constant 0 : index
    %c0_156 = arith.constant 0 : index
    %225 = vector.load %arg22[%c0_155, %c0_156] : memref<176x512xf32, #tpu.memory_space<vmem>>, vector<176x512xf32>
    %cst_157 = arith.constant dense<0.000000e+00> : vector<16x512xf32>
    %226 = tpu.matmul %224, %225, %cst_157 {dimension_numbers = #tpu.dot_dimension_numbers<[1], [0], [0], [1], [0, 0, 1, 1], [], []>} : vector<16x176xf32>, vector<176x512xf32>, vector<16x512xf32> -> vector<16x512xf32>
    %c0_158 = arith.constant 0 : index
    %c0_159 = arith.constant 0 : index
    %c0_160 = arith.constant 0 : index
    %227 = vector.load %arg7[%c0_158, %c0_159, %c0_160] : memref<2x16x1xf32, #tpu.memory_space<vmem>>, vector<1x16x1xf32>
    %228 = vector.shape_cast %227 : vector<1x16x1xf32> to vector<16x1xf32>
    %229 = vector.extract_strided_slice %214 {offsets = [0, 0], sizes = [16, 80], strides = [1, 1]} : vector<16x128xf32> to vector<16x80xf32>
    %230 = vector.extract_strided_slice %218 {offsets = [0, 32], sizes = [16, 80], strides = [1, 1]} : vector<16x128xf32> to vector<16x80xf32>
    %231 = arith.addf %229, %230 : vector<16x80xf32>
    %232 = vector.broadcast %228 : vector<16x1xf32> to vector<16x80xf32>
    %233 = arith.addf %231, %232 : vector<16x80xf32>
    %234 = vector.extract_strided_slice %13 {offsets = [0, 64], sizes = [16, 80], strides = [1, 1]} : vector<16x144xf32> to vector<16x80xf32>
    %235 = arith.addf %233, %234 : vector<16x80xf32>
    %c0_161 = arith.constant 0 : index
    %c0_162 = arith.constant 0 : index
    %c0_163 = arith.constant 0 : index
    %236 = vector.load %arg9[%c0_161, %c0_162, %c0_163] : memref<2x16x1xf32, #tpu.memory_space<vmem>>, vector<1x16x1xf32>
    %237 = vector.shape_cast %236 : vector<1x16x1xf32> to vector<16x1xf32>
    %238 = vector.extract_strided_slice %222 {offsets = [0, 0], sizes = [16, 80], strides = [1, 1]} : vector<16x512xf32> to vector<16x80xf32>
    %239 = vector.extract_strided_slice %226 {offsets = [0, 32], sizes = [16, 80], strides = [1, 1]} : vector<16x512xf32> to vector<16x80xf32>
    %240 = arith.addf %238, %239 : vector<16x80xf32>
    %241 = vector.broadcast %237 : vector<16x1xf32> to vector<16x80xf32>
    %242 = arith.addf %240, %241 : vector<16x80xf32>
    %243 = vector.extract_strided_slice %13 {offsets = [0, 64], sizes = [16, 80], strides = [1, 1]} : vector<16x144xf32> to vector<16x80xf32>
    %244 = arith.addf %242, %243 : vector<16x80xf32>
    %245 = arith.addf %235, %244 : vector<16x80xf32>
    %c0_164 = arith.constant 0 : index
    %c0_165 = arith.constant 0 : index
    %c0_166 = arith.constant 0 : index
    %246 = vector.load %arg9[%c0_164, %c0_165, %c0_166] : memref<2x16x1xf32, #tpu.memory_space<vmem>>, vector<1x16x1xf32>
    %247 = vector.shape_cast %246 : vector<1x16x1xf32> to vector<16x1xf32>
    %248 = vector.extract_strided_slice %222 {offsets = [0, 128], sizes = [16, 80], strides = [1, 1]} : vector<16x512xf32> to vector<16x80xf32>
    %249 = vector.extract_strided_slice %226 {offsets = [0, 160], sizes = [16, 80], strides = [1, 1]} : vector<16x512xf32> to vector<16x80xf32>
    %250 = arith.addf %248, %249 : vector<16x80xf32>
    %251 = vector.broadcast %247 : vector<16x1xf32> to vector<16x80xf32>
    %252 = arith.addf %250, %251 : vector<16x80xf32>
    %253 = vector.extract_strided_slice %13 {offsets = [0, 64], sizes = [16, 80], strides = [1, 1]} : vector<16x144xf32> to vector<16x80xf32>
    %254 = arith.addf %252, %253 : vector<16x80xf32>
    %255 = arith.addf %245, %254 : vector<16x80xf32>
    %c0_167 = arith.constant 0 : index
    %c0_168 = arith.constant 0 : index
    %c0_169 = arith.constant 0 : index
    %256 = vector.load %arg9[%c0_167, %c0_168, %c0_169] : memref<2x16x1xf32, #tpu.memory_space<vmem>>, vector<1x16x1xf32>
    %257 = vector.shape_cast %256 : vector<1x16x1xf32> to vector<16x1xf32>
    %258 = vector.extract_strided_slice %222 {offsets = [0, 256], sizes = [16, 80], strides = [1, 1]} : vector<16x512xf32> to vector<16x80xf32>
    %259 = vector.extract_strided_slice %226 {offsets = [0, 288], sizes = [16, 80], strides = [1, 1]} : vector<16x512xf32> to vector<16x80xf32>
    %260 = arith.addf %258, %259 : vector<16x80xf32>
    %261 = vector.broadcast %257 : vector<16x1xf32> to vector<16x80xf32>
    %262 = arith.addf %260, %261 : vector<16x80xf32>
    %263 = vector.extract_strided_slice %13 {offsets = [0, 64], sizes = [16, 80], strides = [1, 1]} : vector<16x144xf32> to vector<16x80xf32>
    %264 = arith.addf %262, %263 : vector<16x80xf32>
    %265 = arith.addf %255, %264 : vector<16x80xf32>
    %c0_170 = arith.constant 0 : index
    %c0_171 = arith.constant 0 : index
    %c0_172 = arith.constant 0 : index
    %266 = vector.load %arg9[%c0_170, %c0_171, %c0_172] : memref<2x16x1xf32, #tpu.memory_space<vmem>>, vector<1x16x1xf32>
    %267 = vector.shape_cast %266 : vector<1x16x1xf32> to vector<16x1xf32>
    %268 = vector.extract_strided_slice %222 {offsets = [0, 384], sizes = [16, 80], strides = [1, 1]} : vector<16x512xf32> to vector<16x80xf32>
    %269 = vector.extract_strided_slice %226 {offsets = [0, 416], sizes = [16, 80], strides = [1, 1]} : vector<16x512xf32> to vector<16x80xf32>
    %270 = arith.addf %268, %269 : vector<16x80xf32>
    %271 = vector.broadcast %267 : vector<16x1xf32> to vector<16x80xf32>
    %272 = arith.addf %270, %271 : vector<16x80xf32>
    %273 = vector.extract_strided_slice %13 {offsets = [0, 64], sizes = [16, 80], strides = [1, 1]} : vector<16x144xf32> to vector<16x80xf32>
    %274 = arith.addf %272, %273 : vector<16x80xf32>
    %275 = arith.addf %265, %274 : vector<16x80xf32>
    %c0_173 = arith.constant 0 : index
    %c0_174 = arith.constant 0 : index
    %c0_175 = arith.constant 0 : index
    %276 = vector.load %arg10[%c0_173, %c0_174, %c0_175] : memref<2x32x16xf32, #tpu.memory_space<vmem>>, vector<1x32x16xf32>
    %277 = vector.shape_cast %276 : vector<1x32x16xf32> to vector<32x16xf32>
    %cst_176 = arith.constant dense<0.000000e+00> : vector<32x80xf32>
    %278 = tpu.matmul %277, %275, %cst_176 {dimension_numbers = #tpu.dot_dimension_numbers<[1], [0], [0], [1], [0, 0, 1, 1], [], []>} : vector<32x16xf32>, vector<16x80xf32>, vector<32x80xf32> -> vector<32x80xf32>
    %c0_177 = arith.constant 0 : index
    %c0_178 = arith.constant 0 : index
    %c0_179 = arith.constant 0 : index
    %279 = vector.load %arg11[%c0_177, %c0_178, %c0_179] : memref<2x32x1xf32, #tpu.memory_space<vmem>>, vector<1x32x1xf32>
    %280 = vector.shape_cast %279 : vector<1x32x1xf32> to vector<32x1xf32>
    %281 = vector.broadcast %280 : vector<32x1xf32> to vector<32x80xf32>
    %282 = arith.addf %278, %281 : vector<32x80xf32>
    %283 = tpu.concatenate %235, %244, %254, %264, %274 in 1 : vector<16x80xf32>, vector<16x80xf32>, vector<16x80xf32>, vector<16x80xf32>, vector<16x80xf32> -> vector<16x400xf32>
    %c2_180 = arith.constant 2 : index
    %c0_181 = arith.constant 0 : index
    %c0_182 = arith.constant 0 : index
    %284 = vector.load %arg4[%c2_180, %c0_181, %c0_182] : memref<4x32x16xf32, #tpu.memory_space<vmem>>, vector<1x32x16xf32>
    %285 = vector.shape_cast %284 : vector<1x32x16xf32> to vector<32x16xf32>
    %cst_183 = arith.constant dense<0.000000e+00> : vector<32x400xf32>
    %286 = tpu.matmul %285, %283, %cst_183 {dimension_numbers = #tpu.dot_dimension_numbers<[1], [0], [0], [1], [0, 0, 1, 1], [], []>} : vector<32x16xf32>, vector<16x400xf32>, vector<32x400xf32> -> vector<32x400xf32>
    %c3_184 = arith.constant 3 : index
    %c0_185 = arith.constant 0 : index
    %c0_186 = arith.constant 0 : index
    %287 = vector.load %arg4[%c3_184, %c0_185, %c0_186] : memref<4x32x16xf32, #tpu.memory_space<vmem>>, vector<1x32x16xf32>
    %288 = vector.shape_cast %287 : vector<1x32x16xf32> to vector<32x16xf32>
    %cst_187 = arith.constant dense<0.000000e+00> : vector<32x400xf32>
    %289 = tpu.matmul %288, %283, %cst_187 {dimension_numbers = #tpu.dot_dimension_numbers<[1], [0], [0], [1], [0, 0, 1, 1], [], []>} : vector<32x16xf32>, vector<16x400xf32>, vector<32x400xf32> -> vector<32x400xf32>
    %c1_188 = arith.constant 1 : index
    %c0_189 = arith.constant 0 : index
    %c0_190 = arith.constant 0 : index
    %290 = vector.load %arg5[%c1_188, %c0_189, %c0_190] : memref<2x32x1xf32, #tpu.memory_space<vmem>>, vector<1x32x1xf32>
    %291 = vector.shape_cast %290 : vector<1x32x1xf32> to vector<32x1xf32>
    %292 = vector.extract_strided_slice %286 {offsets = [0, 0], sizes = [32, 48], strides = [1, 1]} : vector<32x400xf32> to vector<32x48xf32>
    %293 = vector.extract_strided_slice %289 {offsets = [0, 32], sizes = [32, 48], strides = [1, 1]} : vector<32x400xf32> to vector<32x48xf32>
    %294 = arith.addf %292, %293 : vector<32x48xf32>
    %295 = vector.broadcast %291 : vector<32x1xf32> to vector<32x48xf32>
    %296 = arith.addf %294, %295 : vector<32x48xf32>
    %297 = vector.extract_strided_slice %296 {offsets = [0, 0], sizes = [16, 48], strides = [1, 1]} : vector<32x48xf32> to vector<16x48xf32>
    %298 = math.tanh %297 : vector<16x48xf32>
    %299 = vector.extract_strided_slice %296 {offsets = [16, 0], sizes = [16, 48], strides = [1, 1]} : vector<32x48xf32> to vector<16x48xf32>
    %300 = arith.negf %299 : vector<16x48xf32>
    %301 = math.exp %300 : vector<16x48xf32>
    %cst_191 = arith.constant 1.000000e+00 : f32
    %302 = vector.broadcast %cst_191 : f32 to vector<16x48xf32>
    %303 = arith.addf %302, %301 : vector<16x48xf32>
    %304 = arith.divf %302, %303 : vector<16x48xf32>
    %305 = arith.mulf %298, %304 : vector<16x48xf32>
    %306 = vector.extract_strided_slice %286 {offsets = [0, 80], sizes = [32, 48], strides = [1, 1]} : vector<32x400xf32> to vector<32x48xf32>
    %307 = vector.extract_strided_slice %289 {offsets = [0, 112], sizes = [32, 48], strides = [1, 1]} : vector<32x400xf32> to vector<32x48xf32>
    %308 = arith.addf %306, %307 : vector<32x48xf32>
    %309 = vector.broadcast %291 : vector<32x1xf32> to vector<32x48xf32>
    %310 = arith.addf %308, %309 : vector<32x48xf32>
    %311 = vector.extract_strided_slice %310 {offsets = [0, 0], sizes = [16, 48], strides = [1, 1]} : vector<32x48xf32> to vector<16x48xf32>
    %312 = math.tanh %311 : vector<16x48xf32>
    %313 = vector.extract_strided_slice %310 {offsets = [16, 0], sizes = [16, 48], strides = [1, 1]} : vector<32x48xf32> to vector<16x48xf32>
    %314 = arith.negf %313 : vector<16x48xf32>
    %315 = math.exp %314 : vector<16x48xf32>
    %cst_192 = arith.constant 1.000000e+00 : f32
    %316 = vector.broadcast %cst_192 : f32 to vector<16x48xf32>
    %317 = arith.addf %316, %315 : vector<16x48xf32>
    %318 = arith.divf %316, %317 : vector<16x48xf32>
    %319 = arith.mulf %312, %318 : vector<16x48xf32>
    %320 = vector.extract_strided_slice %286 {offsets = [0, 160], sizes = [32, 48], strides = [1, 1]} : vector<32x400xf32> to vector<32x48xf32>
    %321 = vector.extract_strided_slice %289 {offsets = [0, 192], sizes = [32, 48], strides = [1, 1]} : vector<32x400xf32> to vector<32x48xf32>
    %322 = arith.addf %320, %321 : vector<32x48xf32>
    %323 = vector.broadcast %291 : vector<32x1xf32> to vector<32x48xf32>
    %324 = arith.addf %322, %323 : vector<32x48xf32>
    %325 = vector.extract_strided_slice %324 {offsets = [0, 0], sizes = [16, 48], strides = [1, 1]} : vector<32x48xf32> to vector<16x48xf32>
    %326 = math.tanh %325 : vector<16x48xf32>
    %327 = vector.extract_strided_slice %324 {offsets = [16, 0], sizes = [16, 48], strides = [1, 1]} : vector<32x48xf32> to vector<16x48xf32>
    %328 = arith.negf %327 : vector<16x48xf32>
    %329 = math.exp %328 : vector<16x48xf32>
    %cst_193 = arith.constant 1.000000e+00 : f32
    %330 = vector.broadcast %cst_193 : f32 to vector<16x48xf32>
    %331 = arith.addf %330, %329 : vector<16x48xf32>
    %332 = arith.divf %330, %331 : vector<16x48xf32>
    %333 = arith.mulf %326, %332 : vector<16x48xf32>
    %334 = vector.extract_strided_slice %286 {offsets = [0, 240], sizes = [32, 48], strides = [1, 1]} : vector<32x400xf32> to vector<32x48xf32>
    %335 = vector.extract_strided_slice %289 {offsets = [0, 272], sizes = [32, 48], strides = [1, 1]} : vector<32x400xf32> to vector<32x48xf32>
    %336 = arith.addf %334, %335 : vector<32x48xf32>
    %337 = vector.broadcast %291 : vector<32x1xf32> to vector<32x48xf32>
    %338 = arith.addf %336, %337 : vector<32x48xf32>
    %339 = vector.extract_strided_slice %338 {offsets = [0, 0], sizes = [16, 48], strides = [1, 1]} : vector<32x48xf32> to vector<16x48xf32>
    %340 = math.tanh %339 : vector<16x48xf32>
    %341 = vector.extract_strided_slice %338 {offsets = [16, 0], sizes = [16, 48], strides = [1, 1]} : vector<32x48xf32> to vector<16x48xf32>
    %342 = arith.negf %341 : vector<16x48xf32>
    %343 = math.exp %342 : vector<16x48xf32>
    %cst_194 = arith.constant 1.000000e+00 : f32
    %344 = vector.broadcast %cst_194 : f32 to vector<16x48xf32>
    %345 = arith.addf %344, %343 : vector<16x48xf32>
    %346 = arith.divf %344, %345 : vector<16x48xf32>
    %347 = arith.mulf %340, %346 : vector<16x48xf32>
    %348 = vector.extract_strided_slice %286 {offsets = [0, 320], sizes = [32, 48], strides = [1, 1]} : vector<32x400xf32> to vector<32x48xf32>
    %349 = vector.extract_strided_slice %289 {offsets = [0, 352], sizes = [32, 48], strides = [1, 1]} : vector<32x400xf32> to vector<32x48xf32>
    %350 = arith.addf %348, %349 : vector<32x48xf32>
    %351 = vector.broadcast %291 : vector<32x1xf32> to vector<32x48xf32>
    %352 = arith.addf %350, %351 : vector<32x48xf32>
    %353 = vector.extract_strided_slice %352 {offsets = [0, 0], sizes = [16, 48], strides = [1, 1]} : vector<32x48xf32> to vector<16x48xf32>
    %354 = math.tanh %353 : vector<16x48xf32>
    %355 = vector.extract_strided_slice %352 {offsets = [16, 0], sizes = [16, 48], strides = [1, 1]} : vector<32x48xf32> to vector<16x48xf32>
    %356 = arith.negf %355 : vector<16x48xf32>
    %357 = math.exp %356 : vector<16x48xf32>
    %cst_195 = arith.constant 1.000000e+00 : f32
    %358 = vector.broadcast %cst_195 : f32 to vector<16x48xf32>
    %359 = arith.addf %358, %357 : vector<16x48xf32>
    %360 = arith.divf %358, %359 : vector<16x48xf32>
    %361 = arith.mulf %354, %360 : vector<16x48xf32>
    %362 = arith.truncf %305 : vector<16x48xf32> to vector<16x48xbf16>
    %c0_196 = arith.constant 0 : index
    %c0_197 = arith.constant 0 : index
    %363 = vector.load %arg17[%c0_196, %c0_197] : memref<48x288xbf16, #tpu.memory_space<vmem>>, vector<48x288xbf16>
    %cst_198 = arith.constant dense<0.000000e+00> : vector<16x288xf32>
    %364 = tpu.matmul %362, %363, %cst_198 {dimension_numbers = #tpu.dot_dimension_numbers<[1], [0], [0], [1], [0, 0, 1, 1], [], []>} : vector<16x48xbf16>, vector<48x288xbf16>, vector<16x288xf32> -> vector<16x288xf32>
    %c0_199 = arith.constant 0 : index
    %c0_200 = arith.constant 0 : index
    %365 = vector.load %arg21[%c0_199, %c0_200] : memref<112x128xf32, #tpu.memory_space<vmem>>, vector<16x48xf32>
    tpu.vector_store %arg21[%c0_199, %c0_200], %305 {strides = array<i32>} : memref<112x128xf32, #tpu.memory_space<vmem>>, vector<16x48xf32>,
    %366 = vector.extract_strided_slice %364 {offsets = [0, 0], sizes = [16, 48], strides = [1, 1]} : vector<16x288xf32> to vector<16x48xf32>
    %c16_201 = arith.constant 16 : index
    %c0_202 = arith.constant 0 : index
    %367 = vector.load %arg21[%c16_201, %c0_202] : memref<112x128xf32, #tpu.memory_space<vmem>>, vector<16x48xf32>
    tpu.vector_store %arg21[%c16_201, %c0_202], %366 {strides = array<i32>} : memref<112x128xf32, #tpu.memory_space<vmem>>, vector<16x48xf32>,
    %368 = vector.extract_strided_slice %364 {offsets = [0, 48], sizes = [16, 48], strides = [1, 1]} : vector<16x288xf32> to vector<16x48xf32>
    %c32_203 = arith.constant 32 : index
    %c0_204 = arith.constant 0 : index
    %369 = vector.load %arg21[%c32_203, %c0_204] : memref<112x128xf32, #tpu.memory_space<vmem>>, vector<16x48xf32>
    tpu.vector_store %arg21[%c32_203, %c0_204], %368 {strides = array<i32>} : memref<112x128xf32, #tpu.memory_space<vmem>>, vector<16x48xf32>,
    %370 = vector.extract_strided_slice %364 {offsets = [0, 96], sizes = [16, 48], strides = [1, 1]} : vector<16x288xf32> to vector<16x48xf32>
    %c48_205 = arith.constant 48 : index
    %c0_206 = arith.constant 0 : index
    %371 = vector.load %arg21[%c48_205, %c0_206] : memref<112x128xf32, #tpu.memory_space<vmem>>, vector<16x48xf32>
    tpu.vector_store %arg21[%c48_205, %c0_206], %370 {strides = array<i32>} : memref<112x128xf32, #tpu.memory_space<vmem>>, vector<16x48xf32>,
    %372 = vector.extract_strided_slice %364 {offsets = [0, 144], sizes = [16, 48], strides = [1, 1]} : vector<16x288xf32> to vector<16x48xf32>
    %c64_207 = arith.constant 64 : index
    %c0_208 = arith.constant 0 : index
    %373 = vector.load %arg21[%c64_207, %c0_208] : memref<112x128xf32, #tpu.memory_space<vmem>>, vector<16x48xf32>
    tpu.vector_store %arg21[%c64_207, %c0_208], %372 {strides = array<i32>} : memref<112x128xf32, #tpu.memory_space<vmem>>, vector<16x48xf32>,
    %374 = vector.extract_strided_slice %364 {offsets = [0, 192], sizes = [16, 48], strides = [1, 1]} : vector<16x288xf32> to vector<16x48xf32>
    %c80_209 = arith.constant 80 : index
    %c0_210 = arith.constant 0 : index
    %375 = vector.load %arg21[%c80_209, %c0_210] : memref<112x128xf32, #tpu.memory_space<vmem>>, vector<16x48xf32>
    tpu.vector_store %arg21[%c80_209, %c0_210], %374 {strides = array<i32>} : memref<112x128xf32, #tpu.memory_space<vmem>>, vector<16x48xf32>,
    %376 = vector.extract_strided_slice %364 {offsets = [0, 240], sizes = [16, 48], strides = [1, 1]} : vector<16x288xf32> to vector<16x48xf32>
    %c96_211 = arith.constant 96 : index
    %c0_212 = arith.constant 0 : index
    %377 = vector.load %arg21[%c96_211, %c0_212] : memref<112x128xf32, #tpu.memory_space<vmem>>, vector<16x48xf32>
    tpu.vector_store %arg21[%c96_211, %c0_212], %376 {strides = array<i32>} : memref<112x128xf32, #tpu.memory_space<vmem>>, vector<16x48xf32>,
    %c1_i32_213 = arith.constant 1 : i32
    %378 = tpu.memref_slice %arg25[%c1_i32_213] : memref<2x!tpu.dma_semaphore, #tpu.memory_space<semaphore_mem>> -> memref<1x!tpu.dma_semaphore, #tpu.memory_space<semaphore_mem>>
    %379 = tpu.memref_squeeze %378 : memref<1x!tpu.dma_semaphore, #tpu.memory_space<semaphore_mem>> -> memref<!tpu.dma_semaphore, #tpu.memory_space<semaphore_mem>>
    tpu.wait_dma2 semaphore(%379 : memref<!tpu.dma_semaphore, #tpu.memory_space<semaphore_mem>>) src(%arg19 : memref<4x48x480xbf16, #tpu.memory_space<any>>) dst(%arg24 : memref<4x48x480xbf16, #tpu.memory_space<vmem>>)
    %380 = arith.truncf %319 : vector<16x48xf32> to vector<16x48xbf16>
    %c0_214 = arith.constant 0 : index
    %c0_215 = arith.constant 0 : index
    %c0_216 = arith.constant 0 : index
    %381 = vector.load %arg24[%c0_214, %c0_215, %c0_216] : memref<4x48x480xbf16, #tpu.memory_space<vmem>>, vector<1x48x480xbf16>
    %382 = vector.shape_cast %381 : vector<1x48x480xbf16> to vector<48x480xbf16>
    %cst_217 = arith.constant dense<0.000000e+00> : vector<16x480xf32>
    %383 = tpu.matmul %380, %382, %cst_217 {dimension_numbers = #tpu.dot_dimension_numbers<[1], [0], [0], [1], [0, 0, 1, 1], [], []>} : vector<16x48xbf16>, vector<48x480xbf16>, vector<16x480xf32> -> vector<16x480xf32>
    %c0_218 = arith.constant 0 : index
    %c0_219 = arith.constant 0 : index
    %384 = vector.load %arg22[%c0_218, %c0_219] : memref<176x512xf32, #tpu.memory_space<vmem>>, vector<16x48xf32>
    tpu.vector_store %arg22[%c0_218, %c0_219], %319 {strides = array<i32>} : memref<176x512xf32, #tpu.memory_space<vmem>>, vector<16x48xf32>,
    %385 = vector.extract_strided_slice %383 {offsets = [0, 0], sizes = [16, 48], strides = [1, 1]} : vector<16x480xf32> to vector<16x48xf32>
    %c16_220 = arith.constant 16 : index
    %c0_221 = arith.constant 0 : index
    %386 = vector.load %arg22[%c16_220, %c0_221] : memref<176x512xf32, #tpu.memory_space<vmem>>, vector<16x48xf32>
    tpu.vector_store %arg22[%c16_220, %c0_221], %385 {strides = array<i32>} : memref<176x512xf32, #tpu.memory_space<vmem>>, vector<16x48xf32>,
    %387 = vector.extract_strided_slice %383 {offsets = [0, 48], sizes = [16, 48], strides = [1, 1]} : vector<16x480xf32> to vector<16x48xf32>
    %c32_222 = arith.constant 32 : index
    %c0_223 = arith.constant 0 : index
    %388 = vector.load %arg22[%c32_222, %c0_223] : memref<176x512xf32, #tpu.memory_space<vmem>>, vector<16x48xf32>
    tpu.vector_store %arg22[%c32_222, %c0_223], %387 {strides = array<i32>} : memref<176x512xf32, #tpu.memory_space<vmem>>, vector<16x48xf32>,
    %389 = vector.extract_strided_slice %383 {offsets = [0, 96], sizes = [16, 48], strides = [1, 1]} : vector<16x480xf32> to vector<16x48xf32>
    %c48_224 = arith.constant 48 : index
    %c0_225 = arith.constant 0 : index
    %390 = vector.load %arg22[%c48_224, %c0_225] : memref<176x512xf32, #tpu.memory_space<vmem>>, vector<16x48xf32>
    tpu.vector_store %arg22[%c48_224, %c0_225], %389 {strides = array<i32>} : memref<176x512xf32, #tpu.memory_space<vmem>>, vector<16x48xf32>,
    %391 = vector.extract_strided_slice %383 {offsets = [0, 144], sizes = [16, 48], strides = [1, 1]} : vector<16x480xf32> to vector<16x48xf32>
    %c64_226 = arith.constant 64 : index
    %c0_227 = arith.constant 0 : index
    %392 = vector.load %arg22[%c64_226, %c0_227] : memref<176x512xf32, #tpu.memory_space<vmem>>, vector<16x48xf32>
    tpu.vector_store %arg22[%c64_226, %c0_227], %391 {strides = array<i32>} : memref<176x512xf32, #tpu.memory_space<vmem>>, vector<16x48xf32>,
    %393 = vector.extract_strided_slice %383 {offsets = [0, 192], sizes = [16, 48], strides = [1, 1]} : vector<16x480xf32> to vector<16x48xf32>
    %c80_228 = arith.constant 80 : index
    %c0_229 = arith.constant 0 : index
    %394 = vector.load %arg22[%c80_228, %c0_229] : memref<176x512xf32, #tpu.memory_space<vmem>>, vector<16x48xf32>
    tpu.vector_store %arg22[%c80_228, %c0_229], %393 {strides = array<i32>} : memref<176x512xf32, #tpu.memory_space<vmem>>, vector<16x48xf32>,
    %395 = vector.extract_strided_slice %383 {offsets = [0, 240], sizes = [16, 48], strides = [1, 1]} : vector<16x480xf32> to vector<16x48xf32>
    %c96_230 = arith.constant 96 : index
    %c0_231 = arith.constant 0 : index
    %396 = vector.load %arg22[%c96_230, %c0_231] : memref<176x512xf32, #tpu.memory_space<vmem>>, vector<16x48xf32>
    tpu.vector_store %arg22[%c96_230, %c0_231], %395 {strides = array<i32>} : memref<176x512xf32, #tpu.memory_space<vmem>>, vector<16x48xf32>,
    %397 = vector.extract_strided_slice %383 {offsets = [0, 288], sizes = [16, 48], strides = [1, 1]} : vector<16x480xf32> to vector<16x48xf32>
    %c112_232 = arith.constant 112 : index
    %c0_233 = arith.constant 0 : index
    %398 = vector.load %arg22[%c112_232, %c0_233] : memref<176x512xf32, #tpu.memory_space<vmem>>, vector<16x48xf32>
    tpu.vector_store %arg22[%c112_232, %c0_233], %397 {strides = array<i32>} : memref<176x512xf32, #tpu.memory_space<vmem>>, vector<16x48xf32>,
    %399 = vector.extract_strided_slice %383 {offsets = [0, 336], sizes = [16, 48], strides = [1, 1]} : vector<16x480xf32> to vector<16x48xf32>
    %c128_234 = arith.constant 128 : index
    %c0_235 = arith.constant 0 : index
    %400 = vector.load %arg22[%c128_234, %c0_235] : memref<176x512xf32, #tpu.memory_space<vmem>>, vector<16x48xf32>
    tpu.vector_store %arg22[%c128_234, %c0_235], %399 {strides = array<i32>} : memref<176x512xf32, #tpu.memory_space<vmem>>, vector<16x48xf32>,
    %401 = vector.extract_strided_slice %383 {offsets = [0, 384], sizes = [16, 48], strides = [1, 1]} : vector<16x480xf32> to vector<16x48xf32>
    %c144_236 = arith.constant 144 : index
    %c0_237 = arith.constant 0 : index
    %402 = vector.load %arg22[%c144_236, %c0_237] : memref<176x512xf32, #tpu.memory_space<vmem>>, vector<16x48xf32>
    tpu.vector_store %arg22[%c144_236, %c0_237], %401 {strides = array<i32>} : memref<176x512xf32, #tpu.memory_space<vmem>>, vector<16x48xf32>,
    %403 = vector.extract_strided_slice %383 {offsets = [0, 432], sizes = [16, 48], strides = [1, 1]} : vector<16x480xf32> to vector<16x48xf32>
    %c160_238 = arith.constant 160 : index
    %c0_239 = arith.constant 0 : index
    %404 = vector.load %arg22[%c160_238, %c0_239] : memref<176x512xf32, #tpu.memory_space<vmem>>, vector<16x48xf32>
    tpu.vector_store %arg22[%c160_238, %c0_239], %403 {strides = array<i32>} : memref<176x512xf32, #tpu.memory_space<vmem>>, vector<16x48xf32>,
    %405 = arith.truncf %333 : vector<16x48xf32> to vector<16x48xbf16>
    %c1_240 = arith.constant 1 : index
    %c0_241 = arith.constant 0 : index
    %c0_242 = arith.constant 0 : index
    %406 = vector.load %arg24[%c1_240, %c0_241, %c0_242] : memref<4x48x480xbf16, #tpu.memory_space<vmem>>, vector<1x48x480xbf16>
    %407 = vector.shape_cast %406 : vector<1x48x480xbf16> to vector<48x480xbf16>
    %cst_243 = arith.constant dense<0.000000e+00> : vector<16x480xf32>
    %408 = tpu.matmul %405, %407, %cst_243 {dimension_numbers = #tpu.dot_dimension_numbers<[1], [0], [0], [1], [0, 0, 1, 1], [], []>} : vector<16x48xbf16>, vector<48x480xbf16>, vector<16x480xf32> -> vector<16x480xf32>
    %c0_244 = arith.constant 0 : index
    %c128_245 = arith.constant 128 : index
    %409 = vector.load %arg22[%c0_244, %c128_245] : memref<176x512xf32, #tpu.memory_space<vmem>>, vector<16x48xf32>
    tpu.vector_store %arg22[%c0_244, %c128_245], %333 {strides = array<i32>} : memref<176x512xf32, #tpu.memory_space<vmem>>, vector<16x48xf32>,
    %410 = vector.extract_strided_slice %408 {offsets = [0, 0], sizes = [16, 48], strides = [1, 1]} : vector<16x480xf32> to vector<16x48xf32>
    %c16_246 = arith.constant 16 : index
    %c128_247 = arith.constant 128 : index
    %411 = vector.load %arg22[%c16_246, %c128_247] : memref<176x512xf32, #tpu.memory_space<vmem>>, vector<16x48xf32>
    tpu.vector_store %arg22[%c16_246, %c128_247], %410 {strides = array<i32>} : memref<176x512xf32, #tpu.memory_space<vmem>>, vector<16x48xf32>,
    %412 = vector.extract_strided_slice %408 {offsets = [0, 48], sizes = [16, 48], strides = [1, 1]} : vector<16x480xf32> to vector<16x48xf32>
    %c32_248 = arith.constant 32 : index
    %c128_249 = arith.constant 128 : index
    %413 = vector.load %arg22[%c32_248, %c128_249] : memref<176x512xf32, #tpu.memory_space<vmem>>, vector<16x48xf32>
    tpu.vector_store %arg22[%c32_248, %c128_249], %412 {strides = array<i32>} : memref<176x512xf32, #tpu.memory_space<vmem>>, vector<16x48xf32>,
    %414 = vector.extract_strided_slice %408 {offsets = [0, 96], sizes = [16, 48], strides = [1, 1]} : vector<16x480xf32> to vector<16x48xf32>
    %c48_250 = arith.constant 48 : index
    %c128_251 = arith.constant 128 : index
    %415 = vector.load %arg22[%c48_250, %c128_251] : memref<176x512xf32, #tpu.memory_space<vmem>>, vector<16x48xf32>
    tpu.vector_store %arg22[%c48_250, %c128_251], %414 {strides = array<i32>} : memref<176x512xf32, #tpu.memory_space<vmem>>, vector<16x48xf32>,
    %416 = vector.extract_strided_slice %408 {offsets = [0, 144], sizes = [16, 48], strides = [1, 1]} : vector<16x480xf32> to vector<16x48xf32>
    %c64_252 = arith.constant 64 : index
    %c128_253 = arith.constant 128 : index
    %417 = vector.load %arg22[%c64_252, %c128_253] : memref<176x512xf32, #tpu.memory_space<vmem>>, vector<16x48xf32>
    tpu.vector_store %arg22[%c64_252, %c128_253], %416 {strides = array<i32>} : memref<176x512xf32, #tpu.memory_space<vmem>>, vector<16x48xf32>,
    %418 = vector.extract_strided_slice %408 {offsets = [0, 192], sizes = [16, 48], strides = [1, 1]} : vector<16x480xf32> to vector<16x48xf32>
    %c80_254 = arith.constant 80 : index
    %c128_255 = arith.constant 128 : index
    %419 = vector.load %arg22[%c80_254, %c128_255] : memref<176x512xf32, #tpu.memory_space<vmem>>, vector<16x48xf32>
    tpu.vector_store %arg22[%c80_254, %c128_255], %418 {strides = array<i32>} : memref<176x512xf32, #tpu.memory_space<vmem>>, vector<16x48xf32>,
    %420 = vector.extract_strided_slice %408 {offsets = [0, 240], sizes = [16, 48], strides = [1, 1]} : vector<16x480xf32> to vector<16x48xf32>
    %c96_256 = arith.constant 96 : index
    %c128_257 = arith.constant 128 : index
    %421 = vector.load %arg22[%c96_256, %c128_257] : memref<176x512xf32, #tpu.memory_space<vmem>>, vector<16x48xf32>
    tpu.vector_store %arg22[%c96_256, %c128_257], %420 {strides = array<i32>} : memref<176x512xf32, #tpu.memory_space<vmem>>, vector<16x48xf32>,
    %422 = vector.extract_strided_slice %408 {offsets = [0, 288], sizes = [16, 48], strides = [1, 1]} : vector<16x480xf32> to vector<16x48xf32>
    %c112_258 = arith.constant 112 : index
    %c128_259 = arith.constant 128 : index
    %423 = vector.load %arg22[%c112_258, %c128_259] : memref<176x512xf32, #tpu.memory_space<vmem>>, vector<16x48xf32>
    tpu.vector_store %arg22[%c112_258, %c128_259], %422 {strides = array<i32>} : memref<176x512xf32, #tpu.memory_space<vmem>>, vector<16x48xf32>,
    %424 = vector.extract_strided_slice %408 {offsets = [0, 336], sizes = [16, 48], strides = [1, 1]} : vector<16x480xf32> to vector<16x48xf32>
    %c128_260 = arith.constant 128 : index
    %c128_261 = arith.constant 128 : index
    %425 = vector.load %arg22[%c128_260, %c128_261] : memref<176x512xf32, #tpu.memory_space<vmem>>, vector<16x48xf32>
    tpu.vector_store %arg22[%c128_260, %c128_261], %424 {strides = array<i32>} : memref<176x512xf32, #tpu.memory_space<vmem>>, vector<16x48xf32>,
    %426 = vector.extract_strided_slice %408 {offsets = [0, 384], sizes = [16, 48], strides = [1, 1]} : vector<16x480xf32> to vector<16x48xf32>
    %c144_262 = arith.constant 144 : index
    %c128_263 = arith.constant 128 : index
    %427 = vector.load %arg22[%c144_262, %c128_263] : memref<176x512xf32, #tpu.memory_space<vmem>>, vector<16x48xf32>
    tpu.vector_store %arg22[%c144_262, %c128_263], %426 {strides = array<i32>} : memref<176x512xf32, #tpu.memory_space<vmem>>, vector<16x48xf32>,
    %428 = vector.extract_strided_slice %408 {offsets = [0, 432], sizes = [16, 48], strides = [1, 1]} : vector<16x480xf32> to vector<16x48xf32>
    %c160_264 = arith.constant 160 : index
    %c128_265 = arith.constant 128 : index
    %429 = vector.load %arg22[%c160_264, %c128_265] : memref<176x512xf32, #tpu.memory_space<vmem>>, vector<16x48xf32>
    tpu.vector_store %arg22[%c160_264, %c128_265], %428 {strides = array<i32>} : memref<176x512xf32, #tpu.memory_space<vmem>>, vector<16x48xf32>,
    %430 = arith.truncf %347 : vector<16x48xf32> to vector<16x48xbf16>
    %c2_266 = arith.constant 2 : index
    %c0_267 = arith.constant 0 : index
    %c0_268 = arith.constant 0 : index
    %431 = vector.load %arg24[%c2_266, %c0_267, %c0_268] : memref<4x48x480xbf16, #tpu.memory_space<vmem>>, vector<1x48x480xbf16>
    %432 = vector.shape_cast %431 : vector<1x48x480xbf16> to vector<48x480xbf16>
    %cst_269 = arith.constant dense<0.000000e+00> : vector<16x480xf32>
    %433 = tpu.matmul %430, %432, %cst_269 {dimension_numbers = #tpu.dot_dimension_numbers<[1], [0], [0], [1], [0, 0, 1, 1], [], []>} : vector<16x48xbf16>, vector<48x480xbf16>, vector<16x480xf32> -> vector<16x480xf32>
    %c0_270 = arith.constant 0 : index
    %c256_271 = arith.constant 256 : index
    %434 = vector.load %arg22[%c0_270, %c256_271] : memref<176x512xf32, #tpu.memory_space<vmem>>, vector<16x48xf32>
    tpu.vector_store %arg22[%c0_270, %c256_271], %347 {strides = array<i32>} : memref<176x512xf32, #tpu.memory_space<vmem>>, vector<16x48xf32>,
    %435 = vector.extract_strided_slice %433 {offsets = [0, 0], sizes = [16, 48], strides = [1, 1]} : vector<16x480xf32> to vector<16x48xf32>
    %c16_272 = arith.constant 16 : index
    %c256_273 = arith.constant 256 : index
    %436 = vector.load %arg22[%c16_272, %c256_273] : memref<176x512xf32, #tpu.memory_space<vmem>>, vector<16x48xf32>
    tpu.vector_store %arg22[%c16_272, %c256_273], %435 {strides = array<i32>} : memref<176x512xf32, #tpu.memory_space<vmem>>, vector<16x48xf32>,
    %437 = vector.extract_strided_slice %433 {offsets = [0, 48], sizes = [16, 48], strides = [1, 1]} : vector<16x480xf32> to vector<16x48xf32>
    %c32_274 = arith.constant 32 : index
    %c256_275 = arith.constant 256 : index
    %438 = vector.load %arg22[%c32_274, %c256_275] : memref<176x512xf32, #tpu.memory_space<vmem>>, vector<16x48xf32>
    tpu.vector_store %arg22[%c32_274, %c256_275], %437 {strides = array<i32>} : memref<176x512xf32, #tpu.memory_space<vmem>>, vector<16x48xf32>,
    %439 = vector.extract_strided_slice %433 {offsets = [0, 96], sizes = [16, 48], strides = [1, 1]} : vector<16x480xf32> to vector<16x48xf32>
    %c48_276 = arith.constant 48 : index
    %c256_277 = arith.constant 256 : index
    %440 = vector.load %arg22[%c48_276, %c256_277] : memref<176x512xf32, #tpu.memory_space<vmem>>, vector<16x48xf32>
    tpu.vector_store %arg22[%c48_276, %c256_277], %439 {strides = array<i32>} : memref<176x512xf32, #tpu.memory_space<vmem>>, vector<16x48xf32>,
    %441 = vector.extract_strided_slice %433 {offsets = [0, 144], sizes = [16, 48], strides = [1, 1]} : vector<16x480xf32> to vector<16x48xf32>
    %c64_278 = arith.constant 64 : index
    %c256_279 = arith.constant 256 : index
    %442 = vector.load %arg22[%c64_278, %c256_279] : memref<176x512xf32, #tpu.memory_space<vmem>>, vector<16x48xf32>
    tpu.vector_store %arg22[%c64_278, %c256_279], %441 {strides = array<i32>} : memref<176x512xf32, #tpu.memory_space<vmem>>, vector<16x48xf32>,
    %443 = vector.extract_strided_slice %433 {offsets = [0, 192], sizes = [16, 48], strides = [1, 1]} : vector<16x480xf32> to vector<16x48xf32>
    %c80_280 = arith.constant 80 : index
    %c256_281 = arith.constant 256 : index
    %444 = vector.load %arg22[%c80_280, %c256_281] : memref<176x512xf32, #tpu.memory_space<vmem>>, vector<16x48xf32>
    tpu.vector_store %arg22[%c80_280, %c256_281], %443 {strides = array<i32>} : memref<176x512xf32, #tpu.memory_space<vmem>>, vector<16x48xf32>,
    %445 = vector.extract_strided_slice %433 {offsets = [0, 240], sizes = [16, 48], strides = [1, 1]} : vector<16x480xf32> to vector<16x48xf32>
    %c96_282 = arith.constant 96 : index
    %c256_283 = arith.constant 256 : index
    %446 = vector.load %arg22[%c96_282, %c256_283] : memref<176x512xf32, #tpu.memory_space<vmem>>, vector<16x48xf32>
    tpu.vector_store %arg22[%c96_282, %c256_283], %445 {strides = array<i32>} : memref<176x512xf32, #tpu.memory_space<vmem>>, vector<16x48xf32>,
    %447 = vector.extract_strided_slice %433 {offsets = [0, 288], sizes = [16, 48], strides = [1, 1]} : vector<16x480xf32> to vector<16x48xf32>
    %c112_284 = arith.constant 112 : index
    %c256_285 = arith.constant 256 : index
    %448 = vector.load %arg22[%c112_284, %c256_285] : memref<176x512xf32, #tpu.memory_space<vmem>>, vector<16x48xf32>
    tpu.vector_store %arg22[%c112_284, %c256_285], %447 {strides = array<i32>} : memref<176x512xf32, #tpu.memory_space<vmem>>, vector<16x48xf32>,
    %449 = vector.extract_strided_slice %433 {offsets = [0, 336], sizes = [16, 48], strides = [1, 1]} : vector<16x480xf32> to vector<16x48xf32>
    %c128_286 = arith.constant 128 : index
    %c256_287 = arith.constant 256 : index
    %450 = vector.load %arg22[%c128_286, %c256_287] : memref<176x512xf32, #tpu.memory_space<vmem>>, vector<16x48xf32>
    tpu.vector_store %arg22[%c128_286, %c256_287], %449 {strides = array<i32>} : memref<176x512xf32, #tpu.memory_space<vmem>>, vector<16x48xf32>,
    %451 = vector.extract_strided_slice %433 {offsets = [0, 384], sizes = [16, 48], strides = [1, 1]} : vector<16x480xf32> to vector<16x48xf32>
    %c144_288 = arith.constant 144 : index
    %c256_289 = arith.constant 256 : index
    %452 = vector.load %arg22[%c144_288, %c256_289] : memref<176x512xf32, #tpu.memory_space<vmem>>, vector<16x48xf32>
    tpu.vector_store %arg22[%c144_288, %c256_289], %451 {strides = array<i32>} : memref<176x512xf32, #tpu.memory_space<vmem>>, vector<16x48xf32>,
    %453 = vector.extract_strided_slice %433 {offsets = [0, 432], sizes = [16, 48], strides = [1, 1]} : vector<16x480xf32> to vector<16x48xf32>
    %c160_290 = arith.constant 160 : index
    %c256_291 = arith.constant 256 : index
    %454 = vector.load %arg22[%c160_290, %c256_291] : memref<176x512xf32, #tpu.memory_space<vmem>>, vector<16x48xf32>
    tpu.vector_store %arg22[%c160_290, %c256_291], %453 {strides = array<i32>} : memref<176x512xf32, #tpu.memory_space<vmem>>, vector<16x48xf32>,
    %455 = arith.truncf %361 : vector<16x48xf32> to vector<16x48xbf16>
    %c3_292 = arith.constant 3 : index
    %c0_293 = arith.constant 0 : index
    %c0_294 = arith.constant 0 : index
    %456 = vector.load %arg24[%c3_292, %c0_293, %c0_294] : memref<4x48x480xbf16, #tpu.memory_space<vmem>>, vector<1x48x480xbf16>
    %457 = vector.shape_cast %456 : vector<1x48x480xbf16> to vector<48x480xbf16>
    %cst_295 = arith.constant dense<0.000000e+00> : vector<16x480xf32>
    %458 = tpu.matmul %455, %457, %cst_295 {dimension_numbers = #tpu.dot_dimension_numbers<[1], [0], [0], [1], [0, 0, 1, 1], [], []>} : vector<16x48xbf16>, vector<48x480xbf16>, vector<16x480xf32> -> vector<16x480xf32>
    %c0_296 = arith.constant 0 : index
    %c384_297 = arith.constant 384 : index
    %459 = vector.load %arg22[%c0_296, %c384_297] : memref<176x512xf32, #tpu.memory_space<vmem>>, vector<16x48xf32>
    tpu.vector_store %arg22[%c0_296, %c384_297], %361 {strides = array<i32>} : memref<176x512xf32, #tpu.memory_space<vmem>>, vector<16x48xf32>,
    %460 = vector.extract_strided_slice %458 {offsets = [0, 0], sizes = [16, 48], strides = [1, 1]} : vector<16x480xf32> to vector<16x48xf32>
    %c16_298 = arith.constant 16 : index
    %c384_299 = arith.constant 384 : index
    %461 = vector.load %arg22[%c16_298, %c384_299] : memref<176x512xf32, #tpu.memory_space<vmem>>, vector<16x48xf32>
    tpu.vector_store %arg22[%c16_298, %c384_299], %460 {strides = array<i32>} : memref<176x512xf32, #tpu.memory_space<vmem>>, vector<16x48xf32>,
    %462 = vector.extract_strided_slice %458 {offsets = [0, 48], sizes = [16, 48], strides = [1, 1]} : vector<16x480xf32> to vector<16x48xf32>
    %c32_300 = arith.constant 32 : index
    %c384_301 = arith.constant 384 : index
    %463 = vector.load %arg22[%c32_300, %c384_301] : memref<176x512xf32, #tpu.memory_space<vmem>>, vector<16x48xf32>
    tpu.vector_store %arg22[%c32_300, %c384_301], %462 {strides = array<i32>} : memref<176x512xf32, #tpu.memory_space<vmem>>, vector<16x48xf32>,
    %464 = vector.extract_strided_slice %458 {offsets = [0, 96], sizes = [16, 48], strides = [1, 1]} : vector<16x480xf32> to vector<16x48xf32>
    %c48_302 = arith.constant 48 : index
    %c384_303 = arith.constant 384 : index
    %465 = vector.load %arg22[%c48_302, %c384_303] : memref<176x512xf32, #tpu.memory_space<vmem>>, vector<16x48xf32>
    tpu.vector_store %arg22[%c48_302, %c384_303], %464 {strides = array<i32>} : memref<176x512xf32, #tpu.memory_space<vmem>>, vector<16x48xf32>,
    %466 = vector.extract_strided_slice %458 {offsets = [0, 144], sizes = [16, 48], strides = [1, 1]} : vector<16x480xf32> to vector<16x48xf32>
    %c64_304 = arith.constant 64 : index
    %c384_305 = arith.constant 384 : index
    %467 = vector.load %arg22[%c64_304, %c384_305] : memref<176x512xf32, #tpu.memory_space<vmem>>, vector<16x48xf32>
    tpu.vector_store %arg22[%c64_304, %c384_305], %466 {strides = array<i32>} : memref<176x512xf32, #tpu.memory_space<vmem>>, vector<16x48xf32>,
    %468 = vector.extract_strided_slice %458 {offsets = [0, 192], sizes = [16, 48], strides = [1, 1]} : vector<16x480xf32> to vector<16x48xf32>
    %c80_306 = arith.constant 80 : index
    %c384_307 = arith.constant 384 : index
    %469 = vector.load %arg22[%c80_306, %c384_307] : memref<176x512xf32, #tpu.memory_space<vmem>>, vector<16x48xf32>
    tpu.vector_store %arg22[%c80_306, %c384_307], %468 {strides = array<i32>} : memref<176x512xf32, #tpu.memory_space<vmem>>, vector<16x48xf32>,
    %470 = vector.extract_strided_slice %458 {offsets = [0, 240], sizes = [16, 48], strides = [1, 1]} : vector<16x480xf32> to vector<16x48xf32>
    %c96_308 = arith.constant 96 : index
    %c384_309 = arith.constant 384 : index
    %471 = vector.load %arg22[%c96_308, %c384_309] : memref<176x512xf32, #tpu.memory_space<vmem>>, vector<16x48xf32>
    tpu.vector_store %arg22[%c96_308, %c384_309], %470 {strides = array<i32>} : memref<176x512xf32, #tpu.memory_space<vmem>>, vector<16x48xf32>,
    %472 = vector.extract_strided_slice %458 {offsets = [0, 288], sizes = [16, 48], strides = [1, 1]} : vector<16x480xf32> to vector<16x48xf32>
    %c112_310 = arith.constant 112 : index
    %c384_311 = arith.constant 384 : index
    %473 = vector.load %arg22[%c112_310, %c384_311] : memref<176x512xf32, #tpu.memory_space<vmem>>, vector<16x48xf32>
    tpu.vector_store %arg22[%c112_310, %c384_311], %472 {strides = array<i32>} : memref<176x512xf32, #tpu.memory_space<vmem>>, vector<16x48xf32>,
    %474 = vector.extract_strided_slice %458 {offsets = [0, 336], sizes = [16, 48], strides = [1, 1]} : vector<16x480xf32> to vector<16x48xf32>
    %c128_312 = arith.constant 128 : index
    %c384_313 = arith.constant 384 : index
    %475 = vector.load %arg22[%c128_312, %c384_313] : memref<176x512xf32, #tpu.memory_space<vmem>>, vector<16x48xf32>
    tpu.vector_store %arg22[%c128_312, %c384_313], %474 {strides = array<i32>} : memref<176x512xf32, #tpu.memory_space<vmem>>, vector<16x48xf32>,
    %476 = vector.extract_strided_slice %458 {offsets = [0, 384], sizes = [16, 48], strides = [1, 1]} : vector<16x480xf32> to vector<16x48xf32>
    %c144_314 = arith.constant 144 : index
    %c384_315 = arith.constant 384 : index
    %477 = vector.load %arg22[%c144_314, %c384_315] : memref<176x512xf32, #tpu.memory_space<vmem>>, vector<16x48xf32>
    tpu.vector_store %arg22[%c144_314, %c384_315], %476 {strides = array<i32>} : memref<176x512xf32, #tpu.memory_space<vmem>>, vector<16x48xf32>,
    %478 = vector.extract_strided_slice %458 {offsets = [0, 432], sizes = [16, 48], strides = [1, 1]} : vector<16x480xf32> to vector<16x48xf32>
    %c160_316 = arith.constant 160 : index
    %c384_317 = arith.constant 384 : index
    %479 = vector.load %arg22[%c160_316, %c384_317] : memref<176x512xf32, #tpu.memory_space<vmem>>, vector<16x48xf32>
    tpu.vector_store %arg22[%c160_316, %c384_317], %478 {strides = array<i32>} : memref<176x512xf32, #tpu.memory_space<vmem>>, vector<16x48xf32>,
    %c2_318 = arith.constant 2 : index
    %c0_319 = arith.constant 0 : index
    %c0_320 = arith.constant 0 : index
    %480 = vector.load %arg6[%c2_318, %c0_319, %c0_320] : memref<4x16x112xf32, #tpu.memory_space<vmem>>, vector<1x16x112xf32>
    %481 = vector.shape_cast %480 : vector<1x16x112xf32> to vector<16x112xf32>
    %c0_321 = arith.constant 0 : index
    %c0_322 = arith.constant 0 : index
    %482 = vector.load %arg21[%c0_321, %c0_322] : memref<112x128xf32, #tpu.memory_space<vmem>>, vector<112x128xf32>
    %cst_323 = arith.constant dense<0.000000e+00> : vector<16x128xf32>
    %483 = tpu.matmul %481, %482, %cst_323 {dimension_numbers = #tpu.dot_dimension_numbers<[1], [0], [0], [1], [0, 0, 1, 1], [], []>} : vector<16x112xf32>, vector<112x128xf32>, vector<16x128xf32> -> vector<16x128xf32>
    %c3_324 = arith.constant 3 : index
    %c0_325 = arith.constant 0 : index
    %c0_326 = arith.constant 0 : index
    %484 = vector.load %arg6[%c3_324, %c0_325, %c0_326] : memref<4x16x112xf32, #tpu.memory_space<vmem>>, vector<1x16x112xf32>
    %485 = vector.shape_cast %484 : vector<1x16x112xf32> to vector<16x112xf32>
    %c0_327 = arith.constant 0 : index
    %c0_328 = arith.constant 0 : index
    %486 = vector.load %arg21[%c0_327, %c0_328] : memref<112x128xf32, #tpu.memory_space<vmem>>, vector<112x128xf32>
    %cst_329 = arith.constant dense<0.000000e+00> : vector<16x128xf32>
    %487 = tpu.matmul %485, %486, %cst_329 {dimension_numbers = #tpu.dot_dimension_numbers<[1], [0], [0], [1], [0, 0, 1, 1], [], []>} : vector<16x112xf32>, vector<112x128xf32>, vector<16x128xf32> -> vector<16x128xf32>
    %c2_330 = arith.constant 2 : index
    %c0_331 = arith.constant 0 : index
    %c0_332 = arith.constant 0 : index
    %488 = vector.load %arg8[%c2_330, %c0_331, %c0_332] : memref<4x16x176xf32, #tpu.memory_space<vmem>>, vector<1x16x176xf32>
    %489 = vector.shape_cast %488 : vector<1x16x176xf32> to vector<16x176xf32>
    %c0_333 = arith.constant 0 : index
    %c0_334 = arith.constant 0 : index
    %490 = vector.load %arg22[%c0_333, %c0_334] : memref<176x512xf32, #tpu.memory_space<vmem>>, vector<176x512xf32>
    %cst_335 = arith.constant dense<0.000000e+00> : vector<16x512xf32>
    %491 = tpu.matmul %489, %490, %cst_335 {dimension_numbers = #tpu.dot_dimension_numbers<[1], [0], [0], [1], [0, 0, 1, 1], [], []>} : vector<16x176xf32>, vector<176x512xf32>, vector<16x512xf32> -> vector<16x512xf32>
    %c3_336 = arith.constant 3 : index
    %c0_337 = arith.constant 0 : index
    %c0_338 = arith.constant 0 : index
    %492 = vector.load %arg8[%c3_336, %c0_337, %c0_338] : memref<4x16x176xf32, #tpu.memory_space<vmem>>, vector<1x16x176xf32>
    %493 = vector.shape_cast %492 : vector<1x16x176xf32> to vector<16x176xf32>
    %c0_339 = arith.constant 0 : index
    %c0_340 = arith.constant 0 : index
    %494 = vector.load %arg22[%c0_339, %c0_340] : memref<176x512xf32, #tpu.memory_space<vmem>>, vector<176x512xf32>
    %cst_341 = arith.constant dense<0.000000e+00> : vector<16x512xf32>
    %495 = tpu.matmul %493, %494, %cst_341 {dimension_numbers = #tpu.dot_dimension_numbers<[1], [0], [0], [1], [0, 0, 1, 1], [], []>} : vector<16x176xf32>, vector<176x512xf32>, vector<16x512xf32> -> vector<16x512xf32>
    %c1_342 = arith.constant 1 : index
    %c0_343 = arith.constant 0 : index
    %c0_344 = arith.constant 0 : index
    %496 = vector.load %arg7[%c1_342, %c0_343, %c0_344] : memref<2x16x1xf32, #tpu.memory_space<vmem>>, vector<1x16x1xf32>
    %497 = vector.shape_cast %496 : vector<1x16x1xf32> to vector<16x1xf32>
    %498 = vector.extract_strided_slice %483 {offsets = [0, 0], sizes = [16, 16], strides = [1, 1]} : vector<16x128xf32> to vector<16x16xf32>
    %499 = vector.extract_strided_slice %487 {offsets = [0, 32], sizes = [16, 16], strides = [1, 1]} : vector<16x128xf32> to vector<16x16xf32>
    %500 = arith.addf %498, %499 : vector<16x16xf32>
    %501 = vector.broadcast %497 : vector<16x1xf32> to vector<16x16xf32>
    %502 = arith.addf %500, %501 : vector<16x16xf32>
    %503 = vector.extract_strided_slice %235 {offsets = [0, 64], sizes = [16, 16], strides = [1, 1]} : vector<16x80xf32> to vector<16x16xf32>
    %504 = arith.addf %502, %503 : vector<16x16xf32>
    %c1_345 = arith.constant 1 : index
    %c0_346 = arith.constant 0 : index
    %c0_347 = arith.constant 0 : index
    %505 = vector.load %arg9[%c1_345, %c0_346, %c0_347] : memref<2x16x1xf32, #tpu.memory_space<vmem>>, vector<1x16x1xf32>
    %506 = vector.shape_cast %505 : vector<1x16x1xf32> to vector<16x1xf32>
    %507 = vector.extract_strided_slice %491 {offsets = [0, 0], sizes = [16, 16], strides = [1, 1]} : vector<16x512xf32> to vector<16x16xf32>
    %508 = vector.extract_strided_slice %495 {offsets = [0, 32], sizes = [16, 16], strides = [1, 1]} : vector<16x512xf32> to vector<16x16xf32>
    %509 = arith.addf %507, %508 : vector<16x16xf32>
    %510 = vector.broadcast %506 : vector<16x1xf32> to vector<16x16xf32>
    %511 = arith.addf %509, %510 : vector<16x16xf32>
    %512 = vector.extract_strided_slice %244 {offsets = [0, 64], sizes = [16, 16], strides = [1, 1]} : vector<16x80xf32> to vector<16x16xf32>
    %513 = arith.addf %511, %512 : vector<16x16xf32>
    %514 = arith.addf %504, %513 : vector<16x16xf32>
    %c1_348 = arith.constant 1 : index
    %c0_349 = arith.constant 0 : index
    %c0_350 = arith.constant 0 : index
    %515 = vector.load %arg9[%c1_348, %c0_349, %c0_350] : memref<2x16x1xf32, #tpu.memory_space<vmem>>, vector<1x16x1xf32>
    %516 = vector.shape_cast %515 : vector<1x16x1xf32> to vector<16x1xf32>
    %517 = vector.extract_strided_slice %491 {offsets = [0, 128], sizes = [16, 16], strides = [1, 1]} : vector<16x512xf32> to vector<16x16xf32>
    %518 = vector.extract_strided_slice %495 {offsets = [0, 160], sizes = [16, 16], strides = [1, 1]} : vector<16x512xf32> to vector<16x16xf32>
    %519 = arith.addf %517, %518 : vector<16x16xf32>
    %520 = vector.broadcast %516 : vector<16x1xf32> to vector<16x16xf32>
    %521 = arith.addf %519, %520 : vector<16x16xf32>
    %522 = vector.extract_strided_slice %254 {offsets = [0, 64], sizes = [16, 16], strides = [1, 1]} : vector<16x80xf32> to vector<16x16xf32>
    %523 = arith.addf %521, %522 : vector<16x16xf32>
    %524 = arith.addf %514, %523 : vector<16x16xf32>
    %c1_351 = arith.constant 1 : index
    %c0_352 = arith.constant 0 : index
    %c0_353 = arith.constant 0 : index
    %525 = vector.load %arg9[%c1_351, %c0_352, %c0_353] : memref<2x16x1xf32, #tpu.memory_space<vmem>>, vector<1x16x1xf32>
    %526 = vector.shape_cast %525 : vector<1x16x1xf32> to vector<16x1xf32>
    %527 = vector.extract_strided_slice %491 {offsets = [0, 256], sizes = [16, 16], strides = [1, 1]} : vector<16x512xf32> to vector<16x16xf32>
    %528 = vector.extract_strided_slice %495 {offsets = [0, 288], sizes = [16, 16], strides = [1, 1]} : vector<16x512xf32> to vector<16x16xf32>
    %529 = arith.addf %527, %528 : vector<16x16xf32>
    %530 = vector.broadcast %526 : vector<16x1xf32> to vector<16x16xf32>
    %531 = arith.addf %529, %530 : vector<16x16xf32>
    %532 = vector.extract_strided_slice %264 {offsets = [0, 64], sizes = [16, 16], strides = [1, 1]} : vector<16x80xf32> to vector<16x16xf32>
    %533 = arith.addf %531, %532 : vector<16x16xf32>
    %534 = arith.addf %524, %533 : vector<16x16xf32>
    %c1_354 = arith.constant 1 : index
    %c0_355 = arith.constant 0 : index
    %c0_356 = arith.constant 0 : index
    %535 = vector.load %arg9[%c1_354, %c0_355, %c0_356] : memref<2x16x1xf32, #tpu.memory_space<vmem>>, vector<1x16x1xf32>
    %536 = vector.shape_cast %535 : vector<1x16x1xf32> to vector<16x1xf32>
    %537 = vector.extract_strided_slice %491 {offsets = [0, 384], sizes = [16, 16], strides = [1, 1]} : vector<16x512xf32> to vector<16x16xf32>
    %538 = vector.extract_strided_slice %495 {offsets = [0, 416], sizes = [16, 16], strides = [1, 1]} : vector<16x512xf32> to vector<16x16xf32>
    %539 = arith.addf %537, %538 : vector<16x16xf32>
    %540 = vector.broadcast %536 : vector<16x1xf32> to vector<16x16xf32>
    %541 = arith.addf %539, %540 : vector<16x16xf32>
    %542 = vector.extract_strided_slice %274 {offsets = [0, 64], sizes = [16, 16], strides = [1, 1]} : vector<16x80xf32> to vector<16x16xf32>
    %543 = arith.addf %541, %542 : vector<16x16xf32>
    %544 = arith.addf %534, %543 : vector<16x16xf32>
    %c1_357 = arith.constant 1 : index
    %c0_358 = arith.constant 0 : index
    %c0_359 = arith.constant 0 : index
    %545 = vector.load %arg10[%c1_357, %c0_358, %c0_359] : memref<2x32x16xf32, #tpu.memory_space<vmem>>, vector<1x32x16xf32>
    %546 = vector.shape_cast %545 : vector<1x32x16xf32> to vector<32x16xf32>
    %cst_360 = arith.constant dense<0.000000e+00> : vector<32x16xf32>
    %547 = tpu.matmul %546, %544, %cst_360 {dimension_numbers = #tpu.dot_dimension_numbers<[1], [0], [0], [1], [0, 0, 1, 1], [], []>} : vector<32x16xf32>, vector<16x16xf32>, vector<32x16xf32> -> vector<32x16xf32>
    %c1_361 = arith.constant 1 : index
    %c0_362 = arith.constant 0 : index
    %c0_363 = arith.constant 0 : index
    %548 = vector.load %arg11[%c1_361, %c0_362, %c0_363] : memref<2x32x1xf32, #tpu.memory_space<vmem>>, vector<1x32x1xf32>
    %549 = vector.shape_cast %548 : vector<1x32x1xf32> to vector<32x1xf32>
    %550 = vector.broadcast %549 : vector<32x1xf32> to vector<32x16xf32>
    %551 = arith.addf %547, %550 : vector<32x16xf32>
    %552 = vector.extract_strided_slice %282 {offsets = [0, 64], sizes = [32, 16], strides = [1, 1]} : vector<32x80xf32> to vector<32x16xf32>
    %553 = arith.addf %551, %552 : vector<32x16xf32>
    %cst_364 = arith.constant 0.00999999977 : f32
    %cst_365 = arith.constant 0.000000e+00 : f32
    %554 = vector.broadcast %cst_365 : f32 to vector<32x16xf32>
    %555 = arith.cmpf oge, %553, %554 : vector<32x16xf32>
    %556 = vector.broadcast %cst_364 : f32 to vector<32x16xf32>
    %557 = arith.mulf %556, %553 : vector<32x16xf32>
    %558 = arith.select %555, %553, %557 : vector<32x16xi1>, vector<32x16xf32>
    %c0_366 = arith.constant 0 : index
    %c0_367 = arith.constant 0 : index
    %559 = vector.load %arg12[%c0_366, %c0_367] : memref<64x32xf32, #tpu.memory_space<vmem>>, vector<64x32xf32>
    %cst_368 = arith.constant dense<0.000000e+00> : vector<64x16xf32>
    %560 = tpu.matmul %559, %558, %cst_368 {dimension_numbers = #tpu.dot_dimension_numbers<[1], [0], [0], [1], [0, 0, 1, 1], [], []>} : vector<64x32xf32>, vector<32x16xf32>, vector<64x16xf32> -> vector<64x16xf32>
    %c0_369 = arith.constant 0 : index
    %c0_370 = arith.constant 0 : index
    %561 = vector.load %arg13[%c0_369, %c0_370] : memref<64x1xf32, #tpu.memory_space<vmem>>, vector<64x1xf32>
    %562 = vector.broadcast %561 : vector<64x1xf32> to vector<64x16xf32>
    %563 = arith.addf %560, %562 : vector<64x16xf32>
    %cst_371 = arith.constant 0.00999999977 : f32
    %cst_372 = arith.constant 0.000000e+00 : f32
    %564 = vector.broadcast %cst_372 : f32 to vector<64x16xf32>
    %565 = arith.cmpf oge, %563, %564 : vector<64x16xf32>
    %566 = vector.broadcast %cst_371 : f32 to vector<64x16xf32>
    %567 = arith.mulf %566, %563 : vector<64x16xf32>
    %568 = arith.select %565, %563, %567 : vector<64x16xi1>, vector<64x16xf32>
    %c0_373 = arith.constant 0 : index
    %c0_374 = arith.constant 0 : index
    %569 = vector.load %arg14[%c0_373, %c0_374] : memref<7x64xf32, #tpu.memory_space<vmem>>, vector<7x64xf32>
    %cst_375 = arith.constant dense<0.000000e+00> : vector<7x16xf32>
    %570 = tpu.matmul %569, %568, %cst_375 {dimension_numbers = #tpu.dot_dimension_numbers<[1], [0], [0], [1], [0, 0, 1, 1], [], []>} : vector<7x64xf32>, vector<64x16xf32>, vector<7x16xf32> -> vector<7x16xf32>
    %c0_376 = arith.constant 0 : index
    %c0_377 = arith.constant 0 : index
    %571 = vector.load %arg15[%c0_376, %c0_377] : memref<7x1xf32, #tpu.memory_space<vmem>>, vector<7x1xf32>
    %572 = vector.broadcast %571 : vector<7x1xf32> to vector<7x16xf32>
    %573 = arith.addf %570, %572 : vector<7x16xf32>
    %c0_378 = arith.constant 0 : index
    %c0_379 = arith.constant 0 : index
    %574 = vector.load %arg20[%c0_378, %c0_379] : memref<7x16xf32, #tpu.memory_space<vmem>>, vector<7x16xf32>
    tpu.vector_store %arg20[%c0_378, %c0_379], %573 {strides = array<i32>} : memref<7x16xf32, #tpu.memory_space<vmem>>, vector<7x16xf32>,
    return
  }
  func.func @transform_0(%arg0: i32) -> (i32, i32) {
    %c0_i32 = arith.constant 0 : i32
    %c0_i32_0 = arith.constant 0 : i32
    %c0_i32_1 = arith.constant 0 : i32
    return %c0_i32, %c0_i32_0 : i32, i32
  }
  func.func @transform_1(%arg0: i32) -> (i32, i32) {
    %c0_i32 = arith.constant 0 : i32
    %c0_i32_0 = arith.constant 0 : i32
    %c0_i32_1 = arith.constant 0 : i32
    return %c0_i32, %c0_i32_0 : i32, i32
  }
  func.func @transform_2(%arg0: i32) -> (i32, i32) {
    %c0_i32 = arith.constant 0 : i32
    %c0_i32_0 = arith.constant 0 : i32
    %c0_i32_1 = arith.constant 0 : i32
    return %c0_i32, %c0_i32_0 : i32, i32
  }
  func.func @transform_3(%arg0: i32) -> (i32, i32, i32) {
    %c0_i32 = arith.constant 0 : i32
    %c0_i32_0 = arith.constant 0 : i32
    %c0_i32_1 = arith.constant 0 : i32
    %c0_i32_2 = arith.constant 0 : i32
    return %c0_i32, %c0_i32_0, %c0_i32_1 : i32, i32, i32
  }
  func.func @transform_4(%arg0: i32) -> (i32, i32, i32) {
    %c0_i32 = arith.constant 0 : i32
    %c0_i32_0 = arith.constant 0 : i32
    %c0_i32_1 = arith.constant 0 : i32
    %c0_i32_2 = arith.constant 0 : i32
    return %c0_i32, %c0_i32_0, %c0_i32_1 : i32, i32, i32
  }
  func.func @transform_5(%arg0: i32) -> (i32, i32, i32) {
    %c0_i32 = arith.constant 0 : i32
    %c0_i32_0 = arith.constant 0 : i32
    %c0_i32_1 = arith.constant 0 : i32
    %c0_i32_2 = arith.constant 0 : i32
    return %c0_i32, %c0_i32_0, %c0_i32_1 : i32, i32, i32
  }
  func.func @transform_6(%arg0: i32) -> (i32, i32, i32) {
    %c0_i32 = arith.constant 0 : i32
    %c0_i32_0 = arith.constant 0 : i32
    %c0_i32_1 = arith.constant 0 : i32
    %c0_i32_2 = arith.constant 0 : i32
    return %c0_i32, %c0_i32_0, %c0_i32_1 : i32, i32, i32
  }
  func.func @transform_7(%arg0: i32) -> (i32, i32, i32) {
    %c0_i32 = arith.constant 0 : i32
    %c0_i32_0 = arith.constant 0 : i32
    %c0_i32_1 = arith.constant 0 : i32
    %c0_i32_2 = arith.constant 0 : i32
    return %c0_i32, %c0_i32_0, %c0_i32_1 : i32, i32, i32
  }
  func.func @transform_8(%arg0: i32) -> (i32, i32, i32) {
    %c0_i32 = arith.constant 0 : i32
    %c0_i32_0 = arith.constant 0 : i32
    %c0_i32_1 = arith.constant 0 : i32
    %c0_i32_2 = arith.constant 0 : i32
    return %c0_i32, %c0_i32_0, %c0_i32_1 : i32, i32, i32
  }
  func.func @transform_9(%arg0: i32) -> (i32, i32, i32) {
    %c0_i32 = arith.constant 0 : i32
    %c0_i32_0 = arith.constant 0 : i32
    %c0_i32_1 = arith.constant 0 : i32
    %c0_i32_2 = arith.constant 0 : i32
    return %c0_i32, %c0_i32_0, %c0_i32_1 : i32, i32, i32
  }
  func.func @transform_10(%arg0: i32) -> (i32, i32, i32) {
    %c0_i32 = arith.constant 0 : i32
    %c0_i32_0 = arith.constant 0 : i32
    %c0_i32_1 = arith.constant 0 : i32
    %c0_i32_2 = arith.constant 0 : i32
    return %c0_i32, %c0_i32_0, %c0_i32_1 : i32, i32, i32
  }
  func.func @transform_11(%arg0: i32) -> (i32, i32) {
    %c0_i32 = arith.constant 0 : i32
    %c0_i32_0 = arith.constant 0 : i32
    %c0_i32_1 = arith.constant 0 : i32
    return %c0_i32, %c0_i32_0 : i32, i32
  }
  func.func @transform_12(%arg0: i32) -> (i32, i32) {
    %c0_i32 = arith.constant 0 : i32
    %c0_i32_0 = arith.constant 0 : i32
    %c0_i32_1 = arith.constant 0 : i32
    return %c0_i32, %c0_i32_0 : i32, i32
  }
  func.func @transform_13(%arg0: i32) -> (i32, i32) {
    %c0_i32 = arith.constant 0 : i32
    %c0_i32_0 = arith.constant 0 : i32
    %c0_i32_1 = arith.constant 0 : i32
    return %c0_i32, %c0_i32_0 : i32, i32
  }
  func.func @transform_14(%arg0: i32) -> (i32, i32) {
    %c0_i32 = arith.constant 0 : i32
    %c0_i32_0 = arith.constant 0 : i32
    %c0_i32_1 = arith.constant 0 : i32
    return %c0_i32, %c0_i32_0 : i32, i32
  }
  func.func @transform_15(%arg0: i32) -> (i32, i32) {
    %c0_i32 = arith.constant 0 : i32
    %c0_i32_0 = arith.constant 0 : i32
    %c0_i32_1 = arith.constant 0 : i32
    return %c0_i32, %c0_i32_0 : i32, i32
  }
  func.func @transform_16(%arg0: i32) -> (i32, i32) {
    %c0_i32 = arith.constant 0 : i32
    %c0_i32_0 = arith.constant 0 : i32
    %c0_i32_1 = arith.constant 0 : i32
    return %c0_i32, %c0_i32_0 : i32, i32
  }
  func.func @transform_19(%arg0: i32) -> (i32, i32) {
    %c0_i32 = arith.constant 0 : i32
    %c0_i32_0 = arith.constant 0 : i32
    %c0_i32_1 = arith.constant 0 : i32
    return %c0_i32, %c0_i32_0 : i32, i32
  }
}

</mosaic_0001>

<bundles_post_ra>
// kernel: mynet_forward.1
= control target key start
LH: loop header
LB: loop body
LE: loop exit
PB: predicated region body
PF: predicated region fallthrough
CT: control target
= control target key end

     0   :  { %s15513_s0 = inlined_call_operand.vmem [shape: f32[4,144], index: 0, kind: input, shape index: {}]   ;;  %s15514_s1 = inlined_call_operand.vmem [shape: f32[16,4], index: 1, kind: input, shape index: {}]   ;;  %s15515_s2 = inlined_call_operand.vmem [shape: f32[16,1], index: 2, kind: input, shape index: {}]   ;;  %s15516_s3 = inlined_call_operand.vmem [shape: f32[4,32,16], index: 3, kind: input, shape index: {}]   ;;  %s15517_s4 = inlined_call_operand.vmem [shape: f32[2,32,1], index: 4, kind: input, shape index: {}]   ;;  %s15518_s5 = inlined_call_operand.vmem [shape: f32[4,16,112], index: 5, kind: input, shape index: {}]   ;;  %s15519_s6 = inlined_call_operand.vmem [shape: f32[2,16,1], index: 6, kind: input, shape index: {}]   ;;  %s15520_s7 = inlined_call_operand.vmem [shape: f32[4,16,176], index: 7, kind: input, shape index: {}]   ;;  %s15521_s8 = inlined_call_operand.vmem [shape: f32[2,16,1], index: 8, kind: input, shape index: {}]   ;;  %s15522_s9 = inlined_call_operand.vmem [shape: f32[2,32,16], index: 9, kind: input, shape index: {}]   ;;  %s15523_s10 = inlined_call_operand.vmem [shape: f32[2,32,1], index: 10, kind: input, shape index: {}]   ;;  %s15524_s11 = inlined_call_operand.vmem [shape: f32[64,32], index: 11, kind: input, shape index: {}]   ;;  %s15525_s12 = inlined_call_operand.vmem [shape: f32[64,1], index: 12, kind: input, shape index: {}]   ;;  %s15526_s13 = inlined_call_operand.vmem [shape: f32[7,64], index: 13, kind: input, shape index: {}]   ;;  %s15527_s14 = inlined_call_operand.vmem [shape: f32[7,1], index: 14, kind: input, shape index: {}]   ;;  %s15528_s15 = inlined_call_operand.vmem [shape: bf16[112,672], index: 15, kind: input, shape index: {}]   ;;  %s15529_s16 = inlined_call_operand.vmem [shape: bf16[48,288], index: 16, kind: input, shape index: {}]   ;;  %s15530_s17 = inlined_call_operand.vmem [shape: bf16[4,112,1120], index: 17, kind: input, shape index: {}]   ;;  %s15531_s18 = inlined_call_operand.vmem [shape: bf16[4,48,480], index: 18, kind: input, shape index: {}]   ;;  %s15532_s19 = inlined_call_operand.vmem [shape: f32[7,16], index: 19, kind: output, shape index: {}]  }
   0x1   :  { %15536 = sst [smem:[#allocation11_spill]] %s15513_s0  ;;  %v76_v0 = vld [vmem:[%s15530_s17] sm:$0xf]  ;;  %v78_v1 = vld [vmem:[%s15530_s17 + $0x24] sm:$0xf]  ;;  %v146_v34 = vld [vmem:[%s15530_s17 + $0x8c] sm:$0xff]  }
   0x2   :  { %15537 = sst [smem:[#allocation12_spill]] %s15514_s1  ;;  %v80_v2 = vld [vmem:[%s15530_s17 + $0x4] sm:$0xf]  ;;  %77 = vst [vmem:[#allocation4] sm:$0xf] %v76_v0  ;;  %147 = vst [vmem:[#allocation4 + $0x8c] sm:$0xff] %v146_v34  }
   0x3   :  { %15538 = sst [smem:[#allocation13_spill]] %s15515_s2  ;;  %79 = vst [vmem:[#allocation4 + $0x4] sm:$0xf] %v78_v1  ;;  %81 = vst [vmem:[#allocation4 + $0x8] sm:$0xf] %v80_v2  ;;  %v110_v17 = vld [vmem:[%s15530_s17 + $0x44] sm:$0xff]  }
   0x4   :  { %15539 = sst [smem:[#allocation14_spill]] %s15516_s3  ;;  %v82_v3 = vld [vmem:[%s15530_s17 + $0x28] sm:$0xf]  ;;  %v86_v5 = vld [vmem:[%s15530_s17 + $0x2c] sm:$0xf]  ;;  %111 = vst [vmem:[#allocation4 + $0x44] sm:$0xff] %v110_v17  }
   0x5   :  { %v84_v4 = vld [vmem:[%s15530_s17 + $0x8] sm:$0xf]  ;;  %83 = vst [vmem:[#allocation4 + $0xc] sm:$0xf] %v82_v3  ;;  %87 = vst [vmem:[#allocation4 + $0x14] sm:$0xf] %v86_v5 }
   0x6   :  { %85 = vst [vmem:[#allocation4 + $0x10] sm:$0xf] %v84_v4  ;;  %v88_v6 = vld [vmem:[%s15530_s17 + $0xc] sm:$0xf]  ;;  %v90_v7 = vld [vmem:[%s15530_s17 + $0x30] sm:$0xf] }
   0x7   :  { %v92_v8 = vld [vmem:[%s15530_s17 + $0x10] sm:$0xf]  ;;  %89 = vst [vmem:[#allocation4 + $0x18] sm:$0xf] %v88_v6  ;;  %91 = vst [vmem:[#allocation4 + $0x1c] sm:$0xf] %v90_v7 }
   0x8   :  { %93 = vst [vmem:[#allocation4 + $0x20] sm:$0xf] %v92_v8  ;;  %v94_v9 = vld [vmem:[%s15530_s17 + $0x34] sm:$0xf]  ;;  %v98_v11 = vld [vmem:[%s15530_s17 + $0x38] sm:$0xf] }
   0x9   :  { %v96_v10 = vld [vmem:[%s15530_s17 + $0x14] sm:$0xf]  ;;  %95 = vst [vmem:[#allocation4 + $0x24] sm:$0xf] %v94_v9  ;;  %99 = vst [vmem:[#allocation4 + $0x2c] sm:$0xf] %v98_v11 }
   0xa   :  { %97 = vst [vmem:[#allocation4 + $0x28] sm:$0xf] %v96_v10  ;;  %v100_v12 = vld [vmem:[%s15530_s17 + $0x18] sm:$0xf]  ;;  %v102_v13 = vld [vmem:[%s15530_s17 + $0x3c] sm:$0xf] }
   0xb   :  { %v104_v14 = vld [vmem:[%s15530_s17 + $0x1c] sm:$0xf]  ;;  %101 = vst [vmem:[#allocation4 + $0x30] sm:$0xf] %v100_v12  ;;  %103 = vst [vmem:[#allocation4 + $0x34] sm:$0xf] %v102_v13 }
   0xc   :  { %105 = vst [vmem:[#allocation4 + $0x38] sm:$0xf] %v104_v14  ;;  %v106_v15 = vld [vmem:[%s15530_s17 + $0x40] sm:$0xf]  ;;  %v114_v18 = vld [vmem:[%s15530_s17 + $0x6c] sm:$0xf] }
   0xd   :  { %v108_v16 = vld [vmem:[%s15530_s17 + $0x20] sm:$0xf]  ;;  %107 = vst [vmem:[#allocation4 + $0x3c] sm:$0xf] %v106_v15  ;;  %v116_v19 = vld [vmem:[%s15530_s17 + $0x4c] sm:$0xf] }
   0xe   :  { %109 = vst [vmem:[#allocation4 + $0x40] sm:$0xf] %v108_v16  ;;  %v118_v20 = vld [vmem:[%s15530_s17 + $0x70] sm:$0xf]  ;;  %115 = vst [vmem:[#allocation4 + $0x4c] sm:$0xf] %v114_v18 }
   0xf   :  { %117 = vst [vmem:[#allocation4 + $0x50] sm:$0xf] %v116_v19  ;;  %119 = vst [vmem:[#allocation4 + $0x54] sm:$0xf] %v118_v20  ;;  %v120_v21 = vld [vmem:[%s15530_s17 + $0x50] sm:$0xf] }
  0x10   :  { %v122_v22 = vld [vmem:[%s15530_s17 + $0x74] sm:$0xf]  ;;  %121 = vst [vmem:[#allocation4 + $0x58] sm:$0xf] %v120_v21  ;;  %v126_v24 = vld [vmem:[%s15530_s17 + $0x78] sm:$0xf] }
  0x11   :  { %v124_v23 = vld [vmem:[%s15530_s17 + $0x54] sm:$0xf]  ;;  %123 = vst [vmem:[#allocation4 + $0x5c] sm:$0xf] %v122_v22  ;;  %v128_v25 = vld [vmem:[%s15530_s17 + $0x58] sm:$0xf] }
  0x12   :  { %125 = vst [vmem:[#allocation4 + $0x60] sm:$0xf] %v124_v23  ;;  %v130_v26 = vld [vmem:[%s15530_s17 + $0x7c] sm:$0xf]  ;;  %127 = vst [vmem:[#allocation4 + $0x64] sm:$0xf] %v126_v24 }
  0x13   :  { %129 = vst [vmem:[#allocation4 + $0x68] sm:$0xf] %v128_v25  ;;  %131 = vst [vmem:[#allocation4 + $0x6c] sm:$0xf] %v130_v26  ;;  %v132_v27 = vld [vmem:[%s15530_s17 + $0x5c] sm:$0xf] }
  0x14   :  { %v134_v28 = vld [vmem:[%s15530_s17 + $0x80] sm:$0xf]  ;;  %133 = vst [vmem:[#allocation4 + $0x70] sm:$0xf] %v132_v27  ;;  %v138_v30 = vld [vmem:[%s15530_s17 + $0x84] sm:$0xf] }
  0x15   :  { %v136_v29 = vld [vmem:[%s15530_s17 + $0x60] sm:$0xf]  ;;  %135 = vst [vmem:[#allocation4 + $0x74] sm:$0xf] %v134_v28  ;;  %v140_v31 = vld [vmem:[%s15530_s17 + $0x64] sm:$0xf] }
  0x16   :  { %137 = vst [vmem:[#allocation4 + $0x78] sm:$0xf] %v136_v29  ;;  %v142_v32 = vld [vmem:[%s15530_s17 + $0x88] sm:$0xf]  ;;  %139 = vst [vmem:[#allocation4 + $0x7c] sm:$0xf] %v138_v30 }
  0x17   :  { %141 = vst [vmem:[#allocation4 + $0x80] sm:$0xf] %v140_v31  ;;  %143 = vst [vmem:[#allocation4 + $0x84] sm:$0xf] %v142_v32  ;;  %v144_v33 = vld [vmem:[%s15530_s17 + $0x68] sm:$0xf] }
  0x18   :  { %v150_v35 = vld [vmem:[%s15530_s17 + $0xb4] sm:$0xf]  ;;  %145 = vst [vmem:[#allocation4 + $0x88] sm:$0xf] %v144_v33  ;;  %v154_v37 = vld [vmem:[%s15530_s17 + $0xb8] sm:$0xf] }
  0x19   :  { %151 = vst [vmem:[#allocation4 + $0x94] sm:$0xf] %v150_v35  ;;  %v152_v36 = vld [vmem:[%s15530_s17 + $0x94] sm:$0xf]  ;;  %v156_v38 = vld [vmem:[%s15530_s17 + $0x98] sm:$0xf] }
  0x1a   :  { %153 = vst [vmem:[#allocation4 + $0x98] sm:$0xf] %v152_v36  ;;  %155 = vst [vmem:[#allocation4 + $0x9c] sm:$0xf] %v154_v37  ;;  %v158_v39 = vld [vmem:[%s15530_s17 + $0xbc] sm:$0xf] }
  0x1b   :  { %157 = vst [vmem:[#allocation4 + $0xa0] sm:$0xf] %v156_v38  ;;  %v160_v40 = vld [vmem:[%s15530_s17 + $0x9c] sm:$0xf]  ;;  %v162_v41 = vld [vmem:[%s15530_s17 + $0xc0] sm:$0xf] }
  0x1c   :  { %159 = vst [vmem:[#allocation4 + $0xa4] sm:$0xf] %v158_v39  ;;  %161 = vst [vmem:[#allocation4 + $0xa8] sm:$0xf] %v160_v40  ;;  %v164_v42 = vld [vmem:[%s15530_s17 + $0xa0] sm:$0xf] }
  0x1d   :  { %163 = vst [vmem:[#allocation4 + $0xac] sm:$0xf] %v162_v41  ;;  %v166_v43 = vld [vmem:[%s15530_s17 + $0xc4] sm:$0xf]  ;;  %165 = vst [vmem:[#allocation4 + $0xb0] sm:$0xf] %v164_v42 }
  0x1e   :  { %v168_v44 = vld [vmem:[%s15530_s17 + $0xa4] sm:$0xf]  ;;  %167 = vst [vmem:[#allocation4 + $0xb4] sm:$0xf] %v166_v43  ;;  %v170_v45 = vld [vmem:[%s15530_s17 + $0xc8] sm:$0xf] }
  0x1f   :  { %169 = vst [vmem:[#allocation4 + $0xb8] sm:$0xf] %v168_v44  ;;  %v172_v46 = vld [vmem:[%s15530_s17 + $0xa8] sm:$0xf]  ;;  %v174_v47 = vld [vmem:[%s15530_s17 + $0xcc] sm:$0xf] }
  0x20   :  { %171 = vst [vmem:[#allocation4 + $0xbc] sm:$0xf] %v170_v45  ;;  %173 = vst [vmem:[#allocation4 + $0xc0] sm:$0xf] %v172_v46  ;;  %v176_v48 = vld [vmem:[%s15530_s17 + $0xac] sm:$0xf] }
  0x21   :  { %175 = vst [vmem:[#allocation4 + $0xc4] sm:$0xf] %v174_v47  ;;  %v178_v49 = vld [vmem:[%s15530_s17 + $0xd0] sm:$0xf]  ;;  %177 = vst [vmem:[#allocation4 + $0xc8] sm:$0xf] %v176_v48 }
  0x22   :  { %v180_v50 = vld [vmem:[%s15530_s17 + $0xb0] sm:$0xf]  ;;  %179 = vst [vmem:[#allocation4 + $0xcc] sm:$0xf] %v178_v49  ;;  %v182_v51 = vld [vmem:[%s15530_s17 + $0xd4] sm:$0xff]   ;;  %v218_v4 = vld [vmem:[%s15530_s17 + $0x11c] sm:$0xff]  }
  0x23   :  { %181 = vst [vmem:[#allocation4 + $0xd0] sm:$0xf] %v180_v50  ;;  %v186_v52 = vld [vmem:[%s15530_s17 + $0xfc] sm:$0xf]  ;;  %183 = vst [vmem:[#allocation4 + $0xd4] sm:$0xff] %v182_v51   ;;  %v254_v21 = vld [vmem:[%s15530_s17 + $0x164] sm:$0xff]  }
  0x24   :  { %v188_v53 = vld [vmem:[%s15530_s17 + $0xdc] sm:$0xf]  ;;  %187 = vst [vmem:[#allocation4 + $0xdc] sm:$0xf] %v186_v52  ;;  %v190_v54 = vld [vmem:[%s15530_s17 + $0x100] sm:$0xf] }
  0x25   :  { %189 = vst [vmem:[#allocation4 + $0xe0] sm:$0xf] %v188_v53  ;;  %v192_v55 = vld [vmem:[%s15530_s17 + $0xe0] sm:$0xf]  ;;  %v194_v56 = vld [vmem:[%s15530_s17 + $0x104] sm:$0xf] }
  0x26   :  { %191 = vst [vmem:[#allocation4 + $0xe4] sm:$0xf] %v190_v54  ;;  %193 = vst [vmem:[#allocation4 + $0xe8] sm:$0xf] %v192_v55  ;;  %v196_v57 = vld [vmem:[%s15530_s17 + $0xe4] sm:$0xf] }
  0x27   :  { %195 = vst [vmem:[#allocation4 + $0xec] sm:$0xf] %v194_v56  ;;  %v198_v58 = vld [vmem:[%s15530_s17 + $0x108] sm:$0xf]  ;;  %197 = vst [vmem:[#allocation4 + $0xf0] sm:$0xf] %v196_v57 }
  0x28   :  { %v200_v59 = vld [vmem:[%s15530_s17 + $0xe8] sm:$0xf]  ;;  %199 = vst [vmem:[#allocation4 + $0xf4] sm:$0xf] %v198_v58  ;;  %v202_v60 = vld [vmem:[%s15530_s17 + $0x10c] sm:$0xf] }
  0x29   :  { %201 = vst [vmem:[#allocation4 + $0xf8] sm:$0xf] %v200_v59  ;;  %v204_v61 = vld [vmem:[%s15530_s17 + $0xec] sm:$0xf]  ;;  %v206_v62 = vld [vmem:[%s15530_s17 + $0x110] sm:$0xf] }
  0x2a   :  { %203 = vst [vmem:[#allocation4 + $0xfc] sm:$0xf] %v202_v60  ;;  %205 = vst [vmem:[#allocation4 + $0x100] sm:$0xf] %v204_v61  ;;  %v208_v63 = vld [vmem:[%s15530_s17 + $0xf0] sm:$0xf] }
  0x2b   :  { %207 = vst [vmem:[#allocation4 + $0x104] sm:$0xf] %v206_v62  ;;  %v210_v0 = vld [vmem:[%s15530_s17 + $0x114] sm:$0xf]  ;;  %209 = vst [vmem:[#allocation4 + $0x108] sm:$0xf] %v208_v63 }
  0x2c   :  { %v212_v1 = vld [vmem:[%s15530_s17 + $0xf4] sm:$0xf]  ;;  %211 = vst [vmem:[#allocation4 + $0x10c] sm:$0xf] %v210_v0  ;;  %v214_v2 = vld [vmem:[%s15530_s17 + $0x118] sm:$0xf] }
  0x2d   :  { %213 = vst [vmem:[#allocation4 + $0x110] sm:$0xf] %v212_v1  ;;  %v216_v3 = vld [vmem:[%s15530_s17 + $0xf8] sm:$0xf]  ;;  %215 = vst [vmem:[#allocation4 + $0x114] sm:$0xf] %v214_v2 }
  0x2e   :  { %217 = vst [vmem:[#allocation4 + $0x118] sm:$0xf] %v216_v3  ;;  %219 = vst [vmem:[#allocation4 + $0x11c] sm:$0xff] %v218_v4   ;;  %v222_v5 = vld [vmem:[%s15530_s17 + $0x144] sm:$0xf]  ;;  %v290_v38 = vld [vmem:[%s15530_s17 + $0x1ac] sm:$0xff]  }
  0x2f   :  { %v224_v6 = vld [vmem:[%s15530_s17 + $0x124] sm:$0xf]  ;;  %v226_v7 = vld [vmem:[%s15530_s17 + $0x148] sm:$0xf]  ;;  %223 = vst [vmem:[#allocation4 + $0x124] sm:$0xf] %v222_v5 }
  0x30   :  { %225 = vst [vmem:[#allocation4 + $0x128] sm:$0xf] %v224_v6  ;;  %227 = vst [vmem:[#allocation4 + $0x12c] sm:$0xf] %v226_v7  ;;  %v228_v8 = vld [vmem:[%s15530_s17 + $0x128] sm:$0xf] }
  0x31   :  { %v230_v9 = vld [vmem:[%s15530_s17 + $0x14c] sm:$0xf]  ;;  %229 = vst [vmem:[#allocation4 + $0x130] sm:$0xf] %v228_v8  ;;  %v234_v11 = vld [vmem:[%s15530_s17 + $0x150] sm:$0xf] }
  0x32   :  { %v232_v10 = vld [vmem:[%s15530_s17 + $0x12c] sm:$0xf]  ;;  %231 = vst [vmem:[#allocation4 + $0x134] sm:$0xf] %v230_v9  ;;  %v236_v12 = vld [vmem:[%s15530_s17 + $0x130] sm:$0xf] }
  0x33   :  { %233 = vst [vmem:[#allocation4 + $0x138] sm:$0xf] %v232_v10  ;;  %v238_v13 = vld [vmem:[%s15530_s17 + $0x154] sm:$0xf]  ;;  %235 = vst [vmem:[#allocation4 + $0x13c] sm:$0xf] %v234_v11 }
  0x34   :  { %237 = vst [vmem:[#allocation4 + $0x140] sm:$0xf] %v236_v12  ;;  %239 = vst [vmem:[#allocation4 + $0x144] sm:$0xf] %v238_v13  ;;  %v240_v14 = vld [vmem:[%s15530_s17 + $0x134] sm:$0xf] }
  0x35   :  { %v242_v15 = vld [vmem:[%s15530_s17 + $0x158] sm:$0xf]  ;;  %241 = vst [vmem:[#allocation4 + $0x148] sm:$0xf] %v240_v14  ;;  %v246_v17 = vld [vmem:[%s15530_s17 + $0x15c] sm:$0xf] }
  0x36   :  { %v244_v16 = vld [vmem:[%s15530_s17 + $0x138] sm:$0xf]  ;;  %243 = vst [vmem:[#allocation4 + $0x14c] sm:$0xf] %v242_v15  ;;  %v248_v18 = vld [vmem:[%s15530_s17 + $0x13c] sm:$0xf] }
  0x37   :  { %245 = vst [vmem:[#allocation4 + $0x150] sm:$0xf] %v244_v16  ;;  %v250_v19 = vld [vmem:[%s15530_s17 + $0x160] sm:$0xf]  ;;  %247 = vst [vmem:[#allocation4 + $0x154] sm:$0xf] %v246_v17 }
  0x38   :  { %249 = vst [vmem:[#allocation4 + $0x158] sm:$0xf] %v248_v18  ;;  %251 = vst [vmem:[#allocation4 + $0x15c] sm:$0xf] %v250_v19  ;;  %v252_v20 = vld [vmem:[%s15530_s17 + $0x140] sm:$0xf] }
  0x39   :  { %v258_v22 = vld [vmem:[%s15530_s17 + $0x18c] sm:$0xf]  ;;  %253 = vst [vmem:[#allocation4 + $0x160] sm:$0xf] %v252_v20  ;;  %255 = vst [vmem:[#allocation4 + $0x164] sm:$0xff] %v254_v21   ;;  %v326_v55 = vld [vmem:[%s15530_s17 + $0x1f4] sm:$0xff]  }
  0x3a   :  { %259 = vst [vmem:[#allocation4 + $0x16c] sm:$0xf] %v258_v22  ;;  %v260_v23 = vld [vmem:[%s15530_s17 + $0x16c] sm:$0xf]  ;;  %v262_v24 = vld [vmem:[%s15530_s17 + $0x190] sm:$0xf] }
  0x3b   :  { %v264_v25 = vld [vmem:[%s15530_s17 + $0x170] sm:$0xf]  ;;  %261 = vst [vmem:[#allocation4 + $0x170] sm:$0xf] %v260_v23  ;;  %263 = vst [vmem:[#allocation4 + $0x174] sm:$0xf] %v262_v24 }
  0x3c   :  { %265 = vst [vmem:[#allocation4 + $0x178] sm:$0xf] %v264_v25  ;;  %v266_v26 = vld [vmem:[%s15530_s17 + $0x194] sm:$0xf]  ;;  %v270_v28 = vld [vmem:[%s15530_s17 + $0x198] sm:$0xf] }
  0x3d   :  { %v268_v27 = vld [vmem:[%s15530_s17 + $0x174] sm:$0xf]  ;;  %267 = vst [vmem:[#allocation4 + $0x17c] sm:$0xf] %v266_v26  ;;  %271 = vst [vmem:[#allocation4 + $0x184] sm:$0xf] %v270_v28 }
  0x3e   :  { %269 = vst [vmem:[#allocation4 + $0x180] sm:$0xf] %v268_v27  ;;  %v272_v29 = vld [vmem:[%s15530_s17 + $0x178] sm:$0xf]  ;;  %v274_v30 = vld [vmem:[%s15530_s17 + $0x19c] sm:$0xf] }
  0x3f   :  { %v276_v31 = vld [vmem:[%s15530_s17 + $0x17c] sm:$0xf]  ;;  %273 = vst [vmem:[#allocation4 + $0x188] sm:$0xf] %v272_v29  ;;  %275 = vst [vmem:[#allocation4 + $0x18c] sm:$0xf] %v274_v30 }
  0x40   :  { %277 = vst [vmem:[#allocation4 + $0x190] sm:$0xf] %v276_v31  ;;  %v278_v32 = vld [vmem:[%s15530_s17 + $0x1a0] sm:$0xf]  ;;  %v282_v34 = vld [vmem:[%s15530_s17 + $0x1a4] sm:$0xf] }
  0x41   :  { %v280_v33 = vld [vmem:[%s15530_s17 + $0x180] sm:$0xf]  ;;  %279 = vst [vmem:[#allocation4 + $0x194] sm:$0xf] %v278_v32  ;;  %283 = vst [vmem:[#allocation4 + $0x19c] sm:$0xf] %v282_v34 }
  0x42   :  { %281 = vst [vmem:[#allocation4 + $0x198] sm:$0xf] %v280_v33  ;;  %v284_v35 = vld [vmem:[%s15530_s17 + $0x184] sm:$0xf]  ;;  %v286_v36 = vld [vmem:[%s15530_s17 + $0x1a8] sm:$0xf] }
  0x43   :  { %v288_v37 = vld [vmem:[%s15530_s17 + $0x188] sm:$0xf]  ;;  %285 = vst [vmem:[#allocation4 + $0x1a0] sm:$0xf] %v284_v35  ;;  %287 = vst [vmem:[#allocation4 + $0x1a4] sm:$0xf] %v286_v36 }
  0x44   :  { %289 = vst [vmem:[#allocation4 + $0x1a8] sm:$0xf] %v288_v37  ;;  %v294_v39 = vld [vmem:[%s15530_s17 + $0x1d4] sm:$0xf]  ;;  %291 = vst [vmem:[#allocation4 + $0x1ac] sm:$0xff] %v290_v38   ;;  %v362_v8 = vld [vmem:[%s15530_s17 + $0x23c] sm:$0xff]  }
  0x45   :  { %v296_v40 = vld [vmem:[%s15530_s17 + $0x1b4] sm:$0xf]  ;;  %295 = vst [vmem:[#allocation4 + $0x1b4] sm:$0xf] %v294_v39  ;;  %v298_v41 = vld [vmem:[%s15530_s17 + $0x1d8] sm:$0xf] }
  0x46   :  { %297 = vst [vmem:[#allocation4 + $0x1b8] sm:$0xf] %v296_v40  ;;  %v300_v42 = vld [vmem:[%s15530_s17 + $0x1b8] sm:$0xf]  ;;  %v302_v43 = vld [vmem:[%s15530_s17 + $0x1dc] sm:$0xf] }
  0x47   :  { %299 = vst [vmem:[#allocation4 + $0x1bc] sm:$0xf] %v298_v41  ;;  %301 = vst [vmem:[#allocation4 + $0x1c0] sm:$0xf] %v300_v42  ;;  %v304_v44 = vld [vmem:[%s15530_s17 + $0x1bc] sm:$0xf] }
  0x48   :  { %303 = vst [vmem:[#allocation4 + $0x1c4] sm:$0xf] %v302_v43  ;;  %v306_v45 = vld [vmem:[%s15530_s17 + $0x1e0] sm:$0xf]  ;;  %305 = vst [vmem:[#allocation4 + $0x1c8] sm:$0xf] %v304_v44 }
  0x49   :  { %v308_v46 = vld [vmem:[%s15530_s17 + $0x1c0] sm:$0xf]  ;;  %307 = vst [vmem:[#allocation4 + $0x1cc] sm:$0xf] %v306_v45  ;;  %v310_v47 = vld [vmem:[%s15530_s17 + $0x1e4] sm:$0xf] }
  0x4a   :  { %309 = vst [vmem:[#allocation4 + $0x1d0] sm:$0xf] %v308_v46  ;;  %v312_v48 = vld [vmem:[%s15530_s17 + $0x1c4] sm:$0xf]  ;;  %v314_v49 = vld [vmem:[%s15530_s17 + $0x1e8] sm:$0xf] }
  0x4b   :  { %311 = vst [vmem:[#allocation4 + $0x1d4] sm:$0xf] %v310_v47  ;;  %313 = vst [vmem:[#allocation4 + $0x1d8] sm:$0xf] %v312_v48  ;;  %v316_v50 = vld [vmem:[%s15530_s17 + $0x1c8] sm:$0xf] }
  0x4c   :  { %315 = vst [vmem:[#allocation4 + $0x1dc] sm:$0xf] %v314_v49  ;;  %v318_v51 = vld [vmem:[%s15530_s17 + $0x1ec] sm:$0xf]  ;;  %317 = vst [vmem:[#allocation4 + $0x1e0] sm:$0xf] %v316_v50 }
  0x4d   :  { %v320_v52 = vld [vmem:[%s15530_s17 + $0x1cc] sm:$0xf]  ;;  %319 = vst [vmem:[#allocation4 + $0x1e4] sm:$0xf] %v318_v51  ;;  %v322_v53 = vld [vmem:[%s15530_s17 + $0x1f0] sm:$0xf] }
  0x4e   :  { %321 = vst [vmem:[#allocation4 + $0x1e8] sm:$0xf] %v320_v52  ;;  %v324_v54 = vld [vmem:[%s15530_s17 + $0x1d0] sm:$0xf]  ;;  %323 = vst [vmem:[#allocation4 + $0x1ec] sm:$0xf] %v322_v53 }
  0x4f   :  { %325 = vst [vmem:[#allocation4 + $0x1f0] sm:$0xf] %v324_v54  ;;  %327 = vst [vmem:[#allocation4 + $0x1f4] sm:$0xff] %v326_v55   ;;  %v330_v56 = vld [vmem:[%s15530_s17 + $0x21c] sm:$0xf]  ;;  %v398_v25 = vld [vmem:[%s15530_s17 + $0x284] sm:$0xff]  }
  0x50   :  { %v332_v57 = vld [vmem:[%s15530_s17 + $0x1fc] sm:$0xf]  ;;  %v334_v58 = vld [vmem:[%s15530_s17 + $0x220] sm:$0xf]  ;;  %331 = vst [vmem:[#allocation4 + $0x1fc] sm:$0xf] %v330_v56 }
  0x51   :  { %333 = vst [vmem:[#allocation4 + $0x200] sm:$0xf] %v332_v57  ;;  %335 = vst [vmem:[#allocation4 + $0x204] sm:$0xf] %v334_v58  ;;  %v336_v59 = vld [vmem:[%s15530_s17 + $0x200] sm:$0xf] }
  0x52   :  { %v338_v60 = vld [vmem:[%s15530_s17 + $0x224] sm:$0xf]  ;;  %337 = vst [vmem:[#allocation4 + $0x208] sm:$0xf] %v336_v59  ;;  %v342_v62 = vld [vmem:[%s15530_s17 + $0x228] sm:$0xf] }
  0x53   :  { %v340_v61 = vld [vmem:[%s15530_s17 + $0x204] sm:$0xf]  ;;  %339 = vst [vmem:[#allocation4 + $0x20c] sm:$0xf] %v338_v60  ;;  %v344_v63 = vld [vmem:[%s15530_s17 + $0x208] sm:$0xf] }
  0x54   :  { %341 = vst [vmem:[#allocation4 + $0x210] sm:$0xf] %v340_v61  ;;  %v346_v0 = vld [vmem:[%s15530_s17 + $0x22c] sm:$0xf]  ;;  %343 = vst [vmem:[#allocation4 + $0x214] sm:$0xf] %v342_v62 }
  0x55   :  { %345 = vst [vmem:[#allocation4 + $0x218] sm:$0xf] %v344_v63  ;;  %347 = vst [vmem:[#allocation4 + $0x21c] sm:$0xf] %v346_v0  ;;  %v348_v1 = vld [vmem:[%s15530_s17 + $0x20c] sm:$0xf] }
  0x56   :  { %v350_v2 = vld [vmem:[%s15530_s17 + $0x230] sm:$0xf]  ;;  %349 = vst [vmem:[#allocation4 + $0x220] sm:$0xf] %v348_v1  ;;  %v354_v4 = vld [vmem:[%s15530_s17 + $0x234] sm:$0xf] }
  0x57   :  { %v352_v3 = vld [vmem:[%s15530_s17 + $0x210] sm:$0xf]  ;;  %351 = vst [vmem:[#allocation4 + $0x224] sm:$0xf] %v350_v2  ;;  %v356_v5 = vld [vmem:[%s15530_s17 + $0x214] sm:$0xf] }
  0x58   :  { %353 = vst [vmem:[#allocation4 + $0x228] sm:$0xf] %v352_v3  ;;  %v358_v6 = vld [vmem:[%s15530_s17 + $0x238] sm:$0xf]  ;;  %355 = vst [vmem:[#allocation4 + $0x22c] sm:$0xf] %v354_v4 }
  0x59   :  { %357 = vst [vmem:[#allocation4 + $0x230] sm:$0xf] %v356_v5  ;;  %359 = vst [vmem:[#allocation4 + $0x234] sm:$0xf] %v358_v6  ;;  %v360_v7 = vld [vmem:[%s15530_s17 + $0x218] sm:$0xf] }
  0x5a   :  { %v366_v9 = vld [vmem:[%s15530_s17 + $0x264] sm:$0xf]  ;;  %361 = vst [vmem:[#allocation4 + $0x238] sm:$0xf] %v360_v7  ;;  %363 = vst [vmem:[#allocation4 + $0x23c] sm:$0xff] %v362_v8   ;;  %v434_v42 = vld [vmem:[%s15530_s17 + $0x2cc] sm:$0xff]  }
  0x5b   :  { %367 = vst [vmem:[#allocation4 + $0x244] sm:$0xf] %v366_v9  ;;  %v368_v10 = vld [vmem:[%s15530_s17 + $0x244] sm:$0xf]  ;;  %v370_v11 = vld [vmem:[%s15530_s17 + $0x268] sm:$0xf] }
  0x5c   :  { %v372_v12 = vld [vmem:[%s15530_s17 + $0x248] sm:$0xf]  ;;  %369 = vst [vmem:[#allocation4 + $0x248] sm:$0xf] %v368_v10  ;;  %371 = vst [vmem:[#allocation4 + $0x24c] sm:$0xf] %v370_v11 }
  0x5d   :  { %373 = vst [vmem:[#allocation4 + $0x250] sm:$0xf] %v372_v12  ;;  %v374_v13 = vld [vmem:[%s15530_s17 + $0x26c] sm:$0xf]  ;;  %v378_v15 = vld [vmem:[%s15530_s17 + $0x270] sm:$0xf] }
  0x5e   :  { %v376_v14 = vld [vmem:[%s15530_s17 + $0x24c] sm:$0xf]  ;;  %375 = vst [vmem:[#allocation4 + $0x254] sm:$0xf] %v374_v13  ;;  %379 = vst [vmem:[#allocation4 + $0x25c] sm:$0xf] %v378_v15 }
  0x5f   :  { %377 = vst [vmem:[#allocation4 + $0x258] sm:$0xf] %v376_v14  ;;  %v380_v16 = vld [vmem:[%s15530_s17 + $0x250] sm:$0xf]  ;;  %v382_v17 = vld [vmem:[%s15530_s17 + $0x274] sm:$0xf] }
  0x60   :  { %v384_v18 = vld [vmem:[%s15530_s17 + $0x254] sm:$0xf]  ;;  %381 = vst [vmem:[#allocation4 + $0x260] sm:$0xf] %v380_v16  ;;  %383 = vst [vmem:[#allocation4 + $0x264] sm:$0xf] %v382_v17 }
  0x61   :  { %385 = vst [vmem:[#allocation4 + $0x268] sm:$0xf] %v384_v18  ;;  %v386_v19 = vld [vmem:[%s15530_s17 + $0x278] sm:$0xf]  ;;  %v390_v21 = vld [vmem:[%s15530_s17 + $0x27c] sm:$0xf] }
  0x62   :  { %v388_v20 = vld [vmem:[%s15530_s17 + $0x258] sm:$0xf]  ;;  %387 = vst [vmem:[#allocation4 + $0x26c] sm:$0xf] %v386_v19  ;;  %391 = vst [vmem:[#allocation4 + $0x274] sm:$0xf] %v390_v21 }
  0x63   :  { %389 = vst [vmem:[#allocation4 + $0x270] sm:$0xf] %v388_v20  ;;  %v392_v22 = vld [vmem:[%s15530_s17 + $0x25c] sm:$0xf]  ;;  %v394_v23 = vld [vmem:[%s15530_s17 + $0x280] sm:$0xf] }
  0x64   :  { %v396_v24 = vld [vmem:[%s15530_s17 + $0x260] sm:$0xf]  ;;  %393 = vst [vmem:[#allocation4 + $0x278] sm:$0xf] %v392_v22  ;;  %395 = vst [vmem:[#allocation4 + $0x27c] sm:$0xf] %v394_v23 }
  0x65   :  { %397 = vst [vmem:[#allocation4 + $0x280] sm:$0xf] %v396_v24  ;;  %v402_v26 = vld [vmem:[%s15530_s17 + $0x2ac] sm:$0xf]  ;;  %399 = vst [vmem:[#allocation4 + $0x284] sm:$0xff] %v398_v25   ;;  %v470_v59 = vld [vmem:[%s15530_s17 + $0x314] sm:$0xff]  }
  0x66   :  { %v404_v27 = vld [vmem:[%s15530_s17 + $0x28c] sm:$0xf]  ;;  %403 = vst [vmem:[#allocation4 + $0x28c] sm:$0xf] %v402_v26  ;;  %v406_v28 = vld [vmem:[%s15530_s17 + $0x2b0] sm:$0xf] }
  0x67   :  { %405 = vst [vmem:[#allocation4 + $0x290] sm:$0xf] %v404_v27  ;;  %v408_v29 = vld [vmem:[%s15530_s17 + $0x290] sm:$0xf]  ;;  %v410_v30 = vld [vmem:[%s15530_s17 + $0x2b4] sm:$0xf] }
  0x68   :  { %407 = vst [vmem:[#allocation4 + $0x294] sm:$0xf] %v406_v28  ;;  %409 = vst [vmem:[#allocation4 + $0x298] sm:$0xf] %v408_v29  ;;  %v412_v31 = vld [vmem:[%s15530_s17 + $0x294] sm:$0xf] }
  0x69   :  { %411 = vst [vmem:[#allocation4 + $0x29c] sm:$0xf] %v410_v30  ;;  %v414_v32 = vld [vmem:[%s15530_s17 + $0x2b8] sm:$0xf]  ;;  %413 = vst [vmem:[#allocation4 + $0x2a0] sm:$0xf] %v412_v31 }
  0x6a   :  { %v416_v33 = vld [vmem:[%s15530_s17 + $0x298] sm:$0xf]  ;;  %415 = vst [vmem:[#allocation4 + $0x2a4] sm:$0xf] %v414_v32  ;;  %v418_v34 = vld [vmem:[%s15530_s17 + $0x2bc] sm:$0xf] }
  0x6b   :  { %417 = vst [vmem:[#allocation4 + $0x2a8] sm:$0xf] %v416_v33  ;;  %v420_v35 = vld [vmem:[%s15530_s17 + $0x29c] sm:$0xf]  ;;  %v422_v36 = vld [vmem:[%s15530_s17 + $0x2c0] sm:$0xf] }
  0x6c   :  { %419 = vst [vmem:[#allocation4 + $0x2ac] sm:$0xf] %v418_v34  ;;  %421 = vst [vmem:[#allocation4 + $0x2b0] sm:$0xf] %v420_v35  ;;  %v424_v37 = vld [vmem:[%s15530_s17 + $0x2a0] sm:$0xf] }
  0x6d   :  { %423 = vst [vmem:[#allocation4 + $0x2b4] sm:$0xf] %v422_v36  ;;  %v426_v38 = vld [vmem:[%s15530_s17 + $0x2c4] sm:$0xf]  ;;  %425 = vst [vmem:[#allocation4 + $0x2b8] sm:$0xf] %v424_v37 }
  0x6e   :  { %v428_v39 = vld [vmem:[%s15530_s17 + $0x2a4] sm:$0xf]  ;;  %427 = vst [vmem:[#allocation4 + $0x2bc] sm:$0xf] %v426_v38  ;;  %v430_v40 = vld [vmem:[%s15530_s17 + $0x2c8] sm:$0xf] }
  0x6f   :  { %429 = vst [vmem:[#allocation4 + $0x2c0] sm:$0xf] %v428_v39  ;;  %v432_v41 = vld [vmem:[%s15530_s17 + $0x2a8] sm:$0xf]  ;;  %431 = vst [vmem:[#allocation4 + $0x2c4] sm:$0xf] %v430_v40 }
  0x70   :  { %433 = vst [vmem:[#allocation4 + $0x2c8] sm:$0xf] %v432_v41  ;;  %435 = vst [vmem:[#allocation4 + $0x2cc] sm:$0xff] %v434_v42   ;;  %v438_v43 = vld [vmem:[%s15530_s17 + $0x2f4] sm:$0xf]  ;;  %v506_v12 = vld [vmem:[%s15530_s17 + $0x35c] sm:$0xff]  }
  0x71   :  { %v440_v44 = vld [vmem:[%s15530_s17 + $0x2d4] sm:$0xf]  ;;  %v442_v45 = vld [vmem:[%s15530_s17 + $0x2f8] sm:$0xf]  ;;  %439 = vst [vmem:[#allocation4 + $0x2d4] sm:$0xf] %v438_v43 }
  0x72   :  { %441 = vst [vmem:[#allocation4 + $0x2d8] sm:$0xf] %v440_v44  ;;  %443 = vst [vmem:[#allocation4 + $0x2dc] sm:$0xf] %v442_v45  ;;  %v444_v46 = vld [vmem:[%s15530_s17 + $0x2d8] sm:$0xf] }
  0x73   :  { %v446_v47 = vld [vmem:[%s15530_s17 + $0x2fc] sm:$0xf]  ;;  %445 = vst [vmem:[#allocation4 + $0x2e0] sm:$0xf] %v444_v46  ;;  %v450_v49 = vld [vmem:[%s15530_s17 + $0x300] sm:$0xf] }
  0x74   :  { %v448_v48 = vld [vmem:[%s15530_s17 + $0x2dc] sm:$0xf]  ;;  %447 = vst [vmem:[#allocation4 + $0x2e4] sm:$0xf] %v446_v47  ;;  %v452_v50 = vld [vmem:[%s15530_s17 + $0x2e0] sm:$0xf] }
  0x75   :  { %449 = vst [vmem:[#allocation4 + $0x2e8] sm:$0xf] %v448_v48  ;;  %v454_v51 = vld [vmem:[%s15530_s17 + $0x304] sm:$0xf]  ;;  %451 = vst [vmem:[#allocation4 + $0x2ec] sm:$0xf] %v450_v49 }
  0x76   :  { %453 = vst [vmem:[#allocation4 + $0x2f0] sm:$0xf] %v452_v50  ;;  %455 = vst [vmem:[#allocation4 + $0x2f4] sm:$0xf] %v454_v51  ;;  %v456_v52 = vld [vmem:[%s15530_s17 + $0x2e4] sm:$0xf] }
  0x77   :  { %v458_v53 = vld [vmem:[%s15530_s17 + $0x308] sm:$0xf]  ;;  %457 = vst [vmem:[#allocation4 + $0x2f8] sm:$0xf] %v456_v52  ;;  %v462_v55 = vld [vmem:[%s15530_s17 + $0x30c] sm:$0xf] }
  0x78   :  { %v460_v54 = vld [vmem:[%s15530_s17 + $0x2e8] sm:$0xf]  ;;  %459 = vst [vmem:[#allocation4 + $0x2fc] sm:$0xf] %v458_v53  ;;  %v464_v56 = vld [vmem:[%s15530_s17 + $0x2ec] sm:$0xf] }
  0x79   :  { %461 = vst [vmem:[#allocation4 + $0x300] sm:$0xf] %v460_v54  ;;  %v466_v57 = vld [vmem:[%s15530_s17 + $0x310] sm:$0xf]  ;;  %463 = vst [vmem:[#allocation4 + $0x304] sm:$0xf] %v462_v55 }
  0x7a   :  { %465 = vst [vmem:[#allocation4 + $0x308] sm:$0xf] %v464_v56  ;;  %467 = vst [vmem:[#allocation4 + $0x30c] sm:$0xf] %v466_v57  ;;  %v468_v58 = vld [vmem:[%s15530_s17 + $0x2f0] sm:$0xf] }
  0x7b   :  { %v474_v60 = vld [vmem:[%s15530_s17 + $0x33c] sm:$0xf]  ;;  %469 = vst [vmem:[#allocation4 + $0x310] sm:$0xf] %v468_v58  ;;  %471 = vst [vmem:[#allocation4 + $0x314] sm:$0xff] %v470_v59   ;;  %v542_v29 = vld [vmem:[%s15530_s17 + $0x3a4] sm:$0xff]  }
  0x7c   :  { %475 = vst [vmem:[#allocation4 + $0x31c] sm:$0xf] %v474_v60  ;;  %v476_v61 = vld [vmem:[%s15530_s17 + $0x31c] sm:$0xf]  ;;  %v478_v62 = vld [vmem:[%s15530_s17 + $0x340] sm:$0xf] }
  0x7d   :  { %v480_v63 = vld [vmem:[%s15530_s17 + $0x320] sm:$0xf]  ;;  %477 = vst [vmem:[#allocation4 + $0x320] sm:$0xf] %v476_v61  ;;  %479 = vst [vmem:[#allocation4 + $0x324] sm:$0xf] %v478_v62 }
  0x7e   :  { %481 = vst [vmem:[#allocation4 + $0x328] sm:$0xf] %v480_v63  ;;  %v482_v0 = vld [vmem:[%s15530_s17 + $0x344] sm:$0xf]  ;;  %v486_v2 = vld [vmem:[%s15530_s17 + $0x348] sm:$0xf] }
  0x7f   :  { %v484_v1 = vld [vmem:[%s15530_s17 + $0x324] sm:$0xf]  ;;  %483 = vst [vmem:[#allocation4 + $0x32c] sm:$0xf] %v482_v0  ;;  %487 = vst [vmem:[#allocation4 + $0x334] sm:$0xf] %v486_v2 }
  0x80   :  { %485 = vst [vmem:[#allocation4 + $0x330] sm:$0xf] %v484_v1  ;;  %v488_v3 = vld [vmem:[%s15530_s17 + $0x328] sm:$0xf]  ;;  %v490_v4 = vld [vmem:[%s15530_s17 + $0x34c] sm:$0xf] }
  0x81   :  { %v492_v5 = vld [vmem:[%s15530_s17 + $0x32c] sm:$0xf]  ;;  %489 = vst [vmem:[#allocation4 + $0x338] sm:$0xf] %v488_v3  ;;  %491 = vst [vmem:[#allocation4 + $0x33c] sm:$0xf] %v490_v4 }
  0x82   :  { %493 = vst [vmem:[#allocation4 + $0x340] sm:$0xf] %v492_v5  ;;  %v494_v6 = vld [vmem:[%s15530_s17 + $0x350] sm:$0xf]  ;;  %v498_v8 = vld [vmem:[%s15530_s17 + $0x354] sm:$0xf] }
  0x83   :  { %v496_v7 = vld [vmem:[%s15530_s17 + $0x330] sm:$0xf]  ;;  %495 = vst [vmem:[#allocation4 + $0x344] sm:$0xf] %v494_v6  ;;  %499 = vst [vmem:[#allocation4 + $0x34c] sm:$0xf] %v498_v8 }
  0x84   :  { %497 = vst [vmem:[#allocation4 + $0x348] sm:$0xf] %v496_v7  ;;  %v500_v9 = vld [vmem:[%s15530_s17 + $0x334] sm:$0xf]  ;;  %v502_v10 = vld [vmem:[%s15530_s17 + $0x358] sm:$0xf] }
  0x85   :  { %v504_v11 = vld [vmem:[%s15530_s17 + $0x338] sm:$0xf]  ;;  %501 = vst [vmem:[#allocation4 + $0x350] sm:$0xf] %v500_v9  ;;  %503 = vst [vmem:[#allocation4 + $0x354] sm:$0xf] %v502_v10 }
  0x86   :  { %505 = vst [vmem:[#allocation4 + $0x358] sm:$0xf] %v504_v11  ;;  %v510_v13 = vld [vmem:[%s15530_s17 + $0x384] sm:$0xf]  ;;  %507 = vst [vmem:[#allocation4 + $0x35c] sm:$0xff] %v506_v12   ;;  %v578_v46 = vld [vmem:[%s15530_s17 + $0x3ec] sm:$0xff]  }
  0x87   :  { %v512_v14 = vld [vmem:[%s15530_s17 + $0x364] sm:$0xf]  ;;  %511 = vst [vmem:[#allocation4 + $0x364] sm:$0xf] %v510_v13  ;;  %v514_v15 = vld [vmem:[%s15530_s17 + $0x388] sm:$0xf] }
  0x88   :  { %513 = vst [vmem:[#allocation4 + $0x368] sm:$0xf] %v512_v14  ;;  %v516_v16 = vld [vmem:[%s15530_s17 + $0x368] sm:$0xf]  ;;  %v518_v17 = vld [vmem:[%s15530_s17 + $0x38c] sm:$0xf] }
  0x89   :  { %515 = vst [vmem:[#allocation4 + $0x36c] sm:$0xf] %v514_v15  ;;  %517 = vst [vmem:[#allocation4 + $0x370] sm:$0xf] %v516_v16  ;;  %v520_v18 = vld [vmem:[%s15530_s17 + $0x36c] sm:$0xf] }
  0x8a   :  { %519 = vst [vmem:[#allocation4 + $0x374] sm:$0xf] %v518_v17  ;;  %v522_v19 = vld [vmem:[%s15530_s17 + $0x390] sm:$0xf]  ;;  %521 = vst [vmem:[#allocation4 + $0x378] sm:$0xf] %v520_v18 }
  0x8b   :  { %v524_v20 = vld [vmem:[%s15530_s17 + $0x370] sm:$0xf]  ;;  %523 = vst [vmem:[#allocation4 + $0x37c] sm:$0xf] %v522_v19  ;;  %v526_v21 = vld [vmem:[%s15530_s17 + $0x394] sm:$0xf] }
  0x8c   :  { %525 = vst [vmem:[#allocation4 + $0x380] sm:$0xf] %v524_v20  ;;  %v528_v22 = vld [vmem:[%s15530_s17 + $0x374] sm:$0xf]  ;;  %v530_v23 = vld [vmem:[%s15530_s17 + $0x398] sm:$0xf] }
  0x8d   :  { %527 = vst [vmem:[#allocation4 + $0x384] sm:$0xf] %v526_v21  ;;  %529 = vst [vmem:[#allocation4 + $0x388] sm:$0xf] %v528_v22  ;;  %v532_v24 = vld [vmem:[%s15530_s17 + $0x378] sm:$0xf] }
  0x8e   :  { %531 = vst [vmem:[#allocation4 + $0x38c] sm:$0xf] %v530_v23  ;;  %v534_v25 = vld [vmem:[%s15530_s17 + $0x39c] sm:$0xf]  ;;  %533 = vst [vmem:[#allocation4 + $0x390] sm:$0xf] %v532_v24 }
  0x8f   :  { %v536_v26 = vld [vmem:[%s15530_s17 + $0x37c] sm:$0xf]  ;;  %535 = vst [vmem:[#allocation4 + $0x394] sm:$0xf] %v534_v25  ;;  %v538_v27 = vld [vmem:[%s15530_s17 + $0x3a0] sm:$0xf] }
  0x90   :  { %537 = vst [vmem:[#allocation4 + $0x398] sm:$0xf] %v536_v26  ;;  %v540_v28 = vld [vmem:[%s15530_s17 + $0x380] sm:$0xf]  ;;  %539 = vst [vmem:[#allocation4 + $0x39c] sm:$0xf] %v538_v27 }
  0x91   :  { %541 = vst [vmem:[#allocation4 + $0x3a0] sm:$0xf] %v540_v28  ;;  %543 = vst [vmem:[#allocation4 + $0x3a4] sm:$0xff] %v542_v29   ;;  %v546_v30 = vld [vmem:[%s15530_s17 + $0x3cc] sm:$0xf]  ;;  %v614_v63 = vld [vmem:[%s15530_s17 + $0x434] sm:$0xff]  }
  0x92   :  { %v548_v31 = vld [vmem:[%s15530_s17 + $0x3ac] sm:$0xf]  ;;  %v550_v32 = vld [vmem:[%s15530_s17 + $0x3d0] sm:$0xf]  ;;  %547 = vst [vmem:[#allocation4 + $0x3ac] sm:$0xf] %v546_v30 }
  0x93   :  { %549 = vst [vmem:[#allocation4 + $0x3b0] sm:$0xf] %v548_v31  ;;  %551 = vst [vmem:[#allocation4 + $0x3b4] sm:$0xf] %v550_v32  ;;  %v552_v33 = vld [vmem:[%s15530_s17 + $0x3b0] sm:$0xf] }
  0x94   :  { %v554_v34 = vld [vmem:[%s15530_s17 + $0x3d4] sm:$0xf]  ;;  %553 = vst [vmem:[#allocation4 + $0x3b8] sm:$0xf] %v552_v33  ;;  %v558_v36 = vld [vmem:[%s15530_s17 + $0x3d8] sm:$0xf] }
  0x95   :  { %v556_v35 = vld [vmem:[%s15530_s17 + $0x3b4] sm:$0xf]  ;;  %555 = vst [vmem:[#allocation4 + $0x3bc] sm:$0xf] %v554_v34  ;;  %v560_v37 = vld [vmem:[%s15530_s17 + $0x3b8] sm:$0xf] }
  0x96   :  { %557 = vst [vmem:[#allocation4 + $0x3c0] sm:$0xf] %v556_v35  ;;  %v562_v38 = vld [vmem:[%s15530_s17 + $0x3dc] sm:$0xf]  ;;  %559 = vst [vmem:[#allocation4 + $0x3c4] sm:$0xf] %v558_v36 }
  0x97   :  { %561 = vst [vmem:[#allocation4 + $0x3c8] sm:$0xf] %v560_v37  ;;  %563 = vst [vmem:[#allocation4 + $0x3cc] sm:$0xf] %v562_v38  ;;  %v564_v39 = vld [vmem:[%s15530_s17 + $0x3bc] sm:$0xf] }
  0x98   :  { %v566_v40 = vld [vmem:[%s15530_s17 + $0x3e0] sm:$0xf]  ;;  %565 = vst [vmem:[#allocation4 + $0x3d0] sm:$0xf] %v564_v39  ;;  %v570_v42 = vld [vmem:[%s15530_s17 + $0x3e4] sm:$0xf] }
  0x99   :  { %v568_v41 = vld [vmem:[%s15530_s17 + $0x3c0] sm:$0xf]  ;;  %567 = vst [vmem:[#allocation4 + $0x3d4] sm:$0xf] %v566_v40  ;;  %v572_v43 = vld [vmem:[%s15530_s17 + $0x3c4] sm:$0xf] }
  0x9a   :  { %569 = vst [vmem:[#allocation4 + $0x3d8] sm:$0xf] %v568_v41  ;;  %v574_v44 = vld [vmem:[%s15530_s17 + $0x3e8] sm:$0xf]  ;;  %571 = vst [vmem:[#allocation4 + $0x3dc] sm:$0xf] %v570_v42 }
  0x9b   :  { %573 = vst [vmem:[#allocation4 + $0x3e0] sm:$0xf] %v572_v43  ;;  %575 = vst [vmem:[#allocation4 + $0x3e4] sm:$0xf] %v574_v44  ;;  %v576_v45 = vld [vmem:[%s15530_s17 + $0x3c8] sm:$0xf] }
  0x9c   :  { %v582_v47 = vld [vmem:[%s15530_s17 + $0x414] sm:$0xf]  ;;  %577 = vst [vmem:[#allocation4 + $0x3e8] sm:$0xf] %v576_v45  ;;  %579 = vst [vmem:[#allocation4 + $0x3ec] sm:$0xff] %v578_v46   ;;  %v650_v16 = vld [vmem:[%s15530_s17 + $0x47c] sm:$0xff]  }
  0x9d   :  { %583 = vst [vmem:[#allocation4 + $0x3f4] sm:$0xf] %v582_v47  ;;  %v584_v48 = vld [vmem:[%s15530_s17 + $0x3f4] sm:$0xf]  ;;  %v586_v49 = vld [vmem:[%s15530_s17 + $0x418] sm:$0xf] }
  0x9e   :  { %v588_v50 = vld [vmem:[%s15530_s17 + $0x3f8] sm:$0xf]  ;;  %585 = vst [vmem:[#allocation4 + $0x3f8] sm:$0xf] %v584_v48  ;;  %587 = vst [vmem:[#allocation4 + $0x3fc] sm:$0xf] %v586_v49 }
  0x9f   :  { %589 = vst [vmem:[#allocation4 + $0x400] sm:$0xf] %v588_v50  ;;  %v590_v51 = vld [vmem:[%s15530_s17 + $0x41c] sm:$0xf]  ;;  %v594_v53 = vld [vmem:[%s15530_s17 + $0x420] sm:$0xf] }
  0xa0   :  { %v592_v52 = vld [vmem:[%s15530_s17 + $0x3fc] sm:$0xf]  ;;  %591 = vst [vmem:[#allocation4 + $0x404] sm:$0xf] %v590_v51  ;;  %595 = vst [vmem:[#allocation4 + $0x40c] sm:$0xf] %v594_v53 }
  0xa1   :  { %593 = vst [vmem:[#allocation4 + $0x408] sm:$0xf] %v592_v52  ;;  %v596_v54 = vld [vmem:[%s15530_s17 + $0x400] sm:$0xf]  ;;  %v598_v55 = vld [vmem:[%s15530_s17 + $0x424] sm:$0xf] }
  0xa2   :  { %v600_v56 = vld [vmem:[%s15530_s17 + $0x404] sm:$0xf]  ;;  %597 = vst [vmem:[#allocation4 + $0x410] sm:$0xf] %v596_v54  ;;  %599 = vst [vmem:[#allocation4 + $0x414] sm:$0xf] %v598_v55 }
  0xa3   :  { %601 = vst [vmem:[#allocation4 + $0x418] sm:$0xf] %v600_v56  ;;  %v602_v57 = vld [vmem:[%s15530_s17 + $0x428] sm:$0xf]  ;;  %v606_v59 = vld [vmem:[%s15530_s17 + $0x42c] sm:$0xf] }
  0xa4   :  { %v604_v58 = vld [vmem:[%s15530_s17 + $0x408] sm:$0xf]  ;;  %603 = vst [vmem:[#allocation4 + $0x41c] sm:$0xf] %v602_v57  ;;  %607 = vst [vmem:[#allocation4 + $0x424] sm:$0xf] %v606_v59 }
  0xa5   :  { %605 = vst [vmem:[#allocation4 + $0x420] sm:$0xf] %v604_v58  ;;  %v608_v60 = vld [vmem:[%s15530_s17 + $0x40c] sm:$0xf]  ;;  %v610_v61 = vld [vmem:[%s15530_s17 + $0x430] sm:$0xf] }
  0xa6   :  { %v612_v62 = vld [vmem:[%s15530_s17 + $0x410] sm:$0xf]  ;;  %609 = vst [vmem:[#allocation4 + $0x428] sm:$0xf] %v608_v60  ;;  %611 = vst [vmem:[#allocation4 + $0x42c] sm:$0xf] %v610_v61 }
  0xa7   :  { %613 = vst [vmem:[#allocation4 + $0x430] sm:$0xf] %v612_v62  ;;  %v618_v0 = vld [vmem:[%s15530_s17 + $0x45c] sm:$0xf]  ;;  %615 = vst [vmem:[#allocation4 + $0x434] sm:$0xff] %v614_v63   ;;  %v686_v33 = vld [vmem:[%s15530_s17 + $0x4c4] sm:$0xff]  }
  0xa8   :  { %v620_v1 = vld [vmem:[%s15530_s17 + $0x43c] sm:$0xf]  ;;  %619 = vst [vmem:[#allocation4 + $0x43c] sm:$0xf] %v618_v0  ;;  %v622_v2 = vld [vmem:[%s15530_s17 + $0x460] sm:$0xf] }
  0xa9   :  { %621 = vst [vmem:[#allocation4 + $0x440] sm:$0xf] %v620_v1  ;;  %v624_v3 = vld [vmem:[%s15530_s17 + $0x440] sm:$0xf]  ;;  %v626_v4 = vld [vmem:[%s15530_s17 + $0x464] sm:$0xf] }
  0xaa   :  { %623 = vst [vmem:[#allocation4 + $0x444] sm:$0xf] %v622_v2  ;;  %625 = vst [vmem:[#allocation4 + $0x448] sm:$0xf] %v624_v3  ;;  %v628_v5 = vld [vmem:[%s15530_s17 + $0x444] sm:$0xf] }
  0xab   :  { %627 = vst [vmem:[#allocation4 + $0x44c] sm:$0xf] %v626_v4  ;;  %v630_v6 = vld [vmem:[%s15530_s17 + $0x468] sm:$0xf]  ;;  %629 = vst [vmem:[#allocation4 + $0x450] sm:$0xf] %v628_v5 }
  0xac   :  { %v632_v7 = vld [vmem:[%s15530_s17 + $0x448] sm:$0xf]  ;;  %631 = vst [vmem:[#allocation4 + $0x454] sm:$0xf] %v630_v6  ;;  %v634_v8 = vld [vmem:[%s15530_s17 + $0x46c] sm:$0xf] }
  0xad   :  { %633 = vst [vmem:[#allocation4 + $0x458] sm:$0xf] %v632_v7  ;;  %v636_v9 = vld [vmem:[%s15530_s17 + $0x44c] sm:$0xf]  ;;  %v638_v10 = vld [vmem:[%s15530_s17 + $0x470] sm:$0xf] }
  0xae   :  { %635 = vst [vmem:[#allocation4 + $0x45c] sm:$0xf] %v634_v8  ;;  %637 = vst [vmem:[#allocation4 + $0x460] sm:$0xf] %v636_v9  ;;  %v640_v11 = vld [vmem:[%s15530_s17 + $0x450] sm:$0xf] }
  0xaf   :  { %639 = vst [vmem:[#allocation4 + $0x464] sm:$0xf] %v638_v10  ;;  %v642_v12 = vld [vmem:[%s15530_s17 + $0x474] sm:$0xf]  ;;  %641 = vst [vmem:[#allocation4 + $0x468] sm:$0xf] %v640_v11 }
  0xb0   :  { %v644_v13 = vld [vmem:[%s15530_s17 + $0x454] sm:$0xf]  ;;  %643 = vst [vmem:[#allocation4 + $0x46c] sm:$0xf] %v642_v12  ;;  %v646_v14 = vld [vmem:[%s15530_s17 + $0x478] sm:$0xf] }
  0xb1   :  { %645 = vst [vmem:[#allocation4 + $0x470] sm:$0xf] %v644_v13  ;;  %v648_v15 = vld [vmem:[%s15530_s17 + $0x458] sm:$0xf]  ;;  %647 = vst [vmem:[#allocation4 + $0x474] sm:$0xf] %v646_v14 }
  0xb2   :  { %649 = vst [vmem:[#allocation4 + $0x478] sm:$0xf] %v648_v15  ;;  %651 = vst [vmem:[#allocation4 + $0x47c] sm:$0xff] %v650_v16   ;;  %v654_v17 = vld [vmem:[%s15530_s17 + $0x4a4] sm:$0xf]  ;;  %v722_v50 = vld [vmem:[%s15530_s17 + $0x50c] sm:$0xff]  }
  0xb3   :  { %v656_v18 = vld [vmem:[%s15530_s17 + $0x484] sm:$0xf]  ;;  %v658_v19 = vld [vmem:[%s15530_s17 + $0x4a8] sm:$0xf]  ;;  %655 = vst [vmem:[#allocation4 + $0x484] sm:$0xf] %v654_v17 }
  0xb4   :  { %657 = vst [vmem:[#allocation4 + $0x488] sm:$0xf] %v656_v18  ;;  %659 = vst [vmem:[#allocation4 + $0x48c] sm:$0xf] %v658_v19  ;;  %v660_v20 = vld [vmem:[%s15530_s17 + $0x488] sm:$0xf] }
  0xb5   :  { %v662_v21 = vld [vmem:[%s15530_s17 + $0x4ac] sm:$0xf]  ;;  %661 = vst [vmem:[#allocation4 + $0x490] sm:$0xf] %v660_v20  ;;  %v666_v23 = vld [vmem:[%s15530_s17 + $0x4b0] sm:$0xf] }
  0xb6   :  { %v664_v22 = vld [vmem:[%s15530_s17 + $0x48c] sm:$0xf]  ;;  %663 = vst [vmem:[#allocation4 + $0x494] sm:$0xf] %v662_v21  ;;  %v668_v24 = vld [vmem:[%s15530_s17 + $0x490] sm:$0xf] }
  0xb7   :  { %665 = vst [vmem:[#allocation4 + $0x498] sm:$0xf] %v664_v22  ;;  %v670_v25 = vld [vmem:[%s15530_s17 + $0x4b4] sm:$0xf]  ;;  %667 = vst [vmem:[#allocation4 + $0x49c] sm:$0xf] %v666_v23 }
  0xb8   :  { %669 = vst [vmem:[#allocation4 + $0x4a0] sm:$0xf] %v668_v24  ;;  %671 = vst [vmem:[#allocation4 + $0x4a4] sm:$0xf] %v670_v25  ;;  %v672_v26 = vld [vmem:[%s15530_s17 + $0x494] sm:$0xf] }
  0xb9   :  { %v674_v27 = vld [vmem:[%s15530_s17 + $0x4b8] sm:$0xf]  ;;  %673 = vst [vmem:[#allocation4 + $0x4a8] sm:$0xf] %v672_v26  ;;  %v678_v29 = vld [vmem:[%s15530_s17 + $0x4bc] sm:$0xf] }
  0xba   :  { %v676_v28 = vld [vmem:[%s15530_s17 + $0x498] sm:$0xf]  ;;  %675 = vst [vmem:[#allocation4 + $0x4ac] sm:$0xf] %v674_v27  ;;  %v680_v30 = vld [vmem:[%s15530_s17 + $0x49c] sm:$0xf] }
  0xbb   :  { %677 = vst [vmem:[#allocation4 + $0x4b0] sm:$0xf] %v676_v28  ;;  %v682_v31 = vld [vmem:[%s15530_s17 + $0x4c0] sm:$0xf]  ;;  %679 = vst [vmem:[#allocation4 + $0x4b4] sm:$0xf] %v678_v29 }
  0xbc   :  { %681 = vst [vmem:[#allocation4 + $0x4b8] sm:$0xf] %v680_v30  ;;  %683 = vst [vmem:[#allocation4 + $0x4bc] sm:$0xf] %v682_v31  ;;  %v684_v32 = vld [vmem:[%s15530_s17 + $0x4a0] sm:$0xf] }
  0xbd   :  { %v690_v34 = vld [vmem:[%s15530_s17 + $0x4ec] sm:$0xf]  ;;  %685 = vst [vmem:[#allocation4 + $0x4c0] sm:$0xf] %v684_v32  ;;  %687 = vst [vmem:[#allocation4 + $0x4c4] sm:$0xff] %v686_v33   ;;  %v758_v3 = vld [vmem:[%s15530_s17 + $0x554] sm:$0xff]  }
  0xbe   :  { %691 = vst [vmem:[#allocation4 + $0x4cc] sm:$0xf] %v690_v34  ;;  %v692_v35 = vld [vmem:[%s15530_s17 + $0x4cc] sm:$0xf]  ;;  %v694_v36 = vld [vmem:[%s15530_s17 + $0x4f0] sm:$0xf] }
  0xbf   :  { %v696_v37 = vld [vmem:[%s15530_s17 + $0x4d0] sm:$0xf]  ;;  %693 = vst [vmem:[#allocation4 + $0x4d0] sm:$0xf] %v692_v35  ;;  %695 = vst [vmem:[#allocation4 + $0x4d4] sm:$0xf] %v694_v36 }
  0xc0   :  { %697 = vst [vmem:[#allocation4 + $0x4d8] sm:$0xf] %v696_v37  ;;  %v698_v38 = vld [vmem:[%s15530_s17 + $0x4f4] sm:$0xf]  ;;  %v702_v40 = vld [vmem:[%s15530_s17 + $0x4f8] sm:$0xf] }
  0xc1   :  { %v700_v39 = vld [vmem:[%s15530_s17 + $0x4d4] sm:$0xf]  ;;  %699 = vst [vmem:[#allocation4 + $0x4dc] sm:$0xf] %v698_v38  ;;  %703 = vst [vmem:[#allocation4 + $0x4e4] sm:$0xf] %v702_v40 }
  0xc2   :  { %701 = vst [vmem:[#allocation4 + $0x4e0] sm:$0xf] %v700_v39  ;;  %v704_v41 = vld [vmem:[%s15530_s17 + $0x4d8] sm:$0xf]  ;;  %v706_v42 = vld [vmem:[%s15530_s17 + $0x4fc] sm:$0xf] }
  0xc3   :  { %v708_v43 = vld [vmem:[%s15530_s17 + $0x4dc] sm:$0xf]  ;;  %705 = vst [vmem:[#allocation4 + $0x4e8] sm:$0xf] %v704_v41  ;;  %707 = vst [vmem:[#allocation4 + $0x4ec] sm:$0xf] %v706_v42 }
  0xc4   :  { %709 = vst [vmem:[#allocation4 + $0x4f0] sm:$0xf] %v708_v43  ;;  %v710_v44 = vld [vmem:[%s15530_s17 + $0x500] sm:$0xf]  ;;  %v714_v46 = vld [vmem:[%s15530_s17 + $0x504] sm:$0xf] }
  0xc5   :  { %v712_v45 = vld [vmem:[%s15530_s17 + $0x4e0] sm:$0xf]  ;;  %711 = vst [vmem:[#allocation4 + $0x4f4] sm:$0xf] %v710_v44  ;;  %715 = vst [vmem:[#allocation4 + $0x4fc] sm:$0xf] %v714_v46 }
  0xc6   :  { %713 = vst [vmem:[#allocation4 + $0x4f8] sm:$0xf] %v712_v45  ;;  %v716_v47 = vld [vmem:[%s15530_s17 + $0x4e4] sm:$0xf]  ;;  %v718_v48 = vld [vmem:[%s15530_s17 + $0x508] sm:$0xf] }
  0xc7   :  { %v720_v49 = vld [vmem:[%s15530_s17 + $0x4e8] sm:$0xf]  ;;  %717 = vst [vmem:[#allocation4 + $0x500] sm:$0xf] %v716_v47  ;;  %719 = vst [vmem:[#allocation4 + $0x504] sm:$0xf] %v718_v48 }
  0xc8   :  { %721 = vst [vmem:[#allocation4 + $0x508] sm:$0xf] %v720_v49  ;;  %v726_v51 = vld [vmem:[%s15530_s17 + $0x534] sm:$0xf]  ;;  %723 = vst [vmem:[#allocation4 + $0x50c] sm:$0xff] %v722_v50   ;;  %v794_v20 = vld [vmem:[%s15530_s17 + $0x59c] sm:$0xff]  }
  0xc9   :  { %v728_v52 = vld [vmem:[%s15530_s17 + $0x514] sm:$0xf]  ;;  %727 = vst [vmem:[#allocation4 + $0x514] sm:$0xf] %v726_v51  ;;  %v730_v53 = vld [vmem:[%s15530_s17 + $0x538] sm:$0xf] }
  0xca   :  { %729 = vst [vmem:[#allocation4 + $0x518] sm:$0xf] %v728_v52  ;;  %v732_v54 = vld [vmem:[%s15530_s17 + $0x518] sm:$0xf]  ;;  %v734_v55 = vld [vmem:[%s15530_s17 + $0x53c] sm:$0xf] }
  0xcb   :  { %731 = vst [vmem:[#allocation4 + $0x51c] sm:$0xf] %v730_v53  ;;  %733 = vst [vmem:[#allocation4 + $0x520] sm:$0xf] %v732_v54  ;;  %v736_v56 = vld [vmem:[%s15530_s17 + $0x51c] sm:$0xf] }
  0xcc   :  { %735 = vst [vmem:[#allocation4 + $0x524] sm:$0xf] %v734_v55  ;;  %v738_v57 = vld [vmem:[%s15530_s17 + $0x540] sm:$0xf]  ;;  %737 = vst [vmem:[#allocation4 + $0x528] sm:$0xf] %v736_v56 }
  0xcd   :  { %v740_v58 = vld [vmem:[%s15530_s17 + $0x520] sm:$0xf]  ;;  %739 = vst [vmem:[#allocation4 + $0x52c] sm:$0xf] %v738_v57  ;;  %v742_v59 = vld [vmem:[%s15530_s17 + $0x544] sm:$0xf] }
  0xce   :  { %741 = vst [vmem:[#allocation4 + $0x530] sm:$0xf] %v740_v58  ;;  %v744_v60 = vld [vmem:[%s15530_s17 + $0x524] sm:$0xf]  ;;  %v746_v61 = vld [vmem:[%s15530_s17 + $0x548] sm:$0xf] }
  0xcf   :  { %743 = vst [vmem:[#allocation4 + $0x534] sm:$0xf] %v742_v59  ;;  %745 = vst [vmem:[#allocation4 + $0x538] sm:$0xf] %v744_v60  ;;  %v748_v62 = vld [vmem:[%s15530_s17 + $0x528] sm:$0xf] }
  0xd0   :  { %747 = vst [vmem:[#allocation4 + $0x53c] sm:$0xf] %v746_v61  ;;  %v750_v63 = vld [vmem:[%s15530_s17 + $0x54c] sm:$0xf]  ;;  %749 = vst [vmem:[#allocation4 + $0x540] sm:$0xf] %v748_v62 }
  0xd1   :  { %v752_v0 = vld [vmem:[%s15530_s17 + $0x52c] sm:$0xf]  ;;  %751 = vst [vmem:[#allocation4 + $0x544] sm:$0xf] %v750_v63  ;;  %v754_v1 = vld [vmem:[%s15530_s17 + $0x550] sm:$0xf] }
  0xd2   :  { %753 = vst [vmem:[#allocation4 + $0x548] sm:$0xf] %v752_v0  ;;  %v756_v2 = vld [vmem:[%s15530_s17 + $0x530] sm:$0xf]  ;;  %755 = vst [vmem:[#allocation4 + $0x54c] sm:$0xf] %v754_v1 }
  0xd3   :  { %757 = vst [vmem:[#allocation4 + $0x550] sm:$0xf] %v756_v2  ;;  %759 = vst [vmem:[#allocation4 + $0x554] sm:$0xff] %v758_v3   ;;  %v762_v4 = vld [vmem:[%s15530_s17 + $0x57c] sm:$0xf]  ;;  %v830_v37 = vld [vmem:[%s15530_s17 + $0x5e4] sm:$0xff]  }
  0xd4   :  { %v764_v5 = vld [vmem:[%s15530_s17 + $0x55c] sm:$0xf]  ;;  %v766_v6 = vld [vmem:[%s15530_s17 + $0x580] sm:$0xf]  ;;  %763 = vst [vmem:[#allocation4 + $0x55c] sm:$0xf] %v762_v4 }
  0xd5   :  { %765 = vst [vmem:[#allocation4 + $0x560] sm:$0xf] %v764_v5  ;;  %767 = vst [vmem:[#allocation4 + $0x564] sm:$0xf] %v766_v6  ;;  %v768_v7 = vld [vmem:[%s15530_s17 + $0x560] sm:$0xf] }
  0xd6   :  { %v770_v8 = vld [vmem:[%s15530_s17 + $0x584] sm:$0xf]  ;;  %769 = vst [vmem:[#allocation4 + $0x568] sm:$0xf] %v768_v7  ;;  %v774_v10 = vld [vmem:[%s15530_s17 + $0x588] sm:$0xf] }
  0xd7   :  { %v772_v9 = vld [vmem:[%s15530_s17 + $0x564] sm:$0xf]  ;;  %771 = vst [vmem:[#allocation4 + $0x56c] sm:$0xf] %v770_v8  ;;  %v776_v11 = vld [vmem:[%s15530_s17 + $0x568] sm:$0xf] }
  0xd8   :  { %773 = vst [vmem:[#allocation4 + $0x570] sm:$0xf] %v772_v9  ;;  %v778_v12 = vld [vmem:[%s15530_s17 + $0x58c] sm:$0xf]  ;;  %775 = vst [vmem:[#allocation4 + $0x574] sm:$0xf] %v774_v10 }
  0xd9   :  { %777 = vst [vmem:[#allocation4 + $0x578] sm:$0xf] %v776_v11  ;;  %779 = vst [vmem:[#allocation4 + $0x57c] sm:$0xf] %v778_v12  ;;  %v780_v13 = vld [vmem:[%s15530_s17 + $0x56c] sm:$0xf] }
  0xda   :  { %v782_v14 = vld [vmem:[%s15530_s17 + $0x590] sm:$0xf]  ;;  %781 = vst [vmem:[#allocation4 + $0x580] sm:$0xf] %v780_v13  ;;  %v786_v16 = vld [vmem:[%s15530_s17 + $0x594] sm:$0xf] }
  0xdb   :  { %v784_v15 = vld [vmem:[%s15530_s17 + $0x570] sm:$0xf]  ;;  %783 = vst [vmem:[#allocation4 + $0x584] sm:$0xf] %v782_v14  ;;  %v788_v17 = vld [vmem:[%s15530_s17 + $0x574] sm:$0xf] }
  0xdc   :  { %785 = vst [vmem:[#allocation4 + $0x588] sm:$0xf] %v784_v15  ;;  %v790_v18 = vld [vmem:[%s15530_s17 + $0x598] sm:$0xf]  ;;  %787 = vst [vmem:[#allocation4 + $0x58c] sm:$0xf] %v786_v16 }
  0xdd   :  { %789 = vst [vmem:[#allocation4 + $0x590] sm:$0xf] %v788_v17  ;;  %791 = vst [vmem:[#allocation4 + $0x594] sm:$0xf] %v790_v18  ;;  %v792_v19 = vld [vmem:[%s15530_s17 + $0x578] sm:$0xf] }
  0xde   :  { %v798_v21 = vld [vmem:[%s15530_s17 + $0x5c4] sm:$0xf]  ;;  %793 = vst [vmem:[#allocation4 + $0x598] sm:$0xf] %v792_v19  ;;  %795 = vst [vmem:[#allocation4 + $0x59c] sm:$0xff] %v794_v20   ;;  %v866_v54 = vld [vmem:[%s15530_s17 + $0x62c] sm:$0xff]  }
  0xdf   :  { %799 = vst [vmem:[#allocation4 + $0x5a4] sm:$0xf] %v798_v21  ;;  %v800_v22 = vld [vmem:[%s15530_s17 + $0x5a4] sm:$0xf]  ;;  %v802_v23 = vld [vmem:[%s15530_s17 + $0x5c8] sm:$0xf] }
  0xe0   :  { %v804_v24 = vld [vmem:[%s15530_s17 + $0x5a8] sm:$0xf]  ;;  %801 = vst [vmem:[#allocation4 + $0x5a8] sm:$0xf] %v800_v22  ;;  %803 = vst [vmem:[#allocation4 + $0x5ac] sm:$0xf] %v802_v23 }
  0xe1   :  { %805 = vst [vmem:[#allocation4 + $0x5b0] sm:$0xf] %v804_v24  ;;  %v806_v25 = vld [vmem:[%s15530_s17 + $0x5cc] sm:$0xf]  ;;  %v810_v27 = vld [vmem:[%s15530_s17 + $0x5d0] sm:$0xf] }
  0xe2   :  { %v808_v26 = vld [vmem:[%s15530_s17 + $0x5ac] sm:$0xf]  ;;  %807 = vst [vmem:[#allocation4 + $0x5b4] sm:$0xf] %v806_v25  ;;  %811 = vst [vmem:[#allocation4 + $0x5bc] sm:$0xf] %v810_v27 }
  0xe3   :  { %809 = vst [vmem:[#allocation4 + $0x5b8] sm:$0xf] %v808_v26  ;;  %v812_v28 = vld [vmem:[%s15530_s17 + $0x5b0] sm:$0xf]  ;;  %v814_v29 = vld [vmem:[%s15530_s17 + $0x5d4] sm:$0xf] }
  0xe4   :  { %v816_v30 = vld [vmem:[%s15530_s17 + $0x5b4] sm:$0xf]  ;;  %813 = vst [vmem:[#allocation4 + $0x5c0] sm:$0xf] %v812_v28  ;;  %815 = vst [vmem:[#allocation4 + $0x5c4] sm:$0xf] %v814_v29 }
  0xe5   :  { %817 = vst [vmem:[#allocation4 + $0x5c8] sm:$0xf] %v816_v30  ;;  %v818_v31 = vld [vmem:[%s15530_s17 + $0x5d8] sm:$0xf]  ;;  %v822_v33 = vld [vmem:[%s15530_s17 + $0x5dc] sm:$0xf] }
  0xe6   :  { %v820_v32 = vld [vmem:[%s15530_s17 + $0x5b8] sm:$0xf]  ;;  %819 = vst [vmem:[#allocation4 + $0x5cc] sm:$0xf] %v818_v31  ;;  %823 = vst [vmem:[#allocation4 + $0x5d4] sm:$0xf] %v822_v33 }
  0xe7   :  { %821 = vst [vmem:[#allocation4 + $0x5d0] sm:$0xf] %v820_v32  ;;  %v824_v34 = vld [vmem:[%s15530_s17 + $0x5bc] sm:$0xf]  ;;  %v826_v35 = vld [vmem:[%s15530_s17 + $0x5e0] sm:$0xf] }
  0xe8   :  { %v828_v36 = vld [vmem:[%s15530_s17 + $0x5c0] sm:$0xf]  ;;  %825 = vst [vmem:[#allocation4 + $0x5d8] sm:$0xf] %v824_v34  ;;  %827 = vst [vmem:[#allocation4 + $0x5dc] sm:$0xf] %v826_v35 }
  0xe9   :  { %829 = vst [vmem:[#allocation4 + $0x5e0] sm:$0xf] %v828_v36  ;;  %v834_v38 = vld [vmem:[%s15530_s17 + $0x60c] sm:$0xf]  ;;  %831 = vst [vmem:[#allocation4 + $0x5e4] sm:$0xff] %v830_v37   ;;  %v902_v7 = vld [vmem:[%s15530_s17 + $0x674] sm:$0xff]  }
  0xea   :  { %v836_v39 = vld [vmem:[%s15530_s17 + $0x5ec] sm:$0xf]  ;;  %835 = vst [vmem:[#allocation4 + $0x5ec] sm:$0xf] %v834_v38  ;;  %v838_v40 = vld [vmem:[%s15530_s17 + $0x610] sm:$0xf] }
  0xeb   :  { %837 = vst [vmem:[#allocation4 + $0x5f0] sm:$0xf] %v836_v39  ;;  %v840_v41 = vld [vmem:[%s15530_s17 + $0x5f0] sm:$0xf]  ;;  %v842_v42 = vld [vmem:[%s15530_s17 + $0x614] sm:$0xf] }
  0xec   :  { %839 = vst [vmem:[#allocation4 + $0x5f4] sm:$0xf] %v838_v40  ;;  %841 = vst [vmem:[#allocation4 + $0x5f8] sm:$0xf] %v840_v41  ;;  %v844_v43 = vld [vmem:[%s15530_s17 + $0x5f4] sm:$0xf] }
  0xed   :  { %843 = vst [vmem:[#allocation4 + $0x5fc] sm:$0xf] %v842_v42  ;;  %v846_v44 = vld [vmem:[%s15530_s17 + $0x618] sm:$0xf]  ;;  %845 = vst [vmem:[#allocation4 + $0x600] sm:$0xf] %v844_v43 }
  0xee   :  { %v848_v45 = vld [vmem:[%s15530_s17 + $0x5f8] sm:$0xf]  ;;  %847 = vst [vmem:[#allocation4 + $0x604] sm:$0xf] %v846_v44  ;;  %v850_v46 = vld [vmem:[%s15530_s17 + $0x61c] sm:$0xf] }
  0xef   :  { %849 = vst [vmem:[#allocation4 + $0x608] sm:$0xf] %v848_v45  ;;  %v852_v47 = vld [vmem:[%s15530_s17 + $0x5fc] sm:$0xf]  ;;  %v854_v48 = vld [vmem:[%s15530_s17 + $0x620] sm:$0xf] }
  0xf0   :  { %851 = vst [vmem:[#allocation4 + $0x60c] sm:$0xf] %v850_v46  ;;  %853 = vst [vmem:[#allocation4 + $0x610] sm:$0xf] %v852_v47  ;;  %v856_v49 = vld [vmem:[%s15530_s17 + $0x600] sm:$0xf] }
  0xf1   :  { %855 = vst [vmem:[#allocation4 + $0x614] sm:$0xf] %v854_v48  ;;  %v858_v50 = vld [vmem:[%s15530_s17 + $0x624] sm:$0xf]  ;;  %857 = vst [vmem:[#allocation4 + $0x618] sm:$0xf] %v856_v49 }
  0xf2   :  { %v860_v51 = vld [vmem:[%s15530_s17 + $0x604] sm:$0xf]  ;;  %859 = vst [vmem:[#allocation4 + $0x61c] sm:$0xf] %v858_v50  ;;  %v862_v52 = vld [vmem:[%s15530_s17 + $0x628] sm:$0xf] }
  0xf3   :  { %861 = vst [vmem:[#allocation4 + $0x620] sm:$0xf] %v860_v51  ;;  %v864_v53 = vld [vmem:[%s15530_s17 + $0x608] sm:$0xf]  ;;  %863 = vst [vmem:[#allocation4 + $0x624] sm:$0xf] %v862_v52 }
  0xf4   :  { %865 = vst [vmem:[#allocation4 + $0x628] sm:$0xf] %v864_v53  ;;  %867 = vst [vmem:[#allocation4 + $0x62c] sm:$0xff] %v866_v54   ;;  %v870_v55 = vld [vmem:[%s15530_s17 + $0x654] sm:$0xf]  ;;  %v938_v24 = vld [vmem:[%s15530_s17 + $0x6bc] sm:$0xff]  }
  0xf5   :  { %v872_v56 = vld [vmem:[%s15530_s17 + $0x634] sm:$0xf]  ;;  %v874_v57 = vld [vmem:[%s15530_s17 + $0x658] sm:$0xf]  ;;  %871 = vst [vmem:[#allocation4 + $0x634] sm:$0xf] %v870_v55 }
  0xf6   :  { %873 = vst [vmem:[#allocation4 + $0x638] sm:$0xf] %v872_v56  ;;  %875 = vst [vmem:[#allocation4 + $0x63c] sm:$0xf] %v874_v57  ;;  %v876_v58 = vld [vmem:[%s15530_s17 + $0x638] sm:$0xf] }
  0xf7   :  { %v878_v59 = vld [vmem:[%s15530_s17 + $0x65c] sm:$0xf]  ;;  %877 = vst [vmem:[#allocation4 + $0x640] sm:$0xf] %v876_v58  ;;  %v882_v61 = vld [vmem:[%s15530_s17 + $0x660] sm:$0xf] }
  0xf8   :  { %v880_v60 = vld [vmem:[%s15530_s17 + $0x63c] sm:$0xf]  ;;  %879 = vst [vmem:[#allocation4 + $0x644] sm:$0xf] %v878_v59  ;;  %v884_v62 = vld [vmem:[%s15530_s17 + $0x640] sm:$0xf] }
  0xf9   :  { %881 = vst [vmem:[#allocation4 + $0x648] sm:$0xf] %v880_v60  ;;  %v886_v63 = vld [vmem:[%s15530_s17 + $0x664] sm:$0xf]  ;;  %883 = vst [vmem:[#allocation4 + $0x64c] sm:$0xf] %v882_v61 }
  0xfa   :  { %885 = vst [vmem:[#allocation4 + $0x650] sm:$0xf] %v884_v62  ;;  %887 = vst [vmem:[#allocation4 + $0x654] sm:$0xf] %v886_v63  ;;  %v888_v0 = vld [vmem:[%s15530_s17 + $0x644] sm:$0xf] }
  0xfb   :  { %v890_v1 = vld [vmem:[%s15530_s17 + $0x668] sm:$0xf]  ;;  %889 = vst [vmem:[#allocation4 + $0x658] sm:$0xf] %v888_v0  ;;  %v894_v3 = vld [vmem:[%s15530_s17 + $0x66c] sm:$0xf] }
  0xfc   :  { %v892_v2 = vld [vmem:[%s15530_s17 + $0x648] sm:$0xf]  ;;  %891 = vst [vmem:[#allocation4 + $0x65c] sm:$0xf] %v890_v1  ;;  %v896_v4 = vld [vmem:[%s15530_s17 + $0x64c] sm:$0xf] }
  0xfd   :  { %893 = vst [vmem:[#allocation4 + $0x660] sm:$0xf] %v892_v2  ;;  %v898_v5 = vld [vmem:[%s15530_s17 + $0x670] sm:$0xf]  ;;  %895 = vst [vmem:[#allocation4 + $0x664] sm:$0xf] %v894_v3 }
  0xfe   :  { %897 = vst [vmem:[#allocation4 + $0x668] sm:$0xf] %v896_v4  ;;  %899 = vst [vmem:[#allocation4 + $0x66c] sm:$0xf] %v898_v5  ;;  %v900_v6 = vld [vmem:[%s15530_s17 + $0x650] sm:$0xf] }
  0xff   :  { %v906_v8 = vld [vmem:[%s15530_s17 + $0x69c] sm:$0xf]  ;;  %901 = vst [vmem:[#allocation4 + $0x670] sm:$0xf] %v900_v6  ;;  %903 = vst [vmem:[#allocation4 + $0x674] sm:$0xff] %v902_v7   ;;  %v974_v41 = vld [vmem:[%s15530_s17 + $0x704] sm:$0xff]  }
 0x100   :  { %907 = vst [vmem:[#allocation4 + $0x67c] sm:$0xf] %v906_v8  ;;  %v908_v9 = vld [vmem:[%s15530_s17 + $0x67c] sm:$0xf]  ;;  %v910_v10 = vld [vmem:[%s15530_s17 + $0x6a0] sm:$0xf] }
 0x101   :  { %v912_v11 = vld [vmem:[%s15530_s17 + $0x680] sm:$0xf]  ;;  %909 = vst [vmem:[#allocation4 + $0x680] sm:$0xf] %v908_v9  ;;  %911 = vst [vmem:[#allocation4 + $0x684] sm:$0xf] %v910_v10 }
 0x102   :  { %913 = vst [vmem:[#allocation4 + $0x688] sm:$0xf] %v912_v11  ;;  %v914_v12 = vld [vmem:[%s15530_s17 + $0x6a4] sm:$0xf]  ;;  %v918_v14 = vld [vmem:[%s15530_s17 + $0x6a8] sm:$0xf] }
 0x103   :  { %v916_v13 = vld [vmem:[%s15530_s17 + $0x684] sm:$0xf]  ;;  %915 = vst [vmem:[#allocation4 + $0x68c] sm:$0xf] %v914_v12  ;;  %919 = vst [vmem:[#allocation4 + $0x694] sm:$0xf] %v918_v14 }
 0x104   :  { %917 = vst [vmem:[#allocation4 + $0x690] sm:$0xf] %v916_v13  ;;  %v920_v15 = vld [vmem:[%s15530_s17 + $0x688] sm:$0xf]  ;;  %v922_v16 = vld [vmem:[%s15530_s17 + $0x6ac] sm:$0xf] }
 0x105   :  { %v924_v17 = vld [vmem:[%s15530_s17 + $0x68c] sm:$0xf]  ;;  %921 = vst [vmem:[#allocation4 + $0x698] sm:$0xf] %v920_v15  ;;  %923 = vst [vmem:[#allocation4 + $0x69c] sm:$0xf] %v922_v16 }
 0x106   :  { %925 = vst [vmem:[#allocation4 + $0x6a0] sm:$0xf] %v924_v17  ;;  %v926_v18 = vld [vmem:[%s15530_s17 + $0x6b0] sm:$0xf]  ;;  %v930_v20 = vld [vmem:[%s15530_s17 + $0x6b4] sm:$0xf] }
 0x107   :  { %v928_v19 = vld [vmem:[%s15530_s17 + $0x690] sm:$0xf]  ;;  %927 = vst [vmem:[#allocation4 + $0x6a4] sm:$0xf] %v926_v18  ;;  %931 = vst [vmem:[#allocation4 + $0x6ac] sm:$0xf] %v930_v20 }
 0x108   :  { %929 = vst [vmem:[#allocation4 + $0x6a8] sm:$0xf] %v928_v19  ;;  %v932_v21 = vld [vmem:[%s15530_s17 + $0x694] sm:$0xf]  ;;  %v934_v22 = vld [vmem:[%s15530_s17 + $0x6b8] sm:$0xf] }
 0x109   :  { %v936_v23 = vld [vmem:[%s15530_s17 + $0x698] sm:$0xf]  ;;  %933 = vst [vmem:[#allocation4 + $0x6b0] sm:$0xf] %v932_v21  ;;  %935 = vst [vmem:[#allocation4 + $0x6b4] sm:$0xf] %v934_v22 }
 0x10a   :  { %937 = vst [vmem:[#allocation4 + $0x6b8] sm:$0xf] %v936_v23  ;;  %v942_v25 = vld [vmem:[%s15530_s17 + $0x6e4] sm:$0xf]  ;;  %939 = vst [vmem:[#allocation4 + $0x6bc] sm:$0xff] %v938_v24   ;;  %v1010_v58 = vld [vmem:[%s15530_s17 + $0x74c] sm:$0xff]  }
 0x10b   :  { %v944_v26 = vld [vmem:[%s15530_s17 + $0x6c4] sm:$0xf]  ;;  %943 = vst [vmem:[#allocation4 + $0x6c4] sm:$0xf] %v942_v25  ;;  %v946_v27 = vld [vmem:[%s15530_s17 + $0x6e8] sm:$0xf] }
 0x10c   :  { %945 = vst [vmem:[#allocation4 + $0x6c8] sm:$0xf] %v944_v26  ;;  %v948_v28 = vld [vmem:[%s15530_s17 + $0x6c8] sm:$0xf]  ;;  %v950_v29 = vld [vmem:[%s15530_s17 + $0x6ec] sm:$0xf] }
 0x10d   :  { %947 = vst [vmem:[#allocation4 + $0x6cc] sm:$0xf] %v946_v27  ;;  %949 = vst [vmem:[#allocation4 + $0x6d0] sm:$0xf] %v948_v28  ;;  %v952_v30 = vld [vmem:[%s15530_s17 + $0x6cc] sm:$0xf] }
 0x10e   :  { %951 = vst [vmem:[#allocation4 + $0x6d4] sm:$0xf] %v950_v29  ;;  %v954_v31 = vld [vmem:[%s15530_s17 + $0x6f0] sm:$0xf]  ;;  %953 = vst [vmem:[#allocation4 + $0x6d8] sm:$0xf] %v952_v30 }
 0x10f   :  { %v956_v32 = vld [vmem:[%s15530_s17 + $0x6d0] sm:$0xf]  ;;  %955 = vst [vmem:[#allocation4 + $0x6dc] sm:$0xf] %v954_v31  ;;  %v958_v33 = vld [vmem:[%s15530_s17 + $0x6f4] sm:$0xf] }
 0x110   :  { %957 = vst [vmem:[#allocation4 + $0x6e0] sm:$0xf] %v956_v32  ;;  %v960_v34 = vld [vmem:[%s15530_s17 + $0x6d4] sm:$0xf]  ;;  %v962_v35 = vld [vmem:[%s15530_s17 + $0x6f8] sm:$0xf] }
 0x111   :  { %959 = vst [vmem:[#allocation4 + $0x6e4] sm:$0xf] %v958_v33  ;;  %961 = vst [vmem:[#allocation4 + $0x6e8] sm:$0xf] %v960_v34  ;;  %v964_v36 = vld [vmem:[%s15530_s17 + $0x6d8] sm:$0xf] }
 0x112   :  { %963 = vst [vmem:[#allocation4 + $0x6ec] sm:$0xf] %v962_v35  ;;  %v966_v37 = vld [vmem:[%s15530_s17 + $0x6fc] sm:$0xf]  ;;  %965 = vst [vmem:[#allocation4 + $0x6f0] sm:$0xf] %v964_v36 }
 0x113   :  { %v968_v38 = vld [vmem:[%s15530_s17 + $0x6dc] sm:$0xf]  ;;  %967 = vst [vmem:[#allocation4 + $0x6f4] sm:$0xf] %v966_v37  ;;  %v970_v39 = vld [vmem:[%s15530_s17 + $0x700] sm:$0xf] }
 0x114   :  { %969 = vst [vmem:[#allocation4 + $0x6f8] sm:$0xf] %v968_v38  ;;  %v972_v40 = vld [vmem:[%s15530_s17 + $0x6e0] sm:$0xf]  ;;  %971 = vst [vmem:[#allocation4 + $0x6fc] sm:$0xf] %v970_v39 }
 0x115   :  { %973 = vst [vmem:[#allocation4 + $0x700] sm:$0xf] %v972_v40  ;;  %975 = vst [vmem:[#allocation4 + $0x704] sm:$0xff] %v974_v41   ;;  %v978_v42 = vld [vmem:[%s15530_s17 + $0x72c] sm:$0xf]  ;;  %v1046_v11 = vld [vmem:[%s15530_s17 + $0x794] sm:$0xff]  }
 0x116   :  { %v980_v43 = vld [vmem:[%s15530_s17 + $0x70c] sm:$0xf]  ;;  %v982_v44 = vld [vmem:[%s15530_s17 + $0x730] sm:$0xf]  ;;  %979 = vst [vmem:[#allocation4 + $0x70c] sm:$0xf] %v978_v42 }
 0x117   :  { %981 = vst [vmem:[#allocation4 + $0x710] sm:$0xf] %v980_v43  ;;  %983 = vst [vmem:[#allocation4 + $0x714] sm:$0xf] %v982_v44  ;;  %v984_v45 = vld [vmem:[%s15530_s17 + $0x710] sm:$0xf] }
 0x118   :  { %v986_v46 = vld [vmem:[%s15530_s17 + $0x734] sm:$0xf]  ;;  %985 = vst [vmem:[#allocation4 + $0x718] sm:$0xf] %v984_v45  ;;  %v990_v48 = vld [vmem:[%s15530_s17 + $0x738] sm:$0xf] }
 0x119   :  { %v988_v47 = vld [vmem:[%s15530_s17 + $0x714] sm:$0xf]  ;;  %987 = vst [vmem:[#allocation4 + $0x71c] sm:$0xf] %v986_v46  ;;  %v992_v49 = vld [vmem:[%s15530_s17 + $0x718] sm:$0xf] }
 0x11a   :  { %989 = vst [vmem:[#allocation4 + $0x720] sm:$0xf] %v988_v47  ;;  %v994_v50 = vld [vmem:[%s15530_s17 + $0x73c] sm:$0xf]  ;;  %991 = vst [vmem:[#allocation4 + $0x724] sm:$0xf] %v990_v48 }
 0x11b   :  { %993 = vst [vmem:[#allocation4 + $0x728] sm:$0xf] %v992_v49  ;;  %995 = vst [vmem:[#allocation4 + $0x72c] sm:$0xf] %v994_v50  ;;  %v996_v51 = vld [vmem:[%s15530_s17 + $0x71c] sm:$0xf] }
 0x11c   :  { %v998_v52 = vld [vmem:[%s15530_s17 + $0x740] sm:$0xf]  ;;  %997 = vst [vmem:[#allocation4 + $0x730] sm:$0xf] %v996_v51  ;;  %v1002_v54 = vld [vmem:[%s15530_s17 + $0x744] sm:$0xf] }
 0x11d   :  { %v1000_v53 = vld [vmem:[%s15530_s17 + $0x720] sm:$0xf]  ;;  %999 = vst [vmem:[#allocation4 + $0x734] sm:$0xf] %v998_v52  ;;  %v1004_v55 = vld [vmem:[%s15530_s17 + $0x724] sm:$0xf] }
 0x11e   :  { %1001 = vst [vmem:[#allocation4 + $0x738] sm:$0xf] %v1000_v53  ;;  %v1006_v56 = vld [vmem:[%s15530_s17 + $0x748] sm:$0xf]  ;;  %1003 = vst [vmem:[#allocation4 + $0x73c] sm:$0xf] %v1002_v54 }
 0x11f   :  { %1005 = vst [vmem:[#allocation4 + $0x740] sm:$0xf] %v1004_v55  ;;  %1007 = vst [vmem:[#allocation4 + $0x744] sm:$0xf] %v1006_v56  ;;  %v1008_v57 = vld [vmem:[%s15530_s17 + $0x728] sm:$0xf] }
 0x120   :  { %v1014_v59 = vld [vmem:[%s15530_s17 + $0x774] sm:$0xf]  ;;  %1009 = vst [vmem:[#allocation4 + $0x748] sm:$0xf] %v1008_v57  ;;  %1011 = vst [vmem:[#allocation4 + $0x74c] sm:$0xff] %v1010_v58  }
 0x121   :  { %1015 = vst [vmem:[#allocation4 + $0x754] sm:$0xf] %v1014_v59  ;;  %v1016_v60 = vld [vmem:[%s15530_s17 + $0x754] sm:$0xf]  ;;  %v1018_v61 = vld [vmem:[%s15530_s17 + $0x778] sm:$0xf] }
 0x122   :  { %v1020_v62 = vld [vmem:[%s15530_s17 + $0x758] sm:$0xf]  ;;  %1017 = vst [vmem:[#allocation4 + $0x758] sm:$0xf] %v1016_v60  ;;  %1019 = vst [vmem:[#allocation4 + $0x75c] sm:$0xf] %v1018_v61 }
 0x123   :  { %1021 = vst [vmem:[#allocation4 + $0x760] sm:$0xf] %v1020_v62  ;;  %v1022_v63 = vld [vmem:[%s15530_s17 + $0x77c] sm:$0xf]  ;;  %v1026_v1 = vld [vmem:[%s15530_s17 + $0x780] sm:$0xf] }
 0x124   :  { %v1024_v0 = vld [vmem:[%s15530_s17 + $0x75c] sm:$0xf]  ;;  %1023 = vst [vmem:[#allocation4 + $0x764] sm:$0xf] %v1022_v63  ;;  %1027 = vst [vmem:[#allocation4 + $0x76c] sm:$0xf] %v1026_v1 }
 0x125   :  { %1025 = vst [vmem:[#allocation4 + $0x768] sm:$0xf] %v1024_v0  ;;  %v1028_v2 = vld [vmem:[%s15530_s17 + $0x760] sm:$0xf]  ;;  %v1030_v3 = vld [vmem:[%s15530_s17 + $0x784] sm:$0xf] }
 0x126   :  { %v1032_v4 = vld [vmem:[%s15530_s17 + $0x764] sm:$0xf]  ;;  %1029 = vst [vmem:[#allocation4 + $0x770] sm:$0xf] %v1028_v2  ;;  %1031 = vst [vmem:[#allocation4 + $0x774] sm:$0xf] %v1030_v3 }
 0x127   :  { %1033 = vst [vmem:[#allocation4 + $0x778] sm:$0xf] %v1032_v4  ;;  %v1034_v5 = vld [vmem:[%s15530_s17 + $0x788] sm:$0xf]  ;;  %v1038_v7 = vld [vmem:[%s15530_s17 + $0x78c] sm:$0xf] }
 0x128   :  { %v1036_v6 = vld [vmem:[%s15530_s17 + $0x768] sm:$0xf]  ;;  %1035 = vst [vmem:[#allocation4 + $0x77c] sm:$0xf] %v1034_v5  ;;  %1039 = vst [vmem:[#allocation4 + $0x784] sm:$0xf] %v1038_v7 }
 0x129   :  { %1037 = vst [vmem:[#allocation4 + $0x780] sm:$0xf] %v1036_v6  ;;  %v1040_v8 = vld [vmem:[%s15530_s17 + $0x76c] sm:$0xf]  ;;  %v1042_v9 = vld [vmem:[%s15530_s17 + $0x790] sm:$0xf] }
 0x12a   :  { %v1044_v10 = vld [vmem:[%s15530_s17 + $0x770] sm:$0xf]  ;;  %1041 = vst [vmem:[#allocation4 + $0x788] sm:$0xf] %v1040_v8  ;;  %1043 = vst [vmem:[#allocation4 + $0x78c] sm:$0xf] %v1042_v9 }
 0x12b   :  { %1045 = vst [vmem:[#allocation4 + $0x790] sm:$0xf] %v1044_v10  ;;  %v1050_v12 = vld [vmem:[%s15530_s17 + $0x7bc] sm:$0xf]  ;;  %1047 = vst [vmem:[#allocation4 + $0x794] sm:$0xff] %v1046_v11  }
 0x12c   :  { %v1052_v13 = vld [vmem:[%s15530_s17 + $0x79c] sm:$0xf]  ;;  %1051 = vst [vmem:[#allocation4 + $0x79c] sm:$0xf] %v1050_v12  ;;  %v1054_v14 = vld [vmem:[%s15530_s17 + $0x7c0] sm:$0xf] }
 0x12d   :  { %1053 = vst [vmem:[#allocation4 + $0x7a0] sm:$0xf] %v1052_v13  ;;  %v1056_v15 = vld [vmem:[%s15530_s17 + $0x7a0] sm:$0xf]  ;;  %v1058_v16 = vld [vmem:[%s15530_s17 + $0x7c4] sm:$0xf] }
 0x12e   :  { %1055 = vst [vmem:[#allocation4 + $0x7a4] sm:$0xf] %v1054_v14  ;;  %1057 = vst [vmem:[#allocation4 + $0x7a8] sm:$0xf] %v1056_v15  ;;  %v1060_v17 = vld [vmem:[%s15530_s17 + $0x7a4] sm:$0xf] }
 0x12f   :  { %1059 = vst [vmem:[#allocation4 + $0x7ac] sm:$0xf] %v1058_v16  ;;  %v1062_v18 = vld [vmem:[%s15530_s17 + $0x7c8] sm:$0xf]  ;;  %1061 = vst [vmem:[#allocation4 + $0x7b0] sm:$0xf] %v1060_v17 }
 0x130   :  { %v1064_v19 = vld [vmem:[%s15530_s17 + $0x7a8] sm:$0xf]  ;;  %1063 = vst [vmem:[#allocation4 + $0x7b4] sm:$0xf] %v1062_v18  ;;  %v1066_v20 = vld [vmem:[%s15530_s17 + $0x7cc] sm:$0xf] }
 0x131   :  { %1065 = vst [vmem:[#allocation4 + $0x7b8] sm:$0xf] %v1064_v19  ;;  %v1068_v21 = vld [vmem:[%s15530_s17 + $0x7ac] sm:$0xf]  ;;  %v1070_v22 = vld [vmem:[%s15530_s17 + $0x7d0] sm:$0xf] }
 0x132   :  { %1067 = vst [vmem:[#allocation4 + $0x7bc] sm:$0xf] %v1066_v20  ;;  %1069 = vst [vmem:[#allocation4 + $0x7c0] sm:$0xf] %v1068_v21  ;;  %v1072_v23 = vld [vmem:[%s15530_s17 + $0x7b0] sm:$0xf] }
 0x133   :  { %1071 = vst [vmem:[#allocation4 + $0x7c4] sm:$0xf] %v1070_v22  ;;  %v1074_v24 = vld [vmem:[%s15530_s17 + $0x7d4] sm:$0xf]  ;;  %1073 = vst [vmem:[#allocation4 + $0x7c8] sm:$0xf] %v1072_v23 }
 0x134   :  { %v1076_v25 = vld [vmem:[%s15530_s17 + $0x7b4] sm:$0xf]  ;;  %1075 = vst [vmem:[#allocation4 + $0x7cc] sm:$0xf] %v1074_v24  ;;  %v1078_v26 = vld [vmem:[%s15530_s17 + $0x7d8] sm:$0xf] }
 0x135   :  { %1077 = vst [vmem:[#allocation4 + $0x7d0] sm:$0xf] %v1076_v25  ;;  %v1080_v27 = vld [vmem:[%s15530_s17 + $0x7b8] sm:$0xf]  ;;  %v1082_v28 = vld [vmem:[%s15530_s17 + $0x7dc] sm:$0xf] }
 0x136   :  { %1079 = vst [vmem:[#allocation4 + $0x7d4] sm:$0xf] %v1078_v26  ;;  %1081 = vst [vmem:[#allocation4 + $0x7d8] sm:$0xf] %v1080_v27 }
 0x137   :  { %1083 = vst [vmem:[#allocation4 + $0x7dc] sm:$0xf] %v1082_v28 }
 0x138   :  { %2122 = vsyncadd [#allocation6], 32256  ;;  %v2141_v29 = vld [vmem:[%s15531_s18] sm:$0xf]  ;;  %v2143_v30 = vld [vmem:[%s15531_s18 + $0x10] sm:$0xf] }
 0x139   :  { %2142 = vst [vmem:[#allocation5] sm:$0xf] %v2141_v29  ;;  %2144 = vst [vmem:[#allocation5 + $0x4] sm:$0xf] %v2143_v30  ;;  %v2145_v31 = vld [vmem:[%s15531_s18 + $0x4] sm:$0xf] }
 0x13a   :  { %v2147_v32 = vld [vmem:[%s15531_s18 + $0x14] sm:$0xf]  ;;  %v2149_v33 = vld [vmem:[%s15531_s18 + $0x8] sm:$0xf]  ;;  %2146 = vst [vmem:[#allocation5 + $0x8] sm:$0xf] %v2145_v31 }
 0x13b   :  { %2148 = vst [vmem:[#allocation5 + $0xc] sm:$0xf] %v2147_v32  ;;  %2150 = vst [vmem:[#allocation5 + $0x10] sm:$0xf] %v2149_v33  ;;  %v2151_v34 = vld [vmem:[%s15531_s18 + $0x18] sm:$0xf] }
 0x13c   :  { %v2153_v35 = vld [vmem:[%s15531_s18 + $0xc] sm:$0xf]  ;;  %v2155_v36 = vld [vmem:[%s15531_s18 + $0x1c] sm:$0xff]   ;;  %2152 = vst [vmem:[#allocation5 + $0x14] sm:$0xf] %v2151_v34 }
 0x13d   :  { %2154 = vst [vmem:[#allocation5 + $0x18] sm:$0xf] %v2153_v35  ;;  %2156 = vst [vmem:[#allocation5 + $0x1c] sm:$0xff] %v2155_v36   ;;  %v2159_v37 = vld [vmem:[%s15531_s18 + $0x30] sm:$0xf]  ;;  %v2171_v43 = vld [vmem:[%s15531_s18 + $0x3c] sm:$0xff]  }
 0x13e   :  { %v2161_v38 = vld [vmem:[%s15531_s18 + $0x24] sm:$0xf]  ;;  %v2163_v39 = vld [vmem:[%s15531_s18 + $0x34] sm:$0xf]  ;;  %2160 = vst [vmem:[#allocation5 + $0x24] sm:$0xf] %v2159_v37 }
 0x13f   :  { %2162 = vst [vmem:[#allocation5 + $0x28] sm:$0xf] %v2161_v38  ;;  %2164 = vst [vmem:[#allocation5 + $0x2c] sm:$0xf] %v2163_v39  ;;  %v2165_v40 = vld [vmem:[%s15531_s18 + $0x28] sm:$0xf] }
 0x140   :  { %v2167_v41 = vld [vmem:[%s15531_s18 + $0x38] sm:$0xf]  ;;  %v2169_v42 = vld [vmem:[%s15531_s18 + $0x2c] sm:$0xf]  ;;  %2166 = vst [vmem:[#allocation5 + $0x30] sm:$0xf] %v2165_v40 }
 0x141   :  { %2168 = vst [vmem:[#allocation5 + $0x34] sm:$0xf] %v2167_v41  ;;  %2170 = vst [vmem:[#allocation5 + $0x38] sm:$0xf] %v2169_v42  ;;  %v2175_v44 = vld [vmem:[%s15531_s18 + $0x50] sm:$0xf] }
 0x142   :  { %v2177_v45 = vld [vmem:[%s15531_s18 + $0x44] sm:$0xf]  ;;  %2172 = vst [vmem:[#allocation5 + $0x3c] sm:$0xff] %v2171_v43   ;;  %2176 = vst [vmem:[#allocation5 + $0x44] sm:$0xf] %v2175_v44  ;;  %v2187_v50 = vld [vmem:[%s15531_s18 + $0x5c] sm:$0xff]  }
 0x143   :  { %2178 = vst [vmem:[#allocation5 + $0x48] sm:$0xf] %v2177_v45  ;;  %v2179_v46 = vld [vmem:[%s15531_s18 + $0x54] sm:$0xf]  ;;  %v2181_v47 = vld [vmem:[%s15531_s18 + $0x48] sm:$0xf] }
 0x144   :  { %v2183_v48 = vld [vmem:[%s15531_s18 + $0x58] sm:$0xf]  ;;  %2180 = vst [vmem:[#allocation5 + $0x4c] sm:$0xf] %v2179_v46  ;;  %2182 = vst [vmem:[#allocation5 + $0x50] sm:$0xf] %v2181_v47 }
 0x145   :  { %2184 = vst [vmem:[#allocation5 + $0x54] sm:$0xf] %v2183_v48  ;;  %v2185_v49 = vld [vmem:[%s15531_s18 + $0x4c] sm:$0xf]  ;;  %v2191_v51 = vld [vmem:[%s15531_s18 + $0x70] sm:$0xf] }
 0x146   :  { %2186 = vst [vmem:[#allocation5 + $0x58] sm:$0xf] %v2185_v49  ;;  %2188 = vst [vmem:[#allocation5 + $0x5c] sm:$0xff] %v2187_v50   ;;  %v2193_v52 = vld [vmem:[%s15531_s18 + $0x64] sm:$0xf]  ;;  %v2203_v57 = vld [vmem:[%s15531_s18 + $0x7c] sm:$0xff]  }
 0x147   :  { %2192 = vst [vmem:[#allocation5 + $0x64] sm:$0xf] %v2191_v51  ;;  %v2195_v53 = vld [vmem:[%s15531_s18 + $0x74] sm:$0xf]  ;;  %v2197_v54 = vld [vmem:[%s15531_s18 + $0x68] sm:$0xf] }
 0x148   :  { %2194 = vst [vmem:[#allocation5 + $0x68] sm:$0xf] %v2193_v52  ;;  %2196 = vst [vmem:[#allocation5 + $0x6c] sm:$0xf] %v2195_v53  ;;  %v2199_v55 = vld [vmem:[%s15531_s18 + $0x78] sm:$0xf] }
 0x149   :  { %2198 = vst [vmem:[#allocation5 + $0x70] sm:$0xf] %v2197_v54  ;;  %v2201_v56 = vld [vmem:[%s15531_s18 + $0x6c] sm:$0xf]  ;;  %2200 = vst [vmem:[#allocation5 + $0x74] sm:$0xf] %v2199_v55 }
 0x14a   :  { %2202 = vst [vmem:[#allocation5 + $0x78] sm:$0xf] %v2201_v56  ;;  %2204 = vst [vmem:[#allocation5 + $0x7c] sm:$0xff] %v2203_v57   ;;  %v2207_v58 = vld [vmem:[%s15531_s18 + $0x90] sm:$0xf]  ;;  %v2219_v0 = vld [vmem:[%s15531_s18 + $0x9c] sm:$0xff]  }
 0x14b   :  { %v2209_v59 = vld [vmem:[%s15531_s18 + $0x84] sm:$0xf]  ;;  %v2211_v60 = vld [vmem:[%s15531_s18 + $0x94] sm:$0xf]  ;;  %2208 = vst [vmem:[#allocation5 + $0x84] sm:$0xf] %v2207_v58 }
 0x14c   :  { %2210 = vst [vmem:[#allocation5 + $0x88] sm:$0xf] %v2209_v59  ;;  %2212 = vst [vmem:[#allocation5 + $0x8c] sm:$0xf] %v2211_v60  ;;  %v2213_v61 = vld [vmem:[%s15531_s18 + $0x88] sm:$0xf] }
 0x14d   :  { %v2215_v62 = vld [vmem:[%s15531_s18 + $0x98] sm:$0xf]  ;;  %v2217_v63 = vld [vmem:[%s15531_s18 + $0x8c] sm:$0xf]  ;;  %2214 = vst [vmem:[#allocation5 + $0x90] sm:$0xf] %v2213_v61 }
 0x14e   :  { %2216 = vst [vmem:[#allocation5 + $0x94] sm:$0xf] %v2215_v62  ;;  %2218 = vst [vmem:[#allocation5 + $0x98] sm:$0xf] %v2217_v63  ;;  %v2223_v1 = vld [vmem:[%s15531_s18 + $0xb0] sm:$0xf] }
 0x14f   :  { %v2225_v2 = vld [vmem:[%s15531_s18 + $0xa4] sm:$0xf]  ;;  %2220 = vst [vmem:[#allocation5 + $0x9c] sm:$0xff] %v2219_v0   ;;  %2224 = vst [vmem:[#allocation5 + $0xa4] sm:$0xf] %v2223_v1  ;;  %v2235_v7 = vld [vmem:[%s15531_s18 + $0xbc] sm:$0xff]  }
 0x150   :  { %2226 = vst [vmem:[#allocation5 + $0xa8] sm:$0xf] %v2225_v2  ;;  %v2227_v3 = vld [vmem:[%s15531_s18 + $0xb4] sm:$0xf]  ;;  %v2229_v4 = vld [vmem:[%s15531_s18 + $0xa8] sm:$0xf] }
 0x151   :  { %v2231_v5 = vld [vmem:[%s15531_s18 + $0xb8] sm:$0xf]  ;;  %2228 = vst [vmem:[#allocation5 + $0xac] sm:$0xf] %v2227_v3  ;;  %2230 = vst [vmem:[#allocation5 + $0xb0] sm:$0xf] %v2229_v4 }
 0x152   :  { %2232 = vst [vmem:[#allocation5 + $0xb4] sm:$0xf] %v2231_v5  ;;  %v2233_v6 = vld [vmem:[%s15531_s18 + $0xac] sm:$0xf]  ;;  %v2239_v8 = vld [vmem:[%s15531_s18 + $0xd0] sm:$0xf] }
 0x153   :  { %2234 = vst [vmem:[#allocation5 + $0xb8] sm:$0xf] %v2233_v6  ;;  %2236 = vst [vmem:[#allocation5 + $0xbc] sm:$0xff] %v2235_v7   ;;  %v2241_v9 = vld [vmem:[%s15531_s18 + $0xc4] sm:$0xf]  ;;  %v2251_v14 = vld [vmem:[%s15531_s18 + $0xdc] sm:$0xff]  }
 0x154   :  { %2240 = vst [vmem:[#allocation5 + $0xc4] sm:$0xf] %v2239_v8  ;;  %v2243_v10 = vld [vmem:[%s15531_s18 + $0xd4] sm:$0xf]  ;;  %v2245_v11 = vld [vmem:[%s15531_s18 + $0xc8] sm:$0xf] }
 0x155   :  { %2242 = vst [vmem:[#allocation5 + $0xc8] sm:$0xf] %v2241_v9  ;;  %2244 = vst [vmem:[#allocation5 + $0xcc] sm:$0xf] %v2243_v10  ;;  %v2247_v12 = vld [vmem:[%s15531_s18 + $0xd8] sm:$0xf] }
 0x156   :  { %2246 = vst [vmem:[#allocation5 + $0xd0] sm:$0xf] %v2245_v11  ;;  %v2249_v13 = vld [vmem:[%s15531_s18 + $0xcc] sm:$0xf]  ;;  %2248 = vst [vmem:[#allocation5 + $0xd4] sm:$0xf] %v2247_v12 }
 0x157   :  { %2250 = vst [vmem:[#allocation5 + $0xd8] sm:$0xf] %v2249_v13  ;;  %2252 = vst [vmem:[#allocation5 + $0xdc] sm:$0xff] %v2251_v14   ;;  %v2255_v15 = vld [vmem:[%s15531_s18 + $0xf0] sm:$0xf]  ;;  %v2267_v21 = vld [vmem:[%s15531_s18 + $0xfc] sm:$0xff]  }
 0x158   :  { %v2257_v16 = vld [vmem:[%s15531_s18 + $0xe4] sm:$0xf]  ;;  %v2259_v17 = vld [vmem:[%s15531_s18 + $0xf4] sm:$0xf]  ;;  %2256 = vst [vmem:[#allocation5 + $0xe4] sm:$0xf] %v2255_v15 }
 0x159   :  { %2258 = vst [vmem:[#allocation5 + $0xe8] sm:$0xf] %v2257_v16  ;;  %2260 = vst [vmem:[#allocation5 + $0xec] sm:$0xf] %v2259_v17  ;;  %v2261_v18 = vld [vmem:[%s15531_s18 + $0xe8] sm:$0xf] }
 0x15a   :  { %v2263_v19 = vld [vmem:[%s15531_s18 + $0xf8] sm:$0xf]  ;;  %v2265_v20 = vld [vmem:[%s15531_s18 + $0xec] sm:$0xf]  ;;  %2262 = vst [vmem:[#allocation5 + $0xf0] sm:$0xf] %v2261_v18 }
 0x15b   :  { %2264 = vst [vmem:[#allocation5 + $0xf4] sm:$0xf] %v2263_v19  ;;  %2266 = vst [vmem:[#allocation5 + $0xf8] sm:$0xf] %v2265_v20  ;;  %v2271_v22 = vld [vmem:[%s15531_s18 + $0x110] sm:$0xf] }
 0x15c   :  { %v2273_v23 = vld [vmem:[%s15531_s18 + $0x104] sm:$0xf]  ;;  %2268 = vst [vmem:[#allocation5 + $0xfc] sm:$0xff] %v2267_v21   ;;  %2272 = vst [vmem:[#allocation5 + $0x104] sm:$0xf] %v2271_v22  ;;  %v2283_v28 = vld [vmem:[%s15531_s18 + $0x11c] sm:$0xff]  }
 0x15d   :  { %2274 = vst [vmem:[#allocation5 + $0x108] sm:$0xf] %v2273_v23  ;;  %v2275_v24 = vld [vmem:[%s15531_s18 + $0x114] sm:$0xf]  ;;  %v2277_v25 = vld [vmem:[%s15531_s18 + $0x108] sm:$0xf] }
 0x15e   :  { %v2279_v26 = vld [vmem:[%s15531_s18 + $0x118] sm:$0xf]  ;;  %2276 = vst [vmem:[#allocation5 + $0x10c] sm:$0xf] %v2275_v24  ;;  %2278 = vst [vmem:[#allocation5 + $0x110] sm:$0xf] %v2277_v25 }
 0x15f   :  { %2280 = vst [vmem:[#allocation5 + $0x114] sm:$0xf] %v2279_v26  ;;  %v2281_v27 = vld [vmem:[%s15531_s18 + $0x10c] sm:$0xf]  ;;  %v2287_v29 = vld [vmem:[%s15531_s18 + $0x130] sm:$0xf] }
 0x160   :  { %2282 = vst [vmem:[#allocation5 + $0x118] sm:$0xf] %v2281_v27  ;;  %2284 = vst [vmem:[#allocation5 + $0x11c] sm:$0xff] %v2283_v28   ;;  %v2289_v30 = vld [vmem:[%s15531_s18 + $0x124] sm:$0xf]  ;;  %v2299_v35 = vld [vmem:[%s15531_s18 + $0x13c] sm:$0xff]  }
 0x161   :  { %2288 = vst [vmem:[#allocation5 + $0x124] sm:$0xf] %v2287_v29  ;;  %v2291_v31 = vld [vmem:[%s15531_s18 + $0x134] sm:$0xf]  ;;  %v2293_v32 = vld [vmem:[%s15531_s18 + $0x128] sm:$0xf] }
 0x162   :  { %2290 = vst [vmem:[#allocation5 + $0x128] sm:$0xf] %v2289_v30  ;;  %2292 = vst [vmem:[#allocation5 + $0x12c] sm:$0xf] %v2291_v31  ;;  %v2295_v33 = vld [vmem:[%s15531_s18 + $0x138] sm:$0xf] }
 0x163   :  { %2294 = vst [vmem:[#allocation5 + $0x130] sm:$0xf] %v2293_v32  ;;  %v2297_v34 = vld [vmem:[%s15531_s18 + $0x12c] sm:$0xf]  ;;  %2296 = vst [vmem:[#allocation5 + $0x134] sm:$0xf] %v2295_v33 }
 0x164   :  { %2298 = vst [vmem:[#allocation5 + $0x138] sm:$0xf] %v2297_v34  ;;  %2300 = vst [vmem:[#allocation5 + $0x13c] sm:$0xff] %v2299_v35   ;;  %v2303_v36 = vld [vmem:[%s15531_s18 + $0x150] sm:$0xf]  ;;  %v2315_v42 = vld [vmem:[%s15531_s18 + $0x15c] sm:$0xff]  }
 0x165   :  { %v2305_v37 = vld [vmem:[%s15531_s18 + $0x144] sm:$0xf]  ;;  %v2307_v38 = vld [vmem:[%s15531_s18 + $0x154] sm:$0xf]  ;;  %2304 = vst [vmem:[#allocation5 + $0x144] sm:$0xf] %v2303_v36 }
 0x166   :  { %2306 = vst [vmem:[#allocation5 + $0x148] sm:$0xf] %v2305_v37  ;;  %2308 = vst [vmem:[#allocation5 + $0x14c] sm:$0xf] %v2307_v38  ;;  %v2309_v39 = vld [vmem:[%s15531_s18 + $0x148] sm:$0xf] }
 0x167   :  { %v2311_v40 = vld [vmem:[%s15531_s18 + $0x158] sm:$0xf]  ;;  %v2313_v41 = vld [vmem:[%s15531_s18 + $0x14c] sm:$0xf]  ;;  %2310 = vst [vmem:[#allocation5 + $0x150] sm:$0xf] %v2309_v39 }
 0x168   :  { %2312 = vst [vmem:[#allocation5 + $0x154] sm:$0xf] %v2311_v40  ;;  %2314 = vst [vmem:[#allocation5 + $0x158] sm:$0xf] %v2313_v41  ;;  %v2319_v43 = vld [vmem:[%s15531_s18 + $0x170] sm:$0xf] }
 0x169   :  { %v2321_v44 = vld [vmem:[%s15531_s18 + $0x164] sm:$0xf]  ;;  %2316 = vst [vmem:[#allocation5 + $0x15c] sm:$0xff] %v2315_v42   ;;  %2320 = vst [vmem:[#allocation5 + $0x164] sm:$0xf] %v2319_v43 }
 0x16a   :  { %2322 = vst [vmem:[#allocation5 + $0x168] sm:$0xf] %v2321_v44  ;;  %v2323_v45 = vld [vmem:[%s15531_s18 + $0x174] sm:$0xf]  ;;  %v2325_v46 = vld [vmem:[%s15531_s18 + $0x168] sm:$0xf] }
 0x16b   :  { %v2327_v47 = vld [vmem:[%s15531_s18 + $0x178] sm:$0xf]  ;;  %2324 = vst [vmem:[#allocation5 + $0x16c] sm:$0xf] %v2323_v45  ;;  %2326 = vst [vmem:[#allocation5 + $0x170] sm:$0xf] %v2325_v46 }
 0x16c   :  { %2328 = vst [vmem:[#allocation5 + $0x174] sm:$0xf] %v2327_v47  ;;  %v2329_v48 = vld [vmem:[%s15531_s18 + $0x16c] sm:$0xf]  ;;  %v2331_v49 = vld [vmem:[%s15531_s18 + $0x17c] sm:$0xf] }
 0x16d   :  { %2330 = vst [vmem:[#allocation5 + $0x178] sm:$0xf] %v2329_v48  ;;  %2332 = vst [vmem:[#allocation5 + $0x17c] sm:$0xf] %v2331_v49 }
 0x16e   :  { %2555 = vsyncadd [#allocation6 + $0x1], 6144  ;;  %s15540_s22 = sld [smem:[#allocation11_spill]]  ;;  %vm2682_vm0 = vcmask 1043456   ;;  %v11200_v52 = vmov 0.0   ;;  %s15541_s23 = sld [smem:[#allocation12_spill]] }
 0x16f   :  { %2570 = vst [vmem:[#allocation3] sm:$0xff] %v11200_v52  ;;  %2571 = vst [vmem:[#allocation3 + $0x8] sm:$0xff] %v11200_v52  ;;  %2751 = vmatprep.mubr.f32.mxu0 %v11200_v52  ;;  %s15542_s3 = sld [smem:[#allocation13_spill]]  ;;  %2916 = vmatprep.mubr.f32.mxu1 %v11200_v52  ;;  %vm2675_vm1 = vcmask 31744   ;;  %v11201_v55 = vmov 0   ;;  %s11202_s0 = smov 16  }
 0x170   :  { %2572 = vst [vmem:[#allocation3 + $0x10] sm:$0xff] %v11200_v52  ;;  %2573 = vst [vmem:[#allocation3 + $0x18] sm:$0xff] %v11200_v52  ;;  %10901 = vset.pattern.permute.xlu0 %v11201_v55  ;;  %10932 = vset.pattern.permute.xlu1 %v11201_v55  ;;  %s11203_s17 = smov 32   ;;  %s11204_s30 = smov 48   ;;  %v3405_v8 = vld [vmem:[%s15517_s4 + $0x10] sm:$0xff]  ;;  %vm2791_vm2 = vcmask 261120  }
 0x171   :  { %2574 = vst [vmem:[#allocation3 + $0x20] sm:$0xff] %v11200_v52  ;;  %2575 = vst [vmem:[#allocation3 + $0x28] sm:$0xff] %v11200_v52  ;;  %s11205_s20 = smov 64   ;;  %vm2806_vm3 = vcmask 392192   ;;  %vm2776_vm4 = vcmask 130048   ;;  %s15543_s2 = sld [smem:[#allocation14_spill]] }
 0x172   :  { %2576 = vst [vmem:[#allocation3 + $0x30] sm:$0xff] %v11200_v52  ;;  %2577 = vst [vmem:[#allocation3 + $0x38] sm:$0xff] %v11200_v52  ;;  %vm2821_vm5 = vcmask 523264   ;;  %s11206_s26 = smov 96   ;;  %vm3431_vm6 = vcmask 785408   ;;  %vm3997_vm7 = vcmask 916480  }
 0x173   :  { %2578 = vst [vmem:[#allocation3 + $0x40] sm:$0xff] %v11200_v52  ;;  %2579 = vst [vmem:[#allocation3 + $0x48] sm:$0xff] %v11200_v52  ;;  %vm4210_vm8 = vcmask 654336  }
 0x174   :  { %v13000_v50 = vld [vmem:[%s15540_s22] sm:$0xff]  ;;  %2580 = vst [vmem:[#allocation3 + $0x50] sm:$0xff] %v11200_v52  ;;  %2581 = vst [vmem:[#allocation3 + $0x58] sm:$0xff] %v11200_v52  ;;  %v2659_v57 = vld [vmem:[%s15541_s23 + $0x8] sm:$0xff] }
 0x175   :  { %v2674_v51 = vcombine.high %v13000_v50, %v13000_v50  ;;  %2582 = vst [vmem:[#allocation3 + $0x60] sm:$0xff] %v11200_v52  ;;  %2583 = vst [vmem:[#allocation3 + $0x68] sm:$0xff] %v11200_v52  ;;  %v2658_v53 = vld [vmem:[%s15541_s23] sm:$0xff]  ;;  %v2662_v56 = vld [vmem:[%s15542_s3 + $0x8] sm:$0xff] }
 0x176   :  { %2584 = vst [vmem:[#allocation3 + $0x70] sm:$0xff] %v11200_v52  ;;  %2585 = vst [vmem:[#allocation3 + $0x78] sm:$0xff] %v11200_v52  ;;  %v2661_v54 = vld [vmem:[%s15542_s3] sm:$0xff] }
 0x177   :  { %2586 = vst [vmem:[#allocation3 + $0x80] sm:$0xff] %v11200_v52  ;;  %2587 = vst [vmem:[#allocation3 + $0x88] sm:$0xff] %v11200_v52  ;;  %9715 = vmatprep.subr.msk.mxu0 %vm2682_vm0, %v2674_v51  ;;  %2665 = vperm.xlu0 %10901, %v2661_v54   ;;  %v2836_v40 = vld [vmem:[%s15543_s2] sm:$0xff]  ;;  %v2837_v47 = vld [vmem:[%s15543_s2 + $0x8] sm:$0xff] }
 0x178   :  { %2588 = vst [vmem:[#allocation3 + $0x90] sm:$0xff] %v11200_v52  ;;  %2589 = vst [vmem:[#allocation3 + $0x98] sm:$0xff] %v11200_v52  ;;  %9716 = vmatpush1.msk.msra.mxu0 %vm2682_vm0, %v13000_v50 }
 0x179   :  { %2590 = vst [vmem:[#allocation3 + $0xa0] sm:$0xff] %v11200_v52  ;;  %2591 = vst [vmem:[#allocation3 + $0xa8] sm:$0xff] %v11200_v52  ;;  %9717 = vmatmul.mubr.msk.f32.vlgmr.msra.gmra.mrb[0].mxu0 %vm2675_vm1, %v2658_v53 }
 0x17a   :  { %2592 = vst [vmem:[#allocation3 + $0xb0] sm:$0xff] %v11200_v52  ;;  %2593 = vst [vmem:[#allocation3 + $0xb8] sm:$0xff] %v11200_v52  ;;  %2757 = vmatprep.mubr.f32.mxu0 %v11200_v52 }
 0x17b   :  { %2594 = vst [vmem:[#allocation3 + $0xc0] sm:$0xff] %v11200_v52  ;;  %2595 = vst [vmem:[#allocation3 + $0xc8] sm:$0xff] %v11200_v52  ;;  %2670 = vperm.xlu0 %10901, %v2662_v56  }
 0x17c   :  { %2596 = vst [vmem:[#allocation3 + $0xd0] sm:$0xff] %v11200_v52  ;;  %2597 = vst [vmem:[#allocation3 + $0xd8] sm:$0xff] %v11200_v52 }
 0x17d   :  { %2598 = vst [vmem:[#allocation3 + $0xe0] sm:$0xff] %v11200_v52  ;;  %2599 = vst [vmem:[#allocation3 + $0xe8] sm:$0xff] %v11200_v52  ;;  %9718 = vmatmul.mubr.msk.f32.gmra.mrb[2].mxu0 %vm2675_vm1, %v2659_v57  ;;  %v2838_v57 = vld [vmem:[%s15543_s2 + $0x10] sm:$0xff] }
 0x17e   :  { %2600 = vst [vmem:[#allocation3 + $0xf0] sm:$0xff] %v11200_v52  ;;  %2601 = vst [vmem:[#allocation3 + $0xf8] sm:$0xff] %v11200_v52  ;;  %3005 = vmatprep.mubr.f32.mxu0 %v11200_v52 }
 0x17f   :  { %2602 = vst [vmem:[#allocation3 + $0x100] sm:$0xff] %v11200_v52  ;;  %2603 = vst [vmem:[#allocation3 + $0x108] sm:$0xff] %v11200_v52 }
 0x180   :  { %2604 = vst [vmem:[#allocation3 + $0x110] sm:$0xff] %v11200_v52  ;;  %2605 = vst [vmem:[#allocation3 + $0x118] sm:$0xff] %v11200_v52 }
 0x181   :  { %2606 = vst [vmem:[#allocation3 + $0x120] sm:$0xff] %v11200_v52  ;;  %2607 = vst [vmem:[#allocation3 + $0x128] sm:$0xff] %v11200_v52 }
 0x182   :  { %2608 = vst [vmem:[#allocation3 + $0x130] sm:$0xff] %v11200_v52  ;;  %2609 = vst [vmem:[#allocation3 + $0x138] sm:$0xff] %v11200_v52 }
 0x183   :  { %2610 = vst [vmem:[#allocation3 + $0x140] sm:$0xff] %v11200_v52  ;;  %2611 = vst [vmem:[#allocation3 + $0x148] sm:$0xff] %v11200_v52 }
 0x184   :  { %2612 = vst [vmem:[#allocation3 + $0x150] sm:$0xff] %v11200_v52  ;;  %2613 = vst [vmem:[#allocation3 + $0x158] sm:$0xff] %v11200_v52 }
 0x185   :  { %2614 = vst [vmem:[#allocation3 + $0x160] sm:$0xff] %v11200_v52  ;;  %2615 = vst [vmem:[#allocation3 + $0x168] sm:$0xff] %v11200_v52 }
 0x186   :  { %2616 = vst [vmem:[#allocation3 + $0x170] sm:$0xff] %v11200_v52  ;;  %2617 = vst [vmem:[#allocation3 + $0x178] sm:$0xff] %v11200_v52 }
 0x187   :  { %2618 = vst [vmem:[#allocation3 + $0x180] sm:$0xff] %v11200_v52  ;;  %2619 = vst [vmem:[#allocation3 + $0x188] sm:$0xff] %v11200_v52 }
 0x188   :  { %2620 = vst [vmem:[#allocation3 + $0x190] sm:$0xff] %v11200_v52  ;;  %2621 = vst [vmem:[#allocation3 + $0x198] sm:$0xff] %v11200_v52 }
 0x189   :  { %2622 = vst [vmem:[#allocation3 + $0x1a0] sm:$0xff] %v11200_v52  ;;  %2623 = vst [vmem:[#allocation3 + $0x1a8] sm:$0xff] %v11200_v52 }
 0x18a   :  { %2624 = vst [vmem:[#allocation3 + $0x1b0] sm:$0xff] %v11200_v52  ;;  %2625 = vst [vmem:[#allocation3 + $0x1b8] sm:$0xff] %v11200_v52 }
 0x18b   :  { %2626 = vst [vmem:[#allocation3 + $0x1c0] sm:$0xff] %v11200_v52  ;;  %2627 = vst [vmem:[#allocation3 + $0x1c8] sm:$0xff] %v11200_v52 }
 0x18c   :  { %2628 = vst [vmem:[#allocation3 + $0x1d0] sm:$0xff] %v11200_v52  ;;  %2629 = vst [vmem:[#allocation3 + $0x1d8] sm:$0xff] %v11200_v52 }
 0x18d   :  { %2630 = vst [vmem:[#allocation3 + $0x1e0] sm:$0xff] %v11200_v52  ;;  %2631 = vst [vmem:[#allocation3 + $0x1e8] sm:$0xff] %v11200_v52 }
 0x18e   :  { %2632 = vst [vmem:[#allocation3 + $0x1f0] sm:$0xff] %v11200_v52  ;;  %2633 = vst [vmem:[#allocation3 + $0x1f8] sm:$0xff] %v11200_v52 }
 0x18f   :  { %2634 = vst [vmem:[#allocation3 + $0x200] sm:$0xff] %v11200_v52  ;;  %2635 = vst [vmem:[#allocation3 + $0x208] sm:$0xff] %v11200_v52 }
 0x190   :  { %2636 = vst [vmem:[#allocation3 + $0x210] sm:$0xff] %v11200_v52  ;;  %2637 = vst [vmem:[#allocation3 + $0x218] sm:$0xff] %v11200_v52 }
 0x191   :  { %2638 = vst [vmem:[#allocation3 + $0x220] sm:$0xff] %v11200_v52  ;;  %2639 = vst [vmem:[#allocation3 + $0x228] sm:$0xff] %v11200_v52 }
 0x192   :  { %2640 = vst [vmem:[#allocation3 + $0x230] sm:$0xff] %v11200_v52  ;;  %2641 = vst [vmem:[#allocation3 + $0x238] sm:$0xff] %v11200_v52 }
 0x193   :  { %2642 = vst [vmem:[#allocation3 + $0x240] sm:$0xff] %v11200_v52  ;;  %2643 = vst [vmem:[#allocation3 + $0x248] sm:$0xff] %v11200_v52 }
 0x194   :  { %2644 = vst [vmem:[#allocation3 + $0x250] sm:$0xff] %v11200_v52  ;;  %2645 = vst [vmem:[#allocation3 + $0x258] sm:$0xff] %v11200_v52 }
 0x195   :  { %2646 = vst [vmem:[#allocation3 + $0x260] sm:$0xff] %v11200_v52  ;;  %2647 = vst [vmem:[#allocation3 + $0x268] sm:$0xff] %v11200_v52 }
 0x196   :  { %2648 = vst [vmem:[#allocation3 + $0x270] sm:$0xff] %v11200_v52  ;;  %2649 = vst [vmem:[#allocation3 + $0x278] sm:$0xff] %v11200_v52 }
 0x197   :  { %2650 = vst [vmem:[#allocation3 + $0x280] sm:$0xff] %v11200_v52  ;;  %2651 = vst [vmem:[#allocation3 + $0x288] sm:$0xff] %v11200_v52 }
 0x198   :  { %2652 = vst [vmem:[#allocation3 + $0x290] sm:$0xff] %v11200_v52  ;;  %2653 = vst [vmem:[#allocation3 + $0x298] sm:$0xff] %v11200_v52 }
 0x199   :  { %2654 = vst [vmem:[#allocation3 + $0x2a0] sm:$0xff] %v11200_v52  ;;  %2655 = vst [vmem:[#allocation3 + $0x2a8] sm:$0xff] %v11200_v52 }
 0x19a   :  { %2656 = vst [vmem:[#allocation3 + $0x2b0] sm:$0xff] %v11200_v52  ;;  %2657 = vst [vmem:[#allocation3 + $0x2b8] sm:$0xff] %v11200_v52 }
 0x19b   :  { %2556 = vst [vmem:[#allocation2] sm:$0xff] %v11200_v52  ;;  %2557 = vst [vmem:[#allocation2 + $0x8] sm:$0xff] %v11200_v52 }
 0x19c   :  { %2558 = vst [vmem:[#allocation2 + $0x10] sm:$0xff] %v11200_v52  ;;  %2559 = vst [vmem:[#allocation2 + $0x18] sm:$0xff] %v11200_v52 }
 0x19d   :  { %2560 = vst [vmem:[#allocation2 + $0x20] sm:$0xff] %v11200_v52  ;;  %2561 = vst [vmem:[#allocation2 + $0x28] sm:$0xff] %v11200_v52 }
 0x19e   :  { %2562 = vst [vmem:[#allocation2 + $0x30] sm:$0xff] %v11200_v52  ;;  %2563 = vst [vmem:[#allocation2 + $0x38] sm:$0xff] %v11200_v52 }
 0x19f   :  { %2564 = vst [vmem:[#allocation2 + $0x40] sm:$0xff] %v11200_v52  ;;  %2565 = vst [vmem:[#allocation2 + $0x48] sm:$0xff] %v11200_v52 }
 0x1a0   :  { %2566 = vst [vmem:[#allocation2 + $0x50] sm:$0xff] %v11200_v52  ;;  %2567 = vst [vmem:[#allocation2 + $0x58] sm:$0xff] %v11200_v52 }
 0x1a1   :  { %2568 = vst [vmem:[#allocation2 + $0x60] sm:$0xff] %v11200_v52  ;;  %2569 = vst [vmem:[#allocation2 + $0x68] sm:$0xff] %v11200_v52 }
 0x1f6   :  { %v2666_v58 = vpop.permute.xlu0 %2665 }
 0x1fa   :  { %v2671_v63 = vpop.permute.xlu0 %2670 }
 0x24c   :  { %v2753_v59 = vpop.f32.mrb[0].mxu0 }
 0x24d   :  { %v2754_v60 = vadd.f32 %v2753_v59, %v2666_v58  ;;  %v2755_v61 = vpop.f32.mrb[1].mxu0  ;;  %v9731_v59 = vld [vmem:[%s15543_s2 + $0x20] sm:$0xff] }
 0x24e   :  { %v2756_v62 = vadd.f32 %v2755_v61, %v2666_v58  ;;  %v2839_v58 = vld [vmem:[%s15543_s2 + $0x18] sm:$0xff]  ;;  %v9733_v61 = vld [vmem:[%s15543_s2 + $0x30] sm:$0xff] }
 0x250   :  { %v2759_v0 = vpop.f32.mrb[2].mxu0  ;;  %v10907_v1 = vpack.i.bf16 %v2756_v62, %v2754_v60 }
 0x251   :  { %v2760_v2 = vadd.f32 %v2759_v0, %v2671_v63  ;;  %v2761_v3 = vpop.f32.mrb[3].mxu0 }
 0x252   :  { %v2762_v4 = vadd.f32 %v2761_v3, %v2671_v63  ;;  %10908 = vrot.lane.b32.xlu0 %v10907_v1, %s11202_s0  ;;  %10903 = vrot.lane.b32.xlu1 %v10907_v1, %s11203_s17  ;;  %v3406_v63 = vld [vmem:[%s15517_s4 + $0x18] sm:$0xff] }
 0x253   :  { %v10922_v5 = vpack.i.bf16 %v2760_v2, %v2754_v60  ;;  %v13132_v6 = vpack.c.bf16 %v2760_v2, %v2754_v60 }
 0x254   :  { %v10912_v7 = vpack.i.bf16 %v2762_v4, %v2760_v2  ;;  %v10927_v9 = vpack.i.bf16 %v2762_v4, %v2756_v62 }
 0x256   :  { %10923 = vrot.lane.b32.xlu0 %v10922_v5, %s11204_s30  ;;  %10913 = vrot.lane.b32.xlu1 %v10912_v7, %s11203_s17 }
 0x25a   :  { %2813 = vrot.lane.b32.xlu0 %v2754_v60, %s11205_s20  ;;  %10918 = vrot.lane.b32.xlu1 %v10912_v7, %s11202_s0  ;;  %v9732_v60 = vld [vmem:[%s15543_s2 + $0x28] sm:$0xff] }
 0x25e   :  { %2817 = vrot.lane.b32.xlu0 %v2760_v2, %s11205_s20  ;;  %2815 = vrot.lane.b32.xlu1 %v2756_v62, %s11205_s20 }
 0x262   :  { %3456 = vperm.xlu0 %10901, %v3405_v8   ;;  %10928 = vrot.lane.b32.xlu1 %v10927_v9, %s11204_s30 }
 0x266   :  { %2819 = vrot.lane.b32.xlu1 %v2762_v4, %s11205_s20 }
 0x26a   :  { %3461 = vperm.xlu1 %10932, %v3406_v63  }
 0x2c4   :  { %v10909_v10 = vpop.permute.xlu0 %10908  ;;  %v10904_v11 = vpop.permute.xlu1 %10903 }
 0x2c5   :  { %v10906_v12 = vunpack.i.h.bf16 %v10904_v11  ;;  %v10905_v13 = vunpack.i.l.bf16 %v10904_v11  ;;  %v10911_v14 = vunpack.i.h.bf16 %v10909_v10  ;;  %v10910_v15 = vunpack.i.l.bf16 %v10909_v10 }
 0x2c7   :  { %v2792_v22 = vsel %vm2791_vm2, %v10905_v13, %v10906_v12  ;;  %v2777_v27 = vsel %vm2776_vm4, %v10910_v15, %v10911_v14  ;;  %v2828_v32 = vsel %vm2776_vm4, %v2756_v62, %v10910_v15  ;;  %v9734_v62 = vld [vmem:[%s15543_s2 + $0x38] sm:$0xff] }
 0x2c8   :  { %v10924_v16 = vpop.permute.xlu0 %10923  ;;  %v10914_v17 = vpop.permute.xlu1 %10913  ;;  %v2830_v34 = vsel %vm2791_vm2, %v2777_v27, %v10905_v13 }
 0x2c9   :  { %v10926_v18 = vunpack.i.h.bf16 %v10924_v16  ;;  %v10925_v19 = vunpack.i.l.bf16 %v10924_v16  ;;  %v10916_v20 = vunpack.i.h.bf16 %v10914_v17  ;;  %v10915_v21 = vunpack.i.l.bf16 %v10914_v17 }
 0x2cb   :  { %v2793_v23 = vsel %vm2791_vm2, %v10915_v21, %v10916_v20  ;;  %v2832_v24 = vsel %vm2806_vm3, %v2792_v22, %v10925_v19 }
 0x2cc   :  { %v10919_v25 = vpop.permute.xlu1 %10918  ;;  %v2833_v26 = vsel %vm2806_vm3, %v2793_v23, %v10926_v18  ;;  %v2814_v38 = vpop.permute.xlu0 %2813 }
 0x2cd   :  { %v10921_v28 = vunpack.i.h.bf16 %v10919_v25  ;;  %v10920_v29 = vunpack.i.l.bf16 %v10919_v25  ;;  %v10362_v30 = vpack.c.bf16 %v2833_v26, %v2832_v24 }
 0x2cf   :  { %v2778_v31 = vsel %vm2776_vm4, %v10920_v29, %v10921_v28  ;;  %10363 = vmatprep.subr.bf16.mxu0 %v10362_v30  ;;  %v2829_v33 = vsel %vm2776_vm4, %v2762_v4, %v10920_v29 }
 0x2d0   :  { %v2816_v35 = vpop.permute.xlu1 %2815  ;;  %v10358_v36 = vpack.c.bf16 %v2829_v33, %v2828_v32  ;;  %v2831_v37 = vsel %vm2791_vm2, %v2778_v31, %v10915_v21  ;;  %v2818_v44 = vpop.permute.xlu0 %2817  ;;  %v3403_v32 = vld [vmem:[%s15517_s4] sm:$0xff]  ;;  %v3404_v33 = vld [vmem:[%s15517_s4 + $0x8] sm:$0xff] }
 0x2d1   :  { %v10364_v39 = vpack.c.bf16 %v2831_v37, %v2830_v34  ;;  %v13172_v51 = vsel %vm2821_vm5, %v2814_v38, %v2816_v35 }
 0x2d2   :  { %10359 = vmatprep.subr.bf16.mxu1 %v10358_v36 }
 0x2d3   :  { %10361 = vmatpush1.bf16.msra.mxu1 %v13132_v6  ;;  %10365 = vmatpush1.bf16.msra.mxu0 %v10364_v39 }
 0x2d4   :  { %v10929_v41 = vpop.permute.xlu1 %10928  ;;  %10371 = vmatprep.subr.bf16.mxu0 %v10358_v36  ;;  %v10936_v36 = vld [vmem:[%s15528_s15 + $0x4] ss:$24 sps:$4 sm:$0xff]  }
 0x2d5   :  { %v10931_v42 = vunpack.i.h.bf16 %v10929_v41  ;;  %v10930_v43 = vunpack.i.l.bf16 %v10929_v41  ;;  %v10937_v41 = vld [vmem:[%s15528_s15 + $0x8] ss:$24 sps:$4 sm:$0xff]  }
 0x2d6   :  { %9719 = vmatmul.mubr.msk.f32.vlgmr.msra.gmra.mrb[0].mxu1 %vm2776_vm4, %v2836_v40  ;;  %9723 = vmatmul.mubr.msk.f32.vlgmr.msra.gmra.mrb[4].mxu0 %vm2776_vm4, %v2836_v40 }
 0x2d7   :  { %v2808_v45 = vsel %vm2806_vm3, %v10926_v18, %v10931_v42  ;;  %v2807_v46 = vsel %vm2806_vm3, %v10925_v19, %v10930_v43  ;;  %10373 = vmatpush1.bf16.msra.mxu0 %v13132_v6  ;;  %2922 = vmatprep.mubr.f32.mxu1 %v11200_v52 }
 0x2d8   :  { %v2820_v48 = vpop.permute.xlu1 %2819  ;;  %3011 = vmatprep.mubr.f32.mxu0 %v11200_v52  ;;  %v2834_v49 = vsel %vm2821_vm5, %v2807_v46, %v2814_v38  ;;  %v2835_v50 = vsel %vm2821_vm5, %v2808_v45, %v2818_v44 }
 0x2d9   :  { %v13175_v53 = vsel %vm2821_vm5, %v2818_v44, %v2820_v48  ;;  %v10368_v56 = vpack.c.bf16 %v2835_v50, %v2834_v49  ;;  %v10942_v44 = vld [vmem:[%s15528_s15 + $0x34] ss:$24 sps:$4 sm:$0xff]   ;;  %v10943_v48 = vld [vmem:[%s15528_s15 + $0x38] ss:$24 sps:$4 sm:$0xff]  }
 0x2da   :  { %v10366_v54 = vpack.c.bf16 %v13175_v53, %v13172_v51  ;;  %9720 = vmatmul.mubr.msk.f32.gmra.mrb[2].mxu1 %vm2776_vm4, %v2837_v47  ;;  %9724 = vmatmul.mubr.msk.f32.gmra.mrb[6].mxu0 %vm2776_vm4, %v2837_v47  ;;  %v10945_v49 = vld [vmem:[%s15528_s15 + $0x3c] ss:$24 sps:$4 sm:$0xff]  }
 0x2db   :  { %2928 = vmatprep.mubr.f32.mxu1 %v11200_v52  ;;  %3017 = vmatprep.mubr.f32.mxu0 %v11200_v52 }
 0x2dc   :  { %10367 = vmatprep.subr.bf16.mxu1 %v10366_v54  ;;  %10379 = vmatprep.subr.bf16.mxu0 %v10366_v54 }
 0x2dd   :  { %10369 = vmatpush1.bf16.msra.mxu1 %v10368_v56 }
 0x2de   :  { %9721 = vmatmul.mubr.msk.f32.gmra.mrb[4].mxu1 %vm2776_vm4, %v2838_v57  ;;  %9725 = vmatmul.mubr.msk.f32.gmra.mrb[8].mxu0 %vm2776_vm4, %v2838_v57 }
 0x2df   :  { %10375 = vmatprep.subr.bf16.mxu1 %v10362_v30  ;;  %2934 = vmatprep.mubr.f32.mxu1 %v11200_v52 }
 0x2e0   :  { %3023 = vmatprep.mubr.f32.mxu0 %v11200_v52 }
 0x2e2   :  { %9722 = vmatmul.mubr.msk.f32.gmra.mrb[6].mxu1 %vm2776_vm4, %v2839_v58  ;;  %9726 = vmatmul.mubr.msk.f32.gmra.mrb[10].mxu0 %vm2776_vm4, %v2839_v58 }
 0x2e3   :  { %3094 = vmatprep.mubr.f32.mxu1 %v11200_v52  ;;  %3200 = vmatprep.mubr.f32.mxu0 %v11200_v52 }
 0x2e6   :  { %9727 = vmatmul.mubr.msk.f32.vlgmr.msra.gmra.mrb[8].mxu1 %vm2776_vm4, %v2836_v40  ;;  %9735 = vmatmul.mubr.msk.f32.vlgmr.msra.gmra.mrb[12].mxu0 %vm2776_vm4, %v9731_v59  ;;  %v10939_v40 = vld [vmem:[%s15528_s15 + $0xc] ss:$24 sps:$4 sm:$0xff]  }
 0x2e7   :  { %10377 = vmatpush1.bf16.msra.mxu1 %v10364_v39  ;;  %10381 = vmatpush1.bf16.msra.mxu0 %v10368_v56  ;;  %v10934_v39 = vld [vmem:[%s15528_s15] ss:$24 sps:$4 sm:$0xff]   ;;  %v10948_v56 = vld [vmem:[%s15528_s15 + $0x64] ss:$24 sps:$4 sm:$0xff]  }
 0x2e8   :  { %3206 = vmatprep.mubr.f32.mxu0 %v11200_v52  ;;  %3100 = vmatprep.mubr.f32.mxu1 %v11200_v52 }
 0x2e9   :  { %4001 = vmatprep.subr.bf16.mxu1 %v10936_v36  ;;  %4044 = vmatprep.subr.bf16.mxu0 %v10939_v40  ;;  %v10964_v36 = vld [vmem:[%s15528_s15 + $0xf0] ss:$24 sps:$4 sm:$0xff]   ;;  %v10970_v40 = vld [vmem:[%s15528_s15 + $0x120] ss:$24 sps:$4 sm:$0xff]  }
 0x2ea   :  { %9736 = vmatmul.mubr.msk.f32.gmra.mrb[14].mxu0 %vm2776_vm4, %v9732_v60  ;;  %9728 = vmatmul.mubr.msk.f32.gmra.mrb[10].mxu1 %vm2776_vm4, %v2837_v47  ;;  %v10940_v47 = vld [vmem:[%s15528_s15 + $0x30] ss:$24 sps:$4 sm:$0xff]  }
 0x2eb   :  { %3212 = vmatprep.mubr.f32.mxu0 %v11200_v52  ;;  %3106 = vmatprep.mubr.f32.mxu1 %v11200_v52 }
 0x2ee   :  { %9737 = vmatmul.mubr.msk.f32.gmra.mrb[16].mxu0 %vm2776_vm4, %v9733_v61  ;;  %9729 = vmatmul.mubr.msk.f32.gmra.mrb[12].mxu1 %vm2776_vm4, %v2838_v57 }
 0x2ef   :  { %3218 = vmatprep.mubr.f32.mxu0 %v11200_v52  ;;  %3112 = vmatprep.mubr.f32.mxu1 %v11200_v52 }
 0x2f2   :  { %9738 = vmatmul.mubr.msk.f32.gmra.mrb[18].mxu0 %vm2776_vm4, %v9734_v62  ;;  %9730 = vmatmul.mubr.msk.f32.gmra.mrb[14].mxu1 %vm2776_vm4, %v2839_v58 }
 0x2f3   :  { %3289 = vmatprep.mubr.f32.mxu1 %v11200_v52  ;;  %3378 = vmatprep.mubr.f32.mxu0 %v11200_v52 }
 0x2f6   :  { %9739 = vmatmul.mubr.msk.f32.vlgmr.msra.gmra.mrb[16].mxu1 %vm2776_vm4, %v9731_v59  ;;  %9743 = vmatmul.mubr.msk.f32.vlgmr.msra.gmra.mrb[20].mxu0 %vm2776_vm4, %v9731_v59  ;;  %v10946_v59 = vld [vmem:[%s15528_s15 + $0x60] ss:$24 sps:$4 sm:$0xff]  }
 0x2f7   :  { %3295 = vmatprep.mubr.f32.mxu1 %v11200_v52  ;;  %3384 = vmatprep.mubr.f32.mxu0 %v11200_v52 }
 0x2f8   :  { %4002 = vmatpush1.bf16.msra.mxu1 %v10934_v39  ;;  %4045 = vmatpush1.bf16.msra.mxu0 %v10937_v41  ;;  %v10972_v39 = vld [vmem:[%s15528_s15 + $0x124] ss:$24 sps:$4 sm:$0xff]  }
 0x2f9   :  { %4003 = vmatprep.subr.bf16.mxu1 %v10942_v44  ;;  %4046 = vmatprep.subr.bf16.mxu0 %v10945_v49  ;;  %v10975_v41 = vld [vmem:[%s15528_s15 + $0x12c] ss:$24 sps:$4 sm:$0xff]   ;;  %v13420_v44 = vpop.permute.xlu0 %3456 }
 0x2fa   :  { %9740 = vmatmul.mubr.msk.f32.gmra.mrb[18].mxu1 %vm2776_vm4, %v9732_v60  ;;  %9744 = vmatmul.mubr.msk.f32.gmra.mrb[22].mxu0 %vm2776_vm4, %v9732_v60  ;;  %v10951_v60 = vld [vmem:[%s15528_s15 + $0x6c] ss:$24 sps:$4 sm:$0xff]  }
 0x2fb   :  { %3301 = vmatprep.mubr.f32.mxu1 %v11200_v52  ;;  %3390 = vmatprep.mubr.f32.mxu0 %v11200_v52 }
 0x2fc   :  { %4004 = vmatpush1.bf16.msra.mxu1 %v10940_v47  ;;  %4047 = vmatpush1.bf16.msra.mxu0 %v10943_v48 }
 0x2fd   :  { %4005 = vmatprep.subr.bf16.mxu1 %v10948_v56  ;;  %4048 = vmatprep.subr.bf16.mxu0 %v10951_v60 }
 0x2fe   :  { %9741 = vmatmul.mubr.msk.f32.gmra.mrb[20].mxu1 %vm2776_vm4, %v9733_v61  ;;  %9745 = vmatmul.mubr.msk.f32.gmra.mrb[24].mxu0 %vm2776_vm4, %v9733_v61  ;;  %v10949_v61 = vld [vmem:[%s15528_s15 + $0x68] ss:$24 sps:$4 sm:$0xff]  }
 0x2ff   :  { %3307 = vmatprep.mubr.f32.mxu1 %v11200_v52  ;;  %3396 = vmatprep.mubr.f32.mxu0 %v11200_v52 }
 0x300   :  { %4006 = vmatpush1.bf16.msra.mxu1 %v10946_v59  ;;  %4049 = vmatpush1.bf16.msra.mxu0 %v10949_v61 }
 0x302   :  { %9742 = vmatmul.mubr.msk.f32.gmra.mrb[22].mxu1 %vm2776_vm4, %v9734_v62  ;;  %9746 = vmatmul.mubr.msk.f32.gmra.mrb[26].mxu0 %vm2776_vm4, %v9734_v62 }
 0x303   :  { %4033 = vmatprep.mubr.bf16.mxu1 %v11201_v55  ;;  %4076 = vmatprep.mubr.bf16.mxu0 %v11201_v55 }
 0x3a9   :  { %v13244_v0 = vpop.f32.mrb[4].mxu0  ;;  %v13246_v1 = vpop.f32.mrb[0].mxu1 }
 0x3aa   :  { %v13248_v2 = vpop.f32.mrb[5].mxu0  ;;  %v13250_v3 = vpop.f32.mrb[1].mxu1 }
 0x3ad   :  { %v13252_v4 = vpop.f32.mrb[6].mxu0  ;;  %v13254_v5 = vpop.f32.mrb[2].mxu1 }
 0x3ae   :  { %v13256_v6 = vpop.f32.mrb[7].mxu0  ;;  %v13258_v7 = vpop.f32.mrb[3].mxu1 }
 0x3b1   :  { %v13260_v8 = vpop.f32.mrb[8].mxu0  ;;  %v13262_v9 = vpop.f32.mrb[4].mxu1 }
 0x3b2   :  { %v13264_v10 = vpop.f32.mrb[9].mxu0  ;;  %v13266_v11 = vpop.f32.mrb[5].mxu1 }
 0x3b5   :  { %v13268_v12 = vpop.f32.mrb[10].mxu0  ;;  %v13270_v13 = vpop.f32.mrb[6].mxu1 }
 0x3b6   :  { %v13272_v14 = vpop.f32.mrb[11].mxu0  ;;  %v13274_v15 = vpop.f32.mrb[7].mxu1 }
 0x3b9   :  { %v3202_v16 = vpop.f32.mrb[12].mxu0  ;;  %v13276_v17 = vpop.f32.mrb[8].mxu1 }
 0x3ba   :  { %v3204_v18 = vpop.f32.mrb[13].mxu0  ;;  %v13278_v19 = vpop.f32.mrb[9].mxu1 }
 0x3bd   :  { %v3208_v20 = vpop.f32.mrb[14].mxu0  ;;  %v13280_v21 = vpop.f32.mrb[10].mxu1 }
 0x3be   :  { %v3210_v22 = vpop.f32.mrb[15].mxu0  ;;  %v13282_v23 = vpop.f32.mrb[11].mxu1 }
 0x3c1   :  { %v3214_v24 = vpop.f32.mrb[16].mxu0  ;;  %v13284_v25 = vpop.f32.mrb[12].mxu1 }
 0x3c2   :  { %3423 = vrot.lane.b32.xlu0 %v3214_v24, %s11206_s26  ;;  %v3216_v26 = vpop.f32.mrb[17].mxu0  ;;  %v13287_v27 = vpop.f32.mrb[13].mxu1  ;;  %v10957_v24 = vld [vmem:[%s15528_s15 + $0x9c] ss:$24 sps:$4 sm:$0xff]  }
 0x3c3   :  { %3425 = vrot.lane.b32.xlu1 %v3216_v26, %s11206_s26  ;;  %v10955_v26 = vld [vmem:[%s15528_s15 + $0x98] ss:$24 sps:$4 sm:$0xff]   ;;  %4050 = vmatprep.subr.bf16.mxu0 %v10957_v24 }
 0x3c4   :  { %4051 = vmatpush1.bf16.msra.mxu0 %v10955_v26 }
 0x3c5   :  { %v3220_v28 = vpop.f32.mrb[18].mxu0  ;;  %v13290_v29 = vpop.f32.mrb[14].mxu1 }
 0x3c6   :  { %3427 = vrot.lane.b32.xlu0 %v3220_v28, %s11206_s26  ;;  %v3222_v30 = vpop.f32.mrb[19].mxu0  ;;  %v13293_v31 = vpop.f32.mrb[15].mxu1  ;;  %v10960_v28 = vld [vmem:[%s15528_s15 + $0xc4] ss:$24 sps:$4 sm:$0xff]  }
 0x3c7   :  { %3429 = vrot.lane.b32.xlu1 %v3222_v30, %s11206_s26  ;;  %v10958_v30 = vld [vmem:[%s15528_s15 + $0xc0] ss:$24 sps:$4 sm:$0xff]  }
 0x3c9   :  { %v3291_v34 = vpop.f32.mrb[16].mxu1  ;;  %v13302_v35 = vpop.f32.mrb[20].mxu0 }
 0x3ca   :  { %3446 = vperm.xlu0 %10901, %v3403_v32   ;;  %v3293_v37 = vpop.f32.mrb[17].mxu1  ;;  %v13307_v38 = vpop.f32.mrb[21].mxu0  ;;  %v10963_v32 = vld [vmem:[%s15528_s15 + $0xcc] ss:$24 sps:$4 sm:$0xff]  }
 0x3cb   :  { %3451 = vperm.xlu1 %10932, %v3404_v33   ;;  %v10961_v33 = vld [vmem:[%s15528_s15 + $0xc8] ss:$24 sps:$4 sm:$0xff]   ;;  %4052 = vmatprep.subr.bf16.mxu0 %v10963_v32 }
 0x3cc   :  { %4053 = vmatpush1.bf16.msra.mxu0 %v10961_v33 }
 0x3cd   :  { %v3297_v42 = vpop.f32.mrb[18].mxu1  ;;  %v3386_v43 = vpop.f32.mrb[22].mxu0 }
 0x3ce   :  { %3415 = vrot.lane.b32.xlu0 %v3202_v16, %s11206_s26  ;;  %v3299_v45 = vpop.f32.mrb[19].mxu1  ;;  %v3388_v46 = vpop.f32.mrb[23].mxu0  ;;  %v10954_v16 = vld [vmem:[%s15528_s15 + $0x94] ss:$24 sps:$4 sm:$0xff]  }
 0x3cf   :  { %3417 = vrot.lane.b32.xlu1 %v3204_v18, %s11206_s26  ;;  %4007 = vmatprep.subr.bf16.mxu1 %v10954_v16 }
 0x3d1   :  { %v3303_v50 = vpop.f32.mrb[20].mxu1  ;;  %v13332_v54 = vpop.f32.mrb[24].mxu0 }
 0x3d2   :  { %3419 = vrot.lane.b32.xlu0 %v3208_v20, %s11206_s26  ;;  %v3305_v57 = vpop.f32.mrb[21].mxu1  ;;  %v3394_v58 = vpop.f32.mrb[25].mxu0 }
 0x3d3   :  { %3421 = vrot.lane.b32.xlu1 %v3210_v22, %s11206_s26  ;;  %v10952_v22 = vld [vmem:[%s15528_s15 + $0x90] ss:$24 sps:$4 sm:$0xff]  }
 0x3d4   :  { %4008 = vmatpush1.bf16.msra.mxu1 %v10952_v22 }
 0x3d5   :  { %v3309_v62 = vpop.f32.mrb[22].mxu1  ;;  %v3398_v63 = vpop.f32.mrb[26].mxu0  ;;  %4009 = vmatprep.subr.bf16.mxu1 %v10960_v28 }
 0x3d6   :  { %3488 = vrot.lane.b32.xlu0 %v3291_v34, %s11206_s26  ;;  %v3311_v18 = vpop.f32.mrb[23].mxu1  ;;  %v3400_v20 = vpop.f32.mrb[27].mxu0  ;;  %v10966_v34 = vld [vmem:[%s15528_s15 + $0xf4] ss:$24 sps:$4 sm:$0xff]  }
 0x3d7   :  { %3490 = vrot.lane.b32.xlu1 %v3297_v42, %s11206_s26  ;;  %v10978_v42 = vld [vmem:[%s15528_s15 + $0x14] ss:$24 sps:$4 sm:$0xff]  }
 0x3d8   :  { %4010 = vmatpush1.bf16.msra.mxu1 %v10958_v30 }
 0x3d9   :  { %4011 = vmatprep.subr.bf16.mxu1 %v10966_v34 }
 0x3da   :  { %3532 = vrot.lane.b32.xlu0 %v3293_v37, %s11206_s26  ;;  %v10969_v37 = vld [vmem:[%s15528_s15 + $0xfc] ss:$24 sps:$4 sm:$0xff]  }
 0x3db   :  { %3534 = vrot.lane.b32.xlu1 %v3299_v45, %s11206_s26  ;;  %4054 = vmatprep.subr.bf16.mxu0 %v10969_v37 }
 0x3dc   :  { %4012 = vmatpush1.bf16.msra.mxu1 %v10964_v36 }
 0x3dd   :  { %4013 = vmatprep.subr.bf16.mxu1 %v10972_v39 }
 0x3de   :  { %3604 = vrot.lane.b32.xlu0 %v13302_v35, %s11206_s26  ;;  %v10967_v35 = vld [vmem:[%s15528_s15 + $0xf8] ss:$24 sps:$4 sm:$0xff]  }
 0x3df   :  { %3606 = vrot.lane.b32.xlu1 %v3386_v43, %s11206_s26  ;;  %4055 = vmatpush1.bf16.msra.mxu0 %v10967_v35  ;;  %v13418_v43 = vpop.permute.xlu1 %3461 }
 0x3e0   :  { %4014 = vmatpush1.bf16.msra.mxu1 %v10970_v40  ;;  %4056 = vmatprep.subr.bf16.mxu0 %v10975_v41 }
 0x3e1   :  { %4087 = vmatprep.subr.bf16.mxu1 %v10978_v42 }
 0x3e2   :  { %3676 = vrot.lane.b32.xlu0 %v13307_v38, %s11206_s26  ;;  %v10973_v38 = vld [vmem:[%s15528_s15 + $0x128] ss:$24 sps:$4 sm:$0xff]  }
 0x3e3   :  { %3678 = vrot.lane.b32.xlu1 %v3388_v46, %s11206_s26  ;;  %4057 = vmatpush1.bf16.msra.mxu0 %v10973_v38 }
 0x3e6   :  { %3492 = vrot.lane.b32.xlu0 %v3303_v50, %s11206_s26 }
 0x3e7   :  { %3494 = vrot.lane.b32.xlu1 %v3309_v62, %s11206_s26 }
 0x3ea   :  { %3536 = vrot.lane.b32.xlu0 %v3305_v57, %s11206_s26 }
 0x3eb   :  { %3538 = vrot.lane.b32.xlu1 %v3311_v18, %s11206_s26 }
 0x3ee   :  { %3608 = vrot.lane.b32.xlu0 %v13332_v54, %s11206_s26 }
 0x3ef   :  { %3610 = vrot.lane.b32.xlu1 %v3398_v63, %s11206_s26 }
 0x3f2   :  { %3680 = vrot.lane.b32.xlu0 %v3394_v58, %s11206_s26 }
 0x3f3   :  { %3682 = vrot.lane.b32.xlu1 %v3400_v20, %s11206_s26 }
 0x434   :  { %v3424_v45 = vpop.permute.xlu0 %3423 }
 0x435   :  { %v13422_v46 = vpop.permute.xlu1 %3425 }
 0x436   :  { %v3434_v47 = vsel %vm3431_vm6, %v3424_v45, %v13422_v46 }
 0x437   :  { %v3442_v48 = vadd.f32 %v3434_v47, %v13262_v9 }
 0x438   :  { %v3428_v49 = vpop.permute.xlu0 %3427 }
 0x439   :  { %v13427_v50 = vpop.permute.xlu1 %3429  ;;  %v3466_v54 = vadd.f32 %v13420_v44, %v3442_v48 }
 0x43a   :  { %v3435_v56 = vsel %vm3431_vm6, %v3428_v49, %v13427_v50 }
 0x43b   :  { %v3443_v57 = vadd.f32 %v3435_v56, %v13270_v13  ;;  %v9747_v58 = vmul.f32 -1.442695, %v3466_v54 }
 0x43d   :  { %v3467_v59 = vadd.f32 %v13418_v43, %v3443_v57  ;;  %10997 = vpow2.f32 %v9747_v58 }
 0x43f   :  { %v9748_v60 = vmul.f32 -1.442695, %v3467_v59 }
 0x441   :  { %10999 = vpow2.f32 %v9748_v60 }
 0x447   :  { %v10998_v9 = vpop.eup %10997 }
 0x448   :  { %v3476_v18 = vadd.f32 1.0, %v10998_v9 }
 0x449   :  { %v13434_v61 = vpop.permute.xlu0 %3446 }
 0x44a   :  { %v13436_v62 = vpop.permute.xlu1 %3451  ;;  %11001 = vrcp.f32 %v3476_v18 }
 0x44b   :  { %v11000_v22 = vpop.eup %10999 }
 0x44c   :  { %v3477_v30 = vadd.f32 1.0, %v11000_v22 }
 0x44d   :  { %v3416_v63 = vpop.permute.xlu0 %3415 }
 0x44e   :  { %v3418_v16 = vpop.permute.xlu1 %3417 }
 0x44f   :  { %v3432_v20 = vsel %vm3431_vm6, %v3416_v63, %v3418_v16 }
 0x450   :  { %v3440_v24 = vadd.f32 %v3432_v20, %v13246_v1 }
 0x451   :  { %v3420_v13 = vpop.permute.xlu0 %3419 }
 0x452   :  { %v3464_v26 = vadd.f32 %v13434_v61, %v3440_v24  ;;  %v3422_v28 = vpop.permute.xlu1 %3421 }
 0x453   :  { %v3433_v32 = vsel %vm3431_vm6, %v3420_v13, %v3422_v28 }
 0x454   :  { %11003 = vtanh.f32 %v3464_v26  ;;  %v3441_v33 = vadd.f32 %v3433_v32, %v13254_v5  ;;  %v11002_v56 = vpop.eup %11001 }
 0x455   :  { %v3489_v34 = vpop.permute.xlu0 %3488  ;;  %11005 = vrcp.f32 %v3477_v30 }
 0x456   :  { %v3465_v36 = vadd.f32 %v13436_v62, %v3441_v33  ;;  %v3496_v37 = vsel %vm3431_vm6, %v3418_v16, %v3489_v34  ;;  %v3491_v35 = vpop.permute.xlu1 %3490 }
 0x457   :  { %v3504_v1 = vadd.f32 %v3496_v37, %v13250_v3  ;;  %v3497_v39 = vsel %vm3431_vm6, %v3422_v28, %v3491_v35 }
 0x458   :  { %11007 = vtanh.f32 %v3465_v36  ;;  %v3505_v40 = vadd.f32 %v3497_v39, %v13258_v7 }
 0x459   :  { %v3508_v41 = vadd.f32 %v3504_v1, %v13434_v61  ;;  %v3533_v38 = vpop.permute.xlu0 %3532 }
 0x45a   :  { %v3509_v42 = vadd.f32 %v3505_v40, %v13436_v62  ;;  %v3540_v5 = vsel %vm3431_vm6, %v3489_v34, %v3533_v38  ;;  %v3553_v45 = vadd.f32 %v3533_v38, %v13248_v2  ;;  %v3535_v47 = vpop.permute.xlu1 %3534 }
 0x45b   :  { %v3552_v48 = vadd.f32 %v3540_v5, %v13244_v0  ;;  %v3541_v49 = vsel %vm3431_vm6, %v3491_v35, %v3535_v47  ;;  %v3555_v3 = vadd.f32 %v3535_v47, %v13256_v6  ;;  %11009 = vtanh.f32 %v3508_v41 }
 0x45c   :  { %v3561_v54 = vadd.f32 %v3553_v45, %v13434_v61  ;;  %v3554_v7 = vadd.f32 %v3541_v49, %v13252_v4  ;;  %11011 = vtanh.f32 %v3509_v42 }
 0x45d   :  { %v3560_v57 = vadd.f32 %v3552_v48, %v13434_v61  ;;  %v3563_v58 = vadd.f32 %v3555_v3, %v13436_v62  ;;  %v3605_v59 = vpop.permute.xlu0 %3604 }
 0x45e   :  { %v11004_v60 = vpop.eup %11003  ;;  %v3562_v9 = vadd.f32 %v3554_v7, %v13436_v62  ;;  %v3612_v0 = vsel %vm3431_vm6, %v3533_v38, %v3605_v59  ;;  %v3625_v63 = vadd.f32 %v3605_v59, %v13276_v17  ;;  %v3607_v16 = vpop.permute.xlu1 %3606  ;;  %11013 = vtanh.f32 %v3561_v54  ;;  %v10984_v7 = vld [vmem:[%s15528_s15 + $0x74] ss:$24 sps:$4 sm:$0xff]  }
 0x45f   :  { %v3482_v18 = vmul.f32 %v11004_v60, %v11002_v56  ;;  %v3624_v20 = vadd.f32 %v3612_v0, %v13248_v2  ;;  %v3613_v4 = vsel %vm3431_vm6, %v3535_v47, %v3607_v16  ;;  %v3627_v13 = vadd.f32 %v3607_v16, %v13280_v21  ;;  %v11006_v26 = vpop.eup %11005 }
 0x460   :  { %v3633_v22 = vadd.f32 %v3625_v63, %v13434_v61  ;;  %v3626_v24 = vadd.f32 %v3613_v4, %v13256_v6  ;;  %11015 = vtanh.f32 %v3560_v57 }
 0x461   :  { %4130 = vst.msk [vmem:[#allocation2] sm:$0xff] %vm3997_vm7, %v3482_v18  ;;  %v3632_v28 = vadd.f32 %v3624_v20, %v13434_v61  ;;  %v3677_v30 = vpop.permute.xlu0 %3676  ;;  %v3635_v2 = vadd.f32 %v3627_v13, %v13436_v62  ;;  %11017 = vtanh.f32 %v3562_v9 }
 0x462   :  { %v11008_v32 = vpop.eup %11007  ;;  %v3634_v33 = vadd.f32 %v3626_v24, %v13436_v62  ;;  %v3684_v34 = vsel %vm3431_vm6, %v3605_v59, %v3677_v30  ;;  %v3679_v36 = vpop.permute.xlu1 %3678  ;;  %v3697_v35 = vadd.f32 %v3677_v30, %v13278_v19  ;;  %11019 = vtanh.f32 %v3563_v58  ;;  %v10987_v30 = vld [vmem:[%s15528_s15 + $0xa4] ss:$24 sps:$4 sm:$0xff]  }
 0x463   :  { %v3483_v37 = vmul.f32 %v11008_v32, %v11006_v26  ;;  %v3696_v6 = vadd.f32 %v3684_v34, %v13276_v17  ;;  %v3685_v1 = vsel %vm3431_vm6, %v3607_v16, %v3679_v36  ;;  %v3699_v39 = vadd.f32 %v3679_v36, %v13282_v23  ;;  %v10976_v17 = vld [vmem:[%s15528_s15 + $0x10] ss:$24 sps:$4 sm:$0xff]  }
 0x464   :  { %v3705_v41 = vadd.f32 %v3697_v35, %v13434_v61  ;;  %v3698_v38 = vadd.f32 %v3685_v1, %v13280_v21  ;;  %11021 = vtanh.f32 %v3633_v22  ;;  %v10982_v22 = vld [vmem:[%s15528_s15 + $0x70] ss:$24 sps:$4 sm:$0xff]  }
 0x465   :  { %4131 = vst.msk [vmem:[#allocation2 + $0x8] sm:$0xff] %vm3997_vm7, %v3483_v37  ;;  %v13478_v40 = vadd.f32 %v3696_v6, %v13434_v61  ;;  %v3493_v42 = vpop.permute.xlu0 %3492  ;;  %v13486_v19 = vadd.f32 %v3699_v39, %v13436_v62  ;;  %v13490_v45 = vpack.c.bf16 %v3483_v37, %v3482_v18  ;;  %v10981_v61 = vld [vmem:[%s15528_s15 + $0x44] ss:$24 sps:$4 sm:$0xff]   ;;  %11023 = vtanh.f32 %v3632_v28  ;;  %v13517_v56 = vpop.eup %11009 }
 0x466   :  { %v3498_v23 = vsel %vm3431_vm6, %v13422_v46, %v3493_v42  ;;  %v3495_v5 = vpop.permute.xlu1 %3494  ;;  %v13496_v21 = vadd.f32 %v3698_v38, %v13436_v62  ;;  %11025 = vtanh.f32 %v3634_v33  ;;  %v13522_v9 = vpop.eup %11011 }
 0x467   :  { %v3506_v47 = vadd.f32 %v3498_v23, %v13266_v11  ;;  %v3499_v48 = vsel %vm3431_vm6, %v13427_v50, %v3495_v5  ;;  %9805 = vmatmul.mubr.msk.bf16.vlgmr.msra.gmra.mrb[24].mxu1 %vm3997_vm7, %v13490_v45  ;;  %9806 = vmatmul.mubr.msk.bf16.vlgmr.msra.gmra.mrb[28].mxu0 %vm3997_vm7, %v13490_v45  ;;  %v10979_v11 = vld [vmem:[%s15528_s15 + $0x40] ss:$24 sps:$4 sm:$0xff]   ;;  %11027 = vtanh.f32 %v3635_v2 }
 0x468   :  { %v3507_v49 = vadd.f32 %v3499_v48, %v13274_v15  ;;  %4088 = vmatpush1.bf16.msra.mxu1 %v10976_v17  ;;  %4119 = vmatprep.mubr.bf16.mxu1 %v11201_v55  ;;  %11029 = vtanh.f32 %v3705_v41  ;;  %v13526_v18 = vpop.eup %11013  ;;  %v10985_v17 = vld [vmem:[%s15528_s15 + $0xa0] ss:$24 sps:$4 sm:$0xff]  }
 0x469   :  { %v3510_v46 = vadd.f32 %v3506_v47, %v13420_v44  ;;  %v3537_v62 = vpop.permute.xlu0 %3536  ;;  %4089 = vmatprep.subr.bf16.mxu1 %v10981_v61 }
 0x46a   :  { %v3511_v15 = vadd.f32 %v3507_v49, %v13418_v43  ;;  %v3542_v50 = vsel %vm3431_vm6, %v3493_v42, %v3537_v62  ;;  %v3557_v3 = vadd.f32 %v3537_v62, %v13264_v10  ;;  %v3539_v54 = vpop.permute.xlu1 %3538  ;;  %v13533_v24 = vpop.eup %11015 }
 0x46b   :  { %v9749_v57 = vmul.f32 -1.442695, %v3510_v46  ;;  %v3556_v58 = vadd.f32 %v3542_v50, %v13260_v8  ;;  %v3543_v59 = vsel %vm3431_vm6, %v3495_v5, %v3539_v54  ;;  %v3559_v60 = vadd.f32 %v3539_v54, %v13272_v14  ;;  %v13540_v32 = vpop.eup %11017 }
 0x46c   :  { %v9750_v0 = vmul.f32 -1.442695, %v3511_v15  ;;  %v3565_v63 = vadd.f32 %v3557_v3, %v13420_v44  ;;  %v3558_v16 = vadd.f32 %v3543_v59, %v13268_v12  ;;  %4090 = vmatpush1.bf16.msra.mxu1 %v10979_v11  ;;  %v13544_v37 = vpop.eup %11019 }
 0x46d   :  { %11031 = vpow2.f32 %v9749_v57  ;;  %v3564_v20 = vadd.f32 %v3556_v58, %v13420_v44  ;;  %v3567_v4 = vadd.f32 %v3559_v60, %v13418_v43  ;;  %v3609_v8 = vpop.permute.xlu0 %3608  ;;  %4091 = vmatprep.subr.bf16.mxu1 %v10984_v7  ;;  %v10988_v58 = vld [vmem:[%s15528_s15 + $0xd0] ss:$24 sps:$4 sm:$0xff]  }
 0x46e   :  { %11033 = vpow2.f32 %v9750_v0  ;;  %v9752_v13 = vmul.f32 -1.442695, %v3565_v63  ;;  %v3566_v26 = vadd.f32 %v3558_v16, %v13418_v43  ;;  %v3614_v12 = vsel %vm3431_vm6, %v3537_v62, %v3609_v8  ;;  %v3611_v28 = vpop.permute.xlu1 %3610  ;;  %v13548_v39 = vpop.eup %11021 }
 0x46f   :  { %v9751_v33 = vmul.f32 -1.442695, %v3564_v20  ;;  %v9754_v2 = vmul.f32 -1.442695, %v3567_v4  ;;  %v3628_v34 = vadd.f32 %v3614_v12, %v13264_v10  ;;  %v3629_v36 = vadd.f32 %v3609_v8, %v13284_v25  ;;  %v13556_v23 = vpop.eup %11023 }
 0x470   :  { %11035 = vpow2.f32 %v9752_v13  ;;  %v9753_v6 = vmul.f32 -1.442695, %v3566_v26  ;;  %v3615_v35 = vsel %vm3431_vm6, %v3539_v54, %v3611_v28  ;;  %v3631_v1 = vadd.f32 %v3611_v28, %v13290_v29  ;;  %4092 = vmatpush1.bf16.msra.mxu1 %v10982_v22  ;;  %v13564_v49 = vpop.eup %11025  ;;  %v10996_v13 = vld [vmem:[%s15528_s15 + $0x134] ss:$24 sps:$4 sm:$0xff]  }
 0x471   :  { %11037 = vpow2.f32 %v9751_v33  ;;  %v3636_v41 = vadd.f32 %v3628_v34, %v13420_v44  ;;  %v3637_v38 = vadd.f32 %v3629_v36, %v13420_v44  ;;  %v3630_v42 = vadd.f32 %v3615_v35, %v13272_v14  ;;  %v3681_v10 = vpop.permute.xlu0 %3680  ;;  %4093 = vmatprep.subr.bf16.mxu1 %v10987_v30  ;;  %v10990_v14 = vld [vmem:[%s15528_s15 + $0xd4] ss:$24 sps:$4 sm:$0xff]   ;;  %v13567_v15 = vpop.eup %11027 }
 0x472   :  { %11039 = vpow2.f32 %v9753_v6  ;;  %v3639_v5 = vadd.f32 %v3631_v1, %v13418_v43  ;;  %v3686_v61 = vsel %vm3431_vm6, %v3609_v8, %v3681_v10  ;;  %v3701_v47 = vadd.f32 %v3681_v10, %v13287_v27  ;;  %v3683_v48 = vpop.permute.xlu1 %3682  ;;  %v13576_v59 = vpop.eup %11029  ;;  %v10994_v6 = vld [vmem:[%s15528_s15 + $0x130] ss:$24 sps:$4 sm:$0xff]  }
 0x473   :  { %11041 = vpow2.f32 %v9754_v2  ;;  %v9755_v46 = vmul.f32 -1.442695, %v3636_v41  ;;  %v9756_v62 = vmul.f32 -1.442695, %v3637_v38  ;;  %v3638_v11 = vadd.f32 %v3630_v42, %v13418_v43 }
 0x474   :  { %v9758_v50 = vmul.f32 -1.442695, %v3639_v5  ;;  %v3700_v3 = vadd.f32 %v3686_v61, %v13284_v25  ;;  %v3709_v27 = vadd.f32 %v3701_v47, %v13420_v44  ;;  %v3687_v54 = vsel %vm3431_vm6, %v3611_v28, %v3683_v48  ;;  %4094 = vmatpush1.bf16.msra.mxu1 %v10985_v17  ;;  %v10993_v25 = vld [vmem:[%s15528_s15 + $0x104] ss:$24 sps:$4 sm:$0xff]  }
 0x475   :  { %11043 = vpow2.f32 %v9755_v46  ;;  %v9757_v7 = vmul.f32 -1.442695, %v3638_v11  ;;  %v3702_v57 = vadd.f32 %v3687_v54, %v13290_v29  ;;  %4095 = vmatprep.subr.bf16.mxu1 %v10990_v14  ;;  %v3703_v28 = vadd.f32 %v3683_v48, %v13293_v31 }
 0x476   :  { %11045 = vpow2.f32 %v9756_v62  ;;  %v3708_v60 = vadd.f32 %v3700_v3, %v13420_v44  ;;  %v9760_v0 = vmul.f32 -1.442695, %v3709_v27  ;;  %v10991_v44 = vld [vmem:[%s15528_s15 + $0x100] ss:$24 sps:$4 sm:$0xff]   ;;  %s11207_s15 = smov 80  }
 0x477   :  { %v11032_v63 = vpop.eup %11031  ;;  %11047 = vpow2.f32 %v9757_v7  ;;  %v3710_v8 = vadd.f32 %v3702_v57, %v13418_v43  ;;  %v3711_v41 = vadd.f32 %v3703_v28, %v13418_v43 }
 0x478   :  { %v11034_v16 = vpop.eup %11033  ;;  %v3520_v29 = vadd.f32 1.0, %v11032_v63  ;;  %11049 = vpow2.f32 %v9758_v50  ;;  %v9759_v20 = vmul.f32 -1.442695, %v3708_v60  ;;  %4096 = vmatpush1.bf16.msra.mxu1 %v10988_v58 }
 0x479   :  { %v3521_v4 = vadd.f32 1.0, %v11034_v16  ;;  %11051 = vpow2.f32 %v9760_v0  ;;  %4097 = vmatprep.subr.bf16.mxu1 %v10993_v25  ;;  %v9761_v36 = vmul.f32 -1.442695, %v3710_v8  ;;  %v9762_v48 = vmul.f32 -1.442695, %v3711_v41 }
 0x47a   :  { %v11036_v22 = vpop.eup %11035  ;;  %11053 = vrcp.f32 %v3520_v29 }
 0x47b   :  { %v11038_v26 = vpop.eup %11037  ;;  %11055 = vrcp.f32 %v3521_v4  ;;  %v3585_v12 = vadd.f32 1.0, %v11036_v22 }
 0x47c   :  { %v11040_v30 = vpop.eup %11039  ;;  %v3584_v33 = vadd.f32 1.0, %v11038_v26  ;;  %11057 = vpow2.f32 %v9759_v20  ;;  %4098 = vmatpush1.bf16.msra.mxu1 %v10991_v44 }
 0x47d   :  { %v11042_v2 = vpop.eup %11041  ;;  %11059 = vrcp.f32 %v3585_v12  ;;  %v3586_v34 = vadd.f32 1.0, %v11040_v30  ;;  %4099 = vmatprep.subr.bf16.mxu1 %v10996_v13 }
 0x47e   :  { %11061 = vrcp.f32 %v3584_v33  ;;  %v3587_v35 = vadd.f32 1.0, %v11042_v2 }
 0x47f   :  { %v11044_v1 = vpop.eup %11043  ;;  %11063 = vrcp.f32 %v3586_v34 }
 0x480   :  { %v11046_v31 = vpop.eup %11045  ;;  %11065 = vrcp.f32 %v3587_v35  ;;  %v3656_v38 = vadd.f32 1.0, %v11044_v1  ;;  %4100 = vmatpush1.bf16.msra.mxu1 %v10994_v6 }
 0x481   :  { %v11048_v42 = vpop.eup %11047  ;;  %v3657_v10 = vadd.f32 1.0, %v11046_v31  ;;  %11067 = vpow2.f32 %v9761_v36 }
 0x482   :  { %v11050_v17 = vpop.eup %11049  ;;  %11069 = vrcp.f32 %v3656_v38  ;;  %v3658_v5 = vadd.f32 1.0, %v11048_v42 }
 0x483   :  { %v11052_v61 = vpop.eup %11051  ;;  %11071 = vrcp.f32 %v3657_v10  ;;  %v3659_v47 = vadd.f32 1.0, %v11050_v17  ;;  %9807 = vmatmul.mubr.msk.bf16.vlgmr.msra.gmra.mrb[28].mxu1 %vm3997_vm7, %v13490_v45 }
 0x484   :  { %v11054_v14 = vpop.eup %11053  ;;  %11073 = vrcp.f32 %v3658_v5  ;;  %v3729_v46 = vadd.f32 1.0, %v11052_v61 }
 0x485   :  { %v11056_v43 = vpop.eup %11055  ;;  %v13597_v62 = vmul.f32 %v11054_v14, %v13517_v56  ;;  %11075 = vrcp.f32 %v3659_v47 }
 0x486   :  { %v11058_v11 = vpop.eup %11057  ;;  %v13600_v50 = vmul.f32 %v11056_v43, %v13522_v9  ;;  %11077 = vrcp.f32 %v3729_v46 }
 0x487   :  { %v11060_v3 = vpop.eup %11059  ;;  %v3728_v27 = vadd.f32 1.0, %v11058_v11  ;;  %11079 = vpow2.f32 %v9762_v48 }
 0x488   :  { %v11062_v54 = vpop.eup %11061  ;;  %11081 = vtanh.f32 %v13478_v40  ;;  %v13604_v7 = vmul.f32 %v11060_v3, %v13526_v18 }
 0x489   :  { %v11064_v45 = vpop.eup %11063  ;;  %v13607_v57 = vmul.f32 %v11062_v54, %v13533_v24  ;;  %11083 = vrcp.f32 %v3728_v27 }
 0x48a   :  { %v11066_v56 = vpop.eup %11065  ;;  %v13610_v58 = vmul.f32 %v11064_v45, %v13540_v32  ;;  %11085 = vtanh.f32 %v13496_v21 }
 0x48b   :  { %v11068_v9 = vpop.eup %11067  ;;  %v13613_v60 = vmul.f32 %v11066_v56, %v13544_v37 }
 0x48c   :  { %v11070_v0 = vpop.eup %11069  ;;  %v3730_v25 = vadd.f32 1.0, %v11068_v9 }
 0x48d   :  { %v11072_v63 = vpop.eup %11071  ;;  %v13617_v40 = vmul.f32 %v11070_v0, %v13556_v23 }
 0x48e   :  { %v11074_v18 = vpop.eup %11073  ;;  %v13620_v24 = vmul.f32 %v11072_v63, %v13548_v39  ;;  %11087 = vrcp.f32 %v3730_v25 }
 0x48f   :  { %v11076_v16 = vpop.eup %11075  ;;  %v13623_v32 = vmul.f32 %v11074_v18, %v13564_v49  ;;  %11089 = vtanh.f32 %v13486_v19 }
 0x490   :  { %v11078_v29 = vpop.eup %11077  ;;  %v13626_v37 = vmul.f32 %v11076_v16, %v13567_v15 }
 0x491   :  { %v11080_v20 = vpop.eup %11079  ;;  %v13629_v4 = vmul.f32 %v11078_v29, %v13576_v59 }
 0x492   :  { %v11082_v21 = vpop.eup %11081  ;;  %v3731_v23 = vadd.f32 1.0, %v11080_v20 }
 0x493   :  { %v11084_v8 = vpop.eup %11083 }
 0x494   :  { %v13632_v39 = vmul.f32 %v11084_v8, %v11082_v21  ;;  %11091 = vrcp.f32 %v3731_v23  ;;  %v11086_v44 = vpop.eup %11085 }
 0x498   :  { %v11088_v22 = vpop.eup %11087 }
 0x499   :  { %v13634_v49 = vmul.f32 %v11088_v22, %v11086_v44  ;;  %v11090_v13 = vpop.eup %11089  ;;  %v4222_v44 = vpack.c.bf16 %v13600_v50, %v13597_v62  ;;  %v4644_v22 = vpack.c.bf16 %v13613_v60, %v13604_v7 }
 0x49e   :  { %v11092_v26 = vpop.eup %11091 }
 0x49f   :  { %v13636_v15 = vmul.f32 %v11092_v26, %v11090_v13 }
 0x53a   :  { %v4035_v12 = vpop.f32.mrb[24].mxu1  ;;  %v4078_v28 = vpop.f32.mrb[28].mxu0 }
 0x53b   :  { %4132 = vst.msk [vmem:[#allocation2 + $0x10] sm:$0xff] %vm3997_vm7, %v4035_v12  ;;  %v4080_v59 = vpop.f32.mrb[29].mxu0  ;;  %4156 = vrot.lane.b32.xlu1 %v4078_v28, %s11203_s17  ;;  %4138 = vrot.lane.b32.xlu0 %v4035_v12, %s11202_s0  ;;  %v4037_v19 = vpop.f32.mrb[25].mxu1 }
 0x53c   :  { %v4039_v30 = vpop.f32.mrb[26].mxu1  ;;  %v4082_v33 = vpop.f32.mrb[30].mxu0 }
 0x53d   :  { %4133 = vst.msk [vmem:[#allocation2 + $0x18] sm:$0xff] %vm3997_vm7, %v4039_v30  ;;  %v4041_v2 = vpop.f32.mrb[27].mxu1  ;;  %v4084_v34 = vpop.f32.mrb[31].mxu0 }
 0x53f   :  { %4170 = vrot.lane.b32.xlu0 %v4078_v28, %s11204_s30  ;;  %4140 = vrot.lane.b32.xlu1 %v4037_v19, %s11202_s0 }
 0x543   :  { %4154 = vrot.lane.b32.xlu0 %v4037_v19, %s11203_s17  ;;  %4172 = vrot.lane.b32.xlu1 %v4080_v59, %s11204_s30 }
 0x547   :  { %4186 = vrot.lane.b32.xlu0 %v4080_v59, %s11205_s20  ;;  %4160 = vrot.lane.b32.xlu1 %v4082_v33, %s11203_s17 }
 0x54b   :  { %4142 = vrot.lane.b32.xlu0 %v4039_v30, %s11202_s0  ;;  %4144 = vrot.lane.b32.xlu1 %v4041_v2, %s11202_s0 }
 0x54f   :  { %4174 = vrot.lane.b32.xlu0 %v4082_v33, %s11204_s30  ;;  %4176 = vrot.lane.b32.xlu1 %v4084_v34, %s11204_s30 }
 0x553   :  { %4158 = vrot.lane.b32.xlu0 %v4041_v2, %s11203_s17 }
 0x556   :  { %v4121_v36 = vpop.f32.mrb[28].mxu1 }
 0x557   :  { %4188 = vrot.lane.b32.xlu1 %v4121_v36, %s11205_s20  ;;  %v4123_v6 = vpop.f32.mrb[29].mxu1  ;;  %4190 = vrot.lane.b32.xlu0 %v4084_v34, %s11205_s20 }
 0x558   :  { %v4125_v35 = vpop.f32.mrb[30].mxu1 }
 0x559   :  { %v4127_v1 = vpop.f32.mrb[31].mxu1 }
 0x55b   :  { %4204 = vrot.lane.b32.xlu1 %v4123_v6, %s11207_s15  ;;  %4202 = vrot.lane.b32.xlu0 %v4121_v36, %s11207_s15 }
 0x55f   :  { %4192 = vrot.lane.b32.xlu1 %v4125_v35, %s11205_s20  ;;  %4206 = vrot.lane.b32.xlu0 %v4125_v35, %s11207_s15 }
 0x563   :  { %4208 = vrot.lane.b32.xlu1 %v4127_v1, %s11207_s15 }
 0x5ad   :  { %v4157_v41 = vpop.permute.xlu1 %4156  ;;  %v4139_v31 = vpop.permute.xlu0 %4138 }
 0x5b1   :  { %v4171_v38 = vpop.permute.xlu0 %4170  ;;  %v4141_v42 = vpop.permute.xlu1 %4140 }
 0x5b2   :  { %v4146_v10 = vsel %vm2776_vm4, %v4139_v31, %v4141_v42 }
 0x5b3   :  { %4150 = vst.msk [vmem:[#allocation2 + $0x20] sm:$0xff] %vm3997_vm7, %v4146_v10 }
 0x5b5   :  { %v4155_v17 = vpop.permute.xlu0 %4154  ;;  %v4173_v5 = vpop.permute.xlu1 %4172 }
 0x5b6   :  { %v4162_v61 = vsel %vm2791_vm2, %v4155_v17, %v4157_v41  ;;  %v4178_v47 = vsel %vm2806_vm3, %v4171_v38, %v4173_v5 }
 0x5b7   :  { %4166 = vst.msk [vmem:[#allocation2 + $0x30] sm:$0xff] %vm3997_vm7, %v4162_v61  ;;  %4182 = vst.msk [vmem:[#allocation2 + $0x40] sm:$0xff] %vm3997_vm7, %v4178_v47 }
 0x5b9   :  { %v4187_v48 = vpop.permute.xlu0 %4186  ;;  %v4161_v14 = vpop.permute.xlu1 %4160 }
 0x5bd   :  { %v4143_v46 = vpop.permute.xlu0 %4142  ;;  %v4145_v43 = vpop.permute.xlu1 %4144 }
 0x5be   :  { %v4147_v11 = vsel %vm2776_vm4, %v4143_v46, %v4145_v43 }
 0x5bf   :  { %4151 = vst.msk [vmem:[#allocation2 + $0x28] sm:$0xff] %vm3997_vm7, %v4147_v11 }
 0x5c1   :  { %v4175_v3 = vpop.permute.xlu0 %4174  ;;  %v4177_v27 = vpop.permute.xlu1 %4176 }
 0x5c2   :  { %v4179_v54 = vsel %vm2806_vm3, %v4175_v3, %v4177_v27 }
 0x5c3   :  { %4183 = vst.msk [vmem:[#allocation2 + $0x48] sm:$0xff] %vm3997_vm7, %v4179_v54 }
 0x5c5   :  { %v4159_v45 = vpop.permute.xlu0 %4158 }
 0x5c6   :  { %v4163_v56 = vsel %vm2791_vm2, %v4159_v45, %v4161_v14 }
 0x5c7   :  { %4167 = vst.msk [vmem:[#allocation2 + $0x38] sm:$0xff] %vm3997_vm7, %v4163_v56 }
 0x5c9   :  { %v4189_v9 = vpop.permute.xlu1 %4188  ;;  %v4191_v0 = vpop.permute.xlu0 %4190 }
 0x5ca   :  { %v4194_v25 = vsel %vm2821_vm5, %v4187_v48, %v4189_v9 }
 0x5cb   :  { %4198 = vst.msk [vmem:[#allocation2 + $0x50] sm:$0xff] %vm3997_vm7, %v4194_v25 }
 0x5cd   :  { %v4205_v63 = vpop.permute.xlu1 %4204  ;;  %v4203_v18 = vpop.permute.xlu0 %4202 }
 0x5ce   :  { %v4211_v16 = vsel %vm4210_vm8, %v4203_v18, %v4205_v63 }
 0x5cf   :  { %4215 = vst.msk [vmem:[#allocation2 + $0x60] sm:$0xff] %vm3997_vm7, %v4211_v16 }
 0x5d1   :  { %v4193_v29 = vpop.permute.xlu1 %4192  ;;  %v4207_v21 = vpop.permute.xlu0 %4206 }
 0x5d2   :  { %v4195_v20 = vsel %vm2821_vm5, %v4191_v0, %v4193_v29 }
 0x5d3   :  { %4199 = vst.msk [vmem:[#allocation2 + $0x58] sm:$0xff] %vm3997_vm7, %v4195_v20 }
 0x5d5   :  { %v4209_v23 = vpop.permute.xlu1 %4208 }
 0x5d6   :  { %v4212_v8 = vsel %vm4210_vm8, %v4207_v21, %v4209_v23 }
 0x5d7   :  { %4216 = vst.msk [vmem:[#allocation2 + $0x68] sm:$0xff] %vm3997_vm7, %v4212_v8 }
 0x5d8   :  { %11196 = dma.done.wait [#allocation6], 32256 }
 0x5d9   :  { %11197 = vsyncadd [#allocation6], 4294935040  ;;  %4324 = vmatprep.mubr.bf16.mxu0 %v11201_v55  ;;  %4367 = vmatprep.mubr.bf16.mxu1 %v11201_v55  ;;  %s11208_s27 = smov 112   ;;  %v4643_v13 = vpack.c.bf16 %v13610_v58, %v13607_v57  ;;  %v4224_v26 = vld [vmem:[#allocation4 + $0x8] sm:$0xff]  ;;  %v4226_v12 = vld [vmem:[#allocation4 + $0x18] sm:$0xff]  ;;  %v5079_v34 = vpack.c.bf16 %v13623_v32, %v13617_v40  ;;  %v5080_v36 = vpack.c.bf16 %v13626_v37, %v13620_v24  ;;  %vm11209_vm9 = vmmov 0  }
 0x5da   :  { %11093 = vset.pattern.permute.xlu1 %v11201_v55  ;;  %11094 = vset.pattern.permute.xlu0 %v11201_v55  ;;  %v4223_v28 = vld [vmem:[#allocation4] sm:$0xff]  ;;  %v4225_v59 = vld [vmem:[#allocation4 + $0x10] sm:$0xff]  ;;  %v4232_v33 = vld [vmem:[#allocation4 + $0x48] sm:$0xff]  ;;  %v5515_v9 = vpack.c.bf16 %v13634_v49, %v13632_v39  ;;  %v5516_v0 = vpack.c.bf16 %v13636_v15, %v13629_v4 }
 0x5db   :  { %4287 = vrot.lane.b32.xlu0 %v4222_v44, %s11208_s27  ;;  %4713 = vrot.lane.b32.xlu1 %v4644_v22, %s11206_s26  ;;  %v4233_v19 = vld [vmem:[#allocation4 + $0x50] sm:$0xff]  ;;  %v4235_v30 = vld [vmem:[#allocation4 + $0x60] sm:$0xff]  ;;  %v4234_v2 = vld [vmem:[#allocation4 + $0x58] sm:$0xff] }
 0x5dc   :  { %4292 = vmatprep.subr.bf16.mxu0 %v4224_v26  ;;  %4335 = vmatprep.subr.bf16.mxu1 %v4226_v12  ;;  %v4242_v6 = vld [vmem:[#allocation4 + $0x98] sm:$0xff]  ;;  %v4244_v35 = vld [vmem:[#allocation4 + $0xa8] sm:$0xff]  ;;  %v4241_v1 = vld [vmem:[#allocation4 + $0x90] sm:$0xff] }
 0x5dd   :  { %4293 = vmatpush1.bf16.msra.mxu0 %v4223_v28  ;;  %4336 = vmatpush1.bf16.msra.mxu1 %v4225_v59  ;;  %v4243_v41 = vld [vmem:[#allocation4 + $0xa0] sm:$0xff]  ;;  %v4253_v38 = vld [vmem:[#allocation4 + $0xf0] sm:$0xff]  ;;  %v4250_v42 = vld [vmem:[#allocation4 + $0xd8] sm:$0xff] }
 0x5de   :  { %4294 = vmatprep.subr.bf16.mxu0 %v4233_v19  ;;  %4337 = vmatprep.subr.bf16.mxu1 %v4235_v30  ;;  %v4251_v31 = vld [vmem:[#allocation4 + $0xe0] sm:$0xff]  ;;  %v4252_v10 = vld [vmem:[#allocation4 + $0xe8] sm:$0xff]  ;;  %v4262_v5 = vld [vmem:[#allocation4 + $0x138] sm:$0xff] }
 0x5df   :  { %4711 = vrot.lane.b32.xlu0 %v4643_v13, %s11206_s26  ;;  %5147 = vrot.lane.b32.xlu1 %v5079_v34, %s11207_s15  ;;  %v4260_v17 = vld [vmem:[#allocation4 + $0x128] sm:$0xff]  ;;  %v4259_v61 = vld [vmem:[#allocation4 + $0x120] sm:$0xff]  ;;  %v4261_v47 = vld [vmem:[#allocation4 + $0x130] sm:$0xff] }
 0x5e0   :  { %v4269_v48 = vld [vmem:[#allocation4 + $0x170] sm:$0xff]  ;;  %v4271_v14 = vld [vmem:[#allocation4 + $0x180] sm:$0xff]  ;;  %v4268_v46 = vld [vmem:[#allocation4 + $0x168] sm:$0xff] }
 0x5e1   :  { %4295 = vmatpush1.bf16.msra.mxu0 %v4232_v33  ;;  %4338 = vmatpush1.bf16.msra.mxu1 %v4234_v2  ;;  %v4270_v43 = vld [vmem:[#allocation4 + $0x178] sm:$0xff]  ;;  %v4280_v3 = vld [vmem:[#allocation4 + $0x1c8] sm:$0xff]  ;;  %v4277_v27 = vld [vmem:[#allocation4 + $0x1b0] sm:$0xff] }
 0x5e2   :  { %4296 = vmatprep.subr.bf16.mxu0 %v4242_v6  ;;  %4339 = vmatprep.subr.bf16.mxu1 %v4244_v35  ;;  %v4278_v11 = vld [vmem:[#allocation4 + $0x1b8] sm:$0xff]  ;;  %v4279_v54 = vld [vmem:[#allocation4 + $0x1c0] sm:$0xff]  ;;  %v4228_v45 = vld [vmem:[#allocation4 + $0x28] sm:$0xff] }
 0x5e3   :  { %5149 = vrot.lane.b32.xlu0 %v5080_v36, %s11207_s15  ;;  %v4230_v56 = vld [vmem:[#allocation4 + $0x38] sm:$0xff]  ;;  %5583 = vrot.lane.b32.xlu1 %v5515_v9, %s11205_s20  ;;  %v4256_v25 = vld [vmem:[#allocation4 + $0x108] sm:$0xff]  ;;  %v4263_v16 = vld [vmem:[#allocation4 + $0x140] sm:$0xff] }
 0x5e4   :  { %v4264_v63 = vld [vmem:[#allocation4 + $0x148] sm:$0xff]  ;;  %v4266_v18 = vld [vmem:[#allocation4 + $0x158] sm:$0xff]  ;;  %v4265_v29 = vld [vmem:[#allocation4 + $0x150] sm:$0xff] }
 0x5e5   :  { %4297 = vmatpush1.bf16.msra.mxu0 %v4241_v1  ;;  %4340 = vmatpush1.bf16.msra.mxu1 %v4243_v41  ;;  %v4273_v20 = vld [vmem:[#allocation4 + $0x190] sm:$0xff]  ;;  %v4275_v21 = vld [vmem:[#allocation4 + $0x1a0] sm:$0xff]  ;;  %v4272_v23 = vld [vmem:[#allocation4 + $0x188] sm:$0xff] }
 0x5e6   :  { %4298 = vmatprep.subr.bf16.mxu0 %v4251_v31  ;;  %4341 = vmatprep.subr.bf16.mxu1 %v4253_v38  ;;  %v4274_v8 = vld [vmem:[#allocation4 + $0x198] sm:$0xff]  ;;  %v4284_v22 = vld [vmem:[#allocation4 + $0x1e8] sm:$0xff]  ;;  %v4281_v13 = vld [vmem:[#allocation4 + $0x1d0] sm:$0xff] }
 0x5e7   :  { %5585 = vrot.lane.b32.xlu0 %v5516_v0, %s11205_s20  ;;  %4937 = vrot.lane.b32.xlu1 %v13607_v57, %s11206_s26  ;;  %v4237_v57 = vld [vmem:[#allocation4 + $0x70] sm:$0xff]  ;;  %v4282_v44 = vld [vmem:[#allocation4 + $0x1d8] sm:$0xff]  ;;  %v4283_v26 = vld [vmem:[#allocation4 + $0x1e0] sm:$0xff] }
 0x5e8   :  { %v4647_v12 = vld [vmem:[#allocation4 + $0x200] sm:$0xff]  ;;  %v4646_v59 = vld [vmem:[#allocation4 + $0x1f8] sm:$0xff]  ;;  %v4656_v19 = vld [vmem:[#allocation4 + $0x248] sm:$0xff] }
 0x5e9   :  { %4299 = vmatpush1.bf16.msra.mxu0 %v4250_v42  ;;  %4342 = vmatpush1.bf16.msra.mxu1 %v4252_v10  ;;  %v4231_v28 = vld [vmem:[#allocation4 + $0x40] sm:$0xff]  ;;  %v4240_v30 = vld [vmem:[#allocation4 + $0x88] sm:$0xff]  ;;  %v4665_v2 = vld [vmem:[#allocation4 + $0x290] sm:$0xff] }
 0x5ea   :  { %4300 = vmatprep.subr.bf16.mxu0 %v4260_v17  ;;  %4343 = vmatprep.subr.bf16.mxu1 %v4262_v5  ;;  %v4655_v33 = vld [vmem:[#allocation4 + $0x240] sm:$0xff]  ;;  %v4249_v34 = vld [vmem:[#allocation4 + $0xd0] sm:$0xff]  ;;  %v4664_v36 = vld [vmem:[#allocation4 + $0x288] sm:$0xff] }
 0x5eb   :  { %4939 = vrot.lane.b32.xlu0 %v13604_v7, %s11206_s26  ;;  %4941 = vrot.lane.b32.xlu1 %v13610_v58, %s11206_s26  ;;  %v4239_v58 = vld [vmem:[#allocation4 + $0x80] sm:$0xff]  ;;  %v4674_v6 = vld [vmem:[#allocation4 + $0x2d8] sm:$0xff]  ;;  %v4673_v1 = vld [vmem:[#allocation4 + $0x2d0] sm:$0xff] }
 0x5ec   :  { %v4258_v35 = vld [vmem:[#allocation4 + $0x118] sm:$0xff]  ;;  %v4683_v41 = vld [vmem:[#allocation4 + $0x320] sm:$0xff]  ;;  %v4692_v42 = vld [vmem:[#allocation4 + $0x368] sm:$0xff] }
 0x5ed   :  { %4301 = vmatpush1.bf16.msra.mxu0 %v4259_v61  ;;  %4344 = vmatpush1.bf16.msra.mxu1 %v4261_v47  ;;  %v4267_v31 = vld [vmem:[#allocation4 + $0x160] sm:$0xff]  ;;  %v4682_v38 = vld [vmem:[#allocation4 + $0x318] sm:$0xff]  ;;  %v4276_v10 = vld [vmem:[#allocation4 + $0x1a8] sm:$0xff] }
 0x5ee   :  { %4302 = vmatprep.subr.bf16.mxu0 %v4269_v48  ;;  %4345 = vmatprep.subr.bf16.mxu1 %v4271_v14  ;;  %v4691_v17 = vld [vmem:[#allocation4 + $0x360] sm:$0xff]  ;;  %v4701_v5 = vld [vmem:[#allocation4 + $0x3b0] sm:$0xff]  ;;  %v4700_v47 = vld [vmem:[#allocation4 + $0x3a8] sm:$0xff] }
 0x5ef   :  { %4943 = vrot.lane.b32.xlu0 %v13613_v60, %s11206_s26  ;;  %4507 = vrot.lane.b32.xlu1 %v13597_v62, %s11208_s27  ;;  %v4227_v62 = vld [vmem:[#allocation4 + $0x20] sm:$0xff]  ;;  %v4236_v60 = vld [vmem:[#allocation4 + $0x68] sm:$0xff]  ;;  %v4285_v61 = vld [vmem:[#allocation4 + $0x1f0] sm:$0xff] }
 0x5f0   :  { %v4659_v9 = vld [vmem:[#allocation4 + $0x260] sm:$0xff] }
 0x5f1   :  { %4303 = vmatpush1.bf16.msra.mxu0 %v4268_v46  ;;  %4346 = vmatpush1.bf16.msra.mxu1 %v4270_v43  ;;  %v4649_v46 = vld [vmem:[#allocation4 + $0x210] sm:$0xff]  ;;  %v4651_v43 = vld [vmem:[#allocation4 + $0x220] sm:$0xff] }
 0x5f2   :  { %4304 = vmatprep.subr.bf16.mxu0 %v4278_v11  ;;  %4347 = vmatprep.subr.bf16.mxu1 %v4280_v3  ;;  %v4648_v3 = vld [vmem:[#allocation4 + $0x208] sm:$0xff]  ;;  %v4667_v0 = vld [vmem:[#allocation4 + $0x2a0] sm:$0xff] }
 0x5f3   :  { %4509 = vrot.lane.b32.xlu0 %v13600_v50, %s11208_s27  ;;  %5809 = vrot.lane.b32.xlu1 %v13632_v39, %s11205_s20  ;;  %v4229_v50 = vld [vmem:[#allocation4 + $0x30] sm:$0xff]  ;;  %v4255_v39 = vld [vmem:[#allocation4 + $0x100] sm:$0xff] }
 0x5f5   :  { %4305 = vmatpush1.bf16.msra.mxu0 %v4277_v27  ;;  %4348 = vmatpush1.bf16.msra.mxu1 %v4279_v54  ;;  %v4650_v27 = vld [vmem:[#allocation4 + $0x218] sm:$0xff] }
 0x5f6   :  { %4378 = vmatprep.subr.bf16.mxu0 %v4228_v45  ;;  %4421 = vmatprep.subr.bf16.mxu1 %v4230_v56  ;;  %v4658_v54 = vld [vmem:[#allocation4 + $0x258] sm:$0xff]  ;;  %v4660_v45 = vld [vmem:[#allocation4 + $0x268] sm:$0xff]  ;;  %v4657_v56 = vld [vmem:[#allocation4 + $0x250] sm:$0xff] }
 0x5f7   :  { %5811 = vrot.lane.b32.xlu0 %v13629_v4, %s11205_s20  ;;  %5813 = vrot.lane.b32.xlu1 %v13634_v49, %s11205_s20  ;;  %v4247_v4 = vld [vmem:[#allocation4 + $0xc0] sm:$0xff]  ;;  %v4257_v49 = vld [vmem:[#allocation4 + $0x110] sm:$0xff] }
 0x5fb   :  { %5815 = vrot.lane.b32.xlu0 %v13636_v15, %s11205_s20  ;;  %5373 = vrot.lane.b32.xlu1 %v13617_v40, %s11207_s15  ;;  %v4238_v40 = vld [vmem:[#allocation4 + $0x78] sm:$0xff] }
 0x5fc   :  { %v4254_v15 = vld [vmem:[#allocation4 + $0xf8] sm:$0xff] }
 0x5ff   :  { %5375 = vrot.lane.b32.xlu0 %v13620_v24, %s11207_s15  ;;  %5377 = vrot.lane.b32.xlu1 %v13623_v32, %s11207_s15  ;;  %v4246_v24 = vld [vmem:[#allocation4 + $0xb8] sm:$0xff]  ;;  %v4248_v32 = vld [vmem:[#allocation4 + $0xc8] sm:$0xff] }
 0x603   :  { %5379 = vrot.lane.b32.xlu0 %v13626_v37, %s11207_s15  ;;  %v4245_v37 = vld [vmem:[#allocation4 + $0xb0] sm:$0xff] }
 0x64d   :  { %v13733_v7 = vpop.permute.xlu0 %4287  ;;  %v4714_v48 = vpop.permute.xlu1 %4713 }
 0x64e   :  { %9808 = vmatmul.mubr.msk.bf16.vlgmr.msra.gmra.mrb[32].mxu0 %vm3997_vm7, %v13733_v7  ;;  %9809 = vmatmul.mubr.msk.bf16.vlgmr.msra.gmra.mrb[32].mxu1 %vm3997_vm7, %v13733_v7 }
 0x64f   :  { %4379 = vmatpush1.bf16.msra.mxu0 %v4227_v62  ;;  %4422 = vmatpush1.bf16.msra.mxu1 %v4229_v50  ;;  %v4669_v62 = vld [vmem:[#allocation4 + $0x2b0] sm:$0xff]  ;;  %v4666_v50 = vld [vmem:[#allocation4 + $0x298] sm:$0xff] }
 0x650   :  { %4380 = vmatprep.subr.bf16.mxu0 %v4237_v57  ;;  %4423 = vmatprep.subr.bf16.mxu1 %v4239_v58  ;;  %v4676_v57 = vld [vmem:[#allocation4 + $0x2e8] sm:$0xff]  ;;  %v4678_v58 = vld [vmem:[#allocation4 + $0x2f8] sm:$0xff] }
 0x651   :  { %4410 = vmatprep.mubr.bf16.mxu0 %v11201_v55  ;;  %4453 = vmatprep.mubr.bf16.mxu1 %v11201_v55  ;;  %v4712_v14 = vpop.permute.xlu0 %4711 }
 0x652   :  { %v13756_v11 = vsel %vm3431_vm6, %v4712_v14, %v4714_v48  ;;  %v5101_v48 = vld [vmem:[#allocation4 + $0x488] sm:$0xff]  ;;  %v5103_v14 = vld [vmem:[#allocation4 + $0x498] sm:$0xff] }
 0x653   :  { %4381 = vmatpush1.bf16.msra.mxu0 %v4236_v60  ;;  %4424 = vmatpush1.bf16.msra.mxu1 %v4238_v40  ;;  %v4675_v60 = vld [vmem:[#allocation4 + $0x2e0] sm:$0xff]  ;;  %v4677_v40 = vld [vmem:[#allocation4 + $0x2f0] sm:$0xff] }
 0x654   :  { %4382 = vmatprep.subr.bf16.mxu0 %v4246_v24  ;;  %4425 = vmatprep.subr.bf16.mxu1 %v4248_v32  ;;  %v4685_v24 = vld [vmem:[#allocation4 + $0x330] sm:$0xff]  ;;  %v4687_v32 = vld [vmem:[#allocation4 + $0x340] sm:$0xff] }
 0x657   :  { %4383 = vmatpush1.bf16.msra.mxu0 %v4245_v37  ;;  %4426 = vmatpush1.bf16.msra.mxu1 %v4247_v4  ;;  %v4684_v37 = vld [vmem:[#allocation4 + $0x328] sm:$0xff]  ;;  %v4686_v4 = vld [vmem:[#allocation4 + $0x338] sm:$0xff] }
 0x658   :  { %4384 = vmatprep.subr.bf16.mxu0 %v4255_v39  ;;  %4427 = vmatprep.subr.bf16.mxu1 %v4257_v49  ;;  %v4694_v39 = vld [vmem:[#allocation4 + $0x378] sm:$0xff]  ;;  %v4696_v49 = vld [vmem:[#allocation4 + $0x388] sm:$0xff] }
 0x65b   :  { %4385 = vmatpush1.bf16.msra.mxu0 %v4254_v15  ;;  %4428 = vmatpush1.bf16.msra.mxu1 %v4256_v25  ;;  %v4693_v15 = vld [vmem:[#allocation4 + $0x370] sm:$0xff]  ;;  %v4695_v25 = vld [vmem:[#allocation4 + $0x380] sm:$0xff] }
 0x65c   :  { %4386 = vmatprep.subr.bf16.mxu0 %v4264_v63  ;;  %4429 = vmatprep.subr.bf16.mxu1 %v4266_v18  ;;  %v4703_v63 = vld [vmem:[#allocation4 + $0x3c0] sm:$0xff]  ;;  %v4705_v18 = vld [vmem:[#allocation4 + $0x3d0] sm:$0xff] }
 0x65f   :  { %4387 = vmatpush1.bf16.msra.mxu0 %v4263_v16  ;;  %4430 = vmatpush1.bf16.msra.mxu1 %v4265_v29  ;;  %v4702_v16 = vld [vmem:[#allocation4 + $0x3b8] sm:$0xff]  ;;  %v4704_v29 = vld [vmem:[#allocation4 + $0x3c8] sm:$0xff] }
 0x660   :  { %4388 = vmatprep.subr.bf16.mxu0 %v4273_v20  ;;  %4431 = vmatprep.subr.bf16.mxu1 %v4275_v21  ;;  %v4653_v20 = vld [vmem:[#allocation4 + $0x230] sm:$0xff]  ;;  %v4652_v21 = vld [vmem:[#allocation4 + $0x228] sm:$0xff] }
 0x663   :  { %4389 = vmatpush1.bf16.msra.mxu0 %v4272_v23  ;;  %4432 = vmatpush1.bf16.msra.mxu1 %v4274_v8  ;;  %v4654_v23 = vld [vmem:[#allocation4 + $0x238] sm:$0xff] }
 0x664   :  { %4390 = vmatprep.subr.bf16.mxu0 %v4282_v44  ;;  %4433 = vmatprep.subr.bf16.mxu1 %v4284_v22  ;;  %v4662_v8 = vld [vmem:[#allocation4 + $0x278] sm:$0xff]  ;;  %v4661_v44 = vld [vmem:[#allocation4 + $0x270] sm:$0xff]  ;;  %v4663_v22 = vld [vmem:[#allocation4 + $0x280] sm:$0xff] }
 0x667   :  { %4391 = vmatpush1.bf16.msra.mxu0 %v4281_v13  ;;  %4434 = vmatpush1.bf16.msra.mxu1 %v4283_v26  ;;  %v4671_v13 = vld [vmem:[#allocation4 + $0x2c0] sm:$0xff]  ;;  %v4670_v26 = vld [vmem:[#allocation4 + $0x2b8] sm:$0xff] }
 0x668   :  { %10093 = vmatprep.subr.bf16.mxu0 %v11200_v52  ;;  %4720 = vmatprep.subr.bf16.mxu1 %v4647_v12  ;;  %v4672_v12 = vld [vmem:[#allocation4 + $0x2c8] sm:$0xff] }
 0x66a   :  { %9810 = vmatmul.mubr.msk.bf16.vlgmr.msra.gmra.mrb[36].mxu0 %vm3997_vm7, %v13733_v7  ;;  %9811 = vmatmul.mubr.msk.bf16.vlgmr.msra.gmra.mrb[36].mxu1 %vm3997_vm7, %v13733_v7 }
 0x66b   :  { %10094 = vmatpush3.bf16.msra.mxu0 %v4231_v28  ;;  %4721 = vmatpush1.bf16.msra.mxu1 %v4646_v59  ;;  %v4680_v28 = vld [vmem:[#allocation4 + $0x308] sm:$0xff]  ;;  %v4679_v59 = vld [vmem:[#allocation4 + $0x300] sm:$0xff] }
 0x66c   :  { %10095 = vmatprep.subr.bf16.mxu0 %v11200_v52  ;;  %4722 = vmatprep.subr.bf16.mxu1 %v4656_v19  ;;  %v4681_v19 = vld [vmem:[#allocation4 + $0x310] sm:$0xff] }
 0x66d   :  { %10107 = vmatprep.mubr.msk.bf16.mxu0 %vm11209_vm9, %v11200_v52  ;;  %4752 = vmatprep.mubr.bf16.mxu1 %v11201_v55 }
 0x66f   :  { %10096 = vmatpush3.bf16.msra.mxu0 %v4240_v30  ;;  %4723 = vmatpush1.bf16.msra.mxu1 %v4655_v33  ;;  %v4689_v30 = vld [vmem:[#allocation4 + $0x350] sm:$0xff]  ;;  %v4688_v33 = vld [vmem:[#allocation4 + $0x348] sm:$0xff] }
 0x670   :  { %10097 = vmatprep.subr.bf16.mxu0 %v11200_v52  ;;  %4724 = vmatprep.subr.bf16.mxu1 %v4665_v2  ;;  %v4690_v2 = vld [vmem:[#allocation4 + $0x358] sm:$0xff] }
 0x673   :  { %10098 = vmatpush3.bf16.msra.mxu0 %v4249_v34  ;;  %4725 = vmatpush1.bf16.msra.mxu1 %v4664_v36  ;;  %v4698_v34 = vld [vmem:[#allocation4 + $0x398] sm:$0xff]  ;;  %v4697_v36 = vld [vmem:[#allocation4 + $0x390] sm:$0xff] }
 0x674   :  { %10099 = vmatprep.subr.bf16.mxu0 %v11200_v52  ;;  %4726 = vmatprep.subr.bf16.mxu1 %v4674_v6  ;;  %v4699_v6 = vld [vmem:[#allocation4 + $0x3a0] sm:$0xff] }
 0x677   :  { %10100 = vmatpush3.bf16.msra.mxu0 %v4258_v35  ;;  %4727 = vmatpush1.bf16.msra.mxu1 %v4673_v1  ;;  %v4707_v35 = vld [vmem:[#allocation4 + $0x3e0] sm:$0xff]  ;;  %v4706_v1 = vld [vmem:[#allocation4 + $0x3d8] sm:$0xff] }
 0x678   :  { %10101 = vmatprep.subr.bf16.mxu0 %v11200_v52  ;;  %4728 = vmatprep.subr.bf16.mxu1 %v4683_v41  ;;  %v4708_v41 = vld [vmem:[#allocation4 + $0x3e8] sm:$0xff] }
 0x67b   :  { %10102 = vmatpush3.bf16.msra.mxu0 %v4267_v31  ;;  %4729 = vmatpush1.bf16.msra.mxu1 %v4682_v38  ;;  %v5083_v31 = vld [vmem:[#allocation4 + $0x3f8] sm:$0xff]  ;;  %v5085_v38 = vld [vmem:[#allocation4 + $0x408] sm:$0xff] }
 0x67c   :  { %10103 = vmatprep.subr.bf16.mxu0 %v11200_v52  ;;  %4730 = vmatprep.subr.bf16.mxu1 %v4692_v42  ;;  %v5082_v42 = vld [vmem:[#allocation4 + $0x3f0] sm:$0xff] }
 0x67f   :  { %10104 = vmatpush3.bf16.msra.mxu0 %v4276_v10  ;;  %4731 = vmatpush1.bf16.msra.mxu1 %v4691_v17  ;;  %v5084_v10 = vld [vmem:[#allocation4 + $0x400] sm:$0xff] }
 0x680   :  { %10105 = vmatprep.subr.bf16.mxu0 %v11200_v52  ;;  %4732 = vmatprep.subr.bf16.mxu1 %v4701_v5  ;;  %v5092_v17 = vld [vmem:[#allocation4 + $0x440] sm:$0xff]  ;;  %v5094_v5 = vld [vmem:[#allocation4 + $0x450] sm:$0xff] }
 0x683   :  { %10106 = vmatpush3.bf16.msra.mxu0 %v4285_v61  ;;  %4733 = vmatpush1.bf16.msra.mxu1 %v4700_v47  ;;  %v5091_v61 = vld [vmem:[#allocation4 + $0x438] sm:$0xff]  ;;  %v5093_v47 = vld [vmem:[#allocation4 + $0x448] sm:$0xff] }
 0x684   :  { %4763 = vmatprep.subr.bf16.mxu0 %v4649_v46  ;;  %4806 = vmatprep.subr.bf16.mxu1 %v4651_v43  ;;  %v5100_v46 = vld [vmem:[#allocation4 + $0x480] sm:$0xff]  ;;  %v5102_v43 = vld [vmem:[#allocation4 + $0x490] sm:$0xff] }
 0x686   :  { %10108 = vmatmul.mubr.msk.bf16.vlgmr.msra.gmra.mrb[40].mxu0 %vm3997_vm7, %v13733_v7  ;;  %9813 = vmatmul.mubr.msk.bf16.vlgmr.msra.gmra.mrb[40].mxu1 %vm3997_vm7, %v13756_v11  ;;  %v4668_v7 = vld [vmem:[#allocation4 + $0x2a8] sm:$0xff] }
 0x687   :  { %4764 = vmatpush1.bf16.msra.mxu0 %v4648_v3  ;;  %4807 = vmatpush1.bf16.msra.mxu1 %v4650_v27  ;;  %v5110_v3 = vld [vmem:[#allocation4 + $0x4d0] sm:$0xff]  ;;  %v5109_v27 = vld [vmem:[#allocation4 + $0x4c8] sm:$0xff] }
 0x688   :  { %4765 = vmatprep.subr.bf16.mxu0 %v4658_v54  ;;  %4808 = vmatprep.subr.bf16.mxu1 %v4660_v45  ;;  %v5111_v54 = vld [vmem:[#allocation4 + $0x4d8] sm:$0xff] }
 0x689   :  { %4795 = vmatprep.mubr.bf16.mxu0 %v11201_v55  ;;  %4838 = vmatprep.mubr.bf16.mxu1 %v11201_v55  ;;  %v5119_v45 = vld [vmem:[#allocation4 + $0x518] sm:$0xff] }
 0x68b   :  { %4766 = vmatpush1.bf16.msra.mxu0 %v4657_v56  ;;  %4809 = vmatpush1.bf16.msra.mxu1 %v4659_v9  ;;  %v5121_v56 = vld [vmem:[#allocation4 + $0x528] sm:$0xff]  ;;  %v5118_v9 = vld [vmem:[#allocation4 + $0x510] sm:$0xff] }
 0x68c   :  { %4767 = vmatprep.subr.bf16.mxu0 %v4667_v0  ;;  %4810 = vmatprep.subr.bf16.mxu1 %v4669_v62  ;;  %v5120_v0 = vld [vmem:[#allocation4 + $0x520] sm:$0xff]  ;;  %v5148_v62 = vpop.permute.xlu1 %5147 }
 0x68f   :  { %4768 = vmatpush1.bf16.msra.mxu0 %v4666_v50  ;;  %4811 = vmatpush1.bf16.msra.mxu1 %v4668_v7  ;;  %v5150_v50 = vpop.permute.xlu0 %5149  ;;  %v5128_v7 = vld [vmem:[#allocation4 + $0x560] sm:$0xff] }
 0x690   :  { %4769 = vmatprep.subr.bf16.mxu0 %v4676_v57  ;;  %4812 = vmatprep.subr.bf16.mxu1 %v4678_v58  ;;  %v5130_v57 = vld [vmem:[#allocation4 + $0x570] sm:$0xff]  ;;  %v5127_v58 = vld [vmem:[#allocation4 + $0x558] sm:$0xff] }
 0x693   :  { %4770 = vmatpush1.bf16.msra.mxu0 %v4675_v60  ;;  %4813 = vmatpush1.bf16.msra.mxu1 %v4677_v40  ;;  %v5129_v60 = vld [vmem:[#allocation4 + $0x568] sm:$0xff]  ;;  %v13784_v40 = vpop.permute.xlu1 %5583 }
 0x694   :  { %4771 = vmatprep.subr.bf16.mxu0 %v4685_v24  ;;  %4814 = vmatprep.subr.bf16.mxu1 %v4687_v32  ;;  %v13786_v24 = vpop.permute.xlu0 %5585  ;;  %v5137_v32 = vld [vmem:[#allocation4 + $0x5a8] sm:$0xff] }
 0x697   :  { %4772 = vmatpush1.bf16.msra.mxu0 %v4684_v37  ;;  %4815 = vmatpush1.bf16.msra.mxu1 %v4686_v4  ;;  %v5139_v37 = vld [vmem:[#allocation4 + $0x5b8] sm:$0xff]  ;;  %v5136_v4 = vld [vmem:[#allocation4 + $0x5a0] sm:$0xff] }
 0x698   :  { %4773 = vmatprep.subr.bf16.mxu0 %v4694_v39  ;;  %4816 = vmatprep.subr.bf16.mxu1 %v4696_v49  ;;  %v5138_v39 = vld [vmem:[#allocation4 + $0x5b0] sm:$0xff]  ;;  %v4938_v49 = vpop.permute.xlu1 %4937 }
 0x69b   :  { %4774 = vmatpush1.bf16.msra.mxu0 %v4693_v15  ;;  %4817 = vmatpush1.bf16.msra.mxu1 %v4695_v25  ;;  %v4940_v15 = vpop.permute.xlu0 %4939  ;;  %v5087_v25 = vld [vmem:[#allocation4 + $0x418] sm:$0xff] }
 0x69c   :  { %4775 = vmatprep.subr.bf16.mxu0 %v4703_v63  ;;  %4818 = vmatprep.subr.bf16.mxu1 %v4705_v18  ;;  %v5089_v63 = vld [vmem:[#allocation4 + $0x428] sm:$0xff]  ;;  %v4945_v18 = vsel %vm3431_vm6, %v4938_v49, %v4940_v15  ;;  %v5135_v15 = vld [vmem:[#allocation4 + $0x598] sm:$0xff] }
 0x69d   :  { %4949 = vst.msk [vmem:[#allocation3 + $0x8] sm:$0xff] %vm3997_vm7, %v4945_v18 }
 0x69f   :  { %4776 = vmatpush1.bf16.msra.mxu0 %v4702_v16  ;;  %4819 = vmatpush1.bf16.msra.mxu1 %v4704_v29  ;;  %v13791_v16 = vsel %vm4210_vm8, %v5148_v62, %v5150_v50  ;;  %v5086_v29 = vld [vmem:[#allocation4 + $0x410] sm:$0xff]  ;;  %v5545_v62 = vld [vmem:[#allocation4 + $0x6c0] sm:$0xff] }
 0x6a0   :  { %4849 = vmatprep.subr.bf16.mxu0 %v4653_v20  ;;  %10111 = vmatprep.subr.bf16.mxu1 %v11200_v52  ;;  %v5088_v20 = vld [vmem:[#allocation4 + $0x420] sm:$0xff]  ;;  %v5555_v50 = vld [vmem:[#allocation4 + $0x710] sm:$0xff] }
 0x6a2   :  { %9814 = vmatmul.mubr.msk.bf16.vlgmr.msra.gmra.mrb[44].mxu0 %vm3997_vm7, %v13756_v11  ;;  %9815 = vmatmul.mubr.msk.bf16.vlgmr.msra.gmra.mrb[44].mxu1 %vm3997_vm7, %v13756_v11 }
 0x6a3   :  { %4850 = vmatpush1.bf16.msra.mxu0 %v4652_v21  ;;  %10112 = vmatpush3.bf16.msra.mxu1 %v4654_v23  ;;  %v4942_v21 = vpop.permute.xlu1 %4941  ;;  %v4944_v23 = vpop.permute.xlu0 %4943 }
 0x6a4   :  { %4851 = vmatprep.subr.bf16.mxu0 %v4662_v8  ;;  %10113 = vmatprep.subr.bf16.mxu1 %v11200_v52  ;;  %v5096_v8 = vld [vmem:[#allocation4 + $0x460] sm:$0xff] }
 0x6a5   :  { %4881 = vmatprep.mubr.bf16.mxu0 %v11201_v55  ;;  %10125 = vmatprep.mubr.msk.bf16.mxu1 %vm11209_vm9, %v11200_v52 }
 0x6a7   :  { %4852 = vmatpush1.bf16.msra.mxu0 %v4661_v44  ;;  %10114 = vmatpush3.bf16.msra.mxu1 %v4663_v22  ;;  %v5098_v44 = vld [vmem:[#allocation4 + $0x470] sm:$0xff]  ;;  %v4946_v22 = vsel %vm3431_vm6, %v4942_v21, %v4944_v23  ;;  %v5144_v21 = vld [vmem:[#allocation4 + $0x5e0] sm:$0xff]  ;;  %v5572_v23 = vld [vmem:[#allocation4 + $0x798] sm:$0xff] }
 0x6a8   :  { %4853 = vmatprep.subr.bf16.mxu0 %v4671_v13  ;;  %10115 = vmatprep.subr.bf16.mxu1 %v11200_v52  ;;  %4950 = vst.msk [vmem:[#allocation3 + $0x28] sm:$0xff] %vm3997_vm7, %v4946_v22  ;;  %v5095_v13 = vld [vmem:[#allocation4 + $0x458] sm:$0xff] }
 0x6ab   :  { %4854 = vmatpush1.bf16.msra.mxu0 %v4670_v26  ;;  %10116 = vmatpush3.bf16.msra.mxu1 %v4672_v12  ;;  %v5097_v26 = vld [vmem:[#allocation4 + $0x468] sm:$0xff]  ;;  %v4508_v12 = vpop.permute.xlu1 %4507 }
 0x6ac   :  { %4855 = vmatprep.subr.bf16.mxu0 %v4680_v28  ;;  %10117 = vmatprep.subr.bf16.mxu1 %v11200_v52  ;;  %v4510_v28 = vpop.permute.xlu0 %4509  ;;  %4513 = vst.msk [vmem:[#allocation3] sm:$0xff] %vm3997_vm7, %v4508_v12 }
 0x6ad   :  { %4514 = vst.msk [vmem:[#allocation3 + $0x20] sm:$0xff] %vm3997_vm7, %v4510_v28  ;;  %v5520_v28 = vld [vmem:[#allocation4 + $0x5f8] sm:$0xff] }
 0x6af   :  { %4856 = vmatpush1.bf16.msra.mxu0 %v4679_v59  ;;  %10118 = vmatpush3.bf16.msra.mxu1 %v4681_v19  ;;  %v5105_v59 = vld [vmem:[#allocation4 + $0x4a8] sm:$0xff]  ;;  %v5107_v19 = vld [vmem:[#allocation4 + $0x4b8] sm:$0xff] }
 0x6b0   :  { %4857 = vmatprep.subr.bf16.mxu0 %v4689_v30  ;;  %10119 = vmatprep.subr.bf16.mxu1 %v11200_v52  ;;  %v5104_v30 = vld [vmem:[#allocation4 + $0x4a0] sm:$0xff] }
 0x6b3   :  { %4858 = vmatpush1.bf16.msra.mxu0 %v4688_v33  ;;  %10120 = vmatpush3.bf16.msra.mxu1 %v4690_v2  ;;  %v5106_v33 = vld [vmem:[#allocation4 + $0x4b0] sm:$0xff] }
 0x6b4   :  { %4859 = vmatprep.subr.bf16.mxu0 %v4698_v34  ;;  %10121 = vmatprep.subr.bf16.mxu1 %v11200_v52  ;;  %v5114_v2 = vld [vmem:[#allocation4 + $0x4f0] sm:$0xff]  ;;  %v5116_v34 = vld [vmem:[#allocation4 + $0x500] sm:$0xff] }
 0x6b7   :  { %4860 = vmatpush1.bf16.msra.mxu0 %v4697_v36  ;;  %10122 = vmatpush3.bf16.msra.mxu1 %v4699_v6  ;;  %v5113_v36 = vld [vmem:[#allocation4 + $0x4e8] sm:$0xff]  ;;  %v5115_v6 = vld [vmem:[#allocation4 + $0x4f8] sm:$0xff] }
 0x6b8   :  { %4861 = vmatprep.subr.bf16.mxu0 %v4707_v35  ;;  %10123 = vmatprep.subr.bf16.mxu1 %v11200_v52  ;;  %v5123_v35 = vld [vmem:[#allocation4 + $0x538] sm:$0xff] }
 0x6bb   :  { %4862 = vmatpush1.bf16.msra.mxu0 %v4706_v1  ;;  %10124 = vmatpush3.bf16.msra.mxu1 %v4708_v41  ;;  %v5125_v1 = vld [vmem:[#allocation4 + $0x548] sm:$0xff]  ;;  %v5122_v41 = vld [vmem:[#allocation4 + $0x530] sm:$0xff] }
 0x6bc   :  { %5156 = vmatprep.subr.bf16.mxu0 %v5083_v31  ;;  %5199 = vmatprep.subr.bf16.mxu1 %v5085_v38  ;;  %v5124_v31 = vld [vmem:[#allocation4 + $0x540] sm:$0xff] }
 0x6bd   :  { %v5132_v38 = vld [vmem:[#allocation4 + $0x580] sm:$0xff] }
 0x6be   :  { %9816 = vmatmul.mubr.msk.bf16.vlgmr.msra.gmra.mrb[48].mxu0 %vm3997_vm7, %v13756_v11  ;;  %10126 = vmatmul.mubr.msk.bf16.vlgmr.msra.gmra.mrb[48].mxu1 %vm3997_vm7, %v13756_v11  ;;  %v5112_v11 = vld [vmem:[#allocation4 + $0x4e0] sm:$0xff] }
 0x6bf   :  { %5157 = vmatpush1.bf16.msra.mxu0 %v5082_v42  ;;  %5200 = vmatpush1.bf16.msra.mxu1 %v5084_v10  ;;  %v5134_v42 = vld [vmem:[#allocation4 + $0x590] sm:$0xff]  ;;  %v5131_v10 = vld [vmem:[#allocation4 + $0x578] sm:$0xff] }
 0x6c0   :  { %5158 = vmatprep.subr.bf16.mxu0 %v5092_v17  ;;  %5201 = vmatprep.subr.bf16.mxu1 %v5094_v5  ;;  %v5133_v17 = vld [vmem:[#allocation4 + $0x588] sm:$0xff] }
 0x6c1   :  { %5188 = vmatprep.mubr.bf16.mxu0 %v11201_v55  ;;  %5231 = vmatprep.mubr.bf16.mxu1 %v11201_v55  ;;  %v5141_v5 = vld [vmem:[#allocation4 + $0x5c8] sm:$0xff] }
 0x6c3   :  { %5159 = vmatpush1.bf16.msra.mxu0 %v5091_v61  ;;  %5202 = vmatpush1.bf16.msra.mxu1 %v5093_v47  ;;  %v5143_v61 = vld [vmem:[#allocation4 + $0x5d8] sm:$0xff]  ;;  %v5140_v47 = vld [vmem:[#allocation4 + $0x5c0] sm:$0xff] }
 0x6c4   :  { %5160 = vmatprep.subr.bf16.mxu0 %v5101_v48  ;;  %5203 = vmatprep.subr.bf16.mxu1 %v5103_v14  ;;  %v5142_v48 = vld [vmem:[#allocation4 + $0x5d0] sm:$0xff] }
 0x6c5   :  { %v5519_v14 = vld [vmem:[#allocation4 + $0x5f0] sm:$0xff] }
 0x6c7   :  { %5161 = vmatpush1.bf16.msra.mxu0 %v5100_v46  ;;  %5204 = vmatpush1.bf16.msra.mxu1 %v5102_v43  ;;  %v5090_v46 = vld [vmem:[#allocation4 + $0x430] sm:$0xff]  ;;  %v5518_v43 = vld [vmem:[#allocation4 + $0x5e8] sm:$0xff] }
 0x6c8   :  { %5162 = vmatprep.subr.bf16.mxu0 %v5110_v3  ;;  %5205 = vmatprep.subr.bf16.mxu1 %v5112_v11  ;;  %v5528_v3 = vld [vmem:[#allocation4 + $0x638] sm:$0xff] }
 0x6c9   :  { %v5099_v11 = vld [vmem:[#allocation4 + $0x478] sm:$0xff] }
 0x6cb   :  { %5163 = vmatpush1.bf16.msra.mxu0 %v5109_v27  ;;  %5206 = vmatpush1.bf16.msra.mxu1 %v5111_v54  ;;  %v5527_v27 = vld [vmem:[#allocation4 + $0x630] sm:$0xff]  ;;  %v5537_v54 = vld [vmem:[#allocation4 + $0x680] sm:$0xff] }
 0x6cc   :  { %5164 = vmatprep.subr.bf16.mxu0 %v5119_v45  ;;  %5207 = vmatprep.subr.bf16.mxu1 %v5121_v56  ;;  %v5108_v45 = vld [vmem:[#allocation4 + $0x4c0] sm:$0xff]  ;;  %v5536_v56 = vld [vmem:[#allocation4 + $0x678] sm:$0xff] }
 0x6cf   :  { %5165 = vmatpush1.bf16.msra.mxu0 %v5118_v9  ;;  %5208 = vmatpush1.bf16.msra.mxu1 %v5120_v0  ;;  %v5546_v9 = vld [vmem:[#allocation4 + $0x6c8] sm:$0xff] }
 0x6d0   :  { %5166 = vmatprep.subr.bf16.mxu0 %v5128_v7  ;;  %5209 = vmatprep.subr.bf16.mxu1 %v5130_v57  ;;  %v5117_v0 = vld [vmem:[#allocation4 + $0x508] sm:$0xff]  ;;  %v5810_v7 = vpop.permute.xlu1 %5809  ;;  %v5812_v57 = vpop.permute.xlu0 %5811 }
 0x6d3   :  { %5167 = vmatpush1.bf16.msra.mxu0 %v5127_v58  ;;  %5210 = vmatpush1.bf16.msra.mxu1 %v5129_v60  ;;  %v5817_v58 = vsel %vm2821_vm5, %v5810_v7, %v5812_v57  ;;  %v5126_v60 = vld [vmem:[#allocation4 + $0x550] sm:$0xff]  ;;  %v5534_v7 = vld [vmem:[#allocation4 + $0x668] sm:$0xff]  ;;  %v5533_v57 = vld [vmem:[#allocation4 + $0x660] sm:$0xff] }
 0x6d4   :  { %5168 = vmatprep.subr.bf16.mxu0 %v5137_v32  ;;  %5211 = vmatprep.subr.bf16.mxu1 %v5139_v37  ;;  %v5554_v32 = vld [vmem:[#allocation4 + $0x708] sm:$0xff]  ;;  %5821 = vst.msk [vmem:[#allocation3 + $0x18] sm:$0xff] %vm3997_vm7, %v5817_v58  ;;  %v5564_v37 = vld [vmem:[#allocation4 + $0x758] sm:$0xff]  ;;  %v5535_v58 = vld [vmem:[#allocation4 + $0x670] sm:$0xff] }
 0x6d7   :  { %5169 = vmatpush1.bf16.msra.mxu0 %v5136_v4  ;;  %5212 = vmatpush1.bf16.msra.mxu1 %v5138_v39  ;;  %v5814_v4 = vpop.permute.xlu1 %5813  ;;  %v5816_v39 = vpop.permute.xlu0 %5815 }
 0x6d8   :  { %5242 = vmatprep.subr.bf16.mxu0 %v5087_v25  ;;  %5285 = vmatprep.subr.bf16.mxu1 %v5089_v63  ;;  %v5818_v49 = vsel %vm2821_vm5, %v5814_v4, %v5816_v39  ;;  %v5563_v25 = vld [vmem:[#allocation4 + $0x750] sm:$0xff]  ;;  %v5573_v63 = vld [vmem:[#allocation4 + $0x7a0] sm:$0xff]  ;;  %v5552_v4 = vld [vmem:[#allocation4 + $0x6f8] sm:$0xff] }
 0x6d9   :  { %5822 = vst.msk [vmem:[#allocation3 + $0x38] sm:$0xff] %vm3997_vm7, %v5818_v49  ;;  %v5551_v39 = vld [vmem:[#allocation4 + $0x6f0] sm:$0xff]  ;;  %v5553_v49 = vld [vmem:[#allocation4 + $0x700] sm:$0xff] }
 0x6da   :  { %9818 = vmatmul.mubr.msk.bf16.vlgmr.msra.gmra.mrb[52].mxu0 %vm3997_vm7, %v13791_v16  ;;  %9819 = vmatmul.mubr.msk.bf16.vlgmr.msra.gmra.mrb[52].mxu1 %vm3997_vm7, %v13791_v16 }
 0x6db   :  { %5243 = vmatpush1.bf16.msra.mxu0 %v5086_v29  ;;  %5286 = vmatpush1.bf16.msra.mxu1 %v5088_v20  ;;  %v5374_v18 = vpop.permute.xlu1 %5373  ;;  %v5376_v29 = vpop.permute.xlu0 %5375 }
 0x6dc   :  { %5244 = vmatprep.subr.bf16.mxu0 %v5096_v8  ;;  %5287 = vmatprep.subr.bf16.mxu1 %v5098_v44  ;;  %v5381_v20 = vsel %vm4210_vm8, %v5374_v18, %v5376_v29  ;;  %v5521_v8 = vld [vmem:[#allocation4 + $0x600] sm:$0xff]  ;;  %v5523_v44 = vld [vmem:[#allocation4 + $0x610] sm:$0xff] }
 0x6dd   :  { %5274 = vmatprep.mubr.bf16.mxu0 %v11201_v55  ;;  %5317 = vmatprep.mubr.bf16.mxu1 %v11201_v55  ;;  %5385 = vst.msk [vmem:[#allocation3 + $0x10] sm:$0xff] %vm3997_vm7, %v5381_v20  ;;  %v5570_v20 = vld [vmem:[#allocation4 + $0x788] sm:$0xff] }
 0x6df   :  { %5245 = vmatpush1.bf16.msra.mxu0 %v5095_v13  ;;  %5288 = vmatpush1.bf16.msra.mxu1 %v5097_v26  ;;  %v5378_v22 = vpop.permute.xlu1 %5377  ;;  %v5380_v13 = vpop.permute.xlu0 %5379  ;;  %v13826_v26 = vsel %vm2821_vm5, %v13784_v40, %v13786_v24  ;;  %v5529_v40 = vld [vmem:[#allocation4 + $0x640] sm:$0xff]  ;;  %v5531_v24 = vld [vmem:[#allocation4 + $0x650] sm:$0xff] }
 0x6e0   :  { %5246 = vmatprep.subr.bf16.mxu0 %v5105_v59  ;;  %5289 = vmatprep.subr.bf16.mxu1 %v5107_v19  ;;  %v5382_v12 = vsel %vm4210_vm8, %v5378_v22, %v5380_v13  ;;  %v5522_v59 = vld [vmem:[#allocation4 + $0x608] sm:$0xff] }
 0x6e1   :  { %5386 = vst.msk [vmem:[#allocation3 + $0x30] sm:$0xff] %vm3997_vm7, %v5382_v12  ;;  %v5530_v19 = vld [vmem:[#allocation4 + $0x648] sm:$0xff]  ;;  %v5569_v12 = vld [vmem:[#allocation4 + $0x780] sm:$0xff] }
 0x6e3   :  { %5247 = vmatpush1.bf16.msra.mxu0 %v5104_v30  ;;  %5290 = vmatpush1.bf16.msra.mxu1 %v5106_v33  ;;  %v5532_v30 = vld [vmem:[#allocation4 + $0x658] sm:$0xff]  ;;  %v5539_v33 = vld [vmem:[#allocation4 + $0x690] sm:$0xff] }
 0x6e4   :  { %5248 = vmatprep.subr.bf16.mxu0 %v5114_v2  ;;  %5291 = vmatprep.subr.bf16.mxu1 %v5116_v34  ;;  %v5541_v2 = vld [vmem:[#allocation4 + $0x6a0] sm:$0xff]  ;;  %v5540_v34 = vld [vmem:[#allocation4 + $0x698] sm:$0xff] }
 0x6e7   :  { %5249 = vmatpush1.bf16.msra.mxu0 %v5113_v36  ;;  %5292 = vmatpush1.bf16.msra.mxu1 %v5115_v6  ;;  %v5548_v36 = vld [vmem:[#allocation4 + $0x6d8] sm:$0xff]  ;;  %v5550_v6 = vld [vmem:[#allocation4 + $0x6e8] sm:$0xff] }
 0x6e8   :  { %5250 = vmatprep.subr.bf16.mxu0 %v5123_v35  ;;  %5293 = vmatprep.subr.bf16.mxu1 %v5125_v1  ;;  %v5547_v35 = vld [vmem:[#allocation4 + $0x6d0] sm:$0xff]  ;;  %v5549_v1 = vld [vmem:[#allocation4 + $0x6e0] sm:$0xff] }
 0x6eb   :  { %5251 = vmatpush1.bf16.msra.mxu0 %v5122_v41  ;;  %5294 = vmatpush1.bf16.msra.mxu1 %v5124_v31  ;;  %v5557_v41 = vld [vmem:[#allocation4 + $0x720] sm:$0xff]  ;;  %v5559_v31 = vld [vmem:[#allocation4 + $0x730] sm:$0xff] }
 0x6ec   :  { %5252 = vmatprep.subr.bf16.mxu0 %v5132_v38  ;;  %5295 = vmatprep.subr.bf16.mxu1 %v5134_v42  ;;  %v5558_v38 = vld [vmem:[#allocation4 + $0x728] sm:$0xff]  ;;  %v5556_v42 = vld [vmem:[#allocation4 + $0x718] sm:$0xff] }
 0x6ef   :  { %5253 = vmatpush1.bf16.msra.mxu0 %v5131_v10  ;;  %5296 = vmatpush1.bf16.msra.mxu1 %v5133_v17 }
 0x6f0   :  { %5254 = vmatprep.subr.bf16.mxu0 %v5141_v5  ;;  %5297 = vmatprep.subr.bf16.mxu1 %v5143_v61  ;;  %v5566_v5 = vld [vmem:[#allocation4 + $0x768] sm:$0xff]  ;;  %v5568_v61 = vld [vmem:[#allocation4 + $0x778] sm:$0xff] }
 0x6f3   :  { %5255 = vmatpush1.bf16.msra.mxu0 %v5140_v47  ;;  %5298 = vmatpush1.bf16.msra.mxu1 %v5142_v48 }
 0x6f4   :  { %10129 = vmatprep.subr.bf16.mxu0 %v11200_v52  ;;  %5592 = vmatprep.subr.bf16.mxu1 %v5519_v14 }
 0x6f6   :  { %9820 = vmatmul.mubr.msk.bf16.vlgmr.msra.gmra.mrb[56].mxu0 %vm3997_vm7, %v13791_v16  ;;  %9821 = vmatmul.mubr.msk.bf16.vlgmr.msra.gmra.mrb[56].mxu1 %vm3997_vm7, %v13791_v16 }
 0x6f7   :  { %10130 = vmatpush3.bf16.msra.mxu0 %v5090_v46  ;;  %5593 = vmatpush1.bf16.msra.mxu1 %v5518_v43 }
 0x6f8   :  { %10131 = vmatprep.subr.bf16.mxu0 %v11200_v52  ;;  %5594 = vmatprep.subr.bf16.mxu1 %v5528_v3 }
 0x6f9   :  { %10143 = vmatprep.mubr.msk.bf16.mxu0 %vm11209_vm9, %v11200_v52  ;;  %5624 = vmatprep.mubr.bf16.mxu1 %v11201_v55 }
 0x6fb   :  { %10132 = vmatpush3.bf16.msra.mxu0 %v5099_v11  ;;  %5595 = vmatpush1.bf16.msra.mxu1 %v5527_v27  ;;  %v5565_v11 = vld [vmem:[#allocation4 + $0x760] sm:$0xff]  ;;  %v5567_v27 = vld [vmem:[#allocation4 + $0x770] sm:$0xff] }
 0x6fc   :  { %10133 = vmatprep.subr.bf16.mxu0 %v11200_v52  ;;  %5596 = vmatprep.subr.bf16.mxu1 %v5537_v54  ;;  %v5575_v54 = vld [vmem:[#allocation4 + $0x7b0] sm:$0xff] }
 0x6ff   :  { %10134 = vmatpush3.bf16.msra.mxu0 %v5108_v45  ;;  %5597 = vmatpush1.bf16.msra.mxu1 %v5536_v56  ;;  %v5577_v45 = vld [vmem:[#allocation4 + $0x7c0] sm:$0xff]  ;;  %v5574_v56 = vld [vmem:[#allocation4 + $0x7a8] sm:$0xff] }
 0x700   :  { %10135 = vmatprep.subr.bf16.mxu0 %v11200_v52  ;;  %5598 = vmatprep.subr.bf16.mxu1 %v5546_v9  ;;  %v5576_v9 = vld [vmem:[#allocation4 + $0x7b8] sm:$0xff] }
 0x703   :  { %10136 = vmatpush3.bf16.msra.mxu0 %v5117_v0  ;;  %5599 = vmatpush1.bf16.msra.mxu1 %v5545_v62  ;;  %v5525_v0 = vld [vmem:[#allocation4 + $0x620] sm:$0xff]  ;;  %v5524_v62 = vld [vmem:[#allocation4 + $0x618] sm:$0xff] }
 0x704   :  { %10137 = vmatprep.subr.bf16.mxu0 %v11200_v52  ;;  %5600 = vmatprep.subr.bf16.mxu1 %v5555_v50  ;;  %v5526_v50 = vld [vmem:[#allocation4 + $0x628] sm:$0xff] }
 0x707   :  { %10138 = vmatpush3.bf16.msra.mxu0 %v5126_v60  ;;  %5601 = vmatpush1.bf16.msra.mxu1 %v5554_v32  ;;  %v5543_v60 = vld [vmem:[#allocation4 + $0x6b0] sm:$0xff]  ;;  %v5542_v32 = vld [vmem:[#allocation4 + $0x6a8] sm:$0xff] }
 0x708   :  { %10139 = vmatprep.subr.bf16.mxu0 %v11200_v52  ;;  %5602 = vmatprep.subr.bf16.mxu1 %v5564_v37  ;;  %v5544_v37 = vld [vmem:[#allocation4 + $0x6b8] sm:$0xff] }
 0x70b   :  { %10140 = vmatpush3.bf16.msra.mxu0 %v5135_v15  ;;  %5603 = vmatpush1.bf16.msra.mxu1 %v5563_v25  ;;  %v5561_v15 = vld [vmem:[#allocation4 + $0x740] sm:$0xff]  ;;  %v5560_v25 = vld [vmem:[#allocation4 + $0x738] sm:$0xff] }
 0x70c   :  { %10141 = vmatprep.subr.bf16.mxu0 %v11200_v52  ;;  %5604 = vmatprep.subr.bf16.mxu1 %v5573_v63  ;;  %v5562_v63 = vld [vmem:[#allocation4 + $0x748] sm:$0xff] }
 0x70f   :  { %10142 = vmatpush3.bf16.msra.mxu0 %v5144_v21  ;;  %5605 = vmatpush1.bf16.msra.mxu1 %v5572_v23 }
 0x710   :  { %5635 = vmatprep.subr.bf16.mxu0 %v5521_v8  ;;  %5678 = vmatprep.subr.bf16.mxu1 %v5523_v44 }
 0x712   :  { %10144 = vmatmul.mubr.msk.bf16.vlgmr.msra.gmra.mrb[60].mxu0 %vm3997_vm7, %v13791_v16  ;;  %9823 = vmatmul.mubr.msk.bf16.vlgmr.msra.gmra.mrb[60].mxu1 %vm3997_vm7, %v13826_v26  ;;  %v5538_v16 = vld [vmem:[#allocation4 + $0x688] sm:$0xff] }
 0x713   :  { %5636 = vmatpush1.bf16.msra.mxu0 %v5520_v28  ;;  %5679 = vmatpush1.bf16.msra.mxu1 %v5522_v59  ;;  %v5571_v28 = vld [vmem:[#allocation4 + $0x790] sm:$0xff] }
 0x714   :  { %5637 = vmatprep.subr.bf16.mxu0 %v5530_v19  ;;  %5680 = vmatprep.subr.bf16.mxu1 %v5532_v30  ;;  %v5579_v59 = vld [vmem:[#allocation4 + $0x7d0] sm:$0xff]  ;;  %v5954_v30 = vld [vmem:[#allocation2 + $0x8] sm:$0xff] }
 0x715   :  { %5667 = vmatprep.mubr.bf16.mxu0 %v11201_v55  ;;  %5710 = vmatprep.mubr.bf16.mxu1 %v11201_v55  ;;  %v5953_v19 = vld [vmem:[#allocation2] sm:$0xff] }
 0x717   :  { %5638 = vmatpush1.bf16.msra.mxu0 %v5529_v40  ;;  %5681 = vmatpush1.bf16.msra.mxu1 %v5531_v24  ;;  %v5578_v40 = vld [vmem:[#allocation4 + $0x7c8] sm:$0xff]  ;;  %v5580_v24 = vld [vmem:[#allocation4 + $0x7d8] sm:$0xff] }
 0x718   :  { %5639 = vmatprep.subr.bf16.mxu0 %v5539_v33  ;;  %5682 = vmatprep.subr.bf16.mxu1 %v5541_v2  ;;  %v10382_v33 = vpack.c.bf16 %v5954_v30, %v5953_v19  ;;  %v5955_v2 = vld [vmem:[#allocation2 + $0x10] sm:$0xff] }
 0x71b   :  { %5640 = vmatpush1.bf16.msra.mxu0 %v5538_v16  ;;  %5683 = vmatpush1.bf16.msra.mxu1 %v5540_v34  ;;  %v5956_v16 = vld [vmem:[#allocation2 + $0x18] sm:$0xff] }
 0x71c   :  { %5641 = vmatprep.subr.bf16.mxu0 %v5548_v36  ;;  %5684 = vmatprep.subr.bf16.mxu1 %v5550_v6  ;;  %v10386_v34 = vpack.c.bf16 %v5956_v16, %v5955_v2  ;;  %v5957_v36 = vld [vmem:[#allocation2 + $0x20] sm:$0xff]  ;;  %v5958_v6 = vld [vmem:[#allocation2 + $0x28] sm:$0xff] }
 0x71f   :  { %5642 = vmatpush1.bf16.msra.mxu0 %v5547_v35  ;;  %5685 = vmatpush1.bf16.msra.mxu1 %v5549_v1  ;;  %v5951_v35 = vld [vmem:[%s15518_s5] sm:$0xff]  ;;  %v9830_v1 = vld [vmem:[%s15518_s5 + $0x10] sm:$0xff] }
 0x720   :  { %5643 = vmatprep.subr.bf16.mxu0 %v5557_v41  ;;  %5686 = vmatprep.subr.bf16.mxu1 %v5559_v31  ;;  %v10390_v41 = vpack.c.bf16 %v5958_v6, %v5957_v36  ;;  %v5959_v31 = vld [vmem:[#allocation2 + $0x30] sm:$0xff] }
 0x721   :  { %v4326_v10 = vpop.f32.mrb[32].mxu0  ;;  %v4369_v17 = vpop.f32.mrb[32].mxu1 }
 0x722   :  { %4515 = vst.msk [vmem:[#allocation3 + $0x40] sm:$0xff] %vm3997_vm7, %v4326_v10  ;;  %4539 = vrot.lane.b32.xlu0 %v4369_v17, %s11203_s17  ;;  %v4371_v47 = vpop.f32.mrb[33].mxu1  ;;  %4521 = vrot.lane.b32.xlu1 %v4326_v10, %s11202_s0  ;;  %v4328_v48 = vpop.f32.mrb[33].mxu0  ;;  %v5962_v10 = vld [vmem:[#allocation2 + $0x48] sm:$0xff] }
 0x723   :  { %5687 = vmatpush1.bf16.msra.mxu1 %v5558_v38  ;;  %5644 = vmatpush1.bf16.msra.mxu0 %v5556_v42  ;;  %v4330_v14 = vpop.f32.mrb[34].mxu0  ;;  %v4373_v46 = vpop.f32.mrb[34].mxu1  ;;  %v5960_v38 = vld [vmem:[#allocation2 + $0x38] sm:$0xff]  ;;  %v5961_v42 = vld [vmem:[#allocation2 + $0x40] sm:$0xff] }
 0x724   :  { %4516 = vst.msk [vmem:[#allocation3 + $0x60] sm:$0xff] %vm3997_vm7, %v4330_v14  ;;  %v4332_v43 = vpop.f32.mrb[35].mxu0  ;;  %v13840_v3 = vpop.f32.mrb[35].mxu1  ;;  %5645 = vmatprep.subr.bf16.mxu0 %v5566_v5  ;;  %5688 = vmatprep.subr.bf16.mxu1 %v5568_v61  ;;  %v5963_v5 = vld [vmem:[#allocation2 + $0x50] sm:$0xff]  ;;  %v5964_v61 = vld [vmem:[#allocation2 + $0x58] sm:$0xff] }
 0x726   :  { %4553 = vrot.lane.b32.xlu1 %v4369_v17, %s11204_s30  ;;  %4523 = vrot.lane.b32.xlu0 %v4328_v48, %s11202_s0  ;;  %v10398_v17 = vpack.c.bf16 %v5962_v10, %v5961_v42 }
 0x727   :  { %5646 = vmatpush1.bf16.msra.mxu0 %v5565_v11  ;;  %5689 = vmatpush1.bf16.msra.mxu1 %v5567_v27 }
 0x728   :  { %5647 = vmatprep.subr.bf16.mxu0 %v5575_v54  ;;  %5690 = vmatprep.subr.bf16.mxu1 %v5577_v45 }
 0x72a   :  { %4537 = vrot.lane.b32.xlu1 %v4328_v48, %s11203_s17  ;;  %4555 = vrot.lane.b32.xlu0 %v4371_v47, %s11204_s30 }
 0x72b   :  { %5648 = vmatpush1.bf16.msra.mxu0 %v5574_v56  ;;  %5691 = vmatpush1.bf16.msra.mxu1 %v5576_v9 }
 0x72c   :  { %5721 = vmatprep.subr.bf16.mxu0 %v5525_v0  ;;  %10147 = vmatprep.subr.bf16.mxu1 %v11200_v52  ;;  %v6137_v0 = vld [vmem:[#allocation3 + $0x8] sm:$0xff] }
 0x72e   :  { %9824 = vmatmul.mubr.msk.bf16.vlgmr.msra.gmra.mrb[64].mxu0 %vm3997_vm7, %v13826_v26  ;;  %9825 = vmatmul.mubr.msk.bf16.vlgmr.msra.gmra.mrb[64].mxu1 %vm3997_vm7, %v13826_v26 }
 0x72f   :  { %5722 = vmatpush1.bf16.msra.mxu0 %v5524_v62  ;;  %10148 = vmatpush3.bf16.msra.mxu1 %v5526_v50  ;;  %v6141_v62 = vld [vmem:[#allocation3 + $0x28] sm:$0xff]  ;;  %v6139_v50 = vld [vmem:[#allocation3 + $0x18] sm:$0xff] }
 0x730   :  { %4569 = vrot.lane.b32.xlu1 %v4371_v47, %s11205_s20  ;;  %4543 = vrot.lane.b32.xlu0 %v4373_v46, %s11203_s17  ;;  %v10402_v47 = vpack.c.bf16 %v5964_v61, %v5963_v5 }
 0x731   :  { %5723 = vmatprep.subr.bf16.mxu0 %v5534_v7  ;;  %10149 = vmatprep.subr.bf16.mxu1 %v11200_v52  ;;  %v6143_v7 = vld [vmem:[#allocation3 + $0x38] sm:$0xff] }
 0x732   :  { %5753 = vmatprep.mubr.bf16.mxu0 %v11201_v55  ;;  %10161 = vmatprep.mubr.msk.bf16.mxu1 %vm11209_vm9, %v11200_v52 }
 0x733   :  { %5724 = vmatpush1.bf16.msra.mxu0 %v5533_v57  ;;  %10150 = vmatpush3.bf16.msra.mxu1 %v5535_v58  ;;  %v13911_v57 = vpack.c.bf16 %v6141_v62, %v6137_v0  ;;  %v6136_v58 = vld [vmem:[#allocation3] sm:$0xff] }
 0x734   :  { %4525 = vrot.lane.b32.xlu1 %v4330_v14, %s11202_s0  ;;  %4527 = vrot.lane.b32.xlu0 %v4332_v43, %s11202_s0 }
 0x735   :  { %5725 = vmatprep.subr.bf16.mxu0 %v5543_v60  ;;  %10151 = vmatprep.subr.bf16.mxu1 %v11200_v52  ;;  %v6140_v60 = vld [vmem:[#allocation3 + $0x20] sm:$0xff] }
 0x737   :  { %5726 = vmatpush1.bf16.msra.mxu0 %v5542_v32  ;;  %10152 = vmatpush3.bf16.msra.mxu1 %v5544_v37  ;;  %v5952_v37 = vld [vmem:[%s15518_s5 + $0x8] sm:$0xff] }
 0x738   :  { %4557 = vrot.lane.b32.xlu1 %v4373_v46, %s11204_s30  ;;  %4559 = vrot.lane.b32.xlu0 %v13840_v3, %s11204_s30  ;;  %v5965_v46 = vld [vmem:[#allocation2 + $0x60] sm:$0xff] }
 0x739   :  { %5727 = vmatprep.subr.bf16.mxu0 %v5552_v4  ;;  %10153 = vmatprep.subr.bf16.mxu1 %v11200_v52  ;;  %v13916_v4 = vpack.c.bf16 %v6143_v7, %v6139_v50 }
 0x73b   :  { %5728 = vmatpush1.bf16.msra.mxu0 %v5551_v39  ;;  %10154 = vmatpush3.bf16.msra.mxu1 %v5553_v49  ;;  %v13919_v39 = vpack.c.bf16 %v6140_v60, %v6136_v58 }
 0x73c   :  { %4541 = vrot.lane.b32.xlu1 %v4332_v43, %s11203_s17  ;;  %5729 = vmatprep.subr.bf16.mxu0 %v5561_v15  ;;  %v5966_v43 = vld [vmem:[#allocation2 + $0x68] sm:$0xff]  ;;  %v6138_v15 = vld [vmem:[#allocation3 + $0x10] sm:$0xff] }
 0x73d   :  { %v4412_v18 = vpop.f32.mrb[36].mxu0  ;;  %v4455_v29 = vpop.f32.mrb[36].mxu1  ;;  %10155 = vmatprep.subr.bf16.mxu1 %v11200_v52  ;;  %v10406_v9 = vpack.c.bf16 %v5966_v43, %v5965_v46 }
 0x73e   :  { %v4457_v21 = vpop.f32.mrb[37].mxu1  ;;  %4571 = vrot.lane.b32.xlu0 %v4412_v18, %s11205_s20  ;;  %v4414_v23 = vpop.f32.mrb[37].mxu0 }
 0x73f   :  { %4623 = vst.msk [vmem:[#allocation3 + $0x240] sm:$0xff] %vm3997_vm7, %v4457_v21  ;;  %v4459_v8 = vpop.f32.mrb[38].mxu1  ;;  %5730 = vmatpush1.bf16.msra.mxu0 %v5560_v25  ;;  %10156 = vmatpush3.bf16.msra.mxu1 %v5562_v63  ;;  %v4416_v44 = vpop.f32.mrb[38].mxu0  ;;  %v6142_v25 = vld [vmem:[#allocation3 + $0x30] sm:$0xff] }
 0x740   :  { %4573 = vrot.lane.b32.xlu1 %v13840_v3, %s11205_s20  ;;  %v13870_v22 = vpop.f32.mrb[39].mxu0  ;;  %v13872_v13 = vpop.f32.mrb[39].mxu1  ;;  %5731 = vmatprep.subr.bf16.mxu0 %v5570_v20  ;;  %v13930_v20 = vpack.c.bf16 %v6142_v25, %v6138_v15 }
 0x741   :  { %4624 = vst.msk [vmem:[#allocation3 + $0x260] sm:$0xff] %vm3997_vm7, %v13872_v13  ;;  %10157 = vmatprep.subr.bf16.mxu1 %v11200_v52 }
 0x742   :  { %4603 = vrot.lane.b32.xlu0 %v4455_v29, %s11206_s26 }
 0x743   :  { %5732 = vmatpush1.bf16.msra.mxu0 %v5569_v12  ;;  %10158 = vmatpush3.bf16.msra.mxu1 %v5571_v28 }
 0x744   :  { %4585 = vrot.lane.b32.xlu1 %v4412_v18, %s11207_s15  ;;  %5733 = vmatprep.subr.bf16.mxu0 %v5579_v59  ;;  %v6148_v18 = vld [vmem:[#allocation3 + $0x60] sm:$0xff] }
 0x745   :  { %10159 = vmatprep.subr.bf16.mxu1 %v11200_v52 }
 0x746   :  { %4587 = vrot.lane.b32.xlu0 %v4414_v23, %s11207_s15 }
 0x747   :  { %5734 = vmatpush1.bf16.msra.mxu0 %v5578_v40  ;;  %10160 = vmatpush3.bf16.msra.mxu1 %v5580_v24 }
 0x748   :  { %4615 = vrot.lane.b32.xlu1 %v4455_v29, %s11208_s27  ;;  %10383 = vmatprep.subr.bf16.mxu0 %v10382_v33  ;;  %v9831_v29 = vld [vmem:[%s15518_s5 + $0x18] sm:$0xff] }
 0x749   :  { %10411 = vmatprep.subr.bf16.mxu1 %v10382_v33 }
 0x74a   :  { %9826 = vmatmul.mubr.msk.bf16.vlgmr.msra.gmra.mrb[68].mxu0 %vm3997_vm7, %v13826_v26  ;;  %10162 = vmatmul.mubr.msk.bf16.vlgmr.msra.gmra.mrb[68].mxu1 %vm3997_vm7, %v13826_v26  ;;  %v10394_v26 = vpack.c.bf16 %v5960_v38, %v5959_v31 }
 0x74b   :  { %4575 = vrot.lane.b32.xlu0 %v4416_v44, %s11205_s20  ;;  %10385 = vmatpush3.bf16.msra.mxu0 %v10382_v33 }
 0x74c   :  { %4601 = vrot.lane.b32.xlu1 %v4414_v23, %s11206_s26  ;;  %10387 = vmatprep.subr.bf16.mxu0 %v10386_v34 }
 0x74d   :  { %10193 = vmatprep.mubr.msk.f32.mxu0 %vm3997_vm7, %v5951_v35  ;;  %10413 = vmatpush3.bf16.msra.mxu1 %v10382_v33 }
 0x74e   :  { %10415 = vmatprep.subr.bf16.mxu1 %v10386_v34  ;;  %10224 = vmatprep.mubr.msk.f32.mxu1 %vm3997_vm7, %v9830_v1 }
 0x74f   :  { %4607 = vrot.lane.b32.xlu0 %v4459_v8, %s11206_s26  ;;  %10389 = vmatpush3.bf16.msra.mxu0 %v10386_v34 }
 0x750   :  { %4629 = vrot.lane.b32.xlu1 %v4457_v21, %s11202_s0  ;;  %10391 = vmatprep.subr.bf16.mxu0 %v10390_v41  ;;  %v6144_v21 = vld [vmem:[#allocation3 + $0x40] sm:$0xff] }
 0x751   :  { %10417 = vmatpush3.bf16.msra.mxu1 %v10386_v34  ;;  %v13936_v23 = vpack.c.bf16 %v6148_v18, %v6144_v21 }
 0x752   :  { %10419 = vmatprep.subr.bf16.mxu1 %v10390_v41 }
 0x753   :  { %4617 = vrot.lane.b32.xlu0 %v4459_v8, %s11208_s27  ;;  %10393 = vmatpush3.bf16.msra.mxu0 %v10390_v41 }
 0x754   :  { %4589 = vrot.lane.b32.xlu1 %v4416_v44, %s11207_s15  ;;  %10395 = vmatprep.subr.bf16.mxu0 %v10394_v26 }
 0x755   :  { %10421 = vmatpush3.bf16.msra.mxu1 %v10390_v41 }
 0x756   :  { %10423 = vmatprep.subr.bf16.mxu1 %v10394_v26 }
 0x757   :  { %4591 = vrot.lane.b32.xlu0 %v13870_v22, %s11207_s15  ;;  %10397 = vmatpush3.bf16.msra.mxu0 %v10394_v26 }
 0x758   :  { %4605 = vrot.lane.b32.xlu1 %v13870_v22, %s11206_s26  ;;  %10399 = vmatprep.subr.bf16.mxu0 %v10398_v17 }
 0x759   :  { %v4498_v48 = vpop.f32.mrb[40].mxu0  ;;  %v4754_v14 = vpop.f32.mrb[40].mxu1  ;;  %10425 = vmatpush3.bf16.msra.mxu1 %v10394_v26 }
 0x75a   :  { %v10109_v3 = vpop.f32.mrb[41].mxu0  ;;  %4951 = vst.msk [vmem:[#allocation3 + $0x48] sm:$0xff] %vm3997_vm7, %v4754_v14  ;;  %v4756_v11 = vpop.f32.mrb[41].mxu1  ;;  %10427 = vmatprep.subr.bf16.mxu1 %v10398_v17 }
 0x75b   :  { %4631 = vrot.lane.b32.xlu0 %v4498_v48, %s11202_s0  ;;  %10401 = vmatpush3.bf16.msra.mxu0 %v10398_v17  ;;  %v4501_v27 = vpop.f32.mrb[42].mxu0  ;;  %v4758_v54 = vpop.f32.mrb[42].mxu1  ;;  %v6133_v3 = vld [vmem:[%s15520_s7 + $0x8] sm:$0xff] }
 0x75c   :  { %4633 = vrot.lane.b32.xlu1 %v13872_v13, %s11202_s0  ;;  %v10110_v45 = vpop.f32.mrb[43].mxu0  ;;  %4952 = vst.msk [vmem:[#allocation3 + $0x68] sm:$0xff] %vm3997_vm7, %v4758_v54  ;;  %v4760_v56 = vpop.f32.mrb[43].mxu1  ;;  %10403 = vmatprep.subr.bf16.mxu0 %v10402_v47 }
 0x75d   :  { %10429 = vmatpush3.bf16.msra.mxu1 %v10398_v17 }
 0x75e   :  { %10431 = vmatprep.subr.bf16.mxu1 %v10402_v47 }
 0x75f   :  { %4959 = vrot.lane.b32.xlu0 %v4756_v11, %s11202_s0  ;;  %10405 = vmatpush3.bf16.msra.mxu0 %v10402_v47 }
 0x760   :  { %4957 = vrot.lane.b32.xlu1 %v4754_v14, %s11202_s0  ;;  %10407 = vmatprep.subr.bf16.mxu0 %v10406_v9 }
 0x761   :  { %v6145_v32 = vld [vmem:[#allocation3 + $0x48] sm:$0xff]  ;;  %10433 = vmatpush3.bf16.msra.mxu1 %v10402_v47 }
 0x762   :  { %10435 = vmatprep.subr.bf16.mxu1 %v10406_v9 }
 0x763   :  { %4635 = vrot.lane.b32.xlu0 %v4501_v27, %s11202_s0  ;;  %10409 = vmatpush3.bf16.msra.mxu0 %v10406_v9  ;;  %v6149_v49 = vld [vmem:[#allocation3 + $0x68] sm:$0xff] }
 0x764   :  { %4973 = vrot.lane.b32.xlu1 %v4756_v11, %s11203_s17  ;;  %10439 = vmatprep.subr.bf16.mxu0 %v13911_v57  ;;  %v13923_v63 = vpack.c.bf16 %v6149_v49, %v6145_v32 }
 0x765   :  { %10437 = vmatpush3.bf16.msra.mxu1 %v10406_v9 }
 0x766   :  { %10194 = vmatmul.mubr.msk.f32.vlgmr.msra.gmra.mrb[72].mxu0 %vm3997_vm7, %v5952_v37  ;;  %10483 = vmatprep.subr.bf16.mxu1 %v13916_v4 }
 0x767   :  { %4963 = vrot.lane.b32.xlu0 %v4760_v56, %s11202_s0  ;;  %10441 = vmatpush1.bf16.msra.mxu0 %v13919_v39 }
 0x768   :  { %4961 = vrot.lane.b32.xlu1 %v4758_v54, %s11202_s0  ;;  %10443 = vmatprep.subr.bf16.mxu0 %v13923_v63 }
 0x769   :  { %10225 = vmatmul.mubr.msk.f32.vlgmr.msra.gmra.mrb[72].mxu1 %vm3997_vm7, %v9831_v29  ;;  %9834 = vmatprep.mubr.msk.f32.mxu0 %vm2806_vm3, %v6133_v3 }
 0x76a   :  { %10485 = vmatpush1.bf16.msra.mxu1 %v13930_v20  ;;  %9836 = vmatprep.mubr.msk.f32.mxu1 %vm2806_vm3, %v6133_v3 }
 0x76b   :  { %10445 = vmatpush1.bf16.msra.mxu0 %v13936_v23 }
 0x76c   :  { %4977 = vrot.lane.b32.xlu1 %v4760_v56, %s11203_s17 }
 0x775   :  { %v4797_v8 = vpop.f32.mrb[44].mxu0  ;;  %v4840_v44 = vpop.f32.mrb[44].mxu1 }
 0x776   :  { %v4842_v22 = vpop.f32.mrb[45].mxu1  ;;  %4989 = vrot.lane.b32.xlu1 %v4797_v8, %s11204_s30  ;;  %4975 = vrot.lane.b32.xlu0 %v4797_v8, %s11203_s17  ;;  %v4799_v13 = vpop.f32.mrb[45].mxu0 }
 0x777   :  { %v4801_v12 = vpop.f32.mrb[46].mxu0  ;;  %v4844_v28 = vpop.f32.mrb[46].mxu1 }
 0x778   :  { %v4803_v59 = vpop.f32.mrb[47].mxu0  ;;  %v4846_v19 = vpop.f32.mrb[47].mxu1 }
 0x77a   :  { %5021 = vrot.lane.b32.xlu1 %v4840_v44, %s11207_s15  ;;  %5007 = vrot.lane.b32.xlu0 %v4840_v44, %s11205_s20 }
 0x77e   :  { %5005 = vrot.lane.b32.xlu1 %v4799_v13, %s11205_s20  ;;  %4991 = vrot.lane.b32.xlu0 %v4799_v13, %s11204_s30 }
 0x782   :  { %5037 = vrot.lane.b32.xlu1 %v4842_v22, %s11206_s26  ;;  %5023 = vrot.lane.b32.xlu0 %v4842_v22, %s11207_s15 }
 0x786   :  { %4993 = vrot.lane.b32.xlu1 %v4801_v12, %s11204_s30  ;;  %4979 = vrot.lane.b32.xlu0 %v4801_v12, %s11203_s17 }
 0x78a   :  { %5025 = vrot.lane.b32.xlu1 %v4844_v28, %s11207_s15  ;;  %5011 = vrot.lane.b32.xlu0 %v4844_v28, %s11205_s20 }
 0x78e   :  { %5009 = vrot.lane.b32.xlu1 %v4803_v59, %s11205_s20  ;;  %4995 = vrot.lane.b32.xlu0 %v4803_v59, %s11204_s30 }
 0x791   :  { %v4883_v30 = vpop.f32.mrb[48].mxu0  ;;  %v4926_v40 = vpop.f32.mrb[48].mxu1 }
 0x792   :  { %v10127_v24 = vpop.f32.mrb[49].mxu1  ;;  %5041 = vrot.lane.b32.xlu1 %v4846_v19, %s11206_s26  ;;  %5027 = vrot.lane.b32.xlu0 %v4846_v19, %s11207_s15  ;;  %v4885_v33 = vpop.f32.mrb[49].mxu0 }
 0x793   :  { %5059 = vst.msk [vmem:[#allocation3 + $0x248] sm:$0xff] %vm3997_vm7, %v4885_v33  ;;  %v4887_v2 = vpop.f32.mrb[50].mxu0  ;;  %v4929_v16 = vpop.f32.mrb[50].mxu1 }
 0x794   :  { %v4889_v34 = vpop.f32.mrb[51].mxu0  ;;  %v10128_v36 = vpop.f32.mrb[51].mxu1 }
 0x795   :  { %5060 = vst.msk [vmem:[#allocation3 + $0x268] sm:$0xff] %vm3997_vm7, %v4889_v34  ;;  %v4540_v6 = vpop.permute.xlu0 %4539  ;;  %v4522_v35 = vpop.permute.xlu1 %4521 }
 0x796   :  { %5051 = vrot.lane.b32.xlu1 %v4883_v30, %s11208_s27  ;;  %5039 = vrot.lane.b32.xlu0 %v4883_v30, %s11206_s26 }
 0x799   :  { %v4554_v1 = vpop.permute.xlu1 %4553  ;;  %v4524_v41 = vpop.permute.xlu0 %4523 }
 0x79a   :  { %v4529_v31 = vsel %vm2776_vm4, %v4522_v35, %v4524_v41  ;;  %5067 = vrot.lane.b32.xlu0 %v4926_v40, %s11202_s0  ;;  %5065 = vrot.lane.b32.xlu1 %v4885_v33, %s11202_s0 }
 0x79b   :  { %4533 = vst.msk [vmem:[#allocation3 + $0x80] sm:$0xff] %vm3997_vm7, %v4529_v31 }
 0x79d   :  { %v4538_v38 = vpop.permute.xlu1 %4537  ;;  %v4556_v26 = vpop.permute.xlu0 %4555 }
 0x79e   :  { %v4545_v42 = vsel %vm2791_vm2, %v4538_v38, %v4540_v6  ;;  %v4561_v10 = vsel %vm2806_vm3, %v4554_v1, %v4556_v26  ;;  %5043 = vrot.lane.b32.xlu0 %v4887_v2, %s11206_s26  ;;  %5069 = vrot.lane.b32.xlu1 %v4889_v34, %s11202_s0 }
 0x79f   :  { %4549 = vst.msk [vmem:[#allocation3 + $0xc0] sm:$0xff] %vm3997_vm7, %v4545_v42  ;;  %4565 = vst.msk [vmem:[#allocation3 + $0x100] sm:$0xff] %vm3997_vm7, %v4561_v10 }
 0x7a2   :  { %v4570_v17 = vpop.permute.xlu1 %4569  ;;  %v4544_v5 = vpop.permute.xlu0 %4543  ;;  %5053 = vrot.lane.b32.xlu0 %v4887_v2, %s11208_s27 }
 0x7a6   :  { %v4526_v61 = vpop.permute.xlu1 %4525  ;;  %v4528_v47 = vpop.permute.xlu0 %4527  ;;  %5071 = vrot.lane.b32.xlu0 %v4929_v16, %s11202_s0 }
 0x7a7   :  { %v4530_v48 = vsel %vm2776_vm4, %v4526_v61, %v4528_v47 }
 0x7a8   :  { %4534 = vst.msk [vmem:[#allocation3 + $0xa0] sm:$0xff] %vm3997_vm7, %v4530_v48 }
 0x7aa   :  { %v4558_v14 = vpop.permute.xlu1 %4557  ;;  %v4560_v46 = vpop.permute.xlu0 %4559 }
 0x7ab   :  { %v4562_v43 = vsel %vm2806_vm3, %v4558_v14, %v4560_v46 }
 0x7ac   :  { %4566 = vst.msk [vmem:[#allocation3 + $0x120] sm:$0xff] %vm3997_vm7, %v4562_v43 }
 0x7ad   :  { %v5233_v11 = vpop.f32.mrb[52].mxu1  ;;  %v5190_v27 = vpop.f32.mrb[52].mxu0 }
 0x7ae   :  { %v4542_v54 = vpop.permute.xlu1 %4541  ;;  %5387 = vst.msk [vmem:[#allocation3 + $0x50] sm:$0xff] %vm3997_vm7, %v5190_v27  ;;  %v5235_v45 = vpop.f32.mrb[53].mxu1  ;;  %5411 = vrot.lane.b32.xlu0 %v5233_v11, %s11203_s17  ;;  %5393 = vrot.lane.b32.xlu1 %v5190_v27, %s11202_s0  ;;  %v6152_v27 = vld [vmem:[#allocation3 + $0x80] sm:$0xff] }
 0x7af   :  { %v4546_v56 = vsel %vm2791_vm2, %v4542_v54, %v4544_v5  ;;  %v5192_v9 = vpop.f32.mrb[53].mxu0  ;;  %v5237_v0 = vpop.f32.mrb[54].mxu1  ;;  %v6156_v14 = vld [vmem:[#allocation3 + $0xa0] sm:$0xff] }
 0x7b0   :  { %4550 = vst.msk [vmem:[#allocation3 + $0xe0] sm:$0xff] %vm3997_vm7, %v4546_v56  ;;  %v5194_v62 = vpop.f32.mrb[54].mxu0  ;;  %v5239_v50 = vpop.f32.mrb[55].mxu1  ;;  %v14047_v56 = vpack.c.bf16 %v6156_v14, %v6152_v27 }
 0x7b1   :  { %5388 = vst.msk [vmem:[#allocation3 + $0x70] sm:$0xff] %vm3997_vm7, %v5194_v62  ;;  %v4572_v7 = vpop.permute.xlu0 %4571  ;;  %v5196_v58 = vpop.f32.mrb[55].mxu0 }
 0x7b2   :  { %v4577_v60 = vsel %vm2821_vm5, %v4570_v17, %v4572_v7  ;;  %v4574_v32 = vpop.permute.xlu1 %4573  ;;  %5425 = vrot.lane.b32.xlu1 %v5233_v11, %s11204_s30  ;;  %5395 = vrot.lane.b32.xlu0 %v5192_v9, %s11202_s0 }
 0x7b3   :  { %4581 = vst.msk [vmem:[#allocation3 + $0x140] sm:$0xff] %vm3997_vm7, %v4577_v60 }
 0x7b5   :  { %v4604_v37 = vpop.permute.xlu0 %4603 }
 0x7b6   :  { %v4586_v49 = vpop.permute.xlu1 %4585  ;;  %5409 = vrot.lane.b32.xlu1 %v5192_v9, %s11203_s17  ;;  %5427 = vrot.lane.b32.xlu0 %v5235_v45, %s11204_s30 }
 0x7b9   :  { %v4588_v15 = vpop.permute.xlu0 %4587 }
 0x7ba   :  { %v4593_v25 = vsel %vm4210_vm8, %v4586_v49, %v4588_v15  ;;  %v4616_v18 = vpop.permute.xlu1 %4615  ;;  %5441 = vrot.lane.b32.xlu1 %v5235_v45, %s11205_s20  ;;  %5415 = vrot.lane.b32.xlu0 %v5237_v0, %s11203_s17 }
 0x7bb   :  { %4597 = vst.msk [vmem:[#allocation3 + $0x180] sm:$0xff] %vm3997_vm7, %v4593_v25  ;;  %4621 = vst.msk [vmem:[#allocation3 + $0x200] sm:$0xff] %vm3997_vm7, %v4616_v18  ;;  %v6146_v18 = vld [vmem:[#allocation3 + $0x50] sm:$0xff] }
 0x7bd   :  { %v4576_v29 = vpop.permute.xlu0 %4575 }
 0x7be   :  { %v4578_v21 = vsel %vm2821_vm5, %v4574_v32, %v4576_v29  ;;  %v4602_v8 = vpop.permute.xlu1 %4601  ;;  %5397 = vrot.lane.b32.xlu1 %v5194_v62, %s11202_s0  ;;  %5399 = vrot.lane.b32.xlu0 %v5196_v58, %s11202_s0  ;;  %v6150_v29 = vld [vmem:[#allocation3 + $0x70] sm:$0xff] }
 0x7bf   :  { %4582 = vst.msk [vmem:[#allocation3 + $0x160] sm:$0xff] %vm3997_vm7, %v4578_v21  ;;  %v4609_v44 = vsel %vm3431_vm6, %v4602_v8, %v4604_v37 }
 0x7c0   :  { %4613 = vst.msk [vmem:[#allocation3 + $0x1c0] sm:$0xff] %vm3997_vm7, %v4609_v44 }
 0x7c1   :  { %v4608_v22 = vpop.permute.xlu0 %4607 }
 0x7c2   :  { %v4630_v13 = vpop.permute.xlu1 %4629  ;;  %5429 = vrot.lane.b32.xlu1 %v5237_v0, %s11204_s30  ;;  %5431 = vrot.lane.b32.xlu0 %v5239_v50, %s11204_s30 }
 0x7c5   :  { %v4618_v12 = vpop.permute.xlu0 %4617 }
 0x7c6   :  { %4622 = vst.msk [vmem:[#allocation3 + $0x220] sm:$0xff] %vm3997_vm7, %v4618_v12  ;;  %v4590_v28 = vpop.permute.xlu1 %4589  ;;  %5413 = vrot.lane.b32.xlu1 %v5196_v58, %s11203_s17 }
 0x7c9   :  { %v4592_v59 = vpop.permute.xlu0 %4591  ;;  %v5319_v19 = vpop.f32.mrb[56].mxu1 }
 0x7ca   :  { %v4594_v30 = vsel %vm4210_vm8, %v4590_v28, %v4592_v59  ;;  %v4606_v40 = vpop.permute.xlu1 %4605  ;;  %v5276_v24 = vpop.f32.mrb[56].mxu0  ;;  %5445 = vrot.lane.b32.xlu1 %v5239_v50, %s11205_s20  ;;  %v14066_v28 = vpack.c.bf16 %v6150_v29, %v6146_v18 }
 0x7cb   :  { %4598 = vst.msk [vmem:[#allocation3 + $0x1a0] sm:$0xff] %vm3997_vm7, %v4594_v30  ;;  %v4610_v33 = vsel %vm3431_vm6, %v4606_v40, %v4608_v22  ;;  %v14014_v2 = vpop.f32.mrb[57].mxu1  ;;  %5443 = vrot.lane.b32.xlu0 %v5276_v24, %s11205_s20  ;;  %v5278_v16 = vpop.f32.mrb[57].mxu0 }
 0x7cc   :  { %4614 = vst.msk [vmem:[#allocation3 + $0x1e0] sm:$0xff] %vm3997_vm7, %v4610_v33  ;;  %5495 = vst.msk [vmem:[#allocation3 + $0x250] sm:$0xff] %vm3997_vm7, %v14014_v2  ;;  %v5280_v34 = vpop.f32.mrb[58].mxu0  ;;  %v5323_v36 = vpop.f32.mrb[58].mxu1 }
 0x7cd   :  { %v14020_v6 = vpop.f32.mrb[59].mxu1  ;;  %v4632_v35 = vpop.permute.xlu0 %4631 }
 0x7ce   :  { %5496 = vst.msk [vmem:[#allocation3 + $0x270] sm:$0xff] %vm3997_vm7, %v14020_v6  ;;  %v4637_v1 = vsel %vm2776_vm4, %v4630_v13, %v4632_v35  ;;  %v5282_v41 = vpop.f32.mrb[59].mxu0  ;;  %v4634_v31 = vpop.permute.xlu1 %4633  ;;  %5457 = vrot.lane.b32.xlu1 %v5276_v24, %s11207_s15 }
 0x7cf   :  { %4641 = vst.msk [vmem:[#allocation3 + $0x280] sm:$0xff] %vm3997_vm7, %v4637_v1  ;;  %5475 = vrot.lane.b32.xlu0 %v5319_v19, %s11206_s26  ;;  %v6164_v1 = vld [vmem:[#allocation3 + $0xe0] sm:$0xff] }
 0x7d1   :  { %v4960_v38 = vpop.permute.xlu0 %4959 }
 0x7d2   :  { %v4958_v26 = vpop.permute.xlu1 %4957  ;;  %5487 = vrot.lane.b32.xlu1 %v5319_v19, %s11208_s27 }
 0x7d3   :  { %v4965_v42 = vsel %vm2776_vm4, %v4958_v26, %v4960_v38  ;;  %5459 = vrot.lane.b32.xlu0 %v5278_v16, %s11207_s15 }
 0x7d4   :  { %4969 = vst.msk [vmem:[#allocation3 + $0x88] sm:$0xff] %vm3997_vm7, %v4965_v42 }
 0x7d5   :  { %v4636_v10 = vpop.permute.xlu0 %4635 }
 0x7d6   :  { %v4638_v17 = vsel %vm2776_vm4, %v4634_v31, %v4636_v10  ;;  %v4974_v5 = vpop.permute.xlu1 %4973  ;;  %5473 = vrot.lane.b32.xlu1 %v5278_v16, %s11206_s26 }
 0x7d7   :  { %4642 = vst.msk [vmem:[#allocation3 + $0x2a0] sm:$0xff] %vm3997_vm7, %v4638_v17  ;;  %5447 = vrot.lane.b32.xlu0 %v5280_v34, %s11205_s20 }
 0x7d9   :  { %v4964_v61 = vpop.permute.xlu0 %4963 }
 0x7da   :  { %v4962_v47 = vpop.permute.xlu1 %4961  ;;  %5461 = vrot.lane.b32.xlu1 %v5280_v34, %s11207_s15 }
 0x7db   :  { %v4966_v48 = vsel %vm2776_vm4, %v4962_v47, %v4964_v61  ;;  %5479 = vrot.lane.b32.xlu0 %v5323_v36, %s11206_s26  ;;  %v6153_v46 = vld [vmem:[#allocation3 + $0x88] sm:$0xff]  ;;  %v6160_v47 = vld [vmem:[#allocation3 + $0xc0] sm:$0xff] }
 0x7dc   :  { %4970 = vst.msk [vmem:[#allocation3 + $0xa8] sm:$0xff] %vm3997_vm7, %v4966_v48 }
 0x7de   :  { %5477 = vrot.lane.b32.xlu1 %v5282_v41, %s11206_s26  ;;  %v4978_v3 = vpop.permute.xlu1 %4977 }
 0x7df   :  { %5489 = vrot.lane.b32.xlu0 %v5323_v36, %s11208_s27 }
 0x7e3   :  { %5463 = vrot.lane.b32.xlu0 %v5282_v41, %s11207_s15  ;;  %v6157_v43 = vld [vmem:[#allocation3 + $0xa8] sm:$0xff] }
 0x7e4   :  { %v14043_v11 = vpack.c.bf16 %v6157_v43, %v6153_v46  ;;  %v14085_v46 = vpack.c.bf16 %v6164_v1, %v6160_v47 }
 0x7e5   :  { %v14045_v54 = vpop.f32.mrb[60].mxu0  ;;  %v5626_v45 = vpop.f32.mrb[60].mxu1 }
 0x7e6   :  { %5823 = vst.msk [vmem:[#allocation3 + $0x58] sm:$0xff] %vm3997_vm7, %v5626_v45  ;;  %10447 = vmatprep.subr.bf16.mxu0 %v14043_v11  ;;  %v5628_v9 = vpop.f32.mrb[61].mxu1  ;;  %5829 = vrot.lane.b32.xlu1 %v5626_v45, %s11202_s0  ;;  %v10145_v0 = vpop.f32.mrb[61].mxu0 }
 0x7e7   :  { %10449 = vmatpush1.bf16.msra.mxu0 %v14047_v56  ;;  %v5630_v62 = vpop.f32.mrb[62].mxu1  ;;  %5831 = vrot.lane.b32.xlu0 %v5628_v9, %s11202_s0  ;;  %v14054_v50 = vpop.f32.mrb[62].mxu0 }
 0x7e8   :  { %5824 = vst.msk [vmem:[#allocation3 + $0x78] sm:$0xff] %vm3997_vm7, %v5630_v62  ;;  %v4990_v7 = vpop.permute.xlu1 %4989  ;;  %v4976_v58 = vpop.permute.xlu0 %4975 }
 0x7e9   :  { %v4981_v60 = vsel %vm2791_vm2, %v4974_v5, %v4976_v58  ;;  %v10146_v32 = vpop.f32.mrb[63].mxu0  ;;  %v5632_v37 = vpop.f32.mrb[63].mxu1 }
 0x7ea   :  { %4985 = vst.msk [vmem:[#allocation3 + $0xc8] sm:$0xff] %vm3997_vm7, %v4981_v60  ;;  %5845 = vrot.lane.b32.xlu1 %v5628_v9, %s11203_s17 }
 0x7eb   :  { %5835 = vrot.lane.b32.xlu0 %v5632_v37, %s11202_s0 }
 0x7ec   :  { %v5022_v49 = vpop.permute.xlu1 %5021  ;;  %v5008_v15 = vpop.permute.xlu0 %5007 }
 0x7ed   :  { %v6147_v25 = vld [vmem:[#allocation3 + $0x58] sm:$0xff] }
 0x7ee   :  { %5833 = vrot.lane.b32.xlu1 %v5630_v62, %s11202_s0  ;;  %v6172_v62 = vld [vmem:[#allocation3 + $0x120] sm:$0xff] }
 0x7ef   :  { %v6151_v21 = vld [vmem:[#allocation3 + $0x78] sm:$0xff] }
 0x7f0   :  { %v5006_v8 = vpop.permute.xlu1 %5005  ;;  %v4992_v44 = vpop.permute.xlu0 %4991  ;;  %v14062_v22 = vpack.c.bf16 %v6151_v21, %v6147_v25 }
 0x7f1   :  { %v5013_v13 = vsel %vm2821_vm5, %v5006_v8, %v5008_v15  ;;  %v4997_v12 = vsel %vm2806_vm3, %v4990_v7, %v4992_v44  ;;  %v6161_v42 = vld [vmem:[#allocation3 + $0xc8] sm:$0xff]  ;;  %v6168_v15 = vld [vmem:[#allocation3 + $0x100] sm:$0xff] }
 0x7f2   :  { %5017 = vst.msk [vmem:[#allocation3 + $0x148] sm:$0xff] %vm3997_vm7, %v5013_v13  ;;  %5001 = vst.msk [vmem:[#allocation3 + $0x108] sm:$0xff] %vm3997_vm7, %v4997_v12  ;;  %10487 = vmatprep.subr.bf16.mxu1 %v14062_v22  ;;  %5849 = vrot.lane.b32.xlu1 %v5632_v37, %s11203_s17  ;;  %v14102_v25 = vpack.c.bf16 %v6172_v62, %v6168_v15  ;;  %v6180_v8 = vld [vmem:[#allocation3 + $0x160] sm:$0xff]  ;;  %v6213_v62 = vld [vmem:[#allocation3 + $0x268] sm:$0xff] }
 0x7f3   :  { %10489 = vmatpush1.bf16.msra.mxu1 %v14066_v28  ;;  %v6176_v12 = vld [vmem:[#allocation3 + $0x140] sm:$0xff] }
 0x7f4   :  { %v5038_v59 = vpop.permute.xlu1 %5037  ;;  %v5024_v19 = vpop.permute.xlu0 %5023 }
 0x7f5   :  { %v5029_v30 = vsel %vm4210_vm8, %v5022_v49, %v5024_v19  ;;  %v14113_v19 = vpack.c.bf16 %v6180_v8, %v6176_v12  ;;  %v6208_v12 = vld [vmem:[#allocation3 + $0x240] sm:$0xff] }
 0x7f6   :  { %5033 = vst.msk [vmem:[#allocation3 + $0x188] sm:$0xff] %vm3997_vm7, %v5029_v30 }
 0x7f8   :  { %v4994_v40 = vpop.permute.xlu1 %4993  ;;  %v4980_v24 = vpop.permute.xlu0 %4979 }
 0x7f9   :  { %v4982_v33 = vsel %vm2791_vm2, %v4978_v3, %v4980_v24  ;;  %v6169_v58 = vld [vmem:[#allocation3 + $0x108] sm:$0xff]  ;;  %v6188_v24 = vld [vmem:[#allocation3 + $0x1a0] sm:$0xff] }
 0x7fa   :  { %4986 = vst.msk [vmem:[#allocation3 + $0xe8] sm:$0xff] %vm3997_vm7, %v4982_v33  ;;  %v6177_v18 = vld [vmem:[#allocation3 + $0x148] sm:$0xff] }
 0x7fc   :  { %v5026_v16 = vpop.permute.xlu1 %5025  ;;  %v5012_v34 = vpop.permute.xlu0 %5011 }
 0x7fd   :  { %v6185_v30 = vld [vmem:[#allocation3 + $0x188] sm:$0xff] }
 0x800   :  { %v5010_v36 = vpop.permute.xlu1 %5009  ;;  %v4996_v35 = vpop.permute.xlu0 %4995 }
 0x801   :  { %v5014_v41 = vsel %vm2821_vm5, %v5010_v36, %v5012_v34  ;;  %v4998_v31 = vsel %vm2806_vm3, %v4994_v40, %v4996_v35  ;;  %v5669_v38 = vpop.f32.mrb[64].mxu0  ;;  %v5712_v26 = vpop.f32.mrb[64].mxu1  ;;  %v6165_v10 = vld [vmem:[#allocation3 + $0xe8] sm:$0xff]  ;;  %v6184_v34 = vld [vmem:[#allocation3 + $0x180] sm:$0xff] }
 0x802   :  { %5018 = vst.msk [vmem:[#allocation3 + $0x168] sm:$0xff] %vm3997_vm7, %v5014_v41  ;;  %5002 = vst.msk [vmem:[#allocation3 + $0x128] sm:$0xff] %vm3997_vm7, %v4998_v31  ;;  %v5714_v17 = vpop.f32.mrb[65].mxu1  ;;  %5861 = vrot.lane.b32.xlu1 %v5669_v38, %s11204_s30  ;;  %5847 = vrot.lane.b32.xlu0 %v5669_v38, %s11203_s17  ;;  %v5671_v5 = vpop.f32.mrb[65].mxu0  ;;  %v14083_v61 = vpack.c.bf16 %v6165_v10, %v6161_v42  ;;  %v14123_v36 = vpack.c.bf16 %v6188_v24, %v6184_v34  ;;  %v6196_v31 = vld [vmem:[#allocation3 + $0x1e0] sm:$0xff] }
 0x803   :  { %v5673_v48 = vpop.f32.mrb[66].mxu0  ;;  %v5716_v14 = vpop.f32.mrb[66].mxu1 }
 0x804   :  { %v14087_v43 = vpop.f32.mrb[67].mxu1  ;;  %10451 = vmatprep.subr.bf16.mxu0 %v14083_v61  ;;  %v5042_v3 = vpop.permute.xlu1 %5041 }
 0x805   :  { %v5028_v27 = vpop.permute.xlu0 %5027  ;;  %v5675_v45 = vpop.f32.mrb[67].mxu0  ;;  %10453 = vmatpush1.bf16.msra.mxu0 %v14085_v46 }
 0x806   :  { %v5030_v9 = vsel %vm4210_vm8, %v5026_v16, %v5028_v27  ;;  %5893 = vrot.lane.b32.xlu1 %v5712_v26, %s11207_s15  ;;  %5879 = vrot.lane.b32.xlu0 %v5712_v26, %s11205_s20  ;;  %v6204_v27 = vld [vmem:[#allocation3 + $0x220] sm:$0xff] }
 0x807   :  { %5034 = vst.msk [vmem:[#allocation3 + $0x1a8] sm:$0xff] %vm3997_vm7, %v5030_v9 }
 0x808   :  { %v5052_v0 = vpop.permute.xlu1 %5051 }
 0x809   :  { %5057 = vst.msk [vmem:[#allocation3 + $0x208] sm:$0xff] %vm3997_vm7, %v5052_v0  ;;  %v5040_v7 = vpop.permute.xlu0 %5039  ;;  %v6173_v60 = vld [vmem:[#allocation3 + $0x128] sm:$0xff] }
 0x80a   :  { %v6181_v32 = vld [vmem:[#allocation3 + $0x168] sm:$0xff]  ;;  %v5045_v37 = vsel %vm3431_vm6, %v5038_v59, %v5040_v7  ;;  %5877 = vrot.lane.b32.xlu1 %v5671_v5, %s11205_s20  ;;  %5863 = vrot.lane.b32.xlu0 %v5671_v5, %s11204_s30  ;;  %v14099_v49 = vpack.c.bf16 %v6173_v60, %v6169_v58  ;;  %v6200_v60 = vld [vmem:[#allocation3 + $0x200] sm:$0xff] }
 0x80b   :  { %5049 = vst.msk [vmem:[#allocation3 + $0x1c8] sm:$0xff] %vm3997_vm7, %v5045_v37  ;;  %v14105_v21 = vpack.c.bf16 %v6181_v32, %v6177_v18  ;;  %v14149_v15 = vpack.c.bf16 %v6204_v27, %v6200_v60 }
 0x80c   :  { %10455 = vmatprep.subr.bf16.mxu0 %v14099_v49  ;;  %v5066_v29 = vpop.permute.xlu1 %5065 }
 0x80d   :  { %v5068_v44 = vpop.permute.xlu0 %5067  ;;  %10457 = vmatpush1.bf16.msra.mxu0 %v14102_v25 }
 0x80e   :  { %v5073_v13 = vsel %vm2776_vm4, %v5066_v29, %v5068_v44  ;;  %10459 = vmatprep.subr.bf16.mxu0 %v14105_v21  ;;  %5909 = vrot.lane.b32.xlu1 %v5714_v17, %s11206_s26  ;;  %v6189_v59 = vld [vmem:[#allocation3 + $0x1a8] sm:$0xff]  ;;  %v6212_v44 = vld [vmem:[#allocation3 + $0x260] sm:$0xff] }
 0x80f   :  { %5077 = vst.msk [vmem:[#allocation3 + $0x288] sm:$0xff] %vm3997_vm7, %v5073_v13  ;;  %5895 = vrot.lane.b32.xlu0 %v5714_v17, %s11207_s15  ;;  %v14115_v40 = vpack.c.bf16 %v6189_v59, %v6185_v30  ;;  %v6192_v17 = vld [vmem:[#allocation3 + $0x1c0] sm:$0xff]  ;;  %v14159_v30 = vpack.c.bf16 %v6212_v44, %v6208_v12 }
 0x810   :  { %v5070_v1 = vpop.permute.xlu1 %5069  ;;  %v14135_v5 = vpack.c.bf16 %v6196_v31, %v6192_v17 }
 0x811   :  { %v5044_v33 = vpop.permute.xlu0 %5043  ;;  %10461 = vmatpush1.bf16.msra.mxu0 %v14113_v19 }
 0x812   :  { %v5046_v16 = vsel %vm3431_vm6, %v5042_v3, %v5044_v33  ;;  %10463 = vmatprep.subr.bf16.mxu0 %v14115_v40  ;;  %5865 = vrot.lane.b32.xlu1 %v5673_v48, %s11204_s30  ;;  %v6193_v26 = vld [vmem:[#allocation3 + $0x1c8] sm:$0xff] }
 0x813   :  { %5050 = vst.msk [vmem:[#allocation3 + $0x1e8] sm:$0xff] %vm3997_vm7, %v5046_v16  ;;  %5851 = vrot.lane.b32.xlu0 %v5673_v48, %s11203_s17 }
 0x815   :  { %v5054_v35 = vpop.permute.xlu0 %5053  ;;  %10465 = vmatpush1.bf16.msra.mxu0 %v14123_v36 }
 0x816   :  { %5058 = vst.msk [vmem:[#allocation3 + $0x228] sm:$0xff] %vm3997_vm7, %v5054_v35  ;;  %5897 = vrot.lane.b32.xlu1 %v5716_v14, %s11207_s15  ;;  %v6217_v24 = vld [vmem:[#allocation3 + $0x288] sm:$0xff]  ;;  %v6220_v35 = vld [vmem:[#allocation3 + $0x2a0] sm:$0xff] }
 0x817   :  { %5883 = vrot.lane.b32.xlu0 %v5716_v14, %s11205_s20  ;;  %v6201_v14 = vld [vmem:[#allocation3 + $0x208] sm:$0xff] }
 0x819   :  { %v5072_v41 = vpop.permute.xlu0 %5071 }
 0x81a   :  { %v5074_v38 = vsel %vm2776_vm4, %v5070_v1, %v5072_v41  ;;  %5881 = vrot.lane.b32.xlu1 %v5675_v45, %s11205_s20  ;;  %v6197_v42 = vld [vmem:[#allocation3 + $0x1e8] sm:$0xff] }
 0x81b   :  { %5078 = vst.msk [vmem:[#allocation3 + $0x2a8] sm:$0xff] %vm3997_vm7, %v5074_v38  ;;  %5867 = vrot.lane.b32.xlu0 %v5675_v45, %s11204_s30  ;;  %v14133_v10 = vpack.c.bf16 %v6197_v42, %v6193_v26  ;;  %v14179_v42 = vld [vmem:[%s15520_s7] sm:$0xff] }
 0x81d   :  { %10467 = vmatprep.subr.bf16.mxu0 %v14133_v10  ;;  %v5755_v47 = vpop.f32.mrb[68].mxu0  ;;  %v5798_v48 = vpop.f32.mrb[68].mxu1  ;;  %v6205_v3 = vld [vmem:[#allocation3 + $0x228] sm:$0xff] }
 0x81e   :  { %10469 = vmatpush1.bf16.msra.mxu0 %v14135_v5  ;;  %v10163_v9 = vpop.f32.mrb[69].mxu1  ;;  %5501 = vrot.lane.b32.xlu1 %v14014_v2, %s11202_s0  ;;  %v5757_v0 = vpop.f32.mrb[69].mxu0  ;;  %v14141_v45 = vpack.c.bf16 %v6205_v3, %v6201_v14  ;;  %v6209_v2 = vld [vmem:[#allocation3 + $0x248] sm:$0xff]  ;;  %v14195_v14 = vld [vmem:[%s15520_s7 + $0x10] sm:$0xff] }
 0x81f   :  { %5899 = vrot.lane.b32.xlu0 %v14087_v43, %s11207_s15  ;;  %5931 = vst.msk [vmem:[#allocation3 + $0x258] sm:$0xff] %vm3997_vm7, %v5757_v0  ;;  %v5759_v7 = vpop.f32.mrb[70].mxu0  ;;  %v14146_v58 = vpop.f32.mrb[70].mxu1  ;;  %v14151_v8 = vpack.c.bf16 %v6213_v62, %v6209_v2 }
 0x820   :  { %10471 = vmatprep.subr.bf16.mxu0 %v14141_v45  ;;  %v10164_v32 = vpop.f32.mrb[71].mxu1  ;;  %v5412_v37 = vpop.permute.xlu0 %5411 }
 0x821   :  { %v5394_v18 = vpop.permute.xlu1 %5393  ;;  %v5761_v29 = vpop.f32.mrb[71].mxu0  ;;  %v14258_v32 = vld [vmem:[%s15520_s7 + $0x20] sm:$0xff] }
 0x822   :  { %5932 = vst.msk [vmem:[#allocation3 + $0x278] sm:$0xff] %vm3997_vm7, %v5761_v29  ;;  %10473 = vmatpush1.bf16.msra.mxu0 %v14149_v15  ;;  %5913 = vrot.lane.b32.xlu1 %v14087_v43, %s11206_s26  ;;  %v6221_v13 = vld [vmem:[#allocation3 + $0x2a8] sm:$0xff]  ;;  %v6216_v43 = vld [vmem:[#allocation3 + $0x280] sm:$0xff] }
 0x823   :  { %5911 = vrot.lane.b32.xlu0 %v5755_v47, %s11206_s26  ;;  %10475 = vmatprep.subr.bf16.mxu0 %v14151_v8  ;;  %v14162_v34 = vpack.c.bf16 %v6221_v13, %v6217_v24  ;;  %v14169_v41 = vpack.c.bf16 %v6220_v35, %v6216_v43  ;;  %v6575_v35 = vld [vmem:[%s15521_s8] sm:$0xff]  ;;  %v6576_v43 = vld [vmem:[%s15521_s8 + $0x8] sm:$0xff] }
 0x824   :  { %v5396_v59 = vpop.permute.xlu0 %5395 }
 0x825   :  { %v5426_v33 = vpop.permute.xlu1 %5425  ;;  %v5401_v16 = vsel %vm2776_vm4, %v5394_v18, %v5396_v59 }
 0x826   :  { %5405 = vst.msk [vmem:[#allocation3 + $0x90] sm:$0xff] %vm3997_vm7, %v5401_v16  ;;  %10477 = vmatpush1.bf16.msra.mxu0 %v14159_v30  ;;  %5923 = vrot.lane.b32.xlu1 %v5755_v47, %s11208_s27 }
 0x827   :  { %5939 = vrot.lane.b32.xlu0 %v5798_v48, %s11202_s0  ;;  %10479 = vmatprep.subr.bf16.mxu0 %v14162_v34  ;;  %v14188_v48 = vld [vmem:[%s15520_s7 + $0x18] sm:$0xff] }
 0x828   :  { %v5428_v1 = vpop.permute.xlu0 %5427 }
 0x829   :  { %v5410_v31 = vpop.permute.xlu1 %5409  ;;  %v5433_v38 = vsel %vm2806_vm3, %v5426_v33, %v5428_v1 }
 0x82a   :  { %v5417_v26 = vsel %vm2791_vm2, %v5410_v31, %v5412_v37  ;;  %5437 = vst.msk [vmem:[#allocation3 + $0x110] sm:$0xff] %vm3997_vm7, %v5433_v38  ;;  %10481 = vmatpush1.bf16.msra.mxu0 %v14169_v41  ;;  %5937 = vrot.lane.b32.xlu1 %v5757_v0, %s11202_s0  ;;  %v14264_v37 = vld [vmem:[%s15520_s7 + $0x38] sm:$0xff] }
 0x82b   :  { %5421 = vst.msk [vmem:[#allocation3 + $0xd0] sm:$0xff] %vm3997_vm7, %v5417_v26  ;;  %5915 = vrot.lane.b32.xlu0 %v5759_v7, %s11206_s26  ;;  %10527 = vmatprep.subr.bf16.mxu0 %v13911_v57 }
 0x82c   :  { %v5416_v17 = vpop.permute.xlu0 %5415 }
 0x82d   :  { %v5442_v47 = vpop.permute.xlu1 %5441  ;;  %6295 = vmatmul.mubr.f32.vlgmr.msra.gmra.mrb[74].mxu0 %v14179_v42  ;;  %v6154_v16 = vld [vmem:[#allocation3 + $0x90] sm:$0xff] }
 0x82e   :  { %10529 = vmatpush1.bf16.msra.mxu0 %v13919_v39  ;;  %5941 = vrot.lane.b32.xlu1 %v5761_v29, %s11202_s0  ;;  %v14206_v39 = vld [vmem:[%s15520_s7 + $0x28] sm:$0xff]  ;;  %v14273_v29 = vld [vmem:[%s15520_s7 + $0x30] sm:$0xff] }
 0x82f   :  { %5503 = vrot.lane.b32.xlu0 %v14045_v54, %s11202_s0  ;;  %10531 = vmatprep.subr.bf16.mxu0 %v13923_v63 }
 0x830   :  { %v5400_v57 = vpop.permute.xlu0 %5399  ;;  %9835 = vmatprep.mubr.msk.f32.mxu0 %vm2806_vm3, %v14188_v48 }
 0x831   :  { %v5398_v3 = vpop.permute.xlu1 %5397  ;;  %6301 = vmatmul.mubr.f32.gmra.mrb[76].mxu0 %v14195_v14 }
 0x832   :  { %v5402_v27 = vsel %vm2776_vm4, %v5398_v3, %v5400_v57  ;;  %10533 = vmatpush1.bf16.msra.mxu0 %v13936_v23  ;;  %5505 = vrot.lane.b32.xlu1 %v14020_v6, %s11202_s0 }
 0x833   :  { %5406 = vst.msk [vmem:[#allocation3 + $0xb0] sm:$0xff] %vm3997_vm7, %v5402_v27  ;;  %5925 = vrot.lane.b32.xlu0 %v5759_v7, %s11208_s27  ;;  %10535 = vmatprep.subr.bf16.mxu0 %v14043_v11 }
 0x834   :  { %v5432_v63 = vpop.permute.xlu0 %5431  ;;  %9842 = vmatprep.mubr.msk.f32.mxu0 %vm2806_vm3, %v14206_v39 }
 0x835   :  { %v5430_v54 = vpop.permute.xlu1 %5429 }
 0x836   :  { %v5434_v9 = vsel %vm2806_vm3, %v5430_v54, %v5432_v63  ;;  %10537 = vmatpush1.bf16.msra.mxu0 %v14047_v56  ;;  %6589 = vperm.xlu1 %11093, %v6575_v35  }
 0x837   :  { %5438 = vst.msk [vmem:[#allocation3 + $0x130] sm:$0xff] %vm3997_vm7, %v5434_v9  ;;  %5943 = vrot.lane.b32.xlu0 %v14146_v58, %s11202_s0  ;;  %10539 = vmatprep.subr.bf16.mxu0 %v14083_v61 }
 0x839   :  { %v5414_v23 = vpop.permute.xlu1 %5413  ;;  %v14290_v1 = vpop.f32.mrb[72].mxu0 }
 0x83a   :  { %v5418_v6 = vsel %vm2791_vm2, %v5414_v23, %v5416_v17  ;;  %10541 = vmatpush1.bf16.msra.mxu0 %v14085_v46  ;;  %v6158_v59 = vld [vmem:[#allocation3 + $0xb0] sm:$0xff] }
 0x83b   :  { %5422 = vst.msk [vmem:[#allocation3 + $0xf0] sm:$0xff] %vm3997_vm7, %v5418_v6  ;;  %5507 = vrot.lane.b32.xlu0 %v14054_v50, %s11202_s0  ;;  %10543 = vmatprep.subr.bf16.mxu0 %v14099_v49 }
 0x83d   :  { %v5446_v11 = vpop.permute.xlu1 %5445  ;;  %v5444_v56 = vpop.permute.xlu0 %5443 }
 0x83e   :  { %v5449_v0 = vsel %vm2821_vm5, %v5442_v47, %v5444_v56  ;;  %10545 = vmatpush1.bf16.msra.mxu0 %v14102_v25 }
 0x83f   :  { %5453 = vst.msk [vmem:[#allocation3 + $0x150] sm:$0xff] %vm3997_vm7, %v5449_v0  ;;  %10547 = vmatprep.subr.bf16.mxu0 %v14105_v21  ;;  %6594 = vperm.xlu0 %11094, %v6576_v43  }
 0x841   :  { %v5458_v61 = vpop.permute.xlu1 %5457  ;;  %v5476_v62 = vpop.permute.xlu0 %5475 }
 0x842   :  { %10549 = vmatpush1.bf16.msra.mxu0 %v14113_v19 }
 0x843   :  { %10551 = vmatprep.subr.bf16.mxu0 %v14115_v40 }
 0x845   :  { %v5488_v46 = vpop.permute.xlu1 %5487  ;;  %v5460_v50 = vpop.permute.xlu0 %5459 }
 0x846   :  { %5493 = vst.msk [vmem:[#allocation3 + $0x210] sm:$0xff] %vm3997_vm7, %v5488_v46  ;;  %v5465_v49 = vsel %vm4210_vm8, %v5458_v61, %v5460_v50  ;;  %10553 = vmatpush1.bf16.msra.mxu0 %v14123_v36 }
 0x847   :  { %5469 = vst.msk [vmem:[#allocation3 + $0x190] sm:$0xff] %vm3997_vm7, %v5465_v49  ;;  %10555 = vmatprep.subr.bf16.mxu0 %v14133_v10 }
 0x849   :  { %v5474_v25 = vpop.permute.xlu1 %5473  ;;  %v5448_v21 = vpop.permute.xlu0 %5447 }
 0x84a   :  { %v5481_v7 = vsel %vm3431_vm6, %v5474_v25, %v5476_v62  ;;  %v5450_v19 = vsel %vm2821_vm5, %v5446_v11, %v5448_v21  ;;  %10557 = vmatpush1.bf16.msra.mxu0 %v14135_v5  ;;  %v6166_v25 = vld [vmem:[#allocation3 + $0xf0] sm:$0xff] }
 0x84b   :  { %5485 = vst.msk [vmem:[#allocation3 + $0x1d0] sm:$0xff] %vm3997_vm7, %v5481_v7  ;;  %5454 = vst.msk [vmem:[#allocation3 + $0x170] sm:$0xff] %vm3997_vm7, %v5450_v19  ;;  %10559 = vmatprep.subr.bf16.mxu0 %v14141_v45 }
 0x84d   :  { %v5462_v40 = vpop.permute.xlu1 %5461  ;;  %v5480_v36 = vpop.permute.xlu0 %5479 }
 0x84e   :  { %10561 = vmatpush1.bf16.msra.mxu0 %v14149_v15 }
 0x84f   :  { %10563 = vmatprep.subr.bf16.mxu0 %v14151_v8 }
 0x851   :  { %v5490_v10 = vpop.permute.xlu0 %5489  ;;  %v5478_v58 = vpop.permute.xlu1 %5477 }
 0x852   :  { %5494 = vst.msk [vmem:[#allocation3 + $0x230] sm:$0xff] %vm3997_vm7, %v5490_v10  ;;  %v5482_v60 = vsel %vm3431_vm6, %v5478_v58, %v5480_v36  ;;  %10565 = vmatpush1.bf16.msra.mxu0 %v14159_v30  ;;  %v6162_v36 = vld [vmem:[#allocation3 + $0xd0] sm:$0xff] }
 0x853   :  { %5486 = vst.msk [vmem:[#allocation3 + $0x1f0] sm:$0xff] %vm3997_vm7, %v5482_v60  ;;  %10567 = vmatprep.subr.bf16.mxu0 %v14162_v34  ;;  %v14281_v34 = vpack.c.bf16 %v6158_v59, %v6154_v16  ;;  %v14311_v58 = vpack.c.bf16 %v6166_v25, %v6162_v36  ;;  %v6170_v59 = vld [vmem:[#allocation3 + $0x110] sm:$0xff] }
 0x854   :  { %v6194_v25 = vld [vmem:[#allocation3 + $0x1d0] sm:$0xff] }
 0x855   :  { %v5464_v5 = vpop.permute.xlu0 %5463 }
 0x856   :  { %v5466_v45 = vsel %vm4210_vm8, %v5462_v40, %v5464_v5  ;;  %10569 = vmatpush1.bf16.msra.mxu0 %v14169_v41  ;;  %v14293_v41 = vpop.f32.mrb[73].mxu0 }
 0x857   :  { %5470 = vst.msk [vmem:[#allocation3 + $0x1b0] sm:$0xff] %vm3997_vm7, %v5466_v45 }
 0x858   :  { %v5830_v15 = vpop.permute.xlu1 %5829 }
 0x859   :  { %6460 = vmatmul.mubr.f32.vlgmr.msra.gmra.mrb[78].mxu0 %v14258_v32  ;;  %v5832_v2 = vpop.permute.xlu0 %5831  ;;  %v6206_v36 = vld [vmem:[#allocation3 + $0x230] sm:$0xff] }
 0x85a   :  { %v5837_v18 = vsel %vm2776_vm4, %v5830_v15, %v5832_v2  ;;  %9843 = vmatprep.mubr.msk.f32.mxu0 %vm2806_vm3, %v14264_v37  ;;  %v6174_v2 = vld [vmem:[#allocation3 + $0x130] sm:$0xff] }
 0x85b   :  { %5841 = vst.msk [vmem:[#allocation3 + $0x98] sm:$0xff] %vm3997_vm7, %v5837_v18 }
 0x85c   :  { %v5846_v8 = vpop.permute.xlu1 %5845 }
 0x85d   :  { %6466 = vmatmul.mubr.f32.gmra.mrb[80].mxu0 %v14273_v29  ;;  %v5836_v44 = vpop.permute.xlu0 %5835 }
 0x860   :  { %v5834_v13 = vpop.permute.xlu1 %5833 }
 0x861   :  { %v5838_v12 = vsel %vm2776_vm4, %v5834_v13, %v5836_v44 }
 0x862   :  { %5842 = vst.msk [vmem:[#allocation3 + $0xb8] sm:$0xff] %vm3997_vm7, %v5838_v12  ;;  %v6155_v30 = vld [vmem:[#allocation3 + $0x98] sm:$0xff] }
 0x864   :  { %v5850_v31 = vpop.permute.xlu1 %5849 }
 0x869   :  { %v6159_v24 = vld [vmem:[#allocation3 + $0xb8] sm:$0xff] }
 0x86a   :  { %v14279_v33 = vpack.c.bf16 %v6159_v24, %v6155_v30  ;;  %v14321_v24 = vpack.c.bf16 %v6174_v2, %v6170_v59 }
 0x86c   :  { %10491 = vmatprep.subr.bf16.mxu1 %v14279_v33 }
 0x86d   :  { %10493 = vmatpush1.bf16.msra.mxu1 %v14281_v34 }
 0x874   :  { %v5862_v38 = vpop.permute.xlu1 %5861  ;;  %v5848_v26 = vpop.permute.xlu0 %5847 }
 0x875   :  { %v5853_v17 = vsel %vm2791_vm2, %v5846_v8, %v5848_v26  ;;  %v6178_v26 = vld [vmem:[#allocation3 + $0x150] sm:$0xff] }
 0x876   :  { %5857 = vst.msk [vmem:[#allocation3 + $0xd8] sm:$0xff] %vm3997_vm7, %v5853_v17 }
 0x878   :  { %v5894_v47 = vpop.permute.xlu1 %5893  ;;  %v5880_v57 = vpop.permute.xlu0 %5879 }
 0x87c   :  { %v5878_v3 = vpop.permute.xlu1 %5877  ;;  %v5864_v27 = vpop.permute.xlu0 %5863 }
 0x87d   :  { %v5885_v63 = vsel %vm2821_vm5, %v5878_v3, %v5880_v57  ;;  %v5869_v54 = vsel %vm2806_vm3, %v5862_v38, %v5864_v27  ;;  %v6163_v7 = vld [vmem:[#allocation3 + $0xd8] sm:$0xff] }
 0x87e   :  { %5889 = vst.msk [vmem:[#allocation3 + $0x158] sm:$0xff] %vm3997_vm7, %v5885_v63  ;;  %5873 = vst.msk [vmem:[#allocation3 + $0x118] sm:$0xff] %vm3997_vm7, %v5869_v54  ;;  %v6190_v54 = vld [vmem:[#allocation3 + $0x1b0] sm:$0xff] }
 0x880   :  { %v5910_v9 = vpop.permute.xlu1 %5909 }
 0x881   :  { %v5896_v23 = vpop.permute.xlu0 %5895 }
 0x882   :  { %v5901_v6 = vsel %vm4210_vm8, %v5894_v47, %v5896_v23  ;;  %v6186_v23 = vld [vmem:[#allocation3 + $0x190] sm:$0xff] }
 0x883   :  { %5905 = vst.msk [vmem:[#allocation3 + $0x198] sm:$0xff] %vm3997_vm7, %v5901_v6  ;;  %v14339_v6 = vpack.c.bf16 %v6190_v54, %v6186_v23 }
 0x884   :  { %v5866_v11 = vpop.permute.xlu1 %5865 }
 0x885   :  { %v5852_v56 = vpop.permute.xlu0 %5851  ;;  %v6171_v8 = vld [vmem:[#allocation3 + $0x118] sm:$0xff] }
 0x886   :  { %v5854_v0 = vsel %vm2791_vm2, %v5850_v31, %v5852_v56  ;;  %v6179_v16 = vld [vmem:[#allocation3 + $0x158] sm:$0xff]  ;;  %v6182_v31 = vld [vmem:[#allocation3 + $0x170] sm:$0xff] }
 0x887   :  { %5858 = vst.msk [vmem:[#allocation3 + $0xf8] sm:$0xff] %vm3997_vm7, %v5854_v0  ;;  %v14329_v47 = vpack.c.bf16 %v6182_v31, %v6178_v26 }
 0x888   :  { %v5898_v61 = vpop.permute.xlu1 %5897 }
 0x889   :  { %v5884_v62 = vpop.permute.xlu0 %5883 }
 0x88a   :  { %v6187_v57 = vld [vmem:[#allocation3 + $0x198] sm:$0xff] }
 0x88c   :  { %v5882_v46 = vpop.permute.xlu1 %5881 }
 0x88d   :  { %v5886_v50 = vsel %vm2821_vm5, %v5882_v46, %v5884_v62  ;;  %v5868_v49 = vpop.permute.xlu0 %5867 }
 0x88e   :  { %5890 = vst.msk [vmem:[#allocation3 + $0x178] sm:$0xff] %vm3997_vm7, %v5886_v50  ;;  %v5870_v21 = vsel %vm2806_vm3, %v5866_v11, %v5868_v49  ;;  %v6167_v19 = vld [vmem:[#allocation3 + $0xf8] sm:$0xff] }
 0x88f   :  { %5874 = vst.msk [vmem:[#allocation3 + $0x138] sm:$0xff] %vm3997_vm7, %v5870_v21  ;;  %v14309_v40 = vpack.c.bf16 %v6167_v19, %v6163_v7 }
 0x890   :  { %v5502_v10 = vpop.permute.xlu1 %5501 }
 0x891   :  { %10495 = vmatprep.subr.bf16.mxu1 %v14309_v40  ;;  %v5900_v60 = vpop.permute.xlu0 %5899 }
 0x892   :  { %v5902_v5 = vsel %vm4210_vm8, %v5898_v61, %v5900_v60  ;;  %10497 = vmatpush1.bf16.msra.mxu1 %v14311_v58  ;;  %v6198_v61 = vld [vmem:[#allocation3 + $0x1f0] sm:$0xff] }
 0x893   :  { %5906 = vst.msk [vmem:[#allocation3 + $0x1b8] sm:$0xff] %vm3997_vm7, %v5902_v5  ;;  %v10512_v21 = vpack.c.bf16 %v6198_v61, %v6194_v25 }
 0x894   :  { %v5914_v45 = vpop.permute.xlu1 %5913 }
 0x895   :  { %v5912_v15 = vpop.permute.xlu0 %5911  ;;  %v6183_v13 = vld [vmem:[#allocation3 + $0x178] sm:$0xff] }
 0x896   :  { %v5917_v18 = vsel %vm3431_vm6, %v5910_v9, %v5912_v15  ;;  %v6175_v44 = vld [vmem:[#allocation3 + $0x138] sm:$0xff]  ;;  %v14325_v43 = vpack.c.bf16 %v6183_v13, %v6179_v16  ;;  %v6210_v16 = vld [vmem:[#allocation3 + $0x250] sm:$0xff] }
 0x897   :  { %5921 = vst.msk [vmem:[#allocation3 + $0x1d8] sm:$0xff] %vm3997_vm7, %v5917_v18  ;;  %v14319_v12 = vpack.c.bf16 %v6175_v44, %v6171_v8  ;;  %v6215_v15 = vld [vmem:[#allocation3 + $0x278] sm:$0xff]  ;;  %v6202_v8 = vld [vmem:[#allocation3 + $0x210] sm:$0xff] }
 0x898   :  { %v5924_v30 = vpop.permute.xlu1 %5923  ;;  %v10516_v44 = vpack.c.bf16 %v6206_v36, %v6202_v8  ;;  %v6211_v13 = vld [vmem:[#allocation3 + $0x258] sm:$0xff] }
 0x899   :  { %10499 = vmatprep.subr.bf16.mxu1 %v14319_v12  ;;  %5929 = vst.msk [vmem:[#allocation3 + $0x218] sm:$0xff] %vm3997_vm7, %v5924_v30  ;;  %v5940_v35 = vpop.permute.xlu0 %5939  ;;  %v10518_v59 = vpack.c.bf16 %v6215_v15, %v6211_v13  ;;  %v6214_v30 = vld [vmem:[#allocation3 + $0x270] sm:$0xff] }
 0x89a   :  { %10501 = vmatpush1.bf16.msra.mxu1 %v14321_v24  ;;  %v6191_v38 = vld [vmem:[#allocation3 + $0x1b8] sm:$0xff] }
 0x89b   :  { %10503 = vmatprep.subr.bf16.mxu1 %v14325_v43  ;;  %v14332_v63 = vpack.c.bf16 %v6191_v38, %v6187_v57  ;;  %v10520_v38 = vpack.c.bf16 %v6214_v30, %v6210_v16 }
 0x89c   :  { %v5938_v17 = vpop.permute.xlu1 %5937 }
 0x89d   :  { %v5945_v3 = vsel %vm2776_vm4, %v5938_v17, %v5940_v35  ;;  %v5916_v27 = vpop.permute.xlu0 %5915  ;;  %v14349_v17 = vpop.f32.mrb[72].mxu1 }
 0x89e   :  { %5949 = vst.msk [vmem:[#allocation3 + $0x298] sm:$0xff] %vm3997_vm7, %v5945_v3  ;;  %v5918_v9 = vsel %vm3431_vm6, %v5914_v45, %v5916_v27  ;;  %10505 = vmatpush1.bf16.msra.mxu1 %v14329_v47  ;;  %v6195_v62 = vld [vmem:[#allocation3 + $0x1d8] sm:$0xff]  ;;  %v14351_v27 = vpop.f32.mrb[73].mxu1 }
 0x89f   :  { %5922 = vst.msk [vmem:[#allocation3 + $0x1f8] sm:$0xff] %vm3997_vm7, %v5918_v9  ;;  %10507 = vmatprep.subr.bf16.mxu1 %v14332_v63 }
 0x8a0   :  { %v5942_v50 = vpop.permute.xlu1 %5941  ;;  %v6203_v5 = vld [vmem:[#allocation3 + $0x218] sm:$0xff] }
 0x8a1   :  { %v5504_v11 = vpop.permute.xlu0 %5503 }
 0x8a2   :  { %v5509_v56 = vsel %vm2776_vm4, %v5502_v10, %v5504_v11  ;;  %10509 = vmatpush1.bf16.msra.mxu1 %v14339_v6 }
 0x8a3   :  { %5513 = vst.msk [vmem:[#allocation3 + $0x290] sm:$0xff] %vm3997_vm7, %v5509_v56 }
 0x8a4   :  { %v5506_v10 = vpop.permute.xlu1 %5505 }
 0x8a5   :  { %v5926_v0 = vpop.permute.xlu0 %5925  ;;  %v6219_v35 = vld [vmem:[#allocation3 + $0x298] sm:$0xff] }
 0x8a6   :  { %5930 = vst.msk [vmem:[#allocation3 + $0x238] sm:$0xff] %vm3997_vm7, %v5926_v0  ;;  %v6199_v46 = vld [vmem:[#allocation3 + $0x1f8] sm:$0xff] }
 0x8a7   :  { %v10510_v49 = vpack.c.bf16 %v6199_v46, %v6195_v62  ;;  %v6550_v0 = vld [vmem:[%s15519_s6 + $0x8] sm:$0xff] }
 0x8a9   :  { %10511 = vmatprep.subr.bf16.mxu1 %v10510_v49  ;;  %v5944_v7 = vpop.permute.xlu0 %5943 }
 0x8aa   :  { %v5946_v19 = vsel %vm2776_vm4, %v5942_v50, %v5944_v7  ;;  %10513 = vmatpush1.bf16.msra.mxu1 %v10512_v21  ;;  %v6218_v57 = vld [vmem:[#allocation3 + $0x290] sm:$0xff] }
 0x8ab   :  { %5950 = vst.msk [vmem:[#allocation3 + $0x2b8] sm:$0xff] %vm3997_vm7, %v5946_v19 }
 0x8ad   :  { %v5508_v60 = vpop.permute.xlu0 %5507  ;;  %v6207_v45 = vld [vmem:[#allocation3 + $0x238] sm:$0xff] }
 0x8ae   :  { %v5510_v2 = vsel %vm2776_vm4, %v5506_v10, %v5508_v60  ;;  %v10514_v18 = vpack.c.bf16 %v6207_v45, %v6203_v5  ;;  %v6651_v5 = vld [vmem:[%s15522_s9] sm:$0xff] }
 0x8af   :  { %5514 = vst.msk [vmem:[#allocation3 + $0x2b0] sm:$0xff] %vm3997_vm7, %v5510_v2  ;;  %10231 = vmatprep.mubr.msk.f32.mxu0 %vm2776_vm4, %v6651_v5 }
 0x8b0   :  { %10515 = vmatprep.subr.bf16.mxu1 %v10514_v18 }
 0x8b1   :  { %10517 = vmatpush1.bf16.msra.mxu1 %v10516_v44 }
 0x8b2   :  { %10519 = vmatprep.subr.bf16.mxu1 %v10518_v59  ;;  %v6223_v31 = vld [vmem:[#allocation3 + $0x2b8] sm:$0xff] }
 0x8b3   :  { %v10522_v26 = vpack.c.bf16 %v6223_v31, %v6219_v35 }
 0x8b5   :  { %10521 = vmatpush1.bf16.msra.mxu1 %v10520_v38 }
 0x8b6   :  { %10523 = vmatprep.subr.bf16.mxu1 %v10522_v26  ;;  %v6222_v3 = vld [vmem:[#allocation3 + $0x2b0] sm:$0xff] }
 0x8b7   :  { %v10524_v54 = vpack.c.bf16 %v6222_v3, %v6218_v57 }
 0x8b9   :  { %10525 = vmatpush1.bf16.msra.mxu1 %v10524_v54 }
 0x8ba   :  { %10571 = vmatprep.subr.bf16.mxu1 %v13916_v4 }
 0x8bc   :  { %6372 = vmatmul.mubr.f32.vlgmr.msra.gmra.mrb[74].mxu1 %v14179_v42 }
 0x8bd   :  { %10573 = vmatpush1.bf16.msra.mxu1 %v13930_v20  ;;  %9837 = vmatprep.mubr.msk.f32.mxu1 %vm2806_vm3, %v14188_v48 }
 0x8be   :  { %10575 = vmatprep.subr.bf16.mxu1 %v14062_v22 }
 0x8c0   :  { %6378 = vmatmul.mubr.f32.gmra.mrb[76].mxu1 %v14195_v14 }
 0x8c1   :  { %10577 = vmatpush1.bf16.msra.mxu1 %v14066_v28  ;;  %9844 = vmatprep.mubr.msk.f32.mxu1 %vm2806_vm3, %v14206_v39 }
 0x8c2   :  { %10579 = vmatprep.subr.bf16.mxu1 %v14279_v33 }
 0x8c5   :  { %10581 = vmatpush1.bf16.msra.mxu1 %v14281_v34  ;;  %v6590_v34 = vpop.permute.xlu1 %6589 }
 0x8c6   :  { %10583 = vmatprep.subr.bf16.mxu1 %v14309_v40 }
 0x8c9   :  { %10585 = vmatpush1.bf16.msra.mxu1 %v14311_v58 }
 0x8ca   :  { %10587 = vmatprep.subr.bf16.mxu1 %v14319_v12  ;;  %v14384_v12 = vpop.permute.xlu0 %6594 }
 0x8cd   :  { %10589 = vmatpush1.bf16.msra.mxu1 %v14321_v24 }
 0x8ce   :  { %10591 = vmatprep.subr.bf16.mxu1 %v14325_v43 }
 0x8d1   :  { %10593 = vmatpush1.bf16.msra.mxu1 %v14329_v47  ;;  %v6549_v47 = vld [vmem:[%s15519_s6] sm:$0xff] }
 0x8d2   :  { %10595 = vmatprep.subr.bf16.mxu1 %v14332_v63 }
 0x8d5   :  { %10597 = vmatpush1.bf16.msra.mxu1 %v14339_v6 }
 0x8d6   :  { %10599 = vmatprep.subr.bf16.mxu1 %v10510_v49 }
 0x8d9   :  { %10601 = vmatpush1.bf16.msra.mxu1 %v10512_v21 }
 0x8da   :  { %10603 = vmatprep.subr.bf16.mxu1 %v10514_v18 }
 0x8dd   :  { %10605 = vmatpush1.bf16.msra.mxu1 %v10516_v44 }
 0x8de   :  { %10607 = vmatprep.subr.bf16.mxu1 %v10518_v59 }
 0x8e1   :  { %10609 = vmatpush1.bf16.msra.mxu1 %v10520_v38 }
 0x8e2   :  { %10611 = vmatprep.subr.bf16.mxu1 %v10522_v26 }
 0x8e5   :  { %10613 = vmatpush1.bf16.msra.mxu1 %v10524_v54 }
 0x8e8   :  { %6537 = vmatmul.mubr.f32.vlgmr.msra.gmra.mrb[78].mxu1 %v14258_v32 }
 0x8e9   :  { %9845 = vmatprep.mubr.msk.f32.mxu1 %vm2806_vm3, %v14264_v37 }
 0x8ec   :  { %6543 = vmatmul.mubr.f32.gmra.mrb[80].mxu1 %v14273_v29 }
 0x8ed   :  { %6986 = vmatprep.mubr.f32.mxu1 %v11200_v52 }
 0x900   :  { %v6296_v4 = vpop.f32.mrb[74].mxu0 }
 0x901   :  { %v6298_v20 = vpop.f32.mrb[75].mxu0 }
 0x904   :  { %v6302_v22 = vpop.f32.mrb[76].mxu0 }
 0x905   :  { %v6304_v28 = vpop.f32.mrb[77].mxu0 }
 0x92c   :  { %v6461_v42 = vpop.f32.mrb[78].mxu0 }
 0x92d   :  { %6579 = vrot.lane.b32.xlu1 %v6461_v42, %s11206_s26  ;;  %v6463_v48 = vpop.f32.mrb[79].mxu0 }
 0x92e   :  { %6605 = vrot.lane.b32.xlu0 %v6463_v48, %s11206_s26 }
 0x930   :  { %v6467_v14 = vpop.f32.mrb[80].mxu0 }
 0x931   :  { %6581 = vrot.lane.b32.xlu1 %v6467_v14, %s11206_s26  ;;  %v6469_v39 = vpop.f32.mrb[81].mxu0 }
 0x935   :  { %6607 = vrot.lane.b32.xlu1 %v6469_v39, %s11206_s26 }
 0x98f   :  { %v6373_v32 = vpop.f32.mrb[74].mxu1 }
 0x990   :  { %v6375_v37 = vpop.f32.mrb[75].mxu1 }
 0x993   :  { %v6379_v29 = vpop.f32.mrb[76].mxu1 }
 0x994   :  { %v14382_v33 = vpop.f32.mrb[77].mxu1 }
 0x99f   :  { %v6580_v40 = vpop.permute.xlu1 %6579 }
 0x9a0   :  { %v6585_v6 = vadd.f32 %v6580_v40, %v6296_v4  ;;  %v6606_v56 = vpop.permute.xlu0 %6605 }
 0x9a1   :  { %v6611_v50 = vadd.f32 %v6606_v56, %v6298_v20 }
 0x9a2   :  { %v6597_v46 = vadd.f32 %v6590_v34, %v6585_v6  ;;  %v6652_v6 = vld [vmem:[%s15522_s9 + $0x8] sm:$0xff] }
 0x9a3   :  { %v6582_v58 = vpop.permute.xlu1 %6581  ;;  %v6613_v7 = vadd.f32 %v6611_v50, %v6590_v34 }
 0x9a4   :  { %v6586_v63 = vadd.f32 %v6582_v58, %v6302_v22  ;;  %v14402_v21 = vadd.f32 %v6597_v46, %v13172_v51  ;;  %v9876_v58 = vld [vmem:[%s15517_s4 + $0x30] sm:$0xff] }
 0x9a5   :  { %v14413_v10 = vadd.f32 %v6613_v7, %v13172_v51 }
 0x9a6   :  { %v6598_v61 = vadd.f32 %v14384_v12, %v6586_v63 }
 0x9a7   :  { %v6608_v9 = vpop.permute.xlu1 %6607 }
 0x9a8   :  { %v6612_v62 = vadd.f32 %v6608_v9, %v6304_v28  ;;  %v14398_v49 = vadd.f32 %v6598_v61, %v13175_v53 }
 0x9aa   :  { %v6614_v25 = vadd.f32 %v6612_v62, %v14384_v12  ;;  %v11095_v36 = vpack.i.bf16 %v14398_v49, %v14402_v21 }
 0x9ac   :  { %v14408_v19 = vadd.f32 %v6614_v25, %v13175_v53 }
 0x9ae   :  { %v11100_v60 = vpack.i.bf16 %v14408_v19, %v14413_v10 }
 0x9bb   :  { %v6538_v24 = vpop.f32.mrb[78].mxu1 }
 0x9bc   :  { %v6540_v43 = vpop.f32.mrb[79].mxu1  ;;  %6621 = vrot.lane.b32.xlu0 %v6538_v24, %s11206_s26 }
 0x9bf   :  { %v6544_v23 = vpop.f32.mrb[80].mxu1 }
 0x9c0   :  { %v6546_v11 = vpop.f32.mrb[81].mxu1  ;;  %6563 = vperm.xlu0 %11094, %v6549_v47   ;;  %6623 = vrot.lane.b32.xlu1 %v6544_v23, %s11206_s26 }
 0x9c4   :  { %6553 = vrot.lane.b32.xlu0 %v14351_v27, %s11206_s26  ;;  %6568 = vperm.xlu1 %11093, %v6550_v0  }
 0x9c8   :  { %6637 = vrot.lane.b32.xlu0 %v6540_v43, %s11206_s26  ;;  %6555 = vrot.lane.b32.xlu1 %v14349_v17, %s11206_s26 }
 0x9cc   :  { %11096 = vrot.lane.b32.xlu0 %v11095_v36, %s11207_s15  ;;  %6639 = vrot.lane.b32.xlu1 %v6546_v11, %s11206_s26  ;;  %v6654_v11 = vld [vmem:[%s15522_s9 + $0x18] sm:$0xff] }
 0x9d0   :  { %11101 = vrot.lane.b32.xlu1 %v11100_v60, %s11203_s17 }
 0xa2e   :  { %v6622_v45 = vpop.permute.xlu0 %6621 }
 0xa2f   :  { %v6627_v15 = vadd.f32 %v6622_v45, %v6373_v32  ;;  %v9850_v45 = vld [vmem:[%s15543_s2 + $0x40] sm:$0xff] }
 0xa31   :  { %v6629_v18 = vadd.f32 %v6627_v15, %v6590_v34  ;;  %v9851_v15 = vld [vmem:[%s15543_s2 + $0x48] sm:$0xff] }
 0xa32   :  { %v6624_v2 = vpop.permute.xlu1 %6623 }
 0xa33   :  { %v6628_v8 = vadd.f32 %v6624_v2, %v6379_v29  ;;  %v14426_v13 = vadd.f32 %v6629_v18, %v13172_v51  ;;  %v9852_v2 = vld [vmem:[%s15543_s2 + $0x50] sm:$0xff]  ;;  %v9853_v18 = vld [vmem:[%s15543_s2 + $0x58] sm:$0xff] }
 0xa35   :  { %v6630_v44 = vadd.f32 %v6628_v8, %v14384_v12 }
 0xa37   :  { %v14429_v59 = vadd.f32 %v6630_v44, %v13175_v53  ;;  %v9862_v44 = vld [vmem:[%s15543_s2 + $0x60] sm:$0xff] }
 0xa39   :  { %v11105_v30 = vpack.i.bf16 %v14429_v59, %v14426_v13 }
 0xa3b   :  { %11106 = vrot.lane.b32.xlu0 %v11105_v30, %s11208_s27 }
 0xa3f   :  { %v6564_v16 = vpop.permute.xlu0 %6563 }
 0xa43   :  { %v6554_v35 = vpop.permute.xlu0 %6553  ;;  %v6569_v31 = vpop.permute.xlu1 %6568 }
 0xa44   :  { %v6559_v38 = vadd.f32 %v6554_v35, %v14293_v41 }
 0xa46   :  { %v6571_v26 = vadd.f32 %v6564_v16, %v6559_v38 }
 0xa47   :  { %v6638_v17 = vpop.permute.xlu0 %6637  ;;  %v6556_v57 = vpop.permute.xlu1 %6555 }
 0xa48   :  { %v14436_v3 = vadd.f32 %v6571_v26, %v13172_v51  ;;  %v6643_v27 = vadd.f32 %v6638_v17, %v6375_v37  ;;  %v6560_v54 = vadd.f32 %v14290_v1, %v6556_v57  ;;  %v9863_v26 = vld [vmem:[%s15543_s2 + $0x68] sm:$0xff]  ;;  %v9864_v17 = vld [vmem:[%s15543_s2 + $0x70] sm:$0xff]  ;;  %v9865_v57 = vld [vmem:[%s15543_s2 + $0x78] sm:$0xff] }
 0xa4a   :  { %v6601_v4 = vadd.f32 %v14402_v21, %v14436_v3  ;;  %v6645_v20 = vadd.f32 %v6643_v27, %v6590_v34  ;;  %v6572_v22 = vadd.f32 %v6569_v31, %v6560_v54 }
 0xa4b   :  { %v11097_v28 = vpop.permute.xlu0 %11096  ;;  %v6640_v42 = vpop.permute.xlu1 %6639 }
 0xa4c   :  { %v6617_v48 = vadd.f32 %v14413_v10, %v6601_v4  ;;  %v6647_v41 = vadd.f32 %v6645_v20, %v13172_v51  ;;  %v14444_v14 = vadd.f32 %v6572_v22, %v13175_v53  ;;  %v11099_v39 = vunpack.i.h.bf16 %v11097_v28 }
 0xa4d   :  { %v11098_v32 = vunpack.i.l.bf16 %v11097_v28  ;;  %v6644_v37 = vadd.f32 %v6640_v42, %v14382_v33 }
 0xa4e   :  { %v6633_v1 = vadd.f32 %v14426_v13, %v6617_v48  ;;  %v6602_v29 = vadd.f32 %v14398_v49, %v14444_v14  ;;  %v6809_v34 = vsel %vm4210_vm8, %v14444_v14, %v11099_v39  ;;  %6802 = vrot.lane.b32.xlu1 %v6647_v41, %s11205_s20 }
 0xa4f   :  { %v6808_v51 = vsel %vm4210_vm8, %v14436_v3, %v11098_v32  ;;  %v6646_v40 = vadd.f32 %v6644_v37, %v14384_v12  ;;  %v9877_v12 = vld [vmem:[%s15517_s4 + $0x38] sm:$0xff]  ;;  %v11102_v56 = vpop.permute.xlu1 %11101 }
 0xa50   :  { %v6649_v33 = vadd.f32 %v6647_v41, %v6633_v1  ;;  %v6618_v24 = vadd.f32 %v14408_v19, %v6602_v29  ;;  %v10620_v43 = vpack.c.bf16 %v6809_v34, %v6808_v51  ;;  %v11104_v0 = vunpack.i.h.bf16 %v11102_v56 }
 0xa51   :  { %v6648_v47 = vadd.f32 %v6646_v40, %v13175_v53  ;;  %v6653_v53 = vld [vmem:[%s15522_s9 + $0x10] sm:$0xff]  ;;  %v11103_v61 = vunpack.i.l.bf16 %v11102_v56 }
 0xa52   :  { %v6634_v63 = vadd.f32 %v14429_v59, %v6618_v24  ;;  %7239 = vperm.xlu1 %11093, %v9876_v58   ;;  %v6811_v25 = vsel %vm2791_vm2, %v11099_v39, %v11104_v0 }
 0xa53   :  { %6804 = vrot.lane.b32.xlu0 %v6648_v47, %s11205_s20  ;;  %v6810_v7 = vsel %vm2791_vm2, %v11098_v32, %v11103_v61 }
 0xa54   :  { %v6650_v9 = vadd.f32 %v6648_v47, %v6634_v63  ;;  %v9874_v47 = vld [vmem:[%s15517_s4 + $0x20] sm:$0xff] }
 0xa56   :  { %v10614_v23 = vpack.c.bf16 %v6650_v9, %v6649_v33 }
 0xa57   :  { %7244 = vperm.xlu0 %11094, %v9877_v12  }
 0xa58   :  { %10615 = vmatprep.subr.bf16.mxu0 %v10614_v23 }
 0xa59   :  { %10617 = vmatpush3.bf16.msra.mxu0 %v10614_v23 }
 0xa5c   :  { %10232 = vmatmul.mubr.msk.f32.vlgmr.msra.gmra.mrb[82].mxu0 %vm2776_vm4, %v6652_v6  ;;  %v9875_v6 = vld [vmem:[%s15517_s4 + $0x28] sm:$0xff] }
 0xa5d   :  { %10234 = vmatprep.mubr.msk.f32.mxu0 %vm2776_vm4, %v6653_v53 }
 0xa60   :  { %10235 = vmatmul.mubr.msk.f32.gmra.mrb[84].mxu0 %vm2776_vm4, %v6654_v11 }
 0xa61   :  { %6897 = vmatprep.mubr.f32.mxu0 %v11200_v52 }
 0xaad   :  { %v11107_v62 = vpop.permute.xlu0 %11106 }
 0xaae   :  { %v11109_v46 = vunpack.i.h.bf16 %v11107_v62  ;;  %v11108_v50 = vunpack.i.l.bf16 %v11107_v62 }
 0xab0   :  { %v6812_v36 = vsel %vm3997_vm7, %v6810_v7, %v11108_v50  ;;  %v6813_v60 = vsel %vm3997_vm7, %v6811_v25, %v11109_v46  ;;  %v11110_v7 = vld [vmem:[%s15529_s16] ss:$12 sps:$4 sm:$0xff]  }
 0xab1   :  { %v10618_v5 = vpack.c.bf16 %v6813_v60, %v6812_v36  ;;  %v11115_v60 = vld [vmem:[%s15529_s16 + $0x1c] ss:$12 sps:$4 sm:$0xff]  }
 0xab3   :  { %10619 = vmatprep.subr.bf16.mxu0 %v10618_v5 }
 0xab4   :  { %10621 = vmatpush1.bf16.msra.mxu0 %v10620_v43 }
 0xab5   :  { %10627 = vmatprep.subr.bf16.mxu0 %v10618_v5 }
 0xab7   :  { %9854 = vmatmul.mubr.msk.f32.vlgmr.msra.gmra.mrb[86].mxu0 %vm2776_vm4, %v9850_v45 }
 0xab8   :  { %10629 = vmatpush1.bf16.msra.mxu0 %v10620_v43  ;;  %6903 = vmatprep.mubr.f32.mxu0 %v11200_v52 }
 0xabb   :  { %9855 = vmatmul.mubr.msk.f32.gmra.mrb[88].mxu0 %vm2776_vm4, %v9851_v15 }
 0xabc   :  { %6909 = vmatprep.mubr.f32.mxu0 %v11200_v52 }
 0xabf   :  { %9856 = vmatmul.mubr.msk.f32.gmra.mrb[90].mxu0 %vm2776_vm4, %v9852_v2 }
 0xac0   :  { %6915 = vmatprep.mubr.f32.mxu0 %v11200_v52  ;;  %v14501_v8 = vpop.permute.xlu1 %6802 }
 0xac1   :  { %v6814_v16 = vsel %vm2821_vm5, %v11108_v50, %v14501_v8  ;;  %v11112_v50 = vld [vmem:[%s15529_s16 + $0x4] ss:$12 sps:$4 sm:$0xff]  }
 0xac2   :  { %7511 = vmatprep.subr.bf16.mxu0 %v11112_v50 }
 0xac3   :  { %9857 = vmatmul.mubr.msk.f32.gmra.mrb[92].mxu0 %vm2776_vm4, %v9853_v18 }
 0xac4   :  { %7088 = vmatprep.mubr.f32.mxu0 %v11200_v52 }
 0xac5   :  { %v14508_v30 = vpop.permute.xlu0 %6804 }
 0xac6   :  { %v6815_v35 = vsel %vm2821_vm5, %v11109_v46, %v14508_v30  ;;  %v10622_v31 = vpack.c.bf16 %v14508_v30, %v14501_v8 }
 0xac7   :  { %v10624_v38 = vpack.c.bf16 %v6815_v35, %v6814_v16  ;;  %9866 = vmatmul.mubr.msk.f32.vlgmr.msra.gmra.mrb[94].mxu0 %vm2776_vm4, %v9862_v44  ;;  %v6655_v16 = vld [vmem:[%s15523_s10] sm:$0xff]  ;;  %v6658_v35 = vld [vmem:[%s15523_s10 + $0x18] sm:$0xff] }
 0xac8   :  { %10623 = vmatprep.subr.bf16.mxu1 %v10622_v31  ;;  %7094 = vmatprep.mubr.f32.mxu0 %v11200_v52 }
 0xac9   :  { %10625 = vmatpush1.bf16.msra.mxu1 %v10624_v38  ;;  %7512 = vmatpush1.bf16.msra.mxu0 %v11110_v7 }
 0xaca   :  { %10631 = vmatprep.subr.bf16.mxu1 %v10622_v31  ;;  %7513 = vmatprep.subr.bf16.mxu0 %v11115_v60  ;;  %v6657_v31 = vld [vmem:[%s15523_s10 + $0x10] sm:$0xff] }
 0xacb   :  { %9867 = vmatmul.mubr.msk.f32.gmra.mrb[96].mxu0 %vm2776_vm4, %v9863_v26 }
 0xacc   :  { %9858 = vmatmul.mubr.msk.f32.vlgmr.msra.gmra.mrb[82].mxu1 %vm2776_vm4, %v9850_v45  ;;  %7100 = vmatprep.mubr.f32.mxu0 %v11200_v52  ;;  %v11113_v45 = vld [vmem:[%s15529_s16 + $0x18] ss:$12 sps:$4 sm:$0xff]  }
 0xacd   :  { %10633 = vmatpush1.bf16.msra.mxu1 %v10624_v38  ;;  %6991 = vmatprep.mubr.f32.mxu1 %v11200_v52 }
 0xace   :  { %7514 = vmatpush1.bf16.msra.mxu0 %v11113_v45 }
 0xacf   :  { %9868 = vmatmul.mubr.msk.f32.gmra.mrb[98].mxu0 %vm2776_vm4, %v9864_v17 }
 0xad0   :  { %9859 = vmatmul.mubr.msk.f32.gmra.mrb[84].mxu1 %vm2776_vm4, %v9851_v15  ;;  %7106 = vmatprep.mubr.f32.mxu0 %v11200_v52  ;;  %v6656_v15 = vld [vmem:[%s15523_s10 + $0x8] sm:$0xff] }
 0xad1   :  { %6996 = vmatprep.mubr.f32.mxu1 %v11200_v52  ;;  %v7240_v38 = vpop.permute.xlu1 %7239 }
 0xad3   :  { %9869 = vmatmul.mubr.msk.f32.gmra.mrb[100].mxu0 %vm2776_vm4, %v9865_v57 }
 0xad4   :  { %9860 = vmatmul.mubr.msk.f32.gmra.mrb[86].mxu1 %vm2776_vm4, %v9852_v2  ;;  %7543 = vmatprep.mubr.bf16.mxu0 %v11201_v55 }
 0xad5   :  { %7001 = vmatprep.mubr.f32.mxu1 %v11200_v52 }
 0xad8   :  { %9861 = vmatmul.mubr.msk.f32.gmra.mrb[88].mxu1 %vm2776_vm4, %v9853_v18  ;;  %v11118_v18 = vld [vmem:[%s15529_s16 + $0x34] ss:$12 sps:$4 sm:$0xff]  }
 0xad9   :  { %7177 = vmatprep.mubr.f32.mxu1 %v11200_v52  ;;  %7515 = vmatprep.subr.bf16.mxu0 %v11118_v18 }
 0xadc   :  { %9870 = vmatmul.mubr.msk.f32.vlgmr.msra.gmra.mrb[90].mxu1 %vm2776_vm4, %v9862_v44  ;;  %v11116_v44 = vld [vmem:[%s15529_s16 + $0x30] ss:$12 sps:$4 sm:$0xff]  }
 0xadd   :  { %7183 = vmatprep.mubr.f32.mxu1 %v11200_v52  ;;  %7516 = vmatpush1.bf16.msra.mxu0 %v11116_v44 }
 0xade   :  { %10237 = vmatprep.subr.bf16.mxu0 %v11200_v52 }
 0xae0   :  { %9871 = vmatmul.mubr.msk.f32.gmra.mrb[92].mxu1 %vm2776_vm4, %v9863_v26  ;;  %v14633_v26 = vpop.permute.xlu0 %7244 }
 0xae1   :  { %7189 = vmatprep.mubr.f32.mxu1 %v11200_v52 }
 0xae4   :  { %9872 = vmatmul.mubr.msk.f32.gmra.mrb[94].mxu1 %vm2776_vm4, %v9864_v17 }
 0xae5   :  { %7195 = vmatprep.mubr.f32.mxu1 %v11200_v52 }
 0xae8   :  { %9873 = vmatmul.mubr.msk.f32.gmra.mrb[96].mxu1 %vm2776_vm4, %v9865_v57 }
 0xb2f   :  { %v14548_v27 = vpop.f32.mrb[82].mxu0 }
 0xb30   :  { %v14550_v54 = vpop.f32.mrb[83].mxu0 }
 0xb33   :  { %v14552_v4 = vpop.f32.mrb[84].mxu0 }
 0xb34   :  { %v14554_v20 = vpop.f32.mrb[85].mxu0 }
 0xb8a   :  { %v14556_v22 = vpop.f32.mrb[86].mxu0 }
 0xb8b   :  { %v14558_v28 = vpop.f32.mrb[87].mxu0 }
 0xb8e   :  { %v14560_v42 = vpop.f32.mrb[88].mxu0 }
 0xb8f   :  { %v14562_v48 = vpop.f32.mrb[89].mxu0 }
 0xb92   :  { %v14564_v41 = vpop.f32.mrb[90].mxu0 }
 0xb93   :  { %v14566_v39 = vpop.f32.mrb[91].mxu0 }
 0xb96   :  { %v14568_v32 = vpop.f32.mrb[92].mxu0 }
 0xb97   :  { %v14570_v37 = vpop.f32.mrb[93].mxu0 }
 0xb9a   :  { %v7090_v1 = vpop.f32.mrb[94].mxu0 }
 0xb9b   :  { %v7092_v29 = vpop.f32.mrb[95].mxu0 }
 0xb9e   :  { %v7096_v34 = vpop.f32.mrb[96].mxu0 }
 0xb9f   :  { %v7098_v51 = vpop.f32.mrb[97].mxu0  ;;  %v14572_v40 = vpop.f32.mrb[82].mxu1 }
 0xba0   :  { %v6990_v58 = vpop.f32.mrb[83].mxu1 }
 0xba2   :  { %v7102_v33 = vpop.f32.mrb[98].mxu0 }
 0xba3   :  { %7215 = vrot.lane.b32.xlu1 %v7102_v33, %s11206_s26  ;;  %v7104_v24 = vpop.f32.mrb[99].mxu0  ;;  %v14575_v43 = vpop.f32.mrb[84].mxu1 }
 0xba4   :  { %v6995_v63 = vpop.f32.mrb[85].mxu1 }
 0xba6   :  { %v7108_v9 = vpop.f32.mrb[100].mxu0 }
 0xba7   :  { %7229 = vperm.xlu1 %11093, %v9874_v47   ;;  %7217 = vrot.lane.b32.xlu0 %v7108_v9, %s11206_s26  ;;  %v7110_v12 = vpop.f32.mrb[101].mxu0  ;;  %v14581_v23 = vpop.f32.mrb[86].mxu1 }
 0xba8   :  { %v7000_v53 = vpop.f32.mrb[87].mxu1 }
 0xbab   :  { %7211 = vrot.lane.b32.xlu1 %v7090_v1, %s11206_s26  ;;  %7234 = vperm.xlu0 %11094, %v9875_v6   ;;  %v14587_v11 = vpop.f32.mrb[88].mxu1 }
 0xbac   :  { %v7005_v56 = vpop.f32.mrb[89].mxu1 }
 0xbaf   :  { %7275 = vrot.lane.b32.xlu1 %v7104_v24, %s11206_s26  ;;  %7213 = vrot.lane.b32.xlu0 %v7096_v34, %s11206_s26  ;;  %v7179_v0 = vpop.f32.mrb[90].mxu1 }
 0xbb0   :  { %v7181_v61 = vpop.f32.mrb[91].mxu1 }
 0xbb3   :  { %7273 = vrot.lane.b32.xlu0 %v7098_v51, %s11206_s26  ;;  %v7185_v62 = vpop.f32.mrb[92].mxu1 }
 0xbb4   :  { %v7187_v46 = vpop.f32.mrb[93].mxu1 }
 0xbb7   :  { %v7191_v25 = vpop.f32.mrb[94].mxu1  ;;  %7345 = vrot.lane.b32.xlu0 %v7185_v62, %s11206_s26 }
 0xbb8   :  { %7347 = vrot.lane.b32.xlu1 %v7191_v25, %s11206_s26  ;;  %v7193_v36 = vpop.f32.mrb[95].mxu1 }
 0xbbb   :  { %7409 = vrot.lane.b32.xlu0 %v7187_v46, %s11206_s26  ;;  %v7197_v5 = vpop.f32.mrb[96].mxu1 }
 0xbbc   :  { %7411 = vrot.lane.b32.xlu1 %v7193_v36, %s11206_s26  ;;  %v7199_v2 = vpop.f32.mrb[97].mxu1 }
 0xbbf   :  { %6666 = vperm.xlu0 %11094, %v6656_v15  }
 0xbc0   :  { %7271 = vrot.lane.b32.xlu1 %v7092_v29, %s11206_s26 }
 0xbc3   :  { %7349 = vrot.lane.b32.xlu0 %v7197_v5, %s11206_s26 }
 0xbc4   :  { %7343 = vrot.lane.b32.xlu1 %v7179_v0, %s11206_s26 }
 0xbc7   :  { %7277 = vrot.lane.b32.xlu0 %v7110_v12, %s11206_s26 }
 0xbc8   :  { %7407 = vrot.lane.b32.xlu1 %v7181_v61, %s11206_s26 }
 0xbcb   :  { %7413 = vrot.lane.b32.xlu0 %v7199_v2, %s11206_s26 }
 0xbcc   :  { %6661 = vperm.xlu1 %11093, %v6655_v16  }
 0xbcf   :  { %6676 = vperm.xlu0 %11094, %v6658_v35  }
 0xbd0   :  { %6671 = vperm.xlu1 %11093, %v6657_v31  }
 0xc15   :  { %v7216_v17 = vpop.permute.xlu1 %7215 }
 0xc16   :  { %v7225_v57 = vadd.f32 %v7216_v17, %v14564_v41 }
 0xc18   :  { %v7249_v1 = vadd.f32 %v7240_v38, %v7225_v57 }
 0xc19   :  { %v14636_v29 = vpop.permute.xlu0 %7217 }
 0xc1a   :  { %v7226_v34 = vadd.f32 %v14636_v29, %v14568_v32  ;;  %v9878_v51 = vmul.f32 -1.442695, %v7249_v1 }
 0xc1c   :  { %v7250_v58 = vadd.f32 %v14633_v26, %v7226_v34  ;;  %11122 = vpow2.f32 %v9878_v51 }
 0xc1e   :  { %v9879_v33 = vmul.f32 -1.442695, %v7250_v58 }
 0xc20   :  { %11124 = vpow2.f32 %v9879_v33 }
 0xc26   :  { %v14641_v24 = vpop.permute.xlu1 %7229  ;;  %v11123_v47 = vpop.eup %11122 }
 0xc27   :  { %v7259_v53 = vadd.f32 1.0, %v11123_v47 }
 0xc2a   :  { %v7212_v63 = vpop.permute.xlu1 %7211  ;;  %v14643_v9 = vpop.permute.xlu0 %7234 }
 0xc2b   :  { %v11125_v12 = vpop.eup %11124  ;;  %v7223_v6 = vadd.f32 %v7212_v63, %v14556_v22 }
 0xc2c   :  { %v7260_v0 = vadd.f32 1.0, %v11125_v12 }
 0xc2d   :  { %v7247_v56 = vadd.f32 %v14641_v24, %v7223_v6 }
 0xc2e   :  { %v7276_v61 = vpop.permute.xlu1 %7275  ;;  %v7214_v62 = vpop.permute.xlu0 %7213 }
 0xc2f   :  { %v7281_v46 = vsel %vm3431_vm6, %v7216_v17, %v7276_v61  ;;  %v7317_v50 = vadd.f32 %v7276_v61, %v14566_v39  ;;  %v7224_v25 = vadd.f32 %v7214_v62, %v14560_v42  ;;  %11126 = vtanh.f32 %v7247_v56 }
 0xc30   :  { %v7289_v7 = vadd.f32 %v7281_v46, %v14564_v41  ;;  %11128 = vrcp.f32 %v7259_v53 }
 0xc31   :  { %v7321_v36 = vadd.f32 %v7317_v50, %v7240_v38  ;;  %v7248_v60 = vadd.f32 %v14643_v9, %v7224_v25  ;;  %11130 = vrcp.f32 %v7260_v0 }
 0xc32   :  { %v7293_v5 = vadd.f32 %v7289_v7, %v7240_v38  ;;  %v7348_v45 = vpop.permute.xlu1 %7347  ;;  %v7274_v15 = vpop.permute.xlu0 %7273 }
 0xc33   :  { %v9882_v2 = vmul.f32 -1.442695, %v7321_v36  ;;  %11132 = vtanh.f32 %v7248_v60  ;;  %v7359_v18 = vadd.f32 %v7348_v45, %v14566_v39  ;;  %v7360_v44 = vadd.f32 %v7348_v45, %v14581_v23 }
 0xc34   :  { %v9880_v16 = vmul.f32 -1.442695, %v7293_v5  ;;  %v7280_v35 = vsel %vm3431_vm6, %v7214_v62, %v7274_v15  ;;  %v7316_v31 = vadd.f32 %v7274_v15, %v14562_v48 }
 0xc35   :  { %11134 = vpow2.f32 %v9882_v2  ;;  %v7367_v41 = vadd.f32 %v7359_v18, %v7240_v38  ;;  %v7368_v17 = vadd.f32 %v7360_v44, %v7240_v38  ;;  %v7288_v57 = vadd.f32 %v7280_v35, %v14560_v42 }
 0xc36   :  { %11136 = vpow2.f32 %v9880_v16  ;;  %v14658_v1 = vadd.f32 %v7316_v31, %v14643_v9  ;;  %v7412_v34 = vpop.permute.xlu1 %7411  ;;  %v7346_v51 = vpop.permute.xlu0 %7345 }
 0xc37   :  { %v9884_v58 = vmul.f32 -1.442695, %v7367_v41  ;;  %v9885_v39 = vmul.f32 -1.442695, %v7368_v17  ;;  %v14661_v33 = vadd.f32 %v7288_v57, %v14643_v9  ;;  %v7417_v47 = vsel %vm3431_vm6, %v7348_v45, %v7412_v34  ;;  %v11119_v41 = vld [vmem:[%s15529_s16 + $0x8] ss:$12 sps:$4 sm:$0xff]  }
 0xc38   :  { %v7425_v12 = vadd.f32 %v7417_v47, %v14581_v23  ;;  %v7357_v6 = vadd.f32 %v7346_v51, %v14562_v48  ;;  %v7358_v53 = vadd.f32 %v7346_v51, %v14575_v43 }
 0xc39   :  { %11138 = vpow2.f32 %v9884_v58  ;;  %v11127_v42 = vpop.eup %11126 }
 0xc3a   :  { %11140 = vpow2.f32 %v9885_v39  ;;  %v7429_v56 = vadd.f32 %v7425_v12, %v7240_v38  ;;  %v14668_v0 = vadd.f32 %v7357_v6, %v14643_v9  ;;  %v14671_v61 = vadd.f32 %v7358_v53, %v14643_v9  ;;  %v7272_v62 = vpop.permute.xlu1 %7271  ;;  %v7410_v46 = vpop.permute.xlu0 %7409  ;;  %v11120_v53 = vld [vmem:[%s15529_s16 + $0x20] ss:$12 sps:$4 sm:$0xff]  }
 0xc3b   :  { %v11129_v50 = vpop.eup %11128  ;;  %v7279_v25 = vsel %vm3431_vm6, %v7212_v63, %v7272_v62  ;;  %v7315_v23 = vadd.f32 %v7272_v62, %v14558_v28  ;;  %v7416_v48 = vsel %vm3431_vm6, %v7346_v51, %v7410_v46 }
 0xc3c   :  { %v11131_v7 = vpop.eup %11130  ;;  %v9888_v36 = vmul.f32 -1.442695, %v7429_v56  ;;  %v7287_v60 = vadd.f32 %v7279_v25, %v14556_v22  ;;  %v7424_v38 = vadd.f32 %v7416_v48, %v14575_v43  ;;  %v7265_v15 = vmul.f32 %v11129_v50, %v11127_v42 }
 0xc3d   :  { %v11133_v5 = vpop.eup %11132  ;;  %v7319_v45 = vadd.f32 %v7315_v23, %v14641_v24 }
 0xc3e   :  { %11142 = vpow2.f32 %v9888_v36  ;;  %v7291_v2 = vadd.f32 %v7287_v60, %v14641_v24  ;;  %v14681_v18 = vadd.f32 %v7424_v38, %v14643_v9  ;;  %v7344_v63 = vpop.permute.xlu1 %7343  ;;  %v6667_v44 = vpop.permute.xlu0 %6666  ;;  %v7266_v16 = vmul.f32 %v11133_v5, %v11131_v7  ;;  %7595 = vst.msk [vmem:[#allocation2] sm:$0xff] %vm2806_vm3, %v7265_v15 }
 0xc3f   :  { %v11135_v35 = vpop.eup %11134  ;;  %v7355_v31 = vadd.f32 %v7344_v63, %v14558_v28  ;;  %v7356_v22 = vadd.f32 %v7344_v63, %v14572_v40  ;;  %v14686_v43 = vadd.f32 %v14548_v27, %v6667_v44  ;;  %11144 = vtanh.f32 %v7319_v45 }
 0xc40   :  { %v11137_v17 = vpop.eup %11136  ;;  %v7331_v9 = vadd.f32 1.0, %v11135_v35  ;;  %v14692_v57 = vpack.c.bf16 %v7266_v16, %v7265_v15  ;;  %7596 = vst.msk [vmem:[#allocation2 + $0x8] sm:$0xff] %vm2806_vm3, %v7266_v16  ;;  %11146 = vtanh.f32 %v7291_v2 }
 0xc41   :  { %v7303_v34 = vadd.f32 1.0, %v11137_v17  ;;  %v7363_v28 = vadd.f32 %v7355_v31, %v14641_v24  ;;  %v7364_v27 = vadd.f32 %v7356_v22, %v14641_v24 }
 0xc42   :  { %11148 = vrcp.f32 %v7331_v9  ;;  %v7408_v51 = vpop.permute.xlu1 %7407  ;;  %9899 = vmatmul.mubr.msk.bf16.vlgmr.msra.gmra.mrb[104].mxu0 %vm2806_vm3, %v14692_v57  ;;  %v7350_v58 = vpop.permute.xlu0 %7349 }
 0xc43   :  { %v11139_v39 = vpop.eup %11138  ;;  %11150 = vrcp.f32 %v7303_v34  ;;  %v7415_v47 = vsel %vm3431_vm6, %v7344_v63, %v7408_v51  ;;  %10238 = vmatpush3.bf16.msra.mxu0 %v11119_v41  ;;  %v7361_v12 = vadd.f32 %v7350_v58, %v14570_v37  ;;  %v7362_v6 = vadd.f32 %v7350_v58, %v14587_v11  ;;  %10243 = vmatprep.mubr.msk.bf16.mxu0 %vm11209_vm9, %v11200_v52 }
 0xc44   :  { %v11141_v42 = vpop.eup %11140  ;;  %v7387_v56 = vadd.f32 1.0, %v11139_v39  ;;  %11152 = vtanh.f32 %v7363_v28  ;;  %v7423_v62 = vadd.f32 %v7415_v47, %v14572_v40  ;;  %10239 = vmatprep.subr.bf16.mxu0 %v11200_v52  ;;  %v11121_v40 = vld [vmem:[%s15529_s16 + $0x38] ss:$12 sps:$4 sm:$0xff]  }
 0xc45   :  { %v7388_v46 = vadd.f32 1.0, %v11141_v42  ;;  %11154 = vtanh.f32 %v7364_v27  ;;  %v7369_v50 = vadd.f32 %v7361_v12, %v14633_v26  ;;  %v7370_v25 = vadd.f32 %v7362_v6, %v14633_v26 }
 0xc46   :  { %11156 = vrcp.f32 %v7387_v56  ;;  %v7427_v23 = vadd.f32 %v7423_v62, %v14641_v24  ;;  %v7278_v48 = vpop.permute.xlu0 %7277 }
 0xc47   :  { %11158 = vrcp.f32 %v7388_v46  ;;  %v9886_v7 = vmul.f32 -1.442695, %v7369_v50  ;;  %v9887_v36 = vmul.f32 -1.442695, %v7370_v25  ;;  %10240 = vmatpush3.bf16.msra.mxu0 %v11120_v53  ;;  %v7282_v60 = vsel %vm3431_vm6, %v14636_v29, %v7278_v48 }
 0xc48   :  { %v11143_v38 = vpop.eup %11142  ;;  %11160 = vtanh.f32 %v7427_v23  ;;  %v7290_v5 = vadd.f32 %v7282_v60, %v14568_v32  ;;  %v7318_v45 = vadd.f32 %v7278_v48, %v14570_v37  ;;  %10241 = vmatprep.subr.bf16.mxu0 %v11200_v52 }
 0xc49   :  { %v7439_v24 = vadd.f32 1.0, %v11143_v38  ;;  %11162 = vpow2.f32 %v9886_v7  ;;  %v11145_v15 = vpop.eup %11144 }
 0xc4a   :  { %11164 = vpow2.f32 %v9887_v36  ;;  %v7294_v2 = vadd.f32 %v7290_v5, %v14633_v26  ;;  %v7322_v29 = vadd.f32 %v7318_v45, %v14633_v26  ;;  %v7414_v63 = vpop.permute.xlu0 %7413  ;;  %v11147_v44 = vpop.eup %11146 }
 0xc4b   :  { %11166 = vrcp.f32 %v7439_v24  ;;  %v6662_v16 = vpop.permute.xlu1 %6661  ;;  %10242 = vmatpush3.bf16.msra.mxu0 %v11121_v40  ;;  %v7418_v35 = vsel %vm3431_vm6, %v7350_v58, %v7414_v63 }
 0xc4c   :  { %v11149_v32 = vpop.eup %11148  ;;  %v9881_v31 = vmul.f32 -1.442695, %v7294_v2  ;;  %v9883_v37 = vmul.f32 -1.442695, %v7322_v29  ;;  %v14724_v22 = vadd.f32 %v14550_v54, %v6662_v16  ;;  %v7426_v41 = vadd.f32 %v7418_v35, %v14587_v11 }
 0xc4d   :  { %v11151_v17 = vpop.eup %11150  ;;  %v14727_v9 = vmul.f32 %v11149_v32, %v11145_v15 }
 0xc4e   :  { %v11153_v34 = vpop.eup %11152  ;;  %v14729_v28 = vmul.f32 %v11151_v17, %v11147_v44  ;;  %11168 = vpow2.f32 %v9881_v31  ;;  %v7430_v27 = vadd.f32 %v7426_v41, %v14633_v26  ;;  %10244 = vmatmul.mubr.msk.bf16.vlgmr.msra.gmra.mrb[108].mxu0 %vm2806_vm3, %v14692_v57  ;;  %v6677_v51 = vpop.permute.xlu0 %6676 }
 0xc4f   :  { %v11155_v58 = vpop.eup %11154  ;;  %11170 = vpow2.f32 %v9883_v37  ;;  %v6672_v39 = vpop.permute.xlu1 %6671  ;;  %v14735_v54 = vadd.f32 %v14552_v4, %v6677_v51 }
 0xc50   :  { %v11157_v11 = vpop.eup %11156  ;;  %v9889_v47 = vmul.f32 -1.442695, %v7430_v27  ;;  %v14738_v12 = vadd.f32 %v14554_v20, %v6672_v39 }
 0xc51   :  { %v11159_v6 = vpop.eup %11158  ;;  %v14740_v53 = vmul.f32 %v11157_v11, %v11153_v34 }
 0xc52   :  { %v11161_v42 = vpop.eup %11160  ;;  %v14742_v26 = vmul.f32 %v11159_v6, %v11155_v58  ;;  %11172 = vpow2.f32 %v9889_v47 }
 0xc53   :  { %v11163_v57 = vpop.eup %11162  ;;  %11174 = vtanh.f32 %v14668_v0 }
 0xc54   :  { %v11165_v56 = vpop.eup %11164  ;;  %v7389_v62 = vadd.f32 1.0, %v11163_v57  ;;  %11176 = vtanh.f32 %v14671_v61 }
 0xc55   :  { %v11167_v46 = vpop.eup %11166  ;;  %v7390_v4 = vadd.f32 1.0, %v11165_v56 }
 0xc56   :  { %v14746_v50 = vmul.f32 %v11167_v46, %v11161_v42  ;;  %11178 = vrcp.f32 %v7389_v62 }
 0xc57   :  { %11180 = vrcp.f32 %v7390_v4 }
 0xc58   :  { %v11169_v20 = vpop.eup %11168  ;;  %11182 = vtanh.f32 %v14658_v1 }
 0xc59   :  { %v11171_v25 = vpop.eup %11170  ;;  %v7304_v23 = vadd.f32 1.0, %v11169_v20  ;;  %11184 = vtanh.f32 %v14661_v33 }
 0xc5a   :  { %v7332_v48 = vadd.f32 1.0, %v11171_v25 }
 0xc5b   :  { %11186 = vrcp.f32 %v7304_v23 }
 0xc5c   :  { %v11173_v7 = vpop.eup %11172  ;;  %11188 = vrcp.f32 %v7332_v48 }
 0xc5d   :  { %v7440_v0 = vadd.f32 1.0, %v11173_v7  ;;  %v11175_v36 = vpop.eup %11174  ;;  %11190 = vtanh.f32 %v14681_v18 }
 0xc5e   :  { %v11177_v61 = vpop.eup %11176 }
 0xc5f   :  { %11192 = vrcp.f32 %v7440_v0 }
 0xc60   :  { %v11179_v60 = vpop.eup %11178 }
 0xc61   :  { %v11181_v40 = vpop.eup %11180  ;;  %v14751_v38 = vmul.f32 %v11179_v60, %v11175_v36 }
 0xc62   :  { %v14753_v5 = vmul.f32 %v11181_v40, %v11177_v61  ;;  %v11183_v1 = vpop.eup %11182 }
 0xc63   :  { %v11185_v45 = vpop.eup %11184  ;;  %v8068_v0 = vpack.c.bf16 %v14751_v38, %v14740_v53 }
 0xc65   :  { %v11187_v24 = vpop.eup %11186 }
 0xc66   :  { %v11189_v33 = vpop.eup %11188  ;;  %v14755_v15 = vmul.f32 %v11187_v24, %v11185_v45 }
 0xc67   :  { %v14757_v2 = vmul.f32 %v11189_v33, %v11183_v1  ;;  %v11191_v29 = vpop.eup %11190 }
 0xc68   :  { %v7661_v7 = vpack.c.bf16 %v14755_v15, %v14729_v28 }
 0xc69   :  { %v11193_v63 = vpop.eup %11192 }
 0xc6a   :  { %v14759_v44 = vmul.f32 %v11193_v63, %v11191_v29 }
 0xd15   :  { %v7545_v18 = vpop.f32.mrb[104].mxu0 }
 0xd16   :  { %7597 = vst.msk [vmem:[#allocation2 + $0x10] sm:$0xff] %vm2806_vm3, %v7545_v18  ;;  %7611 = vrot.lane.b32.xlu1 %v7545_v18, %s11203_s17  ;;  %v7547_v16 = vpop.f32.mrb[105].mxu0 }
 0xd17   :  { %7613 = vrot.lane.b32.xlu0 %v7547_v16, %s11203_s17  ;;  %v7549_v35 = vpop.f32.mrb[106].mxu0 }
 0xd18   :  { %7598 = vst.msk [vmem:[#allocation2 + $0x18] sm:$0xff] %vm2806_vm3, %v7549_v35  ;;  %v7551_v32 = vpop.f32.mrb[107].mxu0 }
 0xd1a   :  { %7601 = vrot.lane.b32.xlu1 %v7545_v18, %s11207_s15 }
 0xd1b   :  { %7603 = vrot.lane.b32.xlu0 %v7549_v35, %s11207_s15 }
 0xd1e   :  { %7643 = vrot.lane.b32.xlu1 %v7547_v16, %s11202_s0 }
 0xd1f   :  { %7617 = vrot.lane.b32.xlu0 %v7551_v32, %s11203_s17 }
 0xd21   :  { %v7588_v31 = vpop.f32.mrb[108].mxu0 }
 0xd22   :  { %v10245_v37 = vpop.f32.mrb[109].mxu0  ;;  %7625 = vrot.lane.b32.xlu1 %v7547_v16, %s11208_s27 }
 0xd23   :  { %v7591_v41 = vpop.f32.mrb[110].mxu0  ;;  %7627 = vrot.lane.b32.xlu0 %v7551_v32, %s11208_s27 }
 0xd24   :  { %v10246_v17 = vpop.f32.mrb[111].mxu0 }
 0xd26   :  { %7615 = vrot.lane.b32.xlu1 %v7549_v35, %s11203_s17 }
 0xd27   :  { %7645 = vrot.lane.b32.xlu0 %v7588_v31, %s11202_s0 }
 0xd2a   :  { %7647 = vrot.lane.b32.xlu1 %v7551_v32, %s11202_s0 }
 0xd2b   :  { %7649 = vrot.lane.b32.xlu0 %v7591_v41, %s11202_s0 }
 0xd2e   :  { %7633 = vrot.lane.b32.xlu1 %v7547_v16, %s11205_s20 }
 0xd2f   :  { %7635 = vrot.lane.b32.xlu0 %v7551_v32, %s11205_s20 }
 0xd88   :  { %v7612_v34 = vpop.permute.xlu1 %7611 }
 0xd89   :  { %v7614_v27 = vpop.permute.xlu0 %7613 }
 0xd8a   :  { %v7619_v51 = vsel %vm2791_vm2, %v7612_v34, %v7614_v27 }
 0xd8b   :  { %7623 = vst.msk [vmem:[#allocation2 + $0x30] sm:$0xff] %vm2806_vm3, %v7619_v51 }
 0xd8c   :  { %v7602_v58 = vpop.permute.xlu1 %7601 }
 0xd8d   :  { %7607 = vst.msk [vmem:[#allocation2 + $0x20] sm:$0xff] %vm2806_vm3, %v7602_v58  ;;  %v7604_v39 = vpop.permute.xlu0 %7603 }
 0xd8e   :  { %7608 = vst.msk [vmem:[#allocation2 + $0x28] sm:$0xff] %vm2806_vm3, %v7604_v39 }
 0xd90   :  { %v7644_v11 = vpop.permute.xlu1 %7643 }
 0xd91   :  { %v7618_v47 = vpop.permute.xlu0 %7617 }
 0xd94   :  { %v7626_v6 = vpop.permute.xlu1 %7625 }
 0xd95   :  { %7631 = vst.msk [vmem:[#allocation2 + $0x40] sm:$0xff] %vm2806_vm3, %v7626_v6  ;;  %v7628_v42 = vpop.permute.xlu0 %7627 }
 0xd96   :  { %7632 = vst.msk [vmem:[#allocation2 + $0x48] sm:$0xff] %vm2806_vm3, %v7628_v42 }
 0xd98   :  { %v7616_v57 = vpop.permute.xlu1 %7615 }
 0xd99   :  { %v7620_v56 = vsel %vm2791_vm2, %v7616_v57, %v7618_v47  ;;  %v7646_v62 = vpop.permute.xlu0 %7645 }
 0xd9a   :  { %7624 = vst.msk [vmem:[#allocation2 + $0x38] sm:$0xff] %vm2806_vm3, %v7620_v56  ;;  %v7651_v46 = vsel %vm2776_vm4, %v7644_v11, %v7646_v62 }
 0xd9b   :  { %7655 = vst.msk [vmem:[#allocation2 + $0x60] sm:$0xff] %vm2806_vm3, %v7651_v46 }
 0xd9c   :  { %v7648_v4 = vpop.permute.xlu1 %7647 }
 0xd9d   :  { %v7650_v20 = vpop.permute.xlu0 %7649 }
 0xd9e   :  { %v7652_v25 = vsel %vm2776_vm4, %v7648_v4, %v7650_v20 }
 0xd9f   :  { %7656 = vst.msk [vmem:[#allocation2 + $0x68] sm:$0xff] %vm2806_vm3, %v7652_v25 }
 0xda0   :  { %v7634_v23 = vpop.permute.xlu1 %7633 }
 0xda1   :  { %7639 = vst.msk [vmem:[#allocation2 + $0x50] sm:$0xff] %vm2806_vm3, %v7634_v23  ;;  %v7636_v48 = vpop.permute.xlu0 %7635 }
 0xda2   :  { %7640 = vst.msk [vmem:[#allocation2 + $0x58] sm:$0xff] %vm2806_vm3, %v7636_v48 }
 0xda3   :  { %11198 = dma.done.wait [#allocation6 + $0x1], 6144 }
 0xda4   :  { %11199 = vsyncadd [#allocation6 + $0x1], 4294961152  ;;  %7712 = vmatprep.mubr.bf16.mxu1 %v11201_v55  ;;  %7755 = vmatprep.mubr.bf16.mxu0 %v11201_v55  ;;  %v7864_v36 = vpack.c.bf16 %v14757_v2, %v14727_v9  ;;  %v8069_v61 = vpack.c.bf16 %v14753_v5, %v14742_v26  ;;  %v8286_v60 = vpack.c.bf16 %v14759_v44, %v14746_v50  ;;  %v7663_v40 = vld [vmem:[#allocation5 + $0x8] sm:$0xff]  ;;  %v7662_v1 = vld [vmem:[#allocation5] sm:$0xff] }
 0xda5   :  { %11194 = vset.pattern.permute.xlu1 %v11201_v55  ;;  %7675 = vrot.lane.b32.xlu0 %v7661_v7, %s11204_s30  ;;  %v7665_v45 = vld [vmem:[#allocation5 + $0x18] sm:$0xff]  ;;  %v7664_v24 = vld [vmem:[#allocation5 + $0x10] sm:$0xff]  ;;  %v7667_v33 = vld [vmem:[#allocation5 + $0x28] sm:$0xff] }
 0xda6   :  { %8085 = vrot.lane.b32.xlu1 %v8068_v0, %s11202_s0  ;;  %11195 = vset.pattern.permute.xlu0 %v11201_v55  ;;  %v7669_v29 = vld [vmem:[#allocation5 + $0x38] sm:$0xff]  ;;  %v7666_v63 = vld [vmem:[#allocation5 + $0x20] sm:$0xff]  ;;  %v7668_v18 = vld [vmem:[#allocation5 + $0x30] sm:$0xff] }
 0xda7   :  { %7680 = vmatprep.subr.bf16.mxu1 %v7663_v40  ;;  %7723 = vmatprep.subr.bf16.mxu0 %v7665_v45  ;;  %v7671_v16 = vld [vmem:[#allocation5 + $0x48] sm:$0xff]  ;;  %v7673_v35 = vld [vmem:[#allocation5 + $0x58] sm:$0xff]  ;;  %v7670_v32 = vld [vmem:[#allocation5 + $0x40] sm:$0xff] }
 0xda8   :  { %7681 = vmatpush1.bf16.msra.mxu1 %v7662_v1  ;;  %7724 = vmatpush1.bf16.msra.mxu0 %v7664_v24  ;;  %v7672_v31 = vld [vmem:[#allocation5 + $0x50] sm:$0xff]  ;;  %v7867_v37 = vld [vmem:[#allocation5 + $0x68] sm:$0xff]  ;;  %v7869_v41 = vld [vmem:[#allocation5 + $0x78] sm:$0xff] }
 0xda9   :  { %7879 = vrot.lane.b32.xlu0 %v7864_v36, %s11206_s26  ;;  %7682 = vmatprep.subr.bf16.mxu1 %v7667_v33  ;;  %v7876_v17 = vld [vmem:[#allocation5 + $0xb0] sm:$0xff]  ;;  %v8072_v34 = vld [vmem:[#allocation5 + $0xc8] sm:$0xff]  ;;  %v8074_v27 = vld [vmem:[#allocation5 + $0xd8] sm:$0xff] }
 0xdaa   :  { %8087 = vrot.lane.b32.xlu1 %v8069_v61, %s11202_s0  ;;  %7725 = vmatprep.subr.bf16.mxu0 %v7669_v29  ;;  %v8071_v58 = vld [vmem:[#allocation5 + $0xc0] sm:$0xff]  ;;  %v8076_v39 = vld [vmem:[#allocation5 + $0xe8] sm:$0xff]  ;;  %v8073_v47 = vld [vmem:[#allocation5 + $0xd0] sm:$0xff] }
 0xdab   :  { %v8078_v6 = vld [vmem:[#allocation5 + $0xf8] sm:$0xff]  ;;  %v8075_v42 = vld [vmem:[#allocation5 + $0xe0] sm:$0xff]  ;;  %v8080_v57 = vld [vmem:[#allocation5 + $0x108] sm:$0xff] }
 0xdac   :  { %7683 = vmatpush1.bf16.msra.mxu1 %v7666_v63  ;;  %7726 = vmatpush1.bf16.msra.mxu0 %v7668_v18  ;;  %v8077_v56 = vld [vmem:[#allocation5 + $0xf0] sm:$0xff]  ;;  %v8082_v62 = vld [vmem:[#allocation5 + $0x118] sm:$0xff]  ;;  %v8079_v46 = vld [vmem:[#allocation5 + $0x100] sm:$0xff] }
 0xdad   :  { %8301 = vrot.lane.b32.xlu0 %v8286_v60, %s11205_s20  ;;  %7684 = vmatprep.subr.bf16.mxu1 %v7671_v16  ;;  %v8289_v20 = vld [vmem:[#allocation5 + $0x128] sm:$0xff]  ;;  %v8081_v25 = vld [vmem:[#allocation5 + $0x110] sm:$0xff]  ;;  %v8291_v48 = vld [vmem:[#allocation5 + $0x138] sm:$0xff] }
 0xdae   :  { %7972 = vrot.lane.b32.xlu1 %v14727_v9, %s11206_s26  ;;  %7727 = vmatprep.subr.bf16.mxu0 %v7673_v35  ;;  %v7866_v9 = vld [vmem:[#allocation5 + $0x60] sm:$0xff]  ;;  %v8293_v0 = vld [vmem:[#allocation5 + $0x148] sm:$0xff]  ;;  %v8290_v36 = vld [vmem:[#allocation5 + $0x130] sm:$0xff] }
 0xdaf   :  { %v8288_v7 = vld [vmem:[#allocation5 + $0x120] sm:$0xff]  ;;  %v8295_v61 = vld [vmem:[#allocation5 + $0x158] sm:$0xff]  ;;  %v8297_v40 = vld [vmem:[#allocation5 + $0x168] sm:$0xff] }
 0xdb0   :  { %7685 = vmatpush1.bf16.msra.mxu1 %v7670_v32  ;;  %7728 = vmatpush1.bf16.msra.mxu0 %v7672_v31  ;;  %v8292_v60 = vld [vmem:[#allocation5 + $0x140] sm:$0xff]  ;;  %v8493_v1 = vld [vmem:[#allocation2] sm:$0xff]  ;;  %v8494_v45 = vld [vmem:[#allocation2 + $0x8] sm:$0xff] }
 0xdb1   :  { %7974 = vrot.lane.b32.xlu0 %v14757_v2, %s11206_s26  ;;  %7884 = vmatprep.subr.bf16.mxu1 %v7867_v37  ;;  %v7868_v2 = vld [vmem:[#allocation5 + $0x70] sm:$0xff]  ;;  %v8299_v33 = vld [vmem:[#allocation5 + $0x178] sm:$0xff]  ;;  %v8296_v29 = vld [vmem:[#allocation5 + $0x160] sm:$0xff]  ;;  %v10634_v63 = vpack.c.bf16 %v8494_v45, %v8493_v1 }
 0xdb2   :  { %7768 = vrot.lane.b32.xlu1 %v14729_v28, %s11204_s30  ;;  %7927 = vmatprep.subr.bf16.mxu0 %v7869_v41  ;;  %v8294_v24 = vld [vmem:[#allocation5 + $0x150] sm:$0xff]  ;;  %v8495_v18 = vld [vmem:[#allocation2 + $0x10] sm:$0xff]  ;;  %v8496_v16 = vld [vmem:[#allocation2 + $0x18] sm:$0xff] }
 0xdb3   :  { %v8298_v35 = vld [vmem:[#allocation5 + $0x170] sm:$0xff]  ;;  %v10638_v31 = vpack.c.bf16 %v8496_v16, %v8495_v18  ;;  %v8498_v37 = vld [vmem:[#allocation2 + $0x28] sm:$0xff] }
 0xdb5   :  { %7770 = vrot.lane.b32.xlu0 %v14755_v15, %s11204_s30  ;;  %v7871_v15 = vld [vmem:[#allocation5 + $0x88] sm:$0xff] }
 0xdb6   :  { %8184 = vrot.lane.b32.xlu1 %v14740_v53, %s11202_s0  ;;  %v7873_v53 = vld [vmem:[#allocation5 + $0x98] sm:$0xff] }
 0xdb9   :  { %8186 = vrot.lane.b32.xlu0 %v14742_v26, %s11202_s0  ;;  %v7870_v26 = vld [vmem:[#allocation5 + $0x80] sm:$0xff] }
 0xdba   :  { %8188 = vrot.lane.b32.xlu1 %v14751_v38, %s11202_s0  ;;  %v7875_v38 = vld [vmem:[#allocation5 + $0xa8] sm:$0xff] }
 0xdbd   :  { %8190 = vrot.lane.b32.xlu0 %v14753_v5, %s11202_s0  ;;  %v7877_v5 = vld [vmem:[#allocation5 + $0xb8] sm:$0xff] }
 0xdbe   :  { %8394 = vrot.lane.b32.xlu1 %v14746_v50, %s11205_s20  ;;  %v7872_v50 = vld [vmem:[#allocation5 + $0x90] sm:$0xff] }
 0xdc1   :  { %8396 = vrot.lane.b32.xlu0 %v14759_v44, %s11205_s20  ;;  %v7874_v44 = vld [vmem:[#allocation5 + $0xa0] sm:$0xff] }
 0xe17   :  { %v7676_v28 = vpop.permute.xlu0 %7675 }
 0xe18   :  { %9901 = vmatmul.mubr.msk.bf16.vlgmr.msra.gmra.mrb[100].mxu1 %vm2806_vm3, %v7676_v28  ;;  %9902 = vmatmul.mubr.msk.bf16.vlgmr.msra.gmra.mrb[112].mxu0 %vm2806_vm3, %v7676_v28  ;;  %v8086_v11 = vpop.permute.xlu1 %8085  ;;  %v8500_v28 = vld [vmem:[#allocation2 + $0x38] sm:$0xff] }
 0xe19   :  { %7885 = vmatpush1.bf16.msra.mxu1 %v7866_v9  ;;  %7916 = vmatprep.mubr.bf16.mxu1 %v11201_v55  ;;  %v8499_v9 = vld [vmem:[#allocation2 + $0x30] sm:$0xff] }
 0xe1a   :  { %7886 = vmatprep.subr.bf16.mxu1 %v7871_v15  ;;  %7928 = vmatpush1.bf16.msra.mxu0 %v7868_v2  ;;  %v10646_v15 = vpack.c.bf16 %v8500_v28, %v8499_v9 }
 0xe1b   :  { %7929 = vmatprep.subr.bf16.mxu0 %v7873_v53  ;;  %7959 = vmatprep.mubr.bf16.mxu0 %v11201_v55  ;;  %v7880_v51 = vpop.permute.xlu0 %7879 }
 0xe1c   :  { %v8088_v4 = vpop.permute.xlu1 %8087 }
 0xe1d   :  { %7887 = vmatpush1.bf16.msra.mxu1 %v7870_v26  ;;  %v8090_v23 = vsel %vm2776_vm4, %v8086_v11, %v8088_v4  ;;  %v8501_v26 = vld [vmem:[#allocation2 + $0x40] sm:$0xff] }
 0xe1e   :  { %7888 = vmatprep.subr.bf16.mxu1 %v7875_v38  ;;  %7930 = vmatpush1.bf16.msra.mxu0 %v7872_v50  ;;  %v8502_v38 = vld [vmem:[#allocation2 + $0x48] sm:$0xff]  ;;  %v9909_v11 = vld [vmem:[%s15518_s5 + $0x20] sm:$0xff] }
 0xe1f   :  { %7931 = vmatprep.subr.bf16.mxu0 %v7877_v5  ;;  %v8302_v32 = vpop.permute.xlu0 %8301  ;;  %v10650_v50 = vpack.c.bf16 %v8502_v38, %v8501_v26 }
 0xe20   :  { %v7973_v2 = vpop.permute.xlu1 %7972 }
 0xe21   :  { %7889 = vmatpush1.bf16.msra.mxu1 %v7874_v44  ;;  %7978 = vst.msk [vmem:[#allocation3 + $0x8] sm:$0xff] %vm2806_vm3, %v7973_v2 }
 0xe22   :  { %7932 = vmatpush1.bf16.msra.mxu0 %v7876_v17  ;;  %8094 = vmatprep.subr.bf16.mxu1 %v8072_v34  ;;  %v8503_v17 = vld [vmem:[#allocation2 + $0x50] sm:$0xff]  ;;  %v8504_v34 = vld [vmem:[#allocation2 + $0x58] sm:$0xff] }
 0xe23   :  { %8137 = vmatprep.subr.bf16.mxu0 %v8074_v27  ;;  %v7975_v53 = vpop.permute.xlu0 %7974  ;;  %v10654_v27 = vpack.c.bf16 %v8504_v34, %v8503_v17 }
 0xe24   :  { %9903 = vmatmul.mubr.msk.bf16.vlgmr.msra.gmra.mrb[104].mxu1 %vm2806_vm3, %v7880_v51  ;;  %7979 = vst.msk [vmem:[#allocation3 + $0x28] sm:$0xff] %vm2806_vm3, %v7975_v53  ;;  %v7769_v5 = vpop.permute.xlu1 %7768 }
 0xe25   :  { %9904 = vmatmul.mubr.msk.bf16.vlgmr.msra.gmra.mrb[116].mxu0 %vm2806_vm3, %v7880_v51  ;;  %8095 = vmatpush1.bf16.msra.mxu1 %v8071_v58  ;;  %7774 = vst.msk [vmem:[#allocation3] sm:$0xff] %vm2806_vm3, %v7769_v5  ;;  %v8505_v51 = vld [vmem:[#allocation2 + $0x60] sm:$0xff]  ;;  %v8506_v58 = vld [vmem:[#allocation2 + $0x68] sm:$0xff] }
 0xe26   :  { %8096 = vmatprep.subr.bf16.mxu1 %v8076_v39  ;;  %8126 = vmatprep.mubr.bf16.mxu1 %v11201_v55  ;;  %v10658_v39 = vpack.c.bf16 %v8506_v58, %v8505_v51 }
 0xe27   :  { %8138 = vmatpush1.bf16.msra.mxu0 %v8073_v47  ;;  %8169 = vmatprep.mubr.bf16.mxu0 %v11201_v55  ;;  %v7771_v44 = vpop.permute.xlu0 %7770 }
 0xe28   :  { %8139 = vmatprep.subr.bf16.mxu0 %v8078_v6  ;;  %7775 = vst.msk [vmem:[#allocation3 + $0x20] sm:$0xff] %vm2806_vm3, %v7771_v44  ;;  %v8678_v47 = vld [vmem:[#allocation3 + $0x8] sm:$0xff]  ;;  %v8185_v4 = vpop.permute.xlu1 %8184 }
 0xe29   :  { %8097 = vmatpush1.bf16.msra.mxu1 %v8075_v42 }
 0xe2a   :  { %8098 = vmatprep.subr.bf16.mxu1 %v8080_v57  ;;  %v9910_v57 = vld [vmem:[%s15518_s5 + $0x28] sm:$0xff] }
 0xe2b   :  { %8140 = vmatpush1.bf16.msra.mxu0 %v8077_v56  ;;  %v8682_v6 = vld [vmem:[#allocation3 + $0x28] sm:$0xff] }
 0xe2c   :  { %8141 = vmatprep.subr.bf16.mxu0 %v8082_v62  ;;  %v14853_v42 = vpack.c.bf16 %v8682_v6, %v8678_v47  ;;  %v8677_v56 = vld [vmem:[#allocation3] sm:$0xff] }
 0xe2d   :  { %8099 = vmatpush1.bf16.msra.mxu1 %v8079_v46 }
 0xe2e   :  { %8306 = vmatprep.subr.bf16.mxu1 %v8289_v20  ;;  %v8187_v20 = vpop.permute.xlu0 %8186 }
 0xe2f   :  { %8142 = vmatpush1.bf16.msra.mxu0 %v8081_v25  ;;  %v8681_v62 = vld [vmem:[#allocation3 + $0x20] sm:$0xff]  ;;  %v8192_v25 = vsel %vm2776_vm4, %v8185_v4, %v8187_v20 }
 0xe30   :  { %9905 = vmatmul.mubr.msk.bf16.vlgmr.msra.gmra.mrb[108].mxu1 %vm2806_vm3, %v8090_v23  ;;  %8349 = vmatprep.subr.bf16.mxu0 %v8291_v48  ;;  %v14858_v46 = vpack.c.bf16 %v8681_v62, %v8677_v56  ;;  %8196 = vst.msk [vmem:[#allocation3 + $0x10] sm:$0xff] %vm2806_vm3, %v8192_v25 }
 0xe31   :  { %8307 = vmatpush1.bf16.msra.mxu1 %v8288_v7  ;;  %8338 = vmatprep.mubr.bf16.mxu1 %v11201_v55 }
 0xe32   :  { %8308 = vmatprep.subr.bf16.mxu1 %v8293_v0  ;;  %9906 = vmatmul.mubr.msk.bf16.vlgmr.msra.gmra.mrb[120].mxu0 %vm2806_vm3, %v8090_v23  ;;  %v8189_v23 = vpop.permute.xlu1 %8188  ;;  %v8191_v48 = vpop.permute.xlu0 %8190 }
 0xe33   :  { %8350 = vmatpush1.bf16.msra.mxu0 %v8290_v36  ;;  %8381 = vmatprep.mubr.bf16.mxu0 %v11201_v55  ;;  %v8497_v55 = vld [vmem:[#allocation2 + $0x20] sm:$0xff]  ;;  %v8193_v7 = vsel %vm2776_vm4, %v8189_v23, %v8191_v48 }
 0xe34   :  { %8351 = vmatprep.subr.bf16.mxu0 %v8295_v61  ;;  %v10642_v41 = vpack.c.bf16 %v8498_v37, %v8497_v55  ;;  %8197 = vst.msk [vmem:[#allocation3 + $0x30] sm:$0xff] %vm2806_vm3, %v8193_v7 }
 0xe35   :  { %8309 = vmatpush1.bf16.msra.mxu1 %v8292_v60 }
 0xe36   :  { %8310 = vmatprep.subr.bf16.mxu1 %v8297_v40  ;;  %v8395_v0 = vpop.permute.xlu1 %8394  ;;  %v8397_v36 = vpop.permute.xlu0 %8396 }
 0xe37   :  { %8352 = vmatpush1.bf16.msra.mxu0 %v8294_v24  ;;  %8400 = vst.msk [vmem:[#allocation3 + $0x18] sm:$0xff] %vm2806_vm3, %v8395_v0  ;;  %8401 = vst.msk [vmem:[#allocation3 + $0x38] sm:$0xff] %vm2806_vm3, %v8397_v36  ;;  %v8679_v1 = vld [vmem:[#allocation3 + $0x10] sm:$0xff]  ;;  %v9913_v24 = vld [vmem:[%s15518_s5 + $0x30] sm:$0xff] }
 0xe38   :  { %8353 = vmatprep.subr.bf16.mxu0 %v8299_v33  ;;  %v9914_v33 = vld [vmem:[%s15518_s5 + $0x38] sm:$0xff] }
 0xe39   :  { %8311 = vmatpush1.bf16.msra.mxu1 %v8296_v29 }
 0xe3a   :  { %10635 = vmatprep.subr.bf16.mxu1 %v10634_v63 }
 0xe3b   :  { %8354 = vmatpush1.bf16.msra.mxu0 %v8298_v35  ;;  %v8683_v45 = vld [vmem:[#allocation3 + $0x30] sm:$0xff] }
 0xe3c   :  { %9907 = vmatmul.mubr.msk.bf16.vlgmr.msra.gmra.mrb[112].mxu1 %vm2806_vm3, %v8302_v32  ;;  %10663 = vmatprep.subr.bf16.mxu0 %v10634_v63  ;;  %v14877_v29 = vpack.c.bf16 %v8683_v45, %v8679_v1 }
 0xe3d   :  { %10637 = vmatpush3.bf16.msra.mxu1 %v10634_v63  ;;  %10275 = vmatprep.mubr.msk.f32.mxu1 %vm3997_vm7, %v9909_v11 }
 0xe3e   :  { %9908 = vmatmul.mubr.msk.bf16.vlgmr.msra.gmra.mrb[124].mxu0 %vm2806_vm3, %v8302_v32  ;;  %10639 = vmatprep.subr.bf16.mxu1 %v10638_v31  ;;  %v8680_v61 = vld [vmem:[#allocation3 + $0x18] sm:$0xff] }
 0xe3f   :  { %10665 = vmatpush3.bf16.msra.mxu0 %v10634_v63  ;;  %v8684_v60 = vld [vmem:[#allocation3 + $0x38] sm:$0xff]  ;;  %10306 = vmatprep.mubr.msk.f32.mxu0 %vm3997_vm7, %v9913_v24 }
 0xe40   :  { %10667 = vmatprep.subr.bf16.mxu0 %v10638_v31  ;;  %v14869_v40 = vpack.c.bf16 %v8684_v60, %v8680_v61 }
 0xe41   :  { %10641 = vmatpush3.bf16.msra.mxu1 %v10638_v31 }
 0xe42   :  { %10643 = vmatprep.subr.bf16.mxu1 %v10642_v41 }
 0xe43   :  { %10669 = vmatpush3.bf16.msra.mxu0 %v10638_v31 }
 0xe44   :  { %10671 = vmatprep.subr.bf16.mxu0 %v10642_v41 }
 0xe45   :  { %10645 = vmatpush3.bf16.msra.mxu1 %v10642_v41 }
 0xe46   :  { %10647 = vmatprep.subr.bf16.mxu1 %v10646_v15 }
 0xe47   :  { %10673 = vmatpush3.bf16.msra.mxu0 %v10642_v41 }
 0xe48   :  { %10675 = vmatprep.subr.bf16.mxu0 %v10646_v15 }
 0xe49   :  { %10649 = vmatpush3.bf16.msra.mxu1 %v10646_v15 }
 0xe4a   :  { %10651 = vmatprep.subr.bf16.mxu1 %v10650_v50 }
 0xe4b   :  { %10677 = vmatpush3.bf16.msra.mxu0 %v10646_v15 }
 0xe4c   :  { %10679 = vmatprep.subr.bf16.mxu0 %v10650_v50 }
 0xe4d   :  { %10653 = vmatpush3.bf16.msra.mxu1 %v10650_v50 }
 0xe4e   :  { %10655 = vmatprep.subr.bf16.mxu1 %v10654_v27 }
 0xe4f   :  { %10681 = vmatpush3.bf16.msra.mxu0 %v10650_v50 }
 0xe50   :  { %10683 = vmatprep.subr.bf16.mxu0 %v10654_v27 }
 0xe51   :  { %10657 = vmatpush3.bf16.msra.mxu1 %v10654_v27 }
 0xe52   :  { %10659 = vmatprep.subr.bf16.mxu1 %v10658_v39 }
 0xe53   :  { %10685 = vmatpush3.bf16.msra.mxu0 %v10654_v27 }
 0xe54   :  { %10687 = vmatprep.subr.bf16.mxu0 %v10658_v39 }
 0xe55   :  { %10661 = vmatpush3.bf16.msra.mxu1 %v10658_v39 }
 0xe56   :  { %10691 = vmatprep.subr.bf16.mxu1 %v14853_v42 }
 0xe57   :  { %10689 = vmatpush3.bf16.msra.mxu0 %v10658_v39 }
 0xe58   :  { %10276 = vmatmul.mubr.msk.f32.vlgmr.msra.gmra.mrb[98].mxu1 %vm3997_vm7, %v9910_v57  ;;  %10735 = vmatprep.subr.bf16.mxu0 %v14869_v40 }
 0xe59   :  { %10693 = vmatpush1.bf16.msra.mxu1 %v14858_v46 }
 0xe5a   :  { %10307 = vmatmul.mubr.msk.f32.vlgmr.msra.gmra.mrb[102].mxu0 %vm3997_vm7, %v9914_v33  ;;  %vm9668_vm7 = vcmask 129024  }
 0xe5b   :  { %10737 = vmatpush1.bf16.msra.mxu0 %v14877_v29 }
 0xeeb   :  { %v7714_v63 = vpop.f32.mrb[100].mxu1  ;;  %v7757_v18 = vpop.f32.mrb[112].mxu0 }
 0xeec   :  { %7776 = vst.msk [vmem:[#allocation3 + $0x40] sm:$0xff] %vm2806_vm3, %v7714_v63  ;;  %7824 = vrot.lane.b32.xlu0 %v7757_v18, %s11202_s0  ;;  %v14885_v16 = vpop.f32.mrb[113].mxu0  ;;  %7780 = vrot.lane.b32.xlu1 %v7714_v63, %s11207_s15  ;;  %v7716_v35 = vpop.f32.mrb[101].mxu1 }
 0xeed   :  { %7852 = vst.msk [vmem:[#allocation3 + $0x240] sm:$0xff] %vm2806_vm3, %v14885_v16  ;;  %v7718_v32 = vpop.f32.mrb[102].mxu1  ;;  %v7761_v31 = vpop.f32.mrb[114].mxu0 }
 0xeee   :  { %7777 = vst.msk [vmem:[#allocation3 + $0x60] sm:$0xff] %vm2806_vm3, %v7718_v32  ;;  %v7720_v55 = vpop.f32.mrb[103].mxu1  ;;  %v14891_v37 = vpop.f32.mrb[115].mxu0 }
 0xeef   :  { %7853 = vst.msk [vmem:[#allocation3 + $0x260] sm:$0xff] %vm2806_vm3, %v14891_v37 }
 0xef0   :  { %7790 = vrot.lane.b32.xlu1 %v7714_v63, %s11203_s17  ;;  %7792 = vrot.lane.b32.xlu0 %v7716_v35, %s11203_s17 }
 0xef3   :  { %v8685_v34 = vld [vmem:[#allocation3 + $0x40] sm:$0xff] }
 0xef4   :  { %7836 = vrot.lane.b32.xlu1 %v7757_v18, %s11206_s26  ;;  %7782 = vrot.lane.b32.xlu0 %v7718_v32, %s11207_s15 }
 0xef5   :  { %v8689_v5 = vld [vmem:[#allocation3 + $0x60] sm:$0xff] }
 0xef6   :  { %v14928_v27 = vpack.c.bf16 %v8689_v5, %v8685_v34 }
 0xef7   :  { %v7918_v41 = vpop.f32.mrb[104].mxu1 }
 0xef8   :  { %7980 = vst.msk [vmem:[#allocation3 + $0x48] sm:$0xff] %vm2806_vm3, %v7918_v41  ;;  %v14900_v9 = vpop.f32.mrb[105].mxu1  ;;  %7844 = vrot.lane.b32.xlu1 %v7757_v18, %s11204_s30  ;;  %7828 = vrot.lane.b32.xlu0 %v7761_v31, %s11202_s0  ;;  %v14904_v28 = vpop.f32.mrb[116].mxu0 }
 0xef9   :  { %v14906_v15 = vpop.f32.mrb[106].mxu1  ;;  %v14908_v2 = vpop.f32.mrb[117].mxu0 }
 0xefa   :  { %7981 = vst.msk [vmem:[#allocation3 + $0x68] sm:$0xff] %vm2806_vm3, %v14906_v15  ;;  %8056 = vst.msk [vmem:[#allocation3 + $0x248] sm:$0xff] %vm2806_vm3, %v14908_v2  ;;  %v14914_v53 = vpop.f32.mrb[118].mxu0  ;;  %v14916_v26 = vpop.f32.mrb[107].mxu1 }
 0xefb   :  { %v14918_v38 = vpop.f32.mrb[119].mxu0 }
 0xefc   :  { %7804 = vrot.lane.b32.xlu1 %v7716_v35, %s11208_s27  ;;  %7838 = vrot.lane.b32.xlu0 %v7761_v31, %s11206_s26  ;;  %8057 = vst.msk [vmem:[#allocation3 + $0x268] sm:$0xff] %vm2806_vm3, %v14918_v38 }
 0xeff   :  { %v8686_v50 = vld [vmem:[#allocation3 + $0x48] sm:$0xff] }
 0xf00   :  { %7812 = vrot.lane.b32.xlu1 %v7716_v35, %s11205_s20  ;;  %7846 = vrot.lane.b32.xlu0 %v7761_v31, %s11204_s30 }
 0xf01   :  { %v8690_v44 = vld [vmem:[#allocation3 + $0x68] sm:$0xff] }
 0xf02   :  { %v14926_v17 = vpack.c.bf16 %v8690_v44, %v8686_v50 }
 0xf03   :  { %v8128_v51 = vpop.f32.mrb[108].mxu1 }
 0xf04   :  { %10695 = vmatprep.subr.bf16.mxu1 %v14926_v17  ;;  %7822 = vrot.lane.b32.xlu1 %v7716_v35, %s11202_s0  ;;  %8198 = vst.msk [vmem:[#allocation3 + $0x50] sm:$0xff] %vm2806_vm3, %v8128_v51  ;;  %v8130_v58 = vpop.f32.mrb[109].mxu1 }
 0xf05   :  { %7796 = vrot.lane.b32.xlu0 %v7720_v55, %s11203_s17  ;;  %10697 = vmatpush1.bf16.msra.mxu1 %v14928_v27  ;;  %v8132_v39 = vpop.f32.mrb[110].mxu1  ;;  %v14935_v11 = vpop.f32.mrb[120].mxu0 }
 0xf06   :  { %8199 = vst.msk [vmem:[#allocation3 + $0x70] sm:$0xff] %vm2806_vm3, %v8132_v39  ;;  %v8134_v47 = vpop.f32.mrb[111].mxu1  ;;  %v14938_v6 = vpop.f32.mrb[121].mxu0 }
 0xf07   :  { %8274 = vst.msk [vmem:[#allocation3 + $0x250] sm:$0xff] %vm2806_vm3, %v14938_v6  ;;  %v14942_v57 = vpop.f32.mrb[122].mxu0 }
 0xf08   :  { %7794 = vrot.lane.b32.xlu1 %v7718_v32, %s11203_s17  ;;  %v14945_v56 = vpop.f32.mrb[123].mxu0 }
 0xf09   :  { %7806 = vrot.lane.b32.xlu0 %v7720_v55, %s11208_s27  ;;  %8275 = vst.msk [vmem:[#allocation3 + $0x270] sm:$0xff] %vm2806_vm3, %v14945_v56 }
 0xf0b   :  { %v8687_v36 = vld [vmem:[#allocation3 + $0x50] sm:$0xff] }
 0xf0c   :  { %7826 = vrot.lane.b32.xlu1 %v7720_v55, %s11202_s0 }
 0xf0d   :  { %7814 = vrot.lane.b32.xlu0 %v7720_v55, %s11205_s20  ;;  %v8691_v61 = vld [vmem:[#allocation3 + $0x70] sm:$0xff] }
 0xf0e   :  { %v14983_v45 = vpack.c.bf16 %v8691_v61, %v8687_v36  ;;  %v9935_v61 = vld [vmem:[%s15521_s8 + $0x10] sm:$0xff] }
 0xf0f   :  { %v8340_v62 = vpop.f32.mrb[112].mxu1 }
 0xf10   :  { %7984 = vrot.lane.b32.xlu1 %v7918_v41, %s11207_s15  ;;  %8402 = vst.msk [vmem:[#allocation3 + $0x58] sm:$0xff] %vm2806_vm3, %v8340_v62  ;;  %v14954_v4 = vpop.f32.mrb[113].mxu1 }
 0xf11   :  { %8028 = vrot.lane.b32.xlu0 %v14904_v28, %s11202_s0  ;;  %v14958_v20 = vpop.f32.mrb[114].mxu1  ;;  %v14960_v25 = vpop.f32.mrb[124].mxu0 }
 0xf12   :  { %8403 = vst.msk [vmem:[#allocation3 + $0x78] sm:$0xff] %vm2806_vm3, %v14958_v20  ;;  %v14964_v23 = vpop.f32.mrb[125].mxu0  ;;  %v14966_v48 = vpop.f32.mrb[115].mxu1 }
 0xf13   :  { %8478 = vst.msk [vmem:[#allocation3 + $0x258] sm:$0xff] %vm2806_vm3, %v14964_v23  ;;  %v14970_v7 = vpop.f32.mrb[126].mxu0 }
 0xf14   :  { %7994 = vrot.lane.b32.xlu1 %v7918_v41, %s11203_s17  ;;  %v14973_v0 = vpop.f32.mrb[127].mxu0 }
 0xf15   :  { %7996 = vrot.lane.b32.xlu0 %v14900_v9, %s11203_s17  ;;  %8479 = vst.msk [vmem:[#allocation3 + $0x278] sm:$0xff] %vm2806_vm3, %v14973_v0 }
 0xf17   :  { %v8688_v60 = vld [vmem:[#allocation3 + $0x58] sm:$0xff] }
 0xf18   :  { %8040 = vrot.lane.b32.xlu1 %v14904_v28, %s11206_s26 }
 0xf19   :  { %7986 = vrot.lane.b32.xlu0 %v14906_v15, %s11207_s15  ;;  %v8692_v1 = vld [vmem:[#allocation3 + $0x78] sm:$0xff] }
 0xf1a   :  { %v14985_v24 = vpack.c.bf16 %v8692_v1, %v8688_v60 }
 0xf1c   :  { %8048 = vrot.lane.b32.xlu1 %v14904_v28, %s11204_s30  ;;  %10739 = vmatprep.subr.bf16.mxu0 %v14985_v24 }
 0xf1d   :  { %8032 = vrot.lane.b32.xlu0 %v14914_v53, %s11202_s0  ;;  %10741 = vmatpush1.bf16.msra.mxu0 %v14983_v45 }
 0xf20   :  { %8008 = vrot.lane.b32.xlu1 %v14900_v9, %s11208_s27 }
 0xf21   :  { %8042 = vrot.lane.b32.xlu0 %v14914_v53, %s11206_s26 }
 0xf24   :  { %8016 = vrot.lane.b32.xlu1 %v14900_v9, %s11205_s20 }
 0xf25   :  { %8050 = vrot.lane.b32.xlu0 %v14914_v53, %s11204_s30 }
 0xf28   :  { %8026 = vrot.lane.b32.xlu1 %v14900_v9, %s11202_s0 }
 0xf29   :  { %8000 = vrot.lane.b32.xlu0 %v14916_v26, %s11203_s17 }
 0xf2c   :  { %7998 = vrot.lane.b32.xlu1 %v14906_v15, %s11203_s17 }
 0xf2d   :  { %8010 = vrot.lane.b32.xlu0 %v14916_v26, %s11208_s27 }
 0xf30   :  { %8030 = vrot.lane.b32.xlu1 %v14916_v26, %s11202_s0 }
 0xf31   :  { %8018 = vrot.lane.b32.xlu0 %v14916_v26, %s11205_s20 }
 0xf34   :  { %8202 = vrot.lane.b32.xlu1 %v8128_v51, %s11207_s15 }
 0xf35   :  { %8246 = vrot.lane.b32.xlu0 %v14935_v11, %s11202_s0 }
 0xf38   :  { %8212 = vrot.lane.b32.xlu1 %v8128_v51, %s11203_s17 }
 0xf39   :  { %8214 = vrot.lane.b32.xlu0 %v8130_v58, %s11203_s17 }
 0xf3c   :  { %8226 = vrot.lane.b32.xlu1 %v8130_v58, %s11208_s27 }
 0xf3d   :  { %8204 = vrot.lane.b32.xlu0 %v8132_v39, %s11207_s15 }
 0xf40   :  { %8234 = vrot.lane.b32.xlu1 %v8130_v58, %s11205_s20 }
 0xf41   :  { %8250 = vrot.lane.b32.xlu0 %v14942_v57, %s11202_s0 }
 0xf44   :  { %8244 = vrot.lane.b32.xlu1 %v8130_v58, %s11202_s0 }
 0xf45   :  { %8218 = vrot.lane.b32.xlu0 %v8134_v47, %s11203_s17 }
 0xf48   :  { %8216 = vrot.lane.b32.xlu1 %v8132_v39, %s11203_s17 }
 0xf49   :  { %8228 = vrot.lane.b32.xlu0 %v8134_v47, %s11208_s27 }
 0xf4c   :  { %8248 = vrot.lane.b32.xlu1 %v8134_v47, %s11202_s0 }
 0xf4d   :  { %8236 = vrot.lane.b32.xlu0 %v8134_v47, %s11205_s20 }
 0xf50   :  { %8406 = vrot.lane.b32.xlu1 %v8340_v62, %s11207_s15 }
 0xf51   :  { %8450 = vrot.lane.b32.xlu0 %v14960_v25, %s11202_s0 }
 0xf54   :  { %8416 = vrot.lane.b32.xlu1 %v8340_v62, %s11203_s17 }
 0xf55   :  { %8418 = vrot.lane.b32.xlu0 %v14954_v4, %s11203_s17 }
 0xf58   :  { %8462 = vrot.lane.b32.xlu1 %v14960_v25, %s11206_s26 }
 0xf59   :  { %8408 = vrot.lane.b32.xlu0 %v14958_v20, %s11207_s15 }
 0xf5c   :  { %8430 = vrot.lane.b32.xlu1 %v14954_v4, %s11208_s27 }
 0xf5d   :  { %8260 = vrot.lane.b32.xlu0 %v14942_v57, %s11206_s26 }
 0xf5e   :  { %v7825_v33 = vpop.permute.xlu0 %7824  ;;  %v7781_v63 = vpop.permute.xlu1 %7780 }
 0xf5f   :  { %7786 = vst.msk [vmem:[#allocation3 + $0x80] sm:$0xff] %vm2806_vm3, %v7781_v63 }
 0xf60   :  { %8438 = vrot.lane.b32.xlu1 %v14954_v4, %s11205_s20 }
 0xf61   :  { %8454 = vrot.lane.b32.xlu0 %v14970_v7, %s11202_s0 }
 0xf62   :  { %v7791_v18 = vpop.permute.xlu1 %7790  ;;  %v7793_v35 = vpop.permute.xlu0 %7792 }
 0xf63   :  { %v7798_v32 = vsel %vm2791_vm2, %v7791_v18, %v7793_v35  ;;  %v9936_v35 = vld [vmem:[%s15521_s8 + $0x18] sm:$0xff] }
 0xf64   :  { %7802 = vst.msk [vmem:[#allocation3 + $0xc0] sm:$0xff] %vm2806_vm3, %v7798_v32  ;;  %8448 = vrot.lane.b32.xlu1 %v14954_v4, %s11202_s0  ;;  %v9934_v32 = vld [vmem:[%s15519_s6 + $0x18] sm:$0xff] }
 0xf65   :  { %8464 = vrot.lane.b32.xlu0 %v14970_v7, %s11206_s26 }
 0xf66   :  { %v7837_v31 = vpop.permute.xlu1 %7836  ;;  %v7783_v55 = vpop.permute.xlu0 %7782  ;;  %v8693_v1 = vld [vmem:[#allocation3 + $0x80] sm:$0xff] }
 0xf67   :  { %7842 = vst.msk [vmem:[#allocation3 + $0x1c0] sm:$0xff] %vm2806_vm3, %v7837_v31  ;;  %7787 = vst.msk [vmem:[#allocation3 + $0xa0] sm:$0xff] %vm2806_vm3, %v7783_v55 }
 0xf68   :  { %8420 = vrot.lane.b32.xlu1 %v14958_v20, %s11203_s17 }
 0xf69   :  { %8422 = vrot.lane.b32.xlu0 %v14966_v48, %s11203_s17 }
 0xf6a   :  { %v7845_v41 = vpop.permute.xlu1 %7844  ;;  %v7829_v9 = vpop.permute.xlu0 %7828 }
 0xf6b   :  { %7850 = vst.msk [vmem:[#allocation3 + $0x200] sm:$0xff] %vm2806_vm3, %v7845_v41 }
 0xf6c   :  { %8258 = vrot.lane.b32.xlu1 %v14935_v11, %s11206_s26 }
 0xf6d   :  { %8432 = vrot.lane.b32.xlu0 %v14966_v48, %s11208_s27 }
 0xf6e   :  { %v7805_v28 = vpop.permute.xlu1 %7804  ;;  %v7839_v15 = vpop.permute.xlu0 %7838 }
 0xf6f   :  { %7810 = vst.msk [vmem:[#allocation3 + $0x100] sm:$0xff] %vm2806_vm3, %v7805_v28  ;;  %7843 = vst.msk [vmem:[#allocation3 + $0x1e0] sm:$0xff] %vm2806_vm3, %v7839_v15 }
 0xf70   :  { %8470 = vrot.lane.b32.xlu1 %v14960_v25, %s11204_s30 }
 0xf71   :  { %8440 = vrot.lane.b32.xlu0 %v14966_v48, %s11205_s20 }
 0xf72   :  { %v7813_v53 = vpop.permute.xlu1 %7812  ;;  %v7847_v26 = vpop.permute.xlu0 %7846 }
 0xf73   :  { %7818 = vst.msk [vmem:[#allocation3 + $0x140] sm:$0xff] %vm2806_vm3, %v7813_v53  ;;  %7851 = vst.msk [vmem:[#allocation3 + $0x220] sm:$0xff] %vm2806_vm3, %v7847_v26 }
 0xf74   :  { %8452 = vrot.lane.b32.xlu1 %v14966_v48, %s11202_s0  ;;  %v9933_v48 = vld [vmem:[%s15519_s6 + $0x10] sm:$0xff] }
 0xf75   :  { %8472 = vrot.lane.b32.xlu0 %v14970_v7, %s11204_s30  ;;  %v8697_v7 = vld [vmem:[#allocation3 + $0xa0] sm:$0xff] }
 0xf76   :  { %v7823_v50 = vpop.permute.xlu1 %7822 }
 0xf77   :  { %v7830_v5 = vsel %vm2776_vm4, %v7823_v50, %v7825_v33  ;;  %v7797_v44 = vpop.permute.xlu0 %7796  ;;  %v15126_v33 = vpack.c.bf16 %v8697_v7, %v8693_v1 }
 0xf78   :  { %7834 = vst.msk [vmem:[#allocation3 + $0x180] sm:$0xff] %vm2806_vm3, %v7830_v5  ;;  %8266 = vrot.lane.b32.xlu1 %v14935_v11, %s11204_s30 }
 0xf79   :  { %8268 = vrot.lane.b32.xlu0 %v14942_v57, %s11204_s30  ;;  %v9918_v57 = vld [vmem:[%s15520_s7 + $0x48] sm:$0xff] }
 0xf7a   :  { %v7795_v34 = vpop.permute.xlu1 %7794  ;;  %9921 = vmatprep.mubr.msk.f32.mxu1 %vm2806_vm3, %v9918_v57  ;;  %9923 = vmatprep.mubr.msk.f32.mxu0 %vm2806_vm3, %v9918_v57 }
 0xf7b   :  { %v7799_v51 = vsel %vm2791_vm2, %v7795_v34, %v7797_v44  ;;  %v7807_v58 = vpop.permute.xlu0 %7806 }
 0xf7c   :  { %7803 = vst.msk [vmem:[#allocation3 + $0xe0] sm:$0xff] %vm2806_vm3, %v7799_v51  ;;  %7811 = vst.msk [vmem:[#allocation3 + $0x120] sm:$0xff] %vm2806_vm3, %v7807_v58  ;;  %8060 = vrot.lane.b32.xlu1 %v14908_v2, %s11207_s15  ;;  %v8701_v51 = vld [vmem:[#allocation3 + $0xc0] sm:$0xff] }
 0xf7d   :  { %8062 = vrot.lane.b32.xlu0 %v14918_v38, %s11207_s15 }
 0xf7e   :  { %v7827_v39 = vpop.permute.xlu1 %7826 }
 0xf7f   :  { %v7831_v11 = vsel %vm2776_vm4, %v7827_v39, %v7829_v9  ;;  %v7815_v47 = vpop.permute.xlu0 %7814 }
 0xf80   :  { %7835 = vst.msk [vmem:[#allocation3 + $0x1a0] sm:$0xff] %vm2806_vm3, %v7831_v11  ;;  %7819 = vst.msk [vmem:[#allocation3 + $0x160] sm:$0xff] %vm2806_vm3, %v7815_v47  ;;  %7856 = vrot.lane.b32.xlu1 %v14885_v16, %s11207_s15 }
 0xf81   :  { %7858 = vrot.lane.b32.xlu0 %v14891_v37, %s11207_s15 }
 0xf82   :  { %v7985_v2 = vpop.permute.xlu1 %7984 }
 0xf83   :  { %v8029_v38 = vpop.permute.xlu0 %8028  ;;  %7990 = vst.msk [vmem:[#allocation3 + $0x88] sm:$0xff] %vm2806_vm3, %v7985_v2  ;;  %v8705_v50 = vld [vmem:[#allocation3 + $0xe0] sm:$0xff] }
 0xf84   :  { %8482 = vrot.lane.b32.xlu1 %v14964_v23, %s11207_s15  ;;  %v15161_v58 = vpack.c.bf16 %v8705_v50, %v8701_v51  ;;  %v15197_v50 = vpop.f32.mrb[98].mxu1 }
 0xf85   :  { %8484 = vrot.lane.b32.xlu0 %v14973_v0, %s11207_s15  ;;  %v15201_v51 = vpop.f32.mrb[99].mxu1 }
 0xf86   :  { %v7995_v62 = vpop.permute.xlu1 %7994 }
 0xf87   :  { %v7997_v4 = vpop.permute.xlu0 %7996 }
 0xf88   :  { %v8002_v16 = vsel %vm2791_vm2, %v7995_v62, %v7997_v4  ;;  %8278 = vrot.lane.b32.xlu1 %v14938_v6, %s11207_s15 }
 0xf89   :  { %8006 = vst.msk [vmem:[#allocation3 + $0xc8] sm:$0xff] %vm2806_vm3, %v8002_v16  ;;  %8280 = vrot.lane.b32.xlu0 %v14945_v56, %s11207_s15 }
 0xf8a   :  { %v8041_v37 = vpop.permute.xlu1 %8040  ;;  %v8694_v0 = vld [vmem:[#allocation3 + $0x88] sm:$0xff] }
 0xf8b   :  { %8046 = vst.msk [vmem:[#allocation3 + $0x1c8] sm:$0xff] %vm2806_vm3, %v8041_v37  ;;  %v7987_v20 = vpop.permute.xlu0 %7986 }
 0xf8c   :  { %7991 = vst.msk [vmem:[#allocation3 + $0xa8] sm:$0xff] %vm2806_vm3, %v7987_v20  ;;  %9105 = vperm.xlu1 %11194, %v9933_v48   ;;  %v8721_v20 = vld [vmem:[#allocation3 + $0x160] sm:$0xff] }
 0xf8d   :  { %9110 = vperm.xlu0 %11195, %v9934_v32   ;;  %v8717_v48 = vld [vmem:[#allocation3 + $0x140] sm:$0xff] }
 0xf8e   :  { %v8049_v25 = vpop.permute.xlu1 %8048 }
 0xf8f   :  { %8054 = vst.msk [vmem:[#allocation3 + $0x208] sm:$0xff] %vm2806_vm3, %v8049_v25  ;;  %v8033_v23 = vpop.permute.xlu0 %8032 }
 0xf90   :  { %9140 = vperm.xlu1 %11194, %v9935_v61   ;;  %v10308_v61 = vpop.f32.mrb[102].mxu0 }
 0xf91   :  { %9117 = vrot.lane.b32.xlu0 %v14436_v3, %s11205_s20 }
 0xf92   :  { %v8009_v6 = vpop.permute.xlu1 %8008  ;;  %v8734_v32 = vld [vmem:[#allocation3 + $0x1c8] sm:$0xff] }
 0xf93   :  { %8014 = vst.msk [vmem:[#allocation3 + $0x108] sm:$0xff] %vm2806_vm3, %v8009_v6  ;;  %v8043_v56 = vpop.permute.xlu0 %8042  ;;  %v8698_v36 = vld [vmem:[#allocation3 + $0xa8] sm:$0xff]  ;;  %v15178_v6 = vpack.c.bf16 %v8721_v20, %v8717_v48 }
 0xf94   :  { %8047 = vst.msk [vmem:[#allocation3 + $0x1e8] sm:$0xff] %vm2806_vm3, %v8043_v56  ;;  %v15124_v60 = vpack.c.bf16 %v8698_v36, %v8694_v0  ;;  %9145 = vperm.xlu1 %11194, %v9936_v35   ;;  %v8729_v36 = vld [vmem:[#allocation3 + $0x1a0] sm:$0xff] }
 0xf95   :  { %9150 = vrot.lane.b32.xlu0 %v14402_v21, %s11205_s20  ;;  %v8702_v21 = vld [vmem:[#allocation3 + $0xc8] sm:$0xff] }
 0xf96   :  { %10699 = vmatprep.subr.bf16.mxu1 %v15124_v60  ;;  %v8017_v63 = vpop.permute.xlu1 %8016 }
 0xf97   :  { %8022 = vst.msk [vmem:[#allocation3 + $0x148] sm:$0xff] %vm2806_vm3, %v8017_v63  ;;  %v8051_v18 = vpop.permute.xlu0 %8050  ;;  %10701 = vmatpush1.bf16.msra.mxu1 %v15126_v33 }
 0xf98   :  { %8055 = vst.msk [vmem:[#allocation3 + $0x228] sm:$0xff] %vm2806_vm3, %v8051_v18  ;;  %9119 = vrot.lane.b32.xlu1 %v14444_v14, %s11205_s20  ;;  %v8725_v18 = vld [vmem:[#allocation3 + $0x180] sm:$0xff] }
 0xf99   :  { %9172 = vrot.lane.b32.xlu0 %v14413_v10, %s11205_s20  ;;  %v8713_v10 = vld [vmem:[#allocation3 + $0x120] sm:$0xff]  ;;  %v15186_v35 = vpack.c.bf16 %v8729_v36, %v8725_v18 }
 0xf9a   :  { %v8027_v31 = vpop.permute.xlu1 %8026  ;;  %v8710_v39 = vld [vmem:[#allocation3 + $0x108] sm:$0xff] }
 0xf9b   :  { %v8034_v55 = vsel %vm2776_vm4, %v8027_v31, %v8029_v38  ;;  %v8001_v41 = vpop.permute.xlu0 %8000  ;;  %v8709_v38 = vld [vmem:[#allocation3 + $0x100] sm:$0xff]  ;;  %v8738_v63 = vld [vmem:[#allocation3 + $0x1e8] sm:$0xff]  ;;  %v8663_v31 = vpop.f32.mrb[103].mxu0 }
 0xf9c   :  { %8038 = vst.msk [vmem:[#allocation3 + $0x188] sm:$0xff] %vm2806_vm3, %v8034_v55  ;;  %9152 = vrot.lane.b32.xlu1 %v14398_v49, %s11205_s20  ;;  %v15170_v62 = vpack.c.bf16 %v8713_v10, %v8709_v38  ;;  %v8754_v10 = vld [vmem:[#allocation3 + $0x268] sm:$0xff] }
 0xf9d   :  { %9095 = vrot.lane.b32.xlu0 %v8663_v31, %s11206_s26 }
 0xf9e   :  { %v7999_v9 = vpop.permute.xlu1 %7998  ;;  %v8718_v4 = vld [vmem:[#allocation3 + $0x148] sm:$0xff] }
 0xf9f   :  { %v8003_v28 = vsel %vm2791_vm2, %v7999_v9, %v8001_v41  ;;  %v8011_v15 = vpop.permute.xlu0 %8010  ;;  %v15188_v41 = vpack.c.bf16 %v8738_v63, %v8734_v32  ;;  %v8737_v9 = vld [vmem:[#allocation3 + $0x1e0] sm:$0xff] }
 0xfa0   :  { %8007 = vst.msk [vmem:[#allocation3 + $0xe8] sm:$0xff] %vm2806_vm3, %v8003_v28  ;;  %8015 = vst.msk [vmem:[#allocation3 + $0x128] sm:$0xff] %vm2806_vm3, %v8011_v15  ;;  %9174 = vrot.lane.b32.xlu1 %v14408_v19, %s11205_s20 }
 0xfa2   :  { %v8031_v53 = vpop.permute.xlu1 %8030 }
 0xfa3   :  { %v8035_v14 = vsel %vm2776_vm4, %v8031_v53, %v8033_v23  ;;  %v8019_v26 = vpop.permute.xlu0 %8018  ;;  %v8726_v7 = vld [vmem:[#allocation3 + $0x188] sm:$0xff] }
 0xfa4   :  { %8039 = vst.msk [vmem:[#allocation3 + $0x1a8] sm:$0xff] %vm2806_vm3, %v8035_v14  ;;  %8023 = vst.msk [vmem:[#allocation3 + $0x168] sm:$0xff] %vm2806_vm3, %v8019_v26  ;;  %9097 = vrot.lane.b32.xlu1 %v10308_v61, %s11206_s26  ;;  %v8746_v53 = vld [vmem:[#allocation3 + $0x228] sm:$0xff]  ;;  %v8733_v14 = vld [vmem:[#allocation3 + $0x1c0] sm:$0xff] }
 0xfa5   :  { %v15195_v26 = vpack.c.bf16 %v8737_v9, %v8733_v14 }
 0xfa6   :  { %v8203_v3 = vpop.permute.xlu1 %8202 }
 0xfa7   :  { %v8247_v49 = vpop.permute.xlu0 %8246  ;;  %8208 = vst.msk [vmem:[#allocation3 + $0x90] sm:$0xff] %vm2806_vm3, %v8203_v3  ;;  %v8706_v5 = vld [vmem:[#allocation3 + $0xe8] sm:$0xff] }
 0xfa8   :  { %v8714_v44 = vld [vmem:[#allocation3 + $0x128] sm:$0xff]  ;;  %v15159_v34 = vpack.c.bf16 %v8706_v5, %v8702_v21 }
 0xfa9   :  { %v15164_v11 = vpack.c.bf16 %v8714_v44, %v8710_v39  ;;  %v8742_v3 = vld [vmem:[#allocation3 + $0x208] sm:$0xff]  ;;  %v8745_v44 = vld [vmem:[#allocation3 + $0x220] sm:$0xff] }
 0xfaa   :  { %10703 = vmatprep.subr.bf16.mxu1 %v15159_v34  ;;  %v8213_v19 = vpop.permute.xlu1 %8212  ;;  %v15199_v5 = vpack.c.bf16 %v8746_v53, %v8742_v3 }
 0xfab   :  { %v8215_v47 = vpop.permute.xlu0 %8214  ;;  %10705 = vmatpush1.bf16.msra.mxu1 %v15161_v58  ;;  %v8722_v57 = vld [vmem:[#allocation3 + $0x168] sm:$0xff] }
 0xfac   :  { %v8220_v2 = vsel %vm2791_vm2, %v8213_v19, %v8215_v47  ;;  %10707 = vmatprep.subr.bf16.mxu1 %v15164_v11  ;;  %v15172_v37 = vpack.c.bf16 %v8722_v57, %v8718_v4  ;;  %v8730_v23 = vld [vmem:[#allocation3 + $0x1a8] sm:$0xff]  ;;  %v8741_v47 = vld [vmem:[#allocation3 + $0x200] sm:$0xff] }
 0xfad   :  { %8224 = vst.msk [vmem:[#allocation3 + $0xd0] sm:$0xff] %vm2806_vm3, %v8220_v2  ;;  %v15180_v0 = vpack.c.bf16 %v8730_v23, %v8726_v7  ;;  %v8750_v19 = vld [vmem:[#allocation3 + $0x248] sm:$0xff]  ;;  %v15208_v57 = vpack.c.bf16 %v8745_v44, %v8741_v47  ;;  %v8753_v4 = vld [vmem:[#allocation3 + $0x260] sm:$0xff] }
 0xfae   :  { %v8227_v16 = vpop.permute.xlu1 %8226  ;;  %v15210_v38 = vpack.c.bf16 %v8754_v10, %v8750_v19  ;;  %v8695_v14 = vld [vmem:[#allocation3 + $0x90] sm:$0xff] }
 0xfaf   :  { %8232 = vst.msk [vmem:[#allocation3 + $0x110] sm:$0xff] %vm2806_vm3, %v8227_v16  ;;  %v8205_v25 = vpop.permute.xlu0 %8204  ;;  %10709 = vmatpush1.bf16.msra.mxu1 %v15170_v62 }
 0xfb0   :  { %8209 = vst.msk [vmem:[#allocation3 + $0xb0] sm:$0xff] %vm2806_vm3, %v8205_v25  ;;  %10711 = vmatprep.subr.bf16.mxu1 %v15172_v37  ;;  %v8749_v25 = vld [vmem:[#allocation3 + $0x240] sm:$0xff] }
 0xfb1   :  { %v15217_v23 = vpack.c.bf16 %v8753_v4, %v8749_v25 }
 0xfb2   :  { %v8235_v56 = vpop.permute.xlu1 %8234 }
 0xfb3   :  { %8240 = vst.msk [vmem:[#allocation3 + $0x150] sm:$0xff] %vm2806_vm3, %v8235_v56  ;;  %v8251_v1 = vpop.permute.xlu0 %8250  ;;  %10713 = vmatpush1.bf16.msra.mxu1 %v15178_v6 }
 0xfb4   :  { %10715 = vmatprep.subr.bf16.mxu1 %v15180_v0 }
 0xfb6   :  { %v8245_v55 = vpop.permute.xlu1 %8244 }
 0xfb7   :  { %v8252_v28 = vsel %vm2776_vm4, %v8245_v55, %v8247_v49  ;;  %v8219_v15 = vpop.permute.xlu0 %8218  ;;  %10717 = vmatpush1.bf16.msra.mxu1 %v15186_v35  ;;  %v8699_v55 = vld [vmem:[#allocation3 + $0xb0] sm:$0xff] }
 0xfb8   :  { %8256 = vst.msk [vmem:[#allocation3 + $0x190] sm:$0xff] %vm2806_vm3, %v8252_v28  ;;  %10719 = vmatprep.subr.bf16.mxu1 %v15188_v41  ;;  %v15230_v3 = vpack.c.bf16 %v8699_v55, %v8695_v14 }
 0xfba   :  { %v8217_v21 = vpop.permute.xlu1 %8216 }
 0xfbb   :  { %v8221_v49 = vsel %vm2791_vm2, %v8217_v21, %v8219_v15  ;;  %v8229_v39 = vpop.permute.xlu0 %8228  ;;  %10721 = vmatpush1.bf16.msra.mxu1 %v15195_v26 }
 0xfbc   :  { %8225 = vst.msk [vmem:[#allocation3 + $0xf0] sm:$0xff] %vm2806_vm3, %v8221_v49  ;;  %8233 = vst.msk [vmem:[#allocation3 + $0x130] sm:$0xff] %vm2806_vm3, %v8229_v39  ;;  %10723 = vmatprep.subr.bf16.mxu1 %v15199_v5 }
 0xfbe   :  { %v8249_v2 = vpop.permute.xlu1 %8248 }
 0xfbf   :  { %v8253_v16 = vsel %vm2776_vm4, %v8249_v2, %v8251_v1  ;;  %v8237_v20 = vpop.permute.xlu0 %8236  ;;  %10725 = vmatpush1.bf16.msra.mxu1 %v15208_v57 }
 0xfc0   :  { %8257 = vst.msk [vmem:[#allocation3 + $0x1b0] sm:$0xff] %vm2806_vm3, %v8253_v16  ;;  %8241 = vst.msk [vmem:[#allocation3 + $0x170] sm:$0xff] %vm2806_vm3, %v8237_v20  ;;  %10727 = vmatprep.subr.bf16.mxu1 %v15210_v38 }
 0xfc2   :  { %v8407_v48 = vpop.permute.xlu1 %8406 }
 0xfc3   :  { %v8451_v7 = vpop.permute.xlu0 %8450  ;;  %8412 = vst.msk [vmem:[#allocation3 + $0x98] sm:$0xff] %vm2806_vm3, %v8407_v48  ;;  %10729 = vmatpush1.bf16.msra.mxu1 %v15217_v23  ;;  %v8707_v20 = vld [vmem:[#allocation3 + $0xf0] sm:$0xff] }
 0xfc6   :  { %v8417_v56 = vpop.permute.xlu1 %8416 }
 0xfc7   :  { %v8419_v36 = vpop.permute.xlu0 %8418 }
 0xfc8   :  { %v8424_v61 = vsel %vm2791_vm2, %v8417_v56, %v8419_v36  ;;  %v8703_v56 = vld [vmem:[#allocation3 + $0xd0] sm:$0xff] }
 0xfc9   :  { %8428 = vst.msk [vmem:[#allocation3 + $0xd8] sm:$0xff] %vm2806_vm3, %v8424_v61  ;;  %v15245_v61 = vpack.c.bf16 %v8707_v20, %v8703_v56  ;;  %v8731_v20 = vld [vmem:[#allocation3 + $0x1b0] sm:$0xff] }
 0xfca   :  { %v8463_v1 = vpop.permute.xlu1 %8462  ;;  %v8696_v28 = vld [vmem:[#allocation3 + $0x98] sm:$0xff]  ;;  %v8727_v56 = vld [vmem:[#allocation3 + $0x190] sm:$0xff] }
 0xfcb   :  { %8468 = vst.msk [vmem:[#allocation3 + $0x1d8] sm:$0xff] %vm2806_vm3, %v8463_v1  ;;  %v8409_v63 = vpop.permute.xlu0 %8408 }
 0xfcc   :  { %8413 = vst.msk [vmem:[#allocation3 + $0xb8] sm:$0xff] %vm2806_vm3, %v8409_v63 }
 0xfce   :  { %v8431_v18 = vpop.permute.xlu1 %8430 }
 0xfcf   :  { %8436 = vst.msk [vmem:[#allocation3 + $0x118] sm:$0xff] %vm2806_vm3, %v8431_v18  ;;  %v8261_v32 = vpop.permute.xlu0 %8260 }
 0xfd0   :  { %8265 = vst.msk [vmem:[#allocation3 + $0x1f0] sm:$0xff] %vm2806_vm3, %v8261_v32  ;;  %v8704_v25 = vld [vmem:[#allocation3 + $0xd8] sm:$0xff] }
 0xfd2   :  { %v8439_v31 = vpop.permute.xlu1 %8438 }
 0xfd3   :  { %8444 = vst.msk [vmem:[#allocation3 + $0x158] sm:$0xff] %vm2806_vm3, %v8439_v31  ;;  %v8455_v9 = vpop.permute.xlu0 %8454  ;;  %v8700_v15 = vld [vmem:[#allocation3 + $0xb8] sm:$0xff]  ;;  %v8715_v31 = vld [vmem:[#allocation3 + $0x130] sm:$0xff] }
 0xfd4   :  { %v15228_v53 = vpack.c.bf16 %v8700_v15, %v8696_v28  ;;  %v8711_v28 = vld [vmem:[#allocation3 + $0x110] sm:$0xff] }
 0xfd5   :  { %v15255_v14 = vpack.c.bf16 %v8715_v31, %v8711_v28 }
 0xfd6   :  { %10743 = vmatprep.subr.bf16.mxu0 %v15228_v53  ;;  %v8449_v21 = vpop.permute.xlu1 %8448  ;;  %v8712_v18 = vld [vmem:[#allocation3 + $0x118] sm:$0xff] }
 0xfd7   :  { %v8456_v44 = vsel %vm2776_vm4, %v8449_v21, %v8451_v7  ;;  %v8465_v49 = vpop.permute.xlu0 %8464  ;;  %10745 = vmatpush1.bf16.msra.mxu0 %v15230_v3 }
 0xfd8   :  { %8460 = vst.msk [vmem:[#allocation3 + $0x198] sm:$0xff] %vm2806_vm3, %v8456_v44  ;;  %8469 = vst.msk [vmem:[#allocation3 + $0x1f8] sm:$0xff] %vm2806_vm3, %v8465_v49  ;;  %v8723_v49 = vld [vmem:[#allocation3 + $0x170] sm:$0xff] }
 0xfda   :  { %v8421_v39 = vpop.permute.xlu1 %8420  ;;  %v8720_v21 = vld [vmem:[#allocation3 + $0x158] sm:$0xff] }
 0xfdb   :  { %v8423_v19 = vpop.permute.xlu0 %8422 }
 0xfdc   :  { %v8425_v10 = vsel %vm2791_vm2, %v8421_v39, %v8423_v19  ;;  %v8719_v19 = vld [vmem:[#allocation3 + $0x150] sm:$0xff] }
 0xfdd   :  { %8429 = vst.msk [vmem:[#allocation3 + $0xf8] sm:$0xff] %vm2806_vm3, %v8425_v10 }
 0xfde   :  { %v8259_v47 = vpop.permute.xlu1 %8258 }
 0xfdf   :  { %8264 = vst.msk [vmem:[#allocation3 + $0x1d0] sm:$0xff] %vm2806_vm3, %v8259_v47  ;;  %v8433_v2 = vpop.permute.xlu0 %8432  ;;  %v15263_v47 = vpack.c.bf16 %v8723_v49, %v8719_v19 }
 0xfe0   :  { %8437 = vst.msk [vmem:[#allocation3 + $0x138] sm:$0xff] %vm2806_vm3, %v8433_v2 }
 0xfe2   :  { %v8471_v4 = vpop.permute.xlu1 %8470 }
 0xfe3   :  { %8476 = vst.msk [vmem:[#allocation3 + $0x218] sm:$0xff] %vm2806_vm3, %v8471_v4  ;;  %v8441_v16 = vpop.permute.xlu0 %8440  ;;  %v8728_v4 = vld [vmem:[#allocation3 + $0x198] sm:$0xff] }
 0xfe4   :  { %8445 = vst.msk [vmem:[#allocation3 + $0x178] sm:$0xff] %vm2806_vm3, %v8441_v16  ;;  %v8708_v48 = vld [vmem:[#allocation3 + $0xf8] sm:$0xff] }
 0xfe5   :  { %v15243_v7 = vpack.c.bf16 %v8708_v48, %v8704_v25  ;;  %v8740_v48 = vld [vmem:[#allocation3 + $0x1f8] sm:$0xff] }
 0xfe6   :  { %v8453_v36 = vpop.permute.xlu1 %8452  ;;  %v8735_v31 = vld [vmem:[#allocation3 + $0x1d0] sm:$0xff] }
 0xfe7   :  { %v8457_v1 = vsel %vm2776_vm4, %v8453_v36, %v8455_v9  ;;  %10747 = vmatprep.subr.bf16.mxu0 %v15243_v7  ;;  %v8473_v63 = vpop.permute.xlu0 %8472  ;;  %v8716_v32 = vld [vmem:[#allocation3 + $0x138] sm:$0xff] }
 0xfe8   :  { %8461 = vst.msk [vmem:[#allocation3 + $0x1b8] sm:$0xff] %vm2806_vm3, %v8457_v1  ;;  %8477 = vst.msk [vmem:[#allocation3 + $0x238] sm:$0xff] %vm2806_vm3, %v8473_v63  ;;  %10749 = vmatpush1.bf16.msra.mxu0 %v15245_v61  ;;  %v15252_v55 = vpack.c.bf16 %v8716_v32, %v8712_v18  ;;  %v15271_v1 = vpack.c.bf16 %v8731_v20, %v8727_v56  ;;  %v8736_v63 = vld [vmem:[#allocation3 + $0x1d8] sm:$0xff] }
 0xfe9   :  { %v15274_v32 = vpack.c.bf16 %v8740_v48, %v8736_v63  ;;  %v8752_v48 = vld [vmem:[#allocation3 + $0x258] sm:$0xff] }
 0xfea   :  { %10751 = vmatprep.subr.bf16.mxu0 %v15252_v55  ;;  %v8267_v15 = vpop.permute.xlu1 %8266  ;;  %v8756_v56 = vld [vmem:[#allocation3 + $0x278] sm:$0xff] }
 0xfeb   :  { %8272 = vst.msk [vmem:[#allocation3 + $0x210] sm:$0xff] %vm2806_vm3, %v8267_v15  ;;  %v8269_v9 = vpop.permute.xlu0 %8268  ;;  %v8724_v44 = vld [vmem:[#allocation3 + $0x178] sm:$0xff]  ;;  %v8739_v15 = vld [vmem:[#allocation3 + $0x1f0] sm:$0xff] }
 0xfec   :  { %8273 = vst.msk [vmem:[#allocation3 + $0x230] sm:$0xff] %vm2806_vm3, %v8269_v9  ;;  %10753 = vmatpush1.bf16.msra.mxu0 %v15255_v14  ;;  %v15260_v39 = vpack.c.bf16 %v8724_v44, %v8720_v21  ;;  %v15279_v21 = vpack.c.bf16 %v8739_v15, %v8735_v31  ;;  %v8744_v44 = vld [vmem:[#allocation3 + $0x218] sm:$0xff] }
 0xfee   :  { %10755 = vmatprep.subr.bf16.mxu0 %v15260_v39  ;;  %v8061_v10 = vpop.permute.xlu1 %8060 }
 0xfef   :  { %8066 = vst.msk [vmem:[#allocation3 + $0x288] sm:$0xff] %vm2806_vm3, %v8061_v10  ;;  %v8063_v2 = vpop.permute.xlu0 %8062  ;;  %v8732_v16 = vld [vmem:[#allocation3 + $0x1b8] sm:$0xff] }
 0xff0   :  { %8067 = vst.msk [vmem:[#allocation3 + $0x2a8] sm:$0xff] %vm2806_vm3, %v8063_v2  ;;  %10757 = vmatpush1.bf16.msra.mxu0 %v15263_v47  ;;  %v15268_v25 = vpack.c.bf16 %v8732_v16, %v8728_v4  ;;  %v8748_v28 = vld [vmem:[#allocation3 + $0x238] sm:$0xff] }
 0xff1   :  { %v15282_v10 = vpack.c.bf16 %v8748_v28, %v8744_v44  ;;  %v15293_v28 = vpack.c.bf16 %v8756_v56, %v8752_v48  ;;  %v8755_v44 = vld [vmem:[#allocation3 + $0x270] sm:$0xff]  ;;  %v9920_v56 = vld [vmem:[%s15520_s7 + $0x58] sm:$0xff] }
 0xff2   :  { %v7857_v36 = vpop.permute.xlu1 %7856  ;;  %10759 = vmatprep.subr.bf16.mxu0 %v15268_v25  ;;  %v8743_v4 = vld [vmem:[#allocation3 + $0x210] sm:$0xff] }
 0xff3   :  { %7862 = vst.msk [vmem:[#allocation3 + $0x280] sm:$0xff] %vm2806_vm3, %v7857_v36  ;;  %v7859_v18 = vpop.permute.xlu0 %7858  ;;  %v8747_v16 = vld [vmem:[#allocation3 + $0x230] sm:$0xff] }
 0xff4   :  { %7863 = vst.msk [vmem:[#allocation3 + $0x2a0] sm:$0xff] %vm2806_vm3, %v7859_v18  ;;  %10761 = vmatpush1.bf16.msra.mxu0 %v15271_v1  ;;  %v15290_v63 = vpack.c.bf16 %v8747_v16, %v8743_v4 }
 0xff5   :  { %10763 = vmatprep.subr.bf16.mxu0 %v15274_v32 }
 0xff6   :  { %v8483_v9 = vpop.permute.xlu1 %8482  ;;  %v8758_v49 = vld [vmem:[#allocation3 + $0x288] sm:$0xff] }
 0xff7   :  { %8488 = vst.msk [vmem:[#allocation3 + $0x298] sm:$0xff] %vm2806_vm3, %v8483_v9  ;;  %v8485_v19 = vpop.permute.xlu0 %8484  ;;  %v8762_v2 = vld [vmem:[#allocation3 + $0x2a8] sm:$0xff]  ;;  %v8751_v9 = vld [vmem:[#allocation3 + $0x250] sm:$0xff] }
 0xff8   :  { %8489 = vst.msk [vmem:[#allocation3 + $0x2b8] sm:$0xff] %vm2806_vm3, %v8485_v19  ;;  %10765 = vmatpush1.bf16.msra.mxu0 %v15279_v21  ;;  %v15286_v20 = vpack.c.bf16 %v8762_v2, %v8758_v49  ;;  %v15298_v19 = vpack.c.bf16 %v8755_v44, %v8751_v9  ;;  %v9917_v2 = vld [vmem:[%s15520_s7 + $0x40] sm:$0xff] }
 0xff9   :  { %10767 = vmatprep.subr.bf16.mxu0 %v15282_v10 }
 0xffa   :  { %10731 = vmatprep.subr.bf16.mxu1 %v15286_v20  ;;  %v8279_v36 = vpop.permute.xlu1 %8278  ;;  %v8757_v18 = vld [vmem:[#allocation3 + $0x280] sm:$0xff] }
 0xffb   :  { %8284 = vst.msk [vmem:[#allocation3 + $0x290] sm:$0xff] %vm2806_vm3, %v8279_v36  ;;  %v8281_v31 = vpop.permute.xlu0 %8280  ;;  %v8761_v15 = vld [vmem:[#allocation3 + $0x2a0] sm:$0xff] }
 0xffc   :  { %8285 = vst.msk [vmem:[#allocation3 + $0x2b0] sm:$0xff] %vm2806_vm3, %v8281_v31  ;;  %10769 = vmatpush1.bf16.msra.mxu0 %v15290_v63  ;;  %v10732_v49 = vpack.c.bf16 %v8761_v15, %v8757_v18  ;;  %v9919_v18 = vld [vmem:[%s15520_s7 + $0x50] sm:$0xff]  ;;  %v9926_v15 = vld [vmem:[%s15520_s7 + $0x68] sm:$0xff] }
 0xffd   :  { %10771 = vmatprep.subr.bf16.mxu0 %v15293_v28 }
 0xffe   :  { %10733 = vmatpush1.bf16.msra.mxu1 %v10732_v49  ;;  %v8760_v4 = vld [vmem:[#allocation3 + $0x298] sm:$0xff] }
 0xfff   :  { %10779 = vmatprep.subr.bf16.mxu1 %v14853_v42  ;;  %v8764_v16 = vld [vmem:[#allocation3 + $0x2b8] sm:$0xff] }
0x1000   :  { %10773 = vmatpush1.bf16.msra.mxu0 %v15298_v19  ;;  %v10774_v48 = vpack.c.bf16 %v8764_v16, %v8760_v4 }
0x1001   :  { %8836 = vmatmul.mubr.f32.vlgmr.msra.gmra.mrb[116].mxu1 %v9917_v2 }
0x1002   :  { %10775 = vmatprep.subr.bf16.mxu0 %v10774_v48  ;;  %10781 = vmatpush1.bf16.msra.mxu1 %v14858_v46  ;;  %v8759_v36 = vld [vmem:[#allocation3 + $0x290] sm:$0xff] }
0x1003   :  { %10783 = vmatprep.subr.bf16.mxu1 %v14926_v17  ;;  %v8763_v42 = vld [vmem:[#allocation3 + $0x2b0] sm:$0xff]  ;;  %9922 = vmatprep.mubr.msk.f32.mxu1 %vm2806_vm3, %v9920_v56 }
0x1004   :  { %v10776_v31 = vpack.c.bf16 %v8763_v42, %v8759_v36  ;;  %v9925_v46 = vld [vmem:[%s15520_s7 + $0x60] sm:$0xff] }
0x1005   :  { %8842 = vmatmul.mubr.f32.gmra.mrb[118].mxu1 %v9919_v18 }
0x1006   :  { %10777 = vmatpush1.bf16.msra.mxu0 %v10776_v31  ;;  %10785 = vmatpush1.bf16.msra.mxu1 %v14928_v27 }
0x1007   :  { %10787 = vmatprep.subr.bf16.mxu1 %v15124_v60  ;;  %10823 = vmatprep.subr.bf16.mxu0 %v14869_v40  ;;  %v9928_v40 = vld [vmem:[%s15520_s7 + $0x78] sm:$0xff] }
0x1008   :  { %9929 = vmatprep.mubr.msk.f32.mxu1 %vm2806_vm3, %v9926_v15 }
0x1009   :  { %8913 = vmatmul.mubr.f32.vlgmr.msra.gmra.mrb[128].mxu0 %v9917_v2 }
0x100a   :  { %10789 = vmatpush1.bf16.msra.mxu1 %v15126_v33  ;;  %10825 = vmatpush1.bf16.msra.mxu0 %v14877_v29  ;;  %v9927_v29 = vld [vmem:[%s15520_s7 + $0x70] sm:$0xff] }
0x100b   :  { %10791 = vmatprep.subr.bf16.mxu1 %v15159_v34  ;;  %10827 = vmatprep.subr.bf16.mxu0 %v14985_v24 }
0x100c   :  { %9924 = vmatprep.mubr.msk.f32.mxu0 %vm2806_vm3, %v9920_v56 }
0x100d   :  { %8919 = vmatmul.mubr.f32.gmra.mrb[130].mxu0 %v9919_v18 }
0x100e   :  { %10793 = vmatpush1.bf16.msra.mxu1 %v15161_v58  ;;  %10829 = vmatpush1.bf16.msra.mxu0 %v14983_v45 }
0x100f   :  { %10795 = vmatprep.subr.bf16.mxu1 %v15164_v11  ;;  %10831 = vmatprep.subr.bf16.mxu0 %v15228_v53  ;;  %v9392_v53 = vld [vmem:[%s15525_s12 + $0x28] sm:$0xff] }
0x1010   :  { %9931 = vmatprep.mubr.msk.f32.mxu0 %vm2806_vm3, %v9926_v15 }
0x1012   :  { %10797 = vmatpush1.bf16.msra.mxu1 %v15170_v62  ;;  %10833 = vmatpush1.bf16.msra.mxu0 %v15230_v3  ;;  %v9589_v3 = vld [vmem:[%s15527_s14] sm:$0x7f] }
0x1013   :  { %10799 = vmatprep.subr.bf16.mxu1 %v15172_v37  ;;  %10835 = vmatprep.subr.bf16.mxu0 %v15243_v7  ;;  %v9394_v7 = vld [vmem:[%s15525_s12 + $0x38] sm:$0xff] }
0x1016   :  { %10801 = vmatpush1.bf16.msra.mxu1 %v15178_v6  ;;  %10837 = vmatpush1.bf16.msra.mxu0 %v15245_v61  ;;  %v9106_v61 = vpop.permute.xlu1 %9105 }
0x1017   :  { %10803 = vmatprep.subr.bf16.mxu1 %v15180_v0  ;;  %10839 = vmatprep.subr.bf16.mxu0 %v15252_v55 }
0x101a   :  { %10805 = vmatpush1.bf16.msra.mxu1 %v15186_v35  ;;  %10841 = vmatpush1.bf16.msra.mxu0 %v15255_v14  ;;  %v9141_v55 = vpop.permute.xlu1 %9140  ;;  %v9111_v14 = vpop.permute.xlu0 %9110 }
0x101b   :  { %10807 = vmatprep.subr.bf16.mxu1 %v15188_v41  ;;  %10843 = vmatprep.subr.bf16.mxu0 %v15260_v39 }
0x101e   :  { %10809 = vmatpush1.bf16.msra.mxu1 %v15195_v26  ;;  %10845 = vmatpush1.bf16.msra.mxu0 %v15263_v47  ;;  %v9937_v26 = vld [vmem:[%s15522_s9 + $0x20] sm:$0xff]  ;;  %v9146_v39 = vpop.permute.xlu1 %9145  ;;  %v9118_v47 = vpop.permute.xlu0 %9117 }
0x101f   :  { %10811 = vmatprep.subr.bf16.mxu1 %v15199_v5  ;;  %10847 = vmatprep.subr.bf16.mxu0 %v15268_v25  ;;  %v9941_v5 = vld [vmem:[%s15523_s10 + $0x20] sm:$0xff] }
0x1022   :  { %10813 = vmatpush1.bf16.msra.mxu1 %v15208_v57  ;;  %10849 = vmatpush1.bf16.msra.mxu0 %v15271_v1  ;;  %v9942_v57 = vld [vmem:[%s15523_s10 + $0x28] sm:$0xff]  ;;  %v9120_v25 = vpop.permute.xlu1 %9119  ;;  %v9151_v1 = vpop.permute.xlu0 %9150 }
0x1023   :  { %10815 = vmatprep.subr.bf16.mxu1 %v15210_v38  ;;  %10851 = vmatprep.subr.bf16.mxu0 %v15274_v32  ;;  %v9944_v38 = vld [vmem:[%s15523_s10 + $0x38] sm:$0xff] }
0x1026   :  { %10817 = vmatpush1.bf16.msra.mxu1 %v15217_v23  ;;  %10853 = vmatpush1.bf16.msra.mxu0 %v15279_v21  ;;  %v9389_v23 = vld [vmem:[%s15525_s12 + $0x10] sm:$0xff]  ;;  %v9153_v32 = vpop.permute.xlu1 %9152  ;;  %v9173_v21 = vpop.permute.xlu0 %9172 }
0x1027   :  { %10819 = vmatprep.subr.bf16.mxu1 %v15286_v20  ;;  %10855 = vmatprep.subr.bf16.mxu0 %v15282_v10 }
0x102a   :  { %10821 = vmatpush1.bf16.msra.mxu1 %v10732_v49  ;;  %10857 = vmatpush1.bf16.msra.mxu0 %v15290_v63  ;;  %v9175_v10 = vpop.permute.xlu1 %9174  ;;  %v9096_v20 = vpop.permute.xlu0 %9095 }
0x102b   :  { %10859 = vmatprep.subr.bf16.mxu0 %v15293_v28  ;;  %v9101_v28 = vadd.f32 %v9096_v20, %v15201_v51 }
0x102d   :  { %9001 = vmatmul.mubr.f32.vlgmr.msra.gmra.mrb[120].mxu1 %v9925_v46  ;;  %v9113_v49 = vadd.f32 %v9106_v61, %v9101_v28  ;;  %v9938_v61 = vld [vmem:[%s15522_s9 + $0x28] sm:$0xff] }
0x102e   :  { %10861 = vmatpush1.bf16.msra.mxu0 %v15298_v19  ;;  %9930 = vmatprep.mubr.msk.f32.mxu1 %vm2806_vm3, %v9928_v40  ;;  %v9098_v63 = vpop.permute.xlu1 %9097 }
0x102f   :  { %10863 = vmatprep.subr.bf16.mxu0 %v10774_v48  ;;  %v9102_v9 = vadd.f32 %v15197_v50, %v9098_v63  ;;  %v9123_v56 = vadd.f32 %v9118_v47, %v9113_v49 }
0x1031   :  { %9007 = vmatmul.mubr.f32.gmra.mrb[122].mxu1 %v9927_v29  ;;  %v9114_v4 = vadd.f32 %v9111_v14, %v9102_v9 }
0x1032   :  { %10865 = vmatpush1.bf16.msra.mxu0 %v10776_v31  ;;  %10313 = vmatprep.mubr.msk.f32.mxu1 %vm2776_vm4, %v9937_v26 }
0x1033   :  { %v9124_v50 = vadd.f32 %v9120_v25, %v9114_v4 }
0x1035   :  { %9078 = vmatmul.mubr.f32.vlgmr.msra.gmra.mrb[132].mxu0 %v9925_v46 }
0x1036   :  { %9932 = vmatprep.mubr.msk.f32.mxu0 %vm2806_vm3, %v9928_v40 }
0x1039   :  { %9084 = vmatmul.mubr.f32.gmra.mrb[134].mxu0 %v9927_v29 }
0x103a   :  { %10355 = vmatprep.mubr.msk.f32.mxu0 %vm11209_vm9, %v11200_v52 }
0x10d4   :  { %v15371_v17 = vpop.f32.mrb[116].mxu1 }
0x10d5   :  { %v15373_v27 = vpop.f32.mrb[117].mxu1 }
0x10d8   :  { %v15375_v45 = vpop.f32.mrb[118].mxu1 }
0x10d9   :  { %v15377_v24 = vpop.f32.mrb[119].mxu1 }
0x10dc   :  { %v15379_v60 = vpop.f32.mrb[128].mxu0 }
0x10dd   :  { %v15381_v33 = vpop.f32.mrb[129].mxu0 }
0x10e0   :  { %v15383_v34 = vpop.f32.mrb[130].mxu0 }
0x10e1   :  { %v15385_v58 = vpop.f32.mrb[131].mxu0 }
0x1100   :  { %v9002_v11 = vpop.f32.mrb[120].mxu1 }
0x1101   :  { %9130 = vrot.lane.b32.xlu0 %v9002_v11, %s11206_s26  ;;  %v9004_v52 = vpop.f32.mrb[121].mxu1 }
0x1104   :  { %v9008_v62 = vpop.f32.mrb[122].mxu1 }
0x1105   :  { %9162 = vrot.lane.b32.xlu0 %v9004_v52, %s11206_s26  ;;  %9132 = vrot.lane.b32.xlu1 %v9008_v62, %s11206_s26  ;;  %v9010_v37 = vpop.f32.mrb[123].mxu1 }
0x1108   :  { %v9079_v6 = vpop.f32.mrb[132].mxu0 }
0x1109   :  { %v9081_v0 = vpop.f32.mrb[133].mxu0  ;;  %9184 = vrot.lane.b32.xlu0 %v9079_v6, %s11206_s26  ;;  %9164 = vrot.lane.b32.xlu1 %v9010_v37, %s11206_s26 }
0x110c   :  { %v9085_v35 = vpop.f32.mrb[134].mxu0 }
0x110d   :  { %v9087_v41 = vpop.f32.mrb[135].mxu0  ;;  %9206 = vrot.lane.b32.xlu0 %v9081_v0, %s11206_s26  ;;  %9186 = vrot.lane.b32.xlu1 %v9085_v35, %s11206_s26 }
0x1111   :  { %9194 = vrot.lane.b32.xlu0 %v14426_v13, %s11205_s20  ;;  %9208 = vrot.lane.b32.xlu1 %v9087_v41, %s11206_s26  ;;  %v9943_v13 = vld [vmem:[%s15523_s10 + $0x30] sm:$0xff] }
0x1115   :  { %9232 = vperm.xlu0 %11195, %v9941_v5   ;;  %9196 = vrot.lane.b32.xlu1 %v14429_v59, %s11205_s20  ;;  %v9387_v59 = vld [vmem:[%s15525_s12] sm:$0xff] }
0x1119   :  { %9242 = vperm.xlu0 %11195, %v9943_v13   ;;  %9237 = vperm.xlu1 %11194, %v9942_v57  }
0x111d   :  { %9351 = vrot.lane.b32.xlu0 %v14724_v22, %s11205_s20  ;;  %9247 = vperm.xlu1 %11194, %v9944_v38   ;;  %v9388_v22 = vld [vmem:[%s15525_s12 + $0x8] sm:$0xff] }
0x1121   :  { %9355 = vrot.lane.b32.xlu0 %v14738_v12, %s11205_s20  ;;  %9353 = vrot.lane.b32.xlu1 %v14686_v43, %s11205_s20  ;;  %v9391_v43 = vld [vmem:[%s15525_s12 + $0x20] sm:$0xff]  ;;  %v9390_v12 = vld [vmem:[%s15525_s12 + $0x18] sm:$0xff] }
0x1125   :  { %9397 = vperm.xlu0 %11195, %v9387_v59   ;;  %9357 = vrot.lane.b32.xlu1 %v14735_v54, %s11205_s20  ;;  %v9393_v54 = vld [vmem:[%s15525_s12 + $0x30] sm:$0xff] }
0x1129   :  { %9407 = vperm.xlu0 %11195, %v9389_v23   ;;  %9402 = vperm.xlu1 %11194, %v9388_v22  }
0x112d   :  { %9417 = vperm.xlu0 %11195, %v9391_v43   ;;  %9412 = vperm.xlu1 %11194, %v9390_v12  }
0x1131   :  { %9427 = vperm.xlu0 %11195, %v9393_v54   ;;  %9422 = vperm.xlu1 %11194, %v9392_v53  }
0x1135   :  { %9592 = vperm.xlu0 %11195, %v9589_v3   ;;  %9432 = vperm.xlu1 %11194, %v9394_v7  }
0x1173   :  { %v9131_v44 = vpop.permute.xlu0 %9130 }
0x1174   :  { %v9136_v19 = vadd.f32 %v9131_v44, %v15371_v17 }
0x1176   :  { %v9148_v2 = vadd.f32 %v9141_v55, %v9136_v19 }
0x1177   :  { %v9163_v16 = vpop.permute.xlu0 %9162  ;;  %v9133_v48 = vpop.permute.xlu1 %9132 }
0x1178   :  { %v9156_v36 = vadd.f32 %v9151_v1, %v9148_v2  ;;  %v9168_v18 = vadd.f32 %v9163_v16, %v15373_v27  ;;  %v9137_v42 = vadd.f32 %v9133_v48, %v15375_v45 }
0x117a   :  { %v9170_v31 = vadd.f32 %v9168_v18, %v9141_v55  ;;  %v9149_v15 = vadd.f32 %v9146_v39, %v9137_v42  ;;  %v9158_v46 = vadd.f32 %v9156_v36, %v9123_v56 }
0x117b   :  { %v9185_v51 = vpop.permute.xlu0 %9184  ;;  %v9165_v40 = vpop.permute.xlu1 %9164 }
0x117c   :  { %v9178_v29 = vadd.f32 %v9173_v21, %v9170_v31  ;;  %v9157_v11 = vadd.f32 %v9153_v32, %v9149_v15  ;;  %v9169_v17 = vadd.f32 %v9165_v40, %v15377_v24  ;;  %v9190_v52 = vadd.f32 %v9185_v51, %v15379_v60 }
0x117e   :  { %v9171_v62 = vadd.f32 %v9169_v17, %v9146_v39  ;;  %v9180_v37 = vadd.f32 %v9178_v29, %v9158_v46  ;;  %v9159_v6 = vadd.f32 %v9157_v11, %v9124_v50  ;;  %v9192_v5 = vadd.f32 %v9190_v52, %v9141_v55  ;;  %v9380_v29 = vld [vmem:[%s15524_s11 + $0x8] sm:$0xff]  ;;  %v9381_v11 = vld [vmem:[%s15524_s11 + $0x10] sm:$0xff]  ;;  %v9382_v17 = vld [vmem:[%s15524_s11 + $0x18] sm:$0xff] }
0x117f   :  { %v9207_v0 = vpop.permute.xlu0 %9206  ;;  %v9187_v35 = vpop.permute.xlu1 %9186  ;;  %v9383_v52 = vld [vmem:[%s15524_s11 + $0x20] sm:$0xff] }
0x1180   :  { %v9179_v27 = vadd.f32 %v9175_v10, %v9171_v62  ;;  %v9212_v45 = vadd.f32 %v9207_v0, %v15381_v33  ;;  %v9191_v26 = vadd.f32 %v9187_v35, %v15383_v34  ;;  %v9384_v62 = vld [vmem:[%s15524_s11 + $0x28] sm:$0xff]  ;;  %v11210_v0 = vmov 0.0|0.0  }
0x1181   :  { %10878 = vmatprep.subr.bf16.mxu0 %v11210_v0 }
0x1182   :  { %v9214_v41 = vadd.f32 %v9212_v45, %v9141_v55  ;;  %v9181_v13 = vadd.f32 %v9179_v27, %v9159_v6  ;;  %v9193_v43 = vadd.f32 %v9191_v26, %v9146_v39  ;;  %v9386_v6 = vld [vmem:[%s15524_s11 + $0x38] sm:$0xff] }
0x1183   :  { %v9195_v57 = vpop.permute.xlu0 %9194  ;;  %v9209_v38 = vpop.permute.xlu1 %9208 }
0x1184   :  { %v9200_v59 = vadd.f32 %v9195_v57, %v9192_v5  ;;  %v9213_v24 = vadd.f32 %v9209_v38, %v15385_v58  ;;  %v9216_v60 = vadd.f32 %v9214_v41, %v14501_v8  ;;  %v9939_v8 = vld [vmem:[%s15522_s9 + $0x30] sm:$0xff]  ;;  %v9379_v58 = vld [vmem:[%s15524_s11] sm:$0xff] }
0x1186   :  { %v9202_v23 = vadd.f32 %v9200_v59, %v9180_v37  ;;  %v9215_v22 = vadd.f32 %v9213_v24, %v9146_v39  ;;  %v9385_v37 = vld [vmem:[%s15524_s11 + $0x30] sm:$0xff] }
0x1187   :  { %v9197_v12 = vpop.permute.xlu1 %9196 }
0x1188   :  { %v9218_v54 = vadd.f32 %v9216_v60, %v9202_v23  ;;  %v9201_v53 = vadd.f32 %v9197_v12, %v9193_v43  ;;  %v9217_v33 = vadd.f32 %v9215_v22, %v14508_v30  ;;  %v9940_v30 = vld [vmem:[%s15522_s9 + $0x38] sm:$0xff] }
0x118a   :  { %v9203_v3 = vadd.f32 %v9201_v53, %v9181_v13 }
0x118c   :  { %v9219_v7 = vadd.f32 %v9217_v33, %v9203_v3 }
0x118e   :  { %v10866_v34 = vpack.c.bf16 %v9219_v7, %v9218_v54 }
0x1190   :  { %10867 = vmatprep.subr.bf16.mxu1 %v10866_v34 }
0x1191   :  { %10869 = vmatpush3.bf16.msra.mxu1 %v10866_v34 }
0x1194   :  { %10314 = vmatmul.mubr.msk.f32.vlgmr.msra.gmra.mrb[124].mxu1 %vm2776_vm4, %v9938_v61  ;;  %v9233_v14 = vpop.permute.xlu0 %9232 }
0x1195   :  { %10316 = vmatprep.mubr.msk.f32.mxu1 %vm2776_vm4, %v9939_v8 }
0x1198   :  { %10317 = vmatmul.mubr.msk.f32.gmra.mrb[126].mxu1 %vm2776_vm4, %v9940_v30  ;;  %v9238_v55 = vpop.permute.xlu1 %9237  ;;  %v9243_v47 = vpop.permute.xlu0 %9242 }
0x1199   :  { %10327 = vmatprep.mubr.msk.f32.mxu1 %vm2791_vm2, %v9379_v58 }
0x119c   :  { %v9248_v39 = vpop.permute.xlu1 %9247  ;;  %v9352_v32 = vpop.permute.xlu0 %9351 }
0x11a0   :  { %v9354_v25 = vpop.permute.xlu1 %9353  ;;  %v9356_v48 = vpop.permute.xlu0 %9355 }
0x11a4   :  { %v9358_v2 = vpop.permute.xlu1 %9357  ;;  %v9398_v27 = vpop.permute.xlu0 %9397 }
0x11a8   :  { %v9403_v35 = vpop.permute.xlu1 %9402  ;;  %v9408_v26 = vpop.permute.xlu0 %9407 }
0x11ac   :  { %v9413_v45 = vpop.permute.xlu1 %9412  ;;  %v9418_v53 = vpop.permute.xlu0 %9417 }
0x11b0   :  { %v9423_v43 = vpop.permute.xlu1 %9422 }
0x1267   :  { %v10315_v1 = vpop.f32.mrb[124].mxu1 }
0x1268   :  { %v9334_v21 = vadd.f32 %v10315_v1, %v9238_v55  ;;  %v9328_v10 = vpop.f32.mrb[125].mxu1 }
0x1269   :  { %v9329_v20 = vadd.f32 %v9328_v10, %v9233_v14 }
0x126a   :  { %v9364_v63 = vadd.f32 %v9354_v25, %v9334_v21 }
0x126b   :  { %v9363_v28 = vadd.f32 %v9352_v32, %v9329_v20  ;;  %v10318_v9 = vpop.f32.mrb[126].mxu1  ;;  %v9428_v32 = vpop.permute.xlu0 %9427 }
0x126c   :  { %vm9368_vm10 = vcmp.ge.f32.partialorder %v9364_v63, 0.0  ;;  %v9372_v44 = vmul.f32 0.01, %v9364_v63  ;;  %v9344_v49 = vadd.f32 %v10318_v9, %v9248_v39  ;;  %v9338_v19 = vpop.f32.mrb[127].mxu1 }
0x126d   :  { %vm9367_vm11 = vcmp.ge.f32.partialorder %v9363_v28, 0.0  ;;  %v9371_v4 = vmul.f32 0.01, %v9363_v28  ;;  %v9339_v16 = vadd.f32 %v9338_v19, %v9243_v47  ;;  %v9433_v47 = vpop.permute.xlu1 %9432 }
0x126e   :  { %v9366_v56 = vadd.f32 %v9358_v2, %v9344_v49  ;;  %v9376_v36 = vsel %vm9368_vm10, %v9364_v63, %v9372_v44 }
0x126f   :  { %v9365_v18 = vadd.f32 %v9356_v48, %v9339_v16  ;;  %v9375_v42 = vsel %vm9367_vm11, %v9363_v28, %v9371_v4  ;;  %v9588_v16 = vld [vmem:[%s15526_s13] sm:$0x7f]  ;;  %v9593_v48 = vpop.permute.xlu0 %9592 }
0x1270   :  { %vm9370_vm12 = vcmp.ge.f32.partialorder %v9366_v56, 0.0  ;;  %v9374_v31 = vmul.f32 0.01, %v9366_v56  ;;  %v10870_v15 = vpack.c.bf16 %v9376_v36, %v9375_v42 }
0x1271   :  { %vm9369_vm13 = vcmp.ge.f32.partialorder %v9365_v18, 0.0  ;;  %v9373_v46 = vmul.f32 0.01, %v9365_v18 }
0x1272   :  { %10871 = vmatprep.subr.bf16.mxu1 %v10870_v15  ;;  %v9378_v51 = vsel %vm9370_vm12, %v9366_v56, %v9374_v31 }
0x1273   :  { %10873 = vmatpush3.bf16.msra.mxu1 %v10870_v15  ;;  %v9377_v40 = vsel %vm9369_vm13, %v9365_v18, %v9373_v46 }
0x1274   :  { %v10874_v50 = vpack.c.bf16 %v9378_v51, %v9377_v40 }
0x1276   :  { %10875 = vmatprep.subr.bf16.mxu1 %v10874_v50 }
0x1277   :  { %10877 = vmatpush3.bf16.msra.mxu1 %v10874_v50 }
0x127a   :  { %10328 = vmatmul.mubr.msk.f32.vlgmr.msra.gmra.mrb[128].mxu1 %vm2791_vm2, %v9380_v29 }
0x127b   :  { %10330 = vmatprep.mubr.msk.f32.mxu1 %vm2791_vm2, %v9381_v11 }
0x127e   :  { %10331 = vmatmul.mubr.msk.f32.gmra.mrb[130].mxu1 %vm2791_vm2, %v9382_v17 }
0x127f   :  { %10333 = vmatprep.mubr.msk.f32.mxu1 %vm2791_vm2, %v9383_v52 }
0x1282   :  { %10334 = vmatmul.mubr.msk.f32.gmra.mrb[132].mxu1 %vm2791_vm2, %v9384_v62 }
0x1283   :  { %10336 = vmatprep.mubr.msk.f32.mxu1 %vm2791_vm2, %v9385_v37 }
0x1286   :  { %10337 = vmatmul.mubr.msk.f32.gmra.mrb[134].mxu1 %vm2791_vm2, %v9386_v6 }
0x134d   :  { %v10329_v41 = vpop.f32.mrb[128].mxu1 }
0x134e   :  { %v9531_v5 = vadd.f32 %v10329_v41, %v9403_v35  ;;  %v9525_v13 = vpop.f32.mrb[129].mxu1 }
0x134f   :  { %v9526_v57 = vadd.f32 %v9525_v13, %v9398_v27 }
0x1350   :  { %vm9565_vm14 = vcmp.ge.f32.partialorder %v9531_v5, 0.0  ;;  %v9573_v38 = vmul.f32 0.01, %v9531_v5 }
0x1351   :  { %vm9564_vm15 = vcmp.ge.f32.partialorder %v9526_v57, 0.0  ;;  %v9572_v59 = vmul.f32 0.01, %v9526_v57  ;;  %v10332_v24 = vpop.f32.mrb[130].mxu1 }
0x1352   :  { %v9581_v60 = vsel %vm9565_vm14, %v9531_v5, %v9573_v38  ;;  %v9541_v23 = vadd.f32 %v10332_v24, %v9413_v45  ;;  %v9535_v22 = vpop.f32.mrb[131].mxu1 }
0x1353   :  { %v9580_v12 = vsel %vm9564_vm15, %v9526_v57, %v9572_v59  ;;  %v9536_v54 = vadd.f32 %v9535_v22, %v9408_v26 }
0x1354   :  { %v10879_v33 = vpack.c.bf16 %v9581_v60, %v9580_v12  ;;  %vm9567_vm0 = vcmp.ge.f32.partialorder %v9541_v23, 0.0  ;;  %v9575_v3 = vmul.f32 0.01, %v9541_v23 }
0x1355   :  { %vm9566_vm1 = vcmp.ge.f32.partialorder %v9536_v54, 0.0  ;;  %v9574_v7 = vmul.f32 0.01, %v9536_v54  ;;  %v10335_v34 = vpop.f32.mrb[132].mxu1 }
0x1356   :  { %v9583_v61 = vsel %vm9567_vm0, %v9541_v23, %v9575_v3  ;;  %v9551_v8 = vadd.f32 %v10335_v34, %v9423_v43  ;;  %v9545_v30 = vpop.f32.mrb[133].mxu1  ;;  %10880 = vmatpush3.bf16.msra.mxu0 %v10879_v33 }
0x1357   :  { %v9582_v58 = vsel %vm9566_vm1, %v9536_v54, %v9574_v7  ;;  %v9546_v55 = vadd.f32 %v9545_v30, %v9418_v53  ;;  %10881 = vmatprep.subr.bf16.mxu0 %v11210_v0 }
0x1358   :  { %v10882_v14 = vpack.c.bf16 %v9583_v61, %v9582_v58  ;;  %vm9569_vm2 = vcmp.ge.f32.partialorder %v9551_v8, 0.0  ;;  %v9577_v39 = vmul.f32 0.01, %v9551_v8 }
0x1359   :  { %vm9568_vm3 = vcmp.ge.f32.partialorder %v9546_v55, 0.0  ;;  %v9576_v25 = vmul.f32 0.01, %v9546_v55  ;;  %v10338_v1 = vpop.f32.mrb[134].mxu1 }
0x135a   :  { %v9585_v21 = vsel %vm9569_vm2, %v9551_v8, %v9577_v39  ;;  %v9561_v10 = vadd.f32 %v10338_v1, %v9433_v47  ;;  %v9555_v20 = vpop.f32.mrb[135].mxu1  ;;  %10883 = vmatpush3.bf16.msra.mxu0 %v10882_v14 }
0x135b   :  { %v9584_v63 = vsel %vm9568_vm3, %v9546_v55, %v9576_v25  ;;  %v9556_v28 = vadd.f32 %v9555_v20, %v9428_v32  ;;  %10884 = vmatprep.subr.bf16.mxu0 %v11210_v0 }
0x135c   :  { %v10885_v9 = vpack.c.bf16 %v9585_v21, %v9584_v63  ;;  %vm9571_vm4 = vcmp.ge.f32.partialorder %v9561_v10, 0.0  ;;  %v9579_v44 = vmul.f32 0.01, %v9561_v10 }
0x135d   :  { %vm9570_vm6 = vcmp.ge.f32.partialorder %v9556_v28, 0.0  ;;  %v9578_v49 = vmul.f32 0.01, %v9556_v28 }
0x135e   :  { %v9587_v19 = vsel %vm9571_vm4, %v9561_v10, %v9579_v44  ;;  %10886 = vmatpush3.bf16.msra.mxu0 %v10885_v9 }
0x135f   :  { %v9586_v2 = vsel %vm9570_vm6, %v9556_v28, %v9578_v49  ;;  %10887 = vmatprep.subr.bf16.mxu0 %v11210_v0 }
0x1360   :  { %v10888_v4 = vpack.c.bf16 %v9587_v19, %v9586_v2 }
0x1362   :  { %10889 = vmatpush3.bf16.msra.mxu0 %v10888_v4 }
0x1365   :  { %10356 = vmatmul.mubr.msk.f32.vlgmr.msra.gmra.mrb[136].mxu0 %vm2821_vm5, %v9588_v16 }
0x1438   :  { %v9664_v56 = vpop.f32.mrb[136].mxu0 }
0x1439   :  { %v9665_v36 = vadd.f32 %v9664_v56, %v9593_v48  ;;  %v10357_v18 = vpop.f32.mrb[137].mxu0 }
0x143b   :  { %9669 = vst.msk [vmem:[%s15532_s19] sm:$0x7f] %vm9668_vm7, %v9665_v36 }
0x143c   :  { %9674 = vsyncmov [#allocation6] }
0x143f   :  { %s9675_s7 = vpop.sfrf %9674 }
0x1440   :  { %p9958_p0 = scmp.ne.s32.totalorder %s9675_s7, 0 }
0x1442   :  { %9679 = shalt.err (%p9958_p0)  }
0x1443   :  { %9681 = vsyncmov [#allocation6 + $0x1] }
0x1446   :  { %s9682_s30 = vpop.sfrf %9681 }
0x1447   :  { %p9959_p1 = scmp.ne.s32.totalorder %s9682_s30, 0 }
0x1449   :  { %9686 = shalt.err (%p9959_p1)  }

</bundles_post_ra>
